<compile_context>
chip_gen: v7x
topology: tpu7x:2x2x1
jax: 0.10.0
libtpu: 0.0.40
codegen_flags: <defaults>
</compile_context>

<pallas_src>
import functools

import jax
import jax.numpy as jnp
from jax.experimental import pallas as pl
from jax.experimental.pallas import tpu as pltpu

_RSQRT2 = 0.7071067811865476  # 1/sqrt(2)
_LN_EPS = 1e-5


def _fused_kernel(x1_ref, x2_ref, gamma_ref, beta_ref, w_ref, b_ref,
                  o_ref, xn_ref):
    # ---- add + LayerNorm, computed once (first grid step) into VMEM scratch ----
    @pl.when(pl.program_id(0) == 0)
    def _():
        x = x1_ref[...] + x2_ref[...]                       # (N, C) f32, VPU
        mean = jnp.mean(x, axis=-1, keepdims=True)
        xc = x - mean
        var = jnp.mean(xc * xc, axis=-1, keepdims=True)     # biased var (PyTorch LN)
        inv = jax.lax.rsqrt(var + _LN_EPS)
        xn = xc * inv * gamma_ref[...] + beta_ref[...]      # broadcast (1, C)
        xn_ref[...] = xn.astype(jnp.bfloat16)               # cached matmul LHS

    # ---- Linear tile: (N, C) @ (C, TF) + b  — bf16 inputs, f32 accumulate (MXU) ----
    y = jnp.dot(xn_ref[...], w_ref[...], preferred_element_type=jnp.float32)
    y = y + b_ref[...]                                      # broadcast (1, TF), f32

    # ---- exact GELU (approximate='none'): 0.5 * y * (1 + erf(y / sqrt(2))) ----
    o_ref[...] = 0.5 * y * (1.0 + jax.lax.erf(y * _RSQRT2))


def prepare_params(gamma, beta, w, b):
    """One-time parameter preparation. Call ONCE at init, not per forward step.

    Returns (gamma2, beta2, w_bf16, b2) in the layouts/dtypes the kernel expects.
    The weight is pre-cast to bf16 here so the per-call forward path never pays
    the 4 MiB-read / 2 MiB-write cast traffic.
    """
    C, F = w.shape
    gamma2 = gamma.reshape(1, C).astype(jnp.float32)
    beta2 = beta.reshape(1, C).astype(jnp.float32)
    w_bf16 = w.astype(jnp.bfloat16)
    b2 = b.reshape(1, F).astype(jnp.float32)
    return gamma2, beta2, w_bf16, b2


@functools.partial(jax.jit, static_argnames=("tile_f",))
def fused_add_ln_linear_gelu(x1, x2, gamma2, beta2, w_bf16, b2, *, tile_f=1024):
    """x1, x2: (B, H, W, C) f32; gamma2/beta2: (1, C) f32; w_bf16: (C, F) bf16;
    b2: (1, F) f32  ->  (B, H, W, F) f32.

    Params must come from `prepare_params` (pre-cast / pre-reshaped).
    """
    B, H, W, C = x1.shape
    F = w_bf16.shape[1]
    N = B * H * W
    assert w_bf16.shape[0] == C
    assert F % tile_f == 0, "F must be divisible by the feature tile size"
    assert tile_f % 128 == 0 and C % 128 == 0

    x1f = x1.reshape(N, C)
    x2f = x2.reshape(N, C)

    # Advisory cost for the XLA scheduler around this custom call.
    bytes_accessed = (2 * N * C * 4          # x1, x2 (f32)
                      + 2 * C * 4            # gamma, beta
                      + C * F * 2            # weight (bf16)
                      + F * 4                # bias
                      + N * F * 4)           # output (f32)
    cost = pl.CostEstimate(flops=2 * N * C * F,
                           transcendentals=N * F,
                           bytes_accessed=bytes_accessed)

    out = pl.pallas_call(
        _fused_kernel,
        out_shape=jax.ShapeDtypeStruct((N, F), jnp.float32),
        grid_spec=pltpu.PrefetchScalarGridSpec(
            num_scalar_prefetch=0,
            grid=(F // tile_f,),
            in_specs=[
                # Grid-invariant inputs (same block index every step -> fetched once)
                pl.BlockSpec((N, C), lambda j: (0, 0)),       # x1
                pl.BlockSpec((N, C), lambda j: (0, 0)),       # x2
                pl.BlockSpec((1, C), lambda j: (0, 0)),       # gamma
                pl.BlockSpec((1, C), lambda j: (0, 0)),       # beta
                # Streamed / double-buffered per feature tile
                pl.BlockSpec((C, tile_f), lambda j: (0, j)),  # w (bf16)
                pl.BlockSpec((1, tile_f), lambda j: (0, j)),  # b
            ],
            out_specs=pl.BlockSpec((N, tile_f), lambda j: (0, j)),
            # Persistent cache of the normalized bf16 activations across F tiles.
            scratch_shapes=[pltpu.VMEM((N, C), jnp.bfloat16)],
        ),
        compiler_params=pltpu.CompilerParams(
            # Must be sequential: steps j>0 read the LN cache written at j==0.
            dimension_semantics=("arbitrary",),
            vmem_limit_bytes=32 << 20,
        ),
        cost_estimate=cost,
    )(x1f, x2f, gamma2, beta2, w_bf16, b2)

    return out.reshape(B, H, W, F)


if __name__ == "__main__":
    key = jax.random.PRNGKey(0)
    k1, k2, kg, kb, kw, kbias = jax.random.split(key, 6)

    B, H, W, C, F = 1, 14, 14, 512, 2048

    x318 = jax.random.normal(k1, (B, H, W, C), dtype=jnp.float32)
    x332 = jax.random.normal(k2, (B, H, W, C), dtype=jnp.float32)

    # Deterministic synthetic parameters (not a checkpoint)
    gamma = 1.0 + 0.02 * jax.random.normal(kg, (C,), dtype=jnp.float32)
    beta = 0.02 * jax.random.normal(kb, (C,), dtype=jnp.float32)
    w = jax.random.normal(kw, (C, F), dtype=jnp.float32) * (1.0 / jnp.sqrt(C))
    b = 0.02 * jax.random.normal(kbias, (F,), dtype=jnp.float32)

    # One-time parameter prep (hoisted out of the forward / hot path).
    params = prepare_params(gamma, beta, w, b)
    params = jax.tree_util.tree_map(jax.block_until_ready, params)

    out = fused_add_ln_linear_gelu(x318, x332, *params)
    out = jax.block_until_ready(out)

    # --- references ---
    N = B * H * W
    xs = (x318 + x332).reshape(N, C)
    mu = jnp.mean(xs, axis=-1, keepdims=True)
    var = jnp.mean((xs - mu) ** 2, axis=-1, keepdims=True)
    xn = (xs - mu) * jax.lax.rsqrt(var + _LN_EPS) * gamma + beta

    # Matched-precision reference (bf16 matmul inputs, f32 accumulation) -> tight check
    y_m = jnp.dot(xn.astype(jnp.bfloat16), w.astype(jnp.bfloat16),
                  preferred_element_type=jnp.float32) + b
    ref_m = (0.5 * y_m * (1.0 + jax.lax.erf(y_m * _RSQRT2))).reshape(B, H, W, F)

    # Full-f32 module-semantics reference -> loose check (bf16 matmul deviation)
    y_f = jnp.dot(xn, w, preferred_element_type=jnp.float32) + b
    ref_f = (0.5 * y_f * (1.0 + jax.lax.erf(y_f * _RSQRT2))).reshape(B, H, W, F)

    assert jnp.allclose(out, ref_m, atol=2e-3, rtol=2e-3), \
        "mismatch vs matched-precision reference"
    assert jnp.allclose(out, ref_f, atol=5e-2, rtol=5e-2), \
        "mismatch vs f32 reference"

    print("KERNEL_OK")
</pallas_src>

<mosaic_0001>
module attributes {stable_mosaic.version = 11 : i64} {
  func.func @_fused_kernel(%arg0: i32, %arg1: memref<196x512xf32, #tpu.memory_space<vmem>>, %arg2: memref<196x512xf32, #tpu.memory_space<vmem>>, %arg3: memref<1x512xf32, #tpu.memory_space<vmem>>, %arg4: memref<1x512xf32, #tpu.memory_space<vmem>>, %arg5: memref<512x1024xbf16, #tpu.memory_space<vmem>>, %arg6: memref<1x1024xf32, #tpu.memory_space<vmem>>, %arg7: memref<196x1024xf32, #tpu.memory_space<vmem>>, %arg8: memref<196x512xbf16, #tpu.memory_space<vmem>>) attributes {dimension_semantics = [#tpu.dimension_semantics<arbitrary>], iteration_bounds = array<i64: 2>, scalar_prefetch = 0 : i64, scratch_operands = 1 : i64, tpu.core_type = #tpu.core_type<tc>, window_params = [{pipeline_mode = #tpu.pipeline_mode<synchronous>, transform_indices = @transform_0, window_bounds = array<i64: 196, 512>}, {pipeline_mode = #tpu.pipeline_mode<synchronous>, transform_indices = @transform_1, window_bounds = array<i64: 196, 512>}, {pipeline_mode = #tpu.pipeline_mode<synchronous>, transform_indices = @transform_2, window_bounds = array<i64: 1, 512>}, {pipeline_mode = #tpu.pipeline_mode<synchronous>, transform_indices = @transform_3, window_bounds = array<i64: 1, 512>}, {transform_indices = @transform_4, window_bounds = array<i64: 512, 1024>}, {transform_indices = @transform_5, window_bounds = array<i64: 1, 1024>}, {transform_indices = @transform_6, window_bounds = array<i64: 196, 1024>}]} {
    %c0_i32 = arith.constant 0 : i32
    %0 = arith.cmpi eq, %arg0, %c0_i32 : i32
    %1 = arith.extui %0 : i1 to i32
    %c0_i32_0 = arith.constant 0 : i32
    %2 = arith.cmpi ne, %1, %c0_i32_0 : i32
    scf.if %2 {
      %c0_11 = arith.constant 0 : index
      %c0_12 = arith.constant 0 : index
      %18 = vector.load %arg1[%c0_11, %c0_12] : memref<196x512xf32, #tpu.memory_space<vmem>>, vector<196x512xf32>
      %c0_13 = arith.constant 0 : index
      %c0_14 = arith.constant 0 : index
      %19 = vector.load %arg2[%c0_13, %c0_14] : memref<196x512xf32, #tpu.memory_space<vmem>>, vector<196x512xf32>
      %20 = arith.addf %18, %19 : vector<196x512xf32>
      %cst_15 = arith.constant dense<0.000000e+00> : vector<196xf32>
      %21 = vector.multi_reduction <add>, %20, %cst_15 [1] : vector<196x512xf32> to vector<196xf32>
      %22 = vector.shape_cast %21 : vector<196xf32> to vector<196x1xf32>
      %cst_16 = arith.constant 5.120000e+02 : f32
      %23 = vector.broadcast %cst_16 : f32 to vector<196x1xf32>
      %24 = arith.divf %22, %23 : vector<196x1xf32>
      %25 = vector.broadcast %24 : vector<196x1xf32> to vector<196x512xf32>
      %26 = arith.subf %20, %25 : vector<196x512xf32>
      %27 = arith.mulf %26, %26 : vector<196x512xf32>
      %cst_17 = arith.constant dense<0.000000e+00> : vector<196xf32>
      %28 = vector.multi_reduction <add>, %27, %cst_17 [1] : vector<196x512xf32> to vector<196xf32>
      %29 = vector.shape_cast %28 : vector<196xf32> to vector<196x1xf32>
      %cst_18 = arith.constant 5.120000e+02 : f32
      %30 = vector.broadcast %cst_18 : f32 to vector<196x1xf32>
      %31 = arith.divf %29, %30 : vector<196x1xf32>
      %cst_19 = arith.constant 9.99999974E-6 : f32
      %32 = vector.broadcast %cst_19 : f32 to vector<196x1xf32>
      %33 = arith.addf %31, %32 : vector<196x1xf32>
      %34 = math.rsqrt %33 : vector<196x1xf32>
      %35 = vector.broadcast %34 : vector<196x1xf32> to vector<196x512xf32>
      %36 = arith.mulf %26, %35 : vector<196x512xf32>
      %c0_20 = arith.constant 0 : index
      %c0_21 = arith.constant 0 : index
      %37 = vector.load %arg3[%c0_20, %c0_21] : memref<1x512xf32, #tpu.memory_space<vmem>>, vector<1x512xf32>
      %38 = vector.broadcast %37 : vector<1x512xf32> to vector<196x512xf32>
      %39 = arith.mulf %36, %38 : vector<196x512xf32>
      %c0_22 = arith.constant 0 : index
      %c0_23 = arith.constant 0 : index
      %40 = vector.load %arg4[%c0_22, %c0_23] : memref<1x512xf32, #tpu.memory_space<vmem>>, vector<1x512xf32>
      %41 = vector.broadcast %40 : vector<1x512xf32> to vector<196x512xf32>
      %42 = arith.addf %39, %41 : vector<196x512xf32>
      %43 = arith.truncf %42 : vector<196x512xf32> to vector<196x512xbf16>
      %c0_24 = arith.constant 0 : index
      %c0_25 = arith.constant 0 : index
      %44 = vector.load %arg8[%c0_24, %c0_25] : memref<196x512xbf16, #tpu.memory_space<vmem>>, vector<196x512xbf16>
      tpu.vector_store %arg8[%c0_24, %c0_25], %43 {strides = array<i32>} : memref<196x512xbf16, #tpu.memory_space<vmem>>, vector<196x512xbf16>,
    } else {
    }
    %c0 = arith.constant 0 : index
    %c0_1 = arith.constant 0 : index
    %3 = vector.load %arg8[%c0, %c0_1] : memref<196x512xbf16, #tpu.memory_space<vmem>>, vector<196x512xbf16>
    %c0_2 = arith.constant 0 : index
    %c0_3 = arith.constant 0 : index
    %4 = vector.load %arg5[%c0_2, %c0_3] : memref<512x1024xbf16, #tpu.memory_space<vmem>>, vector<512x1024xbf16>
    %cst = arith.constant dense<0.000000e+00> : vector<196x1024xf32>
    %5 = tpu.matmul %3, %4, %cst {dimension_numbers = #tpu.dot_dimension_numbers<[1], [0], [0], [1], [0, 0, 1, 1], [], []>} : vector<196x512xbf16>, vector<512x1024xbf16>, vector<196x1024xf32> -> vector<196x1024xf32>
    %c0_4 = arith.constant 0 : index
    %c0_5 = arith.constant 0 : index
    %6 = vector.load %arg6[%c0_4, %c0_5] : memref<1x1024xf32, #tpu.memory_space<vmem>>, vector<1x1024xf32>
    %7 = vector.broadcast %6 : vector<1x1024xf32> to vector<196x1024xf32>
    %8 = arith.addf %5, %7 : vector<196x1024xf32>
    %cst_6 = arith.constant 5.000000e-01 : f32
    %9 = vector.broadcast %cst_6 : f32 to vector<196x1024xf32>
    %10 = arith.mulf %9, %8 : vector<196x1024xf32>
    %cst_7 = arith.constant 0.707106769 : f32
    %11 = vector.broadcast %cst_7 : f32 to vector<196x1024xf32>
    %12 = arith.mulf %8, %11 : vector<196x1024xf32>
    %13 = math.erf %12 : vector<196x1024xf32>
    %cst_8 = arith.constant 1.000000e+00 : f32
    %14 = vector.broadcast %cst_8 : f32 to vector<196x1024xf32>
    %15 = arith.addf %14, %13 : vector<196x1024xf32>
    %16 = arith.mulf %10, %15 : vector<196x1024xf32>
    %c0_9 = arith.constant 0 : index
    %c0_10 = arith.constant 0 : index
    %17 = vector.load %arg7[%c0_9, %c0_10] : memref<196x1024xf32, #tpu.memory_space<vmem>>, vector<196x1024xf32>
    tpu.vector_store %arg7[%c0_9, %c0_10], %16 {strides = array<i32>} : memref<196x1024xf32, #tpu.memory_space<vmem>>, vector<196x1024xf32>,
    return
  }
  func.func @transform_0(%arg0: i32) -> (i32, i32) {
    %c0_i32 = arith.constant 0 : i32
    %c0_i32_0 = arith.constant 0 : i32
    %c0_i32_1 = arith.constant 0 : i32
    return %c0_i32, %c0_i32_0 : i32, i32
  }
  func.func @transform_1(%arg0: i32) -> (i32, i32) {
    %c0_i32 = arith.constant 0 : i32
    %c0_i32_0 = arith.constant 0 : i32
    %c0_i32_1 = arith.constant 0 : i32
    return %c0_i32, %c0_i32_0 : i32, i32
  }
  func.func @transform_2(%arg0: i32) -> (i32, i32) {
    %c0_i32 = arith.constant 0 : i32
    %c0_i32_0 = arith.constant 0 : i32
    %c0_i32_1 = arith.constant 0 : i32
    return %c0_i32, %c0_i32_0 : i32, i32
  }
  func.func @transform_3(%arg0: i32) -> (i32, i32) {
    %c0_i32 = arith.constant 0 : i32
    %c0_i32_0 = arith.constant 0 : i32
    %c0_i32_1 = arith.constant 0 : i32
    return %c0_i32, %c0_i32_0 : i32, i32
  }
  func.func @transform_4(%arg0: i32) -> (i32, i32) {
    %c0_i32 = arith.constant 0 : i32
    %c0_i32_0 = arith.constant 0 : i32
    return %c0_i32, %arg0 : i32, i32
  }
  func.func @transform_5(%arg0: i32) -> (i32, i32) {
    %c0_i32 = arith.constant 0 : i32
    %c0_i32_0 = arith.constant 0 : i32
    return %c0_i32, %arg0 : i32, i32
  }
  func.func @transform_6(%arg0: i32) -> (i32, i32) {
    %c0_i32 = arith.constant 0 : i32
    %c0_i32_0 = arith.constant 0 : i32
    return %c0_i32, %arg0 : i32, i32
  }
}

</mosaic_0001>

<bundles_post_ra>
// kernel: fused_add_ln_linear_gelu.1
= control target key start
LH: loop header
LB: loop body
LE: loop exit
PB: predicated region body
PF: predicated region fallthrough
CT: control target
= control target key end

     0   :  { %s8710_s21 = smov 0   ;;  %s8712_s22 = smov 0   ;;  %s13433_s0 = inlined_call_operand.vmem [shape: f32[196,512], index: 0, kind: input, shape index: {}]   ;;  %s13434_s1 = inlined_call_operand.vmem [shape: f32[196,512], index: 1, kind: input, shape index: {}]   ;;  %s13435_s2 = inlined_call_operand.vmem [shape: f32[1,512], index: 2, kind: input, shape index: {}]   ;;  %s13436_s3 = inlined_call_operand.vmem [shape: f32[1,512], index: 3, kind: input, shape index: {}]   ;;  %s13437_s4 = inlined_call_operand.vmem [shape: bf16[512,2048], index: 4, kind: input, shape index: {}]   ;;  %s13438_s5 = inlined_call_operand.vmem [shape: f32[1,2048], index: 5, kind: input, shape index: {}]   ;;  %s13439_s6 = inlined_call_operand.vmem [shape: f32[196,2048], index: 6, kind: output, shape index: {}]  }
   0x1   :  { %s8714_s23 = smov 0  }
   0x2 LB: > { %s8726_s24 = sadd.s32 4294967295, %s8673_s23   ;;  %s8729_s25 = sadd.s32 1, %s8673_s23   ;;  %s8673_s23 = sphi %s8714_s23, %s13786_s23   ;;  %s8669_s22 = sphi %s8712_s22, %s13785_s22   ;;  %s8665_s21 = sphi %s8710_s21, %s13784_s21  }
   0x3   : > { %s104_s26 = ssub.s32 %s8673_s23, %s8729_s25  ;;  %s107_s27 = sadd.s32 1, %s8669_s22 }
   0x4   : > { %p105_p0 = scmp.eq.s32.totalorder %s104_s26, 0  ;;  %p114_p1 = scmp.ne.s32.totalorder %s8669_s22, %s8665_s21 }
   0x5   : > { %p115_p2 = scmp.eq.s32.totalorder %s8673_s23, 0  ;;  %p170_p3 = scmp.eq.s32.totalorder %s8726_s24, 1 }
   0x6   : > { %s8739_s28 = scalar_select %p105_p0, %s8669_s22, %s107_s27  }
   0x7   : > { %p116_p4 = por %p115_p2, %p114_p1  ;;  %p8741_p5 = por %p170_p3, %p114_p1 }
   0x8   : > { %p7222_p6 = scmp.ge.s32.totalorder %s8673_s23, 2 }
   0xa   : > { %204 = sbr.rel (%p7222_p6) target bundleno = 149 (0x95), region = 32 }
  0x11   : > { %207 = sbr.rel (!%p116_p4) target bundleno = 149 (0x95), region = 36  ;;  %s209_s30 = sand.u32 (%p116_p4), 1, %s8669_s22  }
  0x12   : > { %s7592_s7 = sshll.u32 (%p116_p4), %s8673_s23, 5  ;;  %s7223_s8 = sshll.u32 (%p116_p4), %s209_s30, 11 }
  0x13   : > { %s8751_s11 = scalar_lea.vmem (%p116_p4), %s13437_s4, %s7592_s7  ;;  %s8756_s12 = scalar_lea.vmem (%p116_p4), [#allocation3], %s7223_s8 }
  0x14   : > { %v227_v0 = vld [vmem:[%s8751_s11] sm:$0xff] (%p116_p4)  ;;  %v229_v1 = vld [vmem:[%s8751_s11 + $0x8] sm:$0xff] (%p116_p4)  ;;  %v231_v2 = vld [vmem:[%s8751_s11 + $0x10] sm:$0xff] (%p116_p4) }
  0x15   : > { %228 = vst [vmem:[%s8756_s12] sm:$0xff] (%p116_p4), %v227_v0  ;;  %230 = vst [vmem:[%s8756_s12 + $0x8] sm:$0xff] (%p116_p4), %v229_v1  ;;  %v233_v3 = vld [vmem:[%s8751_s11 + $0x18] sm:$0xff] (%p116_p4)  ;;  %v235_v4 = vld [vmem:[%s8751_s11 + $0x40] sm:$0xff] (%p116_p4) }
  0x16   : > { %232 = vst [vmem:[%s8756_s12 + $0x10] sm:$0xff] (%p116_p4), %v231_v2  ;;  %v237_v5 = vld [vmem:[%s8751_s11 + $0x48] sm:$0xff] (%p116_p4)  ;;  %234 = vst [vmem:[%s8756_s12 + $0x18] sm:$0xff] (%p116_p4), %v233_v3  ;;  %v239_v6 = vld [vmem:[%s8751_s11 + $0x50] sm:$0xff] (%p116_p4) }
  0x17   : > { %236 = vst [vmem:[%s8756_s12 + $0x20] sm:$0xff] (%p116_p4), %v235_v4  ;;  %238 = vst [vmem:[%s8756_s12 + $0x28] sm:$0xff] (%p116_p4), %v237_v5  ;;  %v241_v7 = vld [vmem:[%s8751_s11 + $0x58] sm:$0xff] (%p116_p4)  ;;  %v243_v8 = vld [vmem:[%s8751_s11 + $0x80] sm:$0xff] (%p116_p4) }
  0x18   : > { %240 = vst [vmem:[%s8756_s12 + $0x30] sm:$0xff] %v239_v6  ;;  %242 = vst [vmem:[%s8756_s12 + $0x38] sm:$0xff] %v241_v7  ;;  %v245_v9 = vld [vmem:[%s8751_s11 + $0x88] sm:$0xff]  ;;  %v247_v10 = vld [vmem:[%s8751_s11 + $0x90] sm:$0xff] }
  0x19   : > { %244 = vst [vmem:[%s8756_s12 + $0x40] sm:$0xff] %v243_v8  ;;  %v249_v11 = vld [vmem:[%s8751_s11 + $0x98] sm:$0xff]  ;;  %246 = vst [vmem:[%s8756_s12 + $0x48] sm:$0xff] %v245_v9  ;;  %v251_v12 = vld [vmem:[%s8751_s11 + $0xc0] sm:$0xff] }
  0x1a   : > { %248 = vst [vmem:[%s8756_s12 + $0x50] sm:$0xff] %v247_v10  ;;  %250 = vst [vmem:[%s8756_s12 + $0x58] sm:$0xff] %v249_v11  ;;  %v253_v13 = vld [vmem:[%s8751_s11 + $0xc8] sm:$0xff]  ;;  %v255_v14 = vld [vmem:[%s8751_s11 + $0xd0] sm:$0xff] }
  0x1b   : > { %252 = vst [vmem:[%s8756_s12 + $0x60] sm:$0xff] %v251_v12  ;;  %254 = vst [vmem:[%s8756_s12 + $0x68] sm:$0xff] %v253_v13  ;;  %v257_v15 = vld [vmem:[%s8751_s11 + $0xd8] sm:$0xff]  ;;  %v259_v16 = vld [vmem:[%s8751_s11 + $0x100] sm:$0xff] }
  0x1c   : > { %256 = vst [vmem:[%s8756_s12 + $0x70] sm:$0xff] %v255_v14  ;;  %v261_v17 = vld [vmem:[%s8751_s11 + $0x108] sm:$0xff]  ;;  %258 = vst [vmem:[%s8756_s12 + $0x78] sm:$0xff] %v257_v15  ;;  %v263_v18 = vld [vmem:[%s8751_s11 + $0x110] sm:$0xff] }
  0x1d   : > { %260 = vst [vmem:[%s8756_s12 + $0x80] sm:$0xff] %v259_v16  ;;  %262 = vst [vmem:[%s8756_s12 + $0x88] sm:$0xff] %v261_v17  ;;  %v265_v19 = vld [vmem:[%s8751_s11 + $0x118] sm:$0xff]  ;;  %v267_v20 = vld [vmem:[%s8751_s11 + $0x140] sm:$0xff] }
  0x1e   : > { %264 = vst [vmem:[%s8756_s12 + $0x90] sm:$0xff] %v263_v18  ;;  %266 = vst [vmem:[%s8756_s12 + $0x98] sm:$0xff] %v265_v19  ;;  %v269_v21 = vld [vmem:[%s8751_s11 + $0x148] sm:$0xff]  ;;  %v271_v22 = vld [vmem:[%s8751_s11 + $0x150] sm:$0xff] }
  0x1f   : > { %268 = vst [vmem:[%s8756_s12 + $0xa0] sm:$0xff] %v267_v20  ;;  %v273_v23 = vld [vmem:[%s8751_s11 + $0x158] sm:$0xff]  ;;  %270 = vst [vmem:[%s8756_s12 + $0xa8] sm:$0xff] %v269_v21  ;;  %v275_v24 = vld [vmem:[%s8751_s11 + $0x180] sm:$0xff] }
  0x20   : > { %272 = vst [vmem:[%s8756_s12 + $0xb0] sm:$0xff] %v271_v22  ;;  %274 = vst [vmem:[%s8756_s12 + $0xb8] sm:$0xff] %v273_v23  ;;  %v277_v25 = vld [vmem:[%s8751_s11 + $0x188] sm:$0xff]  ;;  %v279_v26 = vld [vmem:[%s8751_s11 + $0x190] sm:$0xff] }
  0x21   : > { %276 = vst [vmem:[%s8756_s12 + $0xc0] sm:$0xff] %v275_v24  ;;  %278 = vst [vmem:[%s8756_s12 + $0xc8] sm:$0xff] %v277_v25  ;;  %v281_v27 = vld [vmem:[%s8751_s11 + $0x198] sm:$0xff]  ;;  %v283_v28 = vld [vmem:[%s8751_s11 + $0x1c0] sm:$0xff] }
  0x22   : > { %280 = vst [vmem:[%s8756_s12 + $0xd0] sm:$0xff] %v279_v26  ;;  %v285_v29 = vld [vmem:[%s8751_s11 + $0x1c8] sm:$0xff]  ;;  %282 = vst [vmem:[%s8756_s12 + $0xd8] sm:$0xff] %v281_v27  ;;  %v287_v30 = vld [vmem:[%s8751_s11 + $0x1d0] sm:$0xff] }
  0x23   : > { %284 = vst [vmem:[%s8756_s12 + $0xe0] sm:$0xff] %v283_v28  ;;  %286 = vst [vmem:[%s8756_s12 + $0xe8] sm:$0xff] %v285_v29  ;;  %v289_v31 = vld [vmem:[%s8751_s11 + $0x1d8] sm:$0xff]  ;;  %v291_v32 = vld [vmem:[%s8751_s11 + $0x200] sm:$0xff] }
  0x24   : > { %288 = vst [vmem:[%s8756_s12 + $0xf0] sm:$0xff] %v287_v30  ;;  %290 = vst [vmem:[%s8756_s12 + $0xf8] sm:$0xff] %v289_v31  ;;  %v293_v33 = vld [vmem:[%s8751_s11 + $0x208] sm:$0xff]  ;;  %v295_v34 = vld [vmem:[%s8751_s11 + $0x210] sm:$0xff] }
  0x25   : > { %292 = vst [vmem:[%s8756_s12 + $0x100] sm:$0xff] %v291_v32  ;;  %v297_v35 = vld [vmem:[%s8751_s11 + $0x218] sm:$0xff]  ;;  %294 = vst [vmem:[%s8756_s12 + $0x108] sm:$0xff] %v293_v33  ;;  %v299_v36 = vld [vmem:[%s8751_s11 + $0x240] sm:$0xff] }
  0x26   : > { %296 = vst [vmem:[%s8756_s12 + $0x110] sm:$0xff] %v295_v34  ;;  %298 = vst [vmem:[%s8756_s12 + $0x118] sm:$0xff] %v297_v35  ;;  %v301_v37 = vld [vmem:[%s8751_s11 + $0x248] sm:$0xff]  ;;  %v303_v38 = vld [vmem:[%s8751_s11 + $0x250] sm:$0xff] }
  0x27   : > { %300 = vst [vmem:[%s8756_s12 + $0x120] sm:$0xff] %v299_v36  ;;  %302 = vst [vmem:[%s8756_s12 + $0x128] sm:$0xff] %v301_v37  ;;  %v305_v39 = vld [vmem:[%s8751_s11 + $0x258] sm:$0xff]  ;;  %v307_v40 = vld [vmem:[%s8751_s11 + $0x280] sm:$0xff] }
  0x28   : > { %304 = vst [vmem:[%s8756_s12 + $0x130] sm:$0xff] %v303_v38  ;;  %v309_v41 = vld [vmem:[%s8751_s11 + $0x288] sm:$0xff]  ;;  %306 = vst [vmem:[%s8756_s12 + $0x138] sm:$0xff] %v305_v39  ;;  %v311_v42 = vld [vmem:[%s8751_s11 + $0x290] sm:$0xff] }
  0x29   : > { %308 = vst [vmem:[%s8756_s12 + $0x140] sm:$0xff] %v307_v40  ;;  %310 = vst [vmem:[%s8756_s12 + $0x148] sm:$0xff] %v309_v41  ;;  %v313_v43 = vld [vmem:[%s8751_s11 + $0x298] sm:$0xff]  ;;  %v315_v44 = vld [vmem:[%s8751_s11 + $0x2c0] sm:$0xff] }
  0x2a   : > { %312 = vst [vmem:[%s8756_s12 + $0x150] sm:$0xff] %v311_v42  ;;  %314 = vst [vmem:[%s8756_s12 + $0x158] sm:$0xff] %v313_v43  ;;  %v317_v45 = vld [vmem:[%s8751_s11 + $0x2c8] sm:$0xff]  ;;  %v319_v46 = vld [vmem:[%s8751_s11 + $0x2d0] sm:$0xff] }
  0x2b   : > { %316 = vst [vmem:[%s8756_s12 + $0x160] sm:$0xff] %v315_v44  ;;  %v321_v47 = vld [vmem:[%s8751_s11 + $0x2d8] sm:$0xff]  ;;  %318 = vst [vmem:[%s8756_s12 + $0x168] sm:$0xff] %v317_v45  ;;  %v323_v48 = vld [vmem:[%s8751_s11 + $0x300] sm:$0xff] }
  0x2c   : > { %320 = vst [vmem:[%s8756_s12 + $0x170] sm:$0xff] %v319_v46  ;;  %322 = vst [vmem:[%s8756_s12 + $0x178] sm:$0xff] %v321_v47  ;;  %v325_v49 = vld [vmem:[%s8751_s11 + $0x308] sm:$0xff]  ;;  %v327_v50 = vld [vmem:[%s8751_s11 + $0x310] sm:$0xff] }
  0x2d   : > { %324 = vst [vmem:[%s8756_s12 + $0x180] sm:$0xff] %v323_v48  ;;  %326 = vst [vmem:[%s8756_s12 + $0x188] sm:$0xff] %v325_v49  ;;  %v329_v51 = vld [vmem:[%s8751_s11 + $0x318] sm:$0xff]  ;;  %v331_v52 = vld [vmem:[%s8751_s11 + $0x340] sm:$0xff] }
  0x2e   : > { %328 = vst [vmem:[%s8756_s12 + $0x190] sm:$0xff] %v327_v50  ;;  %v333_v53 = vld [vmem:[%s8751_s11 + $0x348] sm:$0xff]  ;;  %330 = vst [vmem:[%s8756_s12 + $0x198] sm:$0xff] %v329_v51  ;;  %v335_v54 = vld [vmem:[%s8751_s11 + $0x350] sm:$0xff] }
  0x2f   : > { %332 = vst [vmem:[%s8756_s12 + $0x1a0] sm:$0xff] %v331_v52  ;;  %334 = vst [vmem:[%s8756_s12 + $0x1a8] sm:$0xff] %v333_v53  ;;  %v337_v55 = vld [vmem:[%s8751_s11 + $0x358] sm:$0xff]  ;;  %v339_v56 = vld [vmem:[%s8751_s11 + $0x380] sm:$0xff] }
  0x30   : > { %336 = vst [vmem:[%s8756_s12 + $0x1b0] sm:$0xff] %v335_v54  ;;  %338 = vst [vmem:[%s8756_s12 + $0x1b8] sm:$0xff] %v337_v55  ;;  %v341_v57 = vld [vmem:[%s8751_s11 + $0x388] sm:$0xff]  ;;  %v343_v58 = vld [vmem:[%s8751_s11 + $0x390] sm:$0xff] }
  0x31   : > { %340 = vst [vmem:[%s8756_s12 + $0x1c0] sm:$0xff] %v339_v56  ;;  %v345_v59 = vld [vmem:[%s8751_s11 + $0x398] sm:$0xff]  ;;  %342 = vst [vmem:[%s8756_s12 + $0x1c8] sm:$0xff] %v341_v57  ;;  %v347_v60 = vld [vmem:[%s8751_s11 + $0x3c0] sm:$0xff] }
  0x32   : > { %344 = vst [vmem:[%s8756_s12 + $0x1d0] sm:$0xff] %v343_v58  ;;  %346 = vst [vmem:[%s8756_s12 + $0x1d8] sm:$0xff] %v345_v59  ;;  %v349_v61 = vld [vmem:[%s8751_s11 + $0x3c8] sm:$0xff]  ;;  %v351_v62 = vld [vmem:[%s8751_s11 + $0x3d0] sm:$0xff] }
  0x33   : > { %348 = vst [vmem:[%s8756_s12 + $0x1e0] sm:$0xff] %v347_v60  ;;  %350 = vst [vmem:[%s8756_s12 + $0x1e8] sm:$0xff] %v349_v61  ;;  %v353_v63 = vld [vmem:[%s8751_s11 + $0x3d8] sm:$0xff]  ;;  %v355_v0 = vld [vmem:[%s8751_s11 + $0x400] sm:$0xff] }
  0x34   : > { %352 = vst [vmem:[%s8756_s12 + $0x1f0] sm:$0xff] %v351_v62  ;;  %v357_v1 = vld [vmem:[%s8751_s11 + $0x408] sm:$0xff]  ;;  %354 = vst [vmem:[%s8756_s12 + $0x1f8] sm:$0xff] %v353_v63  ;;  %v359_v2 = vld [vmem:[%s8751_s11 + $0x410] sm:$0xff] }
  0x35   : > { %356 = vst [vmem:[%s8756_s12 + $0x200] sm:$0xff] %v355_v0  ;;  %358 = vst [vmem:[%s8756_s12 + $0x208] sm:$0xff] %v357_v1  ;;  %v361_v3 = vld [vmem:[%s8751_s11 + $0x418] sm:$0xff]  ;;  %v363_v4 = vld [vmem:[%s8751_s11 + $0x440] sm:$0xff] }
  0x36   : > { %360 = vst [vmem:[%s8756_s12 + $0x210] sm:$0xff] %v359_v2  ;;  %362 = vst [vmem:[%s8756_s12 + $0x218] sm:$0xff] %v361_v3  ;;  %v365_v5 = vld [vmem:[%s8751_s11 + $0x448] sm:$0xff]  ;;  %v367_v6 = vld [vmem:[%s8751_s11 + $0x450] sm:$0xff] }
  0x37   : > { %364 = vst [vmem:[%s8756_s12 + $0x220] sm:$0xff] %v363_v4  ;;  %v369_v7 = vld [vmem:[%s8751_s11 + $0x458] sm:$0xff]  ;;  %366 = vst [vmem:[%s8756_s12 + $0x228] sm:$0xff] %v365_v5  ;;  %v371_v8 = vld [vmem:[%s8751_s11 + $0x480] sm:$0xff] }
  0x38   : > { %368 = vst [vmem:[%s8756_s12 + $0x230] sm:$0xff] %v367_v6  ;;  %370 = vst [vmem:[%s8756_s12 + $0x238] sm:$0xff] %v369_v7  ;;  %v373_v9 = vld [vmem:[%s8751_s11 + $0x488] sm:$0xff]  ;;  %v375_v10 = vld [vmem:[%s8751_s11 + $0x490] sm:$0xff] }
  0x39   : > { %372 = vst [vmem:[%s8756_s12 + $0x240] sm:$0xff] %v371_v8  ;;  %374 = vst [vmem:[%s8756_s12 + $0x248] sm:$0xff] %v373_v9  ;;  %v377_v11 = vld [vmem:[%s8751_s11 + $0x498] sm:$0xff]  ;;  %v379_v12 = vld [vmem:[%s8751_s11 + $0x4c0] sm:$0xff] }
  0x3a   : > { %376 = vst [vmem:[%s8756_s12 + $0x250] sm:$0xff] %v375_v10  ;;  %v381_v13 = vld [vmem:[%s8751_s11 + $0x4c8] sm:$0xff]  ;;  %378 = vst [vmem:[%s8756_s12 + $0x258] sm:$0xff] %v377_v11  ;;  %v383_v14 = vld [vmem:[%s8751_s11 + $0x4d0] sm:$0xff] }
  0x3b   : > { %380 = vst [vmem:[%s8756_s12 + $0x260] sm:$0xff] %v379_v12  ;;  %382 = vst [vmem:[%s8756_s12 + $0x268] sm:$0xff] %v381_v13  ;;  %v385_v15 = vld [vmem:[%s8751_s11 + $0x4d8] sm:$0xff]  ;;  %v387_v16 = vld [vmem:[%s8751_s11 + $0x500] sm:$0xff] }
  0x3c   : > { %384 = vst [vmem:[%s8756_s12 + $0x270] sm:$0xff] %v383_v14  ;;  %386 = vst [vmem:[%s8756_s12 + $0x278] sm:$0xff] %v385_v15  ;;  %v389_v17 = vld [vmem:[%s8751_s11 + $0x508] sm:$0xff]  ;;  %v391_v18 = vld [vmem:[%s8751_s11 + $0x510] sm:$0xff] }
  0x3d   : > { %388 = vst [vmem:[%s8756_s12 + $0x280] sm:$0xff] %v387_v16  ;;  %v393_v19 = vld [vmem:[%s8751_s11 + $0x518] sm:$0xff]  ;;  %390 = vst [vmem:[%s8756_s12 + $0x288] sm:$0xff] %v389_v17  ;;  %v395_v20 = vld [vmem:[%s8751_s11 + $0x540] sm:$0xff] }
  0x3e   : > { %392 = vst [vmem:[%s8756_s12 + $0x290] sm:$0xff] %v391_v18  ;;  %394 = vst [vmem:[%s8756_s12 + $0x298] sm:$0xff] %v393_v19  ;;  %v397_v21 = vld [vmem:[%s8751_s11 + $0x548] sm:$0xff]  ;;  %v399_v22 = vld [vmem:[%s8751_s11 + $0x550] sm:$0xff] }
  0x3f   : > { %396 = vst [vmem:[%s8756_s12 + $0x2a0] sm:$0xff] %v395_v20  ;;  %398 = vst [vmem:[%s8756_s12 + $0x2a8] sm:$0xff] %v397_v21  ;;  %v401_v23 = vld [vmem:[%s8751_s11 + $0x558] sm:$0xff]  ;;  %v403_v24 = vld [vmem:[%s8751_s11 + $0x580] sm:$0xff] }
  0x40   : > { %400 = vst [vmem:[%s8756_s12 + $0x2b0] sm:$0xff] %v399_v22  ;;  %v405_v25 = vld [vmem:[%s8751_s11 + $0x588] sm:$0xff]  ;;  %402 = vst [vmem:[%s8756_s12 + $0x2b8] sm:$0xff] %v401_v23  ;;  %v407_v26 = vld [vmem:[%s8751_s11 + $0x590] sm:$0xff] }
  0x41   : > { %404 = vst [vmem:[%s8756_s12 + $0x2c0] sm:$0xff] %v403_v24  ;;  %406 = vst [vmem:[%s8756_s12 + $0x2c8] sm:$0xff] %v405_v25  ;;  %v409_v27 = vld [vmem:[%s8751_s11 + $0x598] sm:$0xff]  ;;  %v411_v28 = vld [vmem:[%s8751_s11 + $0x5c0] sm:$0xff] }
  0x42   : > { %408 = vst [vmem:[%s8756_s12 + $0x2d0] sm:$0xff] %v407_v26  ;;  %410 = vst [vmem:[%s8756_s12 + $0x2d8] sm:$0xff] %v409_v27  ;;  %v413_v29 = vld [vmem:[%s8751_s11 + $0x5c8] sm:$0xff]  ;;  %v415_v30 = vld [vmem:[%s8751_s11 + $0x5d0] sm:$0xff] }
  0x43   : > { %412 = vst [vmem:[%s8756_s12 + $0x2e0] sm:$0xff] %v411_v28  ;;  %v417_v31 = vld [vmem:[%s8751_s11 + $0x5d8] sm:$0xff]  ;;  %414 = vst [vmem:[%s8756_s12 + $0x2e8] sm:$0xff] %v413_v29  ;;  %v419_v32 = vld [vmem:[%s8751_s11 + $0x600] sm:$0xff] }
  0x44   : > { %416 = vst [vmem:[%s8756_s12 + $0x2f0] sm:$0xff] %v415_v30  ;;  %418 = vst [vmem:[%s8756_s12 + $0x2f8] sm:$0xff] %v417_v31  ;;  %v421_v33 = vld [vmem:[%s8751_s11 + $0x608] sm:$0xff]  ;;  %v423_v34 = vld [vmem:[%s8751_s11 + $0x610] sm:$0xff] }
  0x45   : > { %420 = vst [vmem:[%s8756_s12 + $0x300] sm:$0xff] %v419_v32  ;;  %422 = vst [vmem:[%s8756_s12 + $0x308] sm:$0xff] %v421_v33  ;;  %v425_v35 = vld [vmem:[%s8751_s11 + $0x618] sm:$0xff]  ;;  %v427_v36 = vld [vmem:[%s8751_s11 + $0x640] sm:$0xff] }
  0x46   : > { %424 = vst [vmem:[%s8756_s12 + $0x310] sm:$0xff] %v423_v34  ;;  %v429_v37 = vld [vmem:[%s8751_s11 + $0x648] sm:$0xff]  ;;  %426 = vst [vmem:[%s8756_s12 + $0x318] sm:$0xff] %v425_v35  ;;  %v431_v38 = vld [vmem:[%s8751_s11 + $0x650] sm:$0xff] }
  0x47   : > { %428 = vst [vmem:[%s8756_s12 + $0x320] sm:$0xff] %v427_v36  ;;  %430 = vst [vmem:[%s8756_s12 + $0x328] sm:$0xff] %v429_v37  ;;  %v433_v39 = vld [vmem:[%s8751_s11 + $0x658] sm:$0xff]  ;;  %v435_v40 = vld [vmem:[%s8751_s11 + $0x680] sm:$0xff] }
  0x48   : > { %432 = vst [vmem:[%s8756_s12 + $0x330] sm:$0xff] %v431_v38  ;;  %434 = vst [vmem:[%s8756_s12 + $0x338] sm:$0xff] %v433_v39  ;;  %v437_v41 = vld [vmem:[%s8751_s11 + $0x688] sm:$0xff]  ;;  %v439_v42 = vld [vmem:[%s8751_s11 + $0x690] sm:$0xff] }
  0x49   : > { %436 = vst [vmem:[%s8756_s12 + $0x340] sm:$0xff] %v435_v40  ;;  %v441_v43 = vld [vmem:[%s8751_s11 + $0x698] sm:$0xff]  ;;  %438 = vst [vmem:[%s8756_s12 + $0x348] sm:$0xff] %v437_v41  ;;  %v443_v44 = vld [vmem:[%s8751_s11 + $0x6c0] sm:$0xff] }
  0x4a   : > { %440 = vst [vmem:[%s8756_s12 + $0x350] sm:$0xff] %v439_v42  ;;  %442 = vst [vmem:[%s8756_s12 + $0x358] sm:$0xff] %v441_v43  ;;  %v445_v45 = vld [vmem:[%s8751_s11 + $0x6c8] sm:$0xff]  ;;  %v447_v46 = vld [vmem:[%s8751_s11 + $0x6d0] sm:$0xff] }
  0x4b   : > { %444 = vst [vmem:[%s8756_s12 + $0x360] sm:$0xff] %v443_v44  ;;  %446 = vst [vmem:[%s8756_s12 + $0x368] sm:$0xff] %v445_v45  ;;  %v449_v47 = vld [vmem:[%s8751_s11 + $0x6d8] sm:$0xff]  ;;  %v451_v48 = vld [vmem:[%s8751_s11 + $0x700] sm:$0xff] }
  0x4c   : > { %448 = vst [vmem:[%s8756_s12 + $0x370] sm:$0xff] %v447_v46  ;;  %v453_v49 = vld [vmem:[%s8751_s11 + $0x708] sm:$0xff]  ;;  %450 = vst [vmem:[%s8756_s12 + $0x378] sm:$0xff] %v449_v47  ;;  %v455_v50 = vld [vmem:[%s8751_s11 + $0x710] sm:$0xff] }
  0x4d   : > { %452 = vst [vmem:[%s8756_s12 + $0x380] sm:$0xff] %v451_v48  ;;  %454 = vst [vmem:[%s8756_s12 + $0x388] sm:$0xff] %v453_v49  ;;  %v457_v51 = vld [vmem:[%s8751_s11 + $0x718] sm:$0xff]  ;;  %v459_v52 = vld [vmem:[%s8751_s11 + $0x740] sm:$0xff] }
  0x4e   : > { %456 = vst [vmem:[%s8756_s12 + $0x390] sm:$0xff] %v455_v50  ;;  %458 = vst [vmem:[%s8756_s12 + $0x398] sm:$0xff] %v457_v51  ;;  %v461_v53 = vld [vmem:[%s8751_s11 + $0x748] sm:$0xff]  ;;  %v463_v54 = vld [vmem:[%s8751_s11 + $0x750] sm:$0xff] }
  0x4f   : > { %460 = vst [vmem:[%s8756_s12 + $0x3a0] sm:$0xff] %v459_v52  ;;  %v465_v55 = vld [vmem:[%s8751_s11 + $0x758] sm:$0xff]  ;;  %462 = vst [vmem:[%s8756_s12 + $0x3a8] sm:$0xff] %v461_v53  ;;  %v467_v56 = vld [vmem:[%s8751_s11 + $0x780] sm:$0xff] }
  0x50   : > { %464 = vst [vmem:[%s8756_s12 + $0x3b0] sm:$0xff] %v463_v54  ;;  %466 = vst [vmem:[%s8756_s12 + $0x3b8] sm:$0xff] %v465_v55  ;;  %v469_v57 = vld [vmem:[%s8751_s11 + $0x788] sm:$0xff]  ;;  %v471_v58 = vld [vmem:[%s8751_s11 + $0x790] sm:$0xff] }
  0x51   : > { %468 = vst [vmem:[%s8756_s12 + $0x3c0] sm:$0xff] %v467_v56  ;;  %470 = vst [vmem:[%s8756_s12 + $0x3c8] sm:$0xff] %v469_v57  ;;  %v473_v59 = vld [vmem:[%s8751_s11 + $0x798] sm:$0xff]  ;;  %v475_v60 = vld [vmem:[%s8751_s11 + $0x7c0] sm:$0xff] }
  0x52   : > { %472 = vst [vmem:[%s8756_s12 + $0x3d0] sm:$0xff] %v471_v58  ;;  %v477_v61 = vld [vmem:[%s8751_s11 + $0x7c8] sm:$0xff]  ;;  %474 = vst [vmem:[%s8756_s12 + $0x3d8] sm:$0xff] %v473_v59  ;;  %v479_v62 = vld [vmem:[%s8751_s11 + $0x7d0] sm:$0xff] }
  0x53   : > { %476 = vst [vmem:[%s8756_s12 + $0x3e0] sm:$0xff] %v475_v60  ;;  %478 = vst [vmem:[%s8756_s12 + $0x3e8] sm:$0xff] %v477_v61  ;;  %v481_v63 = vld [vmem:[%s8751_s11 + $0x7d8] sm:$0xff]  ;;  %v483_v0 = vld [vmem:[%s8751_s11 + $0x800] sm:$0xff] }
  0x54   : > { %480 = vst [vmem:[%s8756_s12 + $0x3f0] sm:$0xff] %v479_v62  ;;  %482 = vst [vmem:[%s8756_s12 + $0x3f8] sm:$0xff] %v481_v63  ;;  %v485_v1 = vld [vmem:[%s8751_s11 + $0x808] sm:$0xff]  ;;  %v487_v2 = vld [vmem:[%s8751_s11 + $0x810] sm:$0xff] }
  0x55   : > { %484 = vst [vmem:[%s8756_s12 + $0x400] sm:$0xff] %v483_v0  ;;  %v489_v3 = vld [vmem:[%s8751_s11 + $0x818] sm:$0xff]  ;;  %486 = vst [vmem:[%s8756_s12 + $0x408] sm:$0xff] %v485_v1  ;;  %v491_v4 = vld [vmem:[%s8751_s11 + $0x840] sm:$0xff] }
  0x56   : > { %488 = vst [vmem:[%s8756_s12 + $0x410] sm:$0xff] %v487_v2  ;;  %490 = vst [vmem:[%s8756_s12 + $0x418] sm:$0xff] %v489_v3  ;;  %v493_v5 = vld [vmem:[%s8751_s11 + $0x848] sm:$0xff]  ;;  %v495_v6 = vld [vmem:[%s8751_s11 + $0x850] sm:$0xff] }
  0x57   : > { %492 = vst [vmem:[%s8756_s12 + $0x420] sm:$0xff] %v491_v4  ;;  %494 = vst [vmem:[%s8756_s12 + $0x428] sm:$0xff] %v493_v5  ;;  %v497_v7 = vld [vmem:[%s8751_s11 + $0x858] sm:$0xff]  ;;  %v499_v8 = vld [vmem:[%s8751_s11 + $0x880] sm:$0xff] }
  0x58   : > { %496 = vst [vmem:[%s8756_s12 + $0x430] sm:$0xff] %v495_v6  ;;  %v501_v9 = vld [vmem:[%s8751_s11 + $0x888] sm:$0xff]  ;;  %498 = vst [vmem:[%s8756_s12 + $0x438] sm:$0xff] %v497_v7  ;;  %v503_v10 = vld [vmem:[%s8751_s11 + $0x890] sm:$0xff] }
  0x59   : > { %500 = vst [vmem:[%s8756_s12 + $0x440] sm:$0xff] %v499_v8  ;;  %502 = vst [vmem:[%s8756_s12 + $0x448] sm:$0xff] %v501_v9  ;;  %v505_v11 = vld [vmem:[%s8751_s11 + $0x898] sm:$0xff]  ;;  %v507_v12 = vld [vmem:[%s8751_s11 + $0x8c0] sm:$0xff] }
  0x5a   : > { %504 = vst [vmem:[%s8756_s12 + $0x450] sm:$0xff] %v503_v10  ;;  %506 = vst [vmem:[%s8756_s12 + $0x458] sm:$0xff] %v505_v11  ;;  %v509_v13 = vld [vmem:[%s8751_s11 + $0x8c8] sm:$0xff]  ;;  %v511_v14 = vld [vmem:[%s8751_s11 + $0x8d0] sm:$0xff] }
  0x5b   : > { %508 = vst [vmem:[%s8756_s12 + $0x460] sm:$0xff] %v507_v12  ;;  %v513_v15 = vld [vmem:[%s8751_s11 + $0x8d8] sm:$0xff]  ;;  %510 = vst [vmem:[%s8756_s12 + $0x468] sm:$0xff] %v509_v13  ;;  %v515_v16 = vld [vmem:[%s8751_s11 + $0x900] sm:$0xff] }
  0x5c   : > { %512 = vst [vmem:[%s8756_s12 + $0x470] sm:$0xff] %v511_v14  ;;  %514 = vst [vmem:[%s8756_s12 + $0x478] sm:$0xff] %v513_v15  ;;  %v517_v17 = vld [vmem:[%s8751_s11 + $0x908] sm:$0xff]  ;;  %v519_v18 = vld [vmem:[%s8751_s11 + $0x910] sm:$0xff] }
  0x5d   : > { %516 = vst [vmem:[%s8756_s12 + $0x480] sm:$0xff] %v515_v16  ;;  %518 = vst [vmem:[%s8756_s12 + $0x488] sm:$0xff] %v517_v17  ;;  %v521_v19 = vld [vmem:[%s8751_s11 + $0x918] sm:$0xff]  ;;  %v523_v20 = vld [vmem:[%s8751_s11 + $0x940] sm:$0xff] }
  0x5e   : > { %520 = vst [vmem:[%s8756_s12 + $0x490] sm:$0xff] %v519_v18  ;;  %v525_v21 = vld [vmem:[%s8751_s11 + $0x948] sm:$0xff]  ;;  %522 = vst [vmem:[%s8756_s12 + $0x498] sm:$0xff] %v521_v19  ;;  %v527_v22 = vld [vmem:[%s8751_s11 + $0x950] sm:$0xff] }
  0x5f   : > { %524 = vst [vmem:[%s8756_s12 + $0x4a0] sm:$0xff] %v523_v20  ;;  %526 = vst [vmem:[%s8756_s12 + $0x4a8] sm:$0xff] %v525_v21  ;;  %v529_v23 = vld [vmem:[%s8751_s11 + $0x958] sm:$0xff]  ;;  %v531_v24 = vld [vmem:[%s8751_s11 + $0x980] sm:$0xff] }
  0x60   : > { %528 = vst [vmem:[%s8756_s12 + $0x4b0] sm:$0xff] %v527_v22  ;;  %530 = vst [vmem:[%s8756_s12 + $0x4b8] sm:$0xff] %v529_v23  ;;  %v533_v25 = vld [vmem:[%s8751_s11 + $0x988] sm:$0xff]  ;;  %v535_v26 = vld [vmem:[%s8751_s11 + $0x990] sm:$0xff] }
  0x61   : > { %532 = vst [vmem:[%s8756_s12 + $0x4c0] sm:$0xff] %v531_v24  ;;  %v537_v27 = vld [vmem:[%s8751_s11 + $0x998] sm:$0xff]  ;;  %534 = vst [vmem:[%s8756_s12 + $0x4c8] sm:$0xff] %v533_v25  ;;  %v539_v28 = vld [vmem:[%s8751_s11 + $0x9c0] sm:$0xff] }
  0x62   : > { %536 = vst [vmem:[%s8756_s12 + $0x4d0] sm:$0xff] %v535_v26  ;;  %538 = vst [vmem:[%s8756_s12 + $0x4d8] sm:$0xff] %v537_v27  ;;  %v541_v29 = vld [vmem:[%s8751_s11 + $0x9c8] sm:$0xff]  ;;  %v543_v30 = vld [vmem:[%s8751_s11 + $0x9d0] sm:$0xff] }
  0x63   : > { %540 = vst [vmem:[%s8756_s12 + $0x4e0] sm:$0xff] %v539_v28  ;;  %542 = vst [vmem:[%s8756_s12 + $0x4e8] sm:$0xff] %v541_v29  ;;  %v545_v31 = vld [vmem:[%s8751_s11 + $0x9d8] sm:$0xff]  ;;  %v547_v32 = vld [vmem:[%s8751_s11 + $0xa00] sm:$0xff] }
  0x64   : > { %544 = vst [vmem:[%s8756_s12 + $0x4f0] sm:$0xff] %v543_v30  ;;  %v549_v33 = vld [vmem:[%s8751_s11 + $0xa08] sm:$0xff]  ;;  %546 = vst [vmem:[%s8756_s12 + $0x4f8] sm:$0xff] %v545_v31  ;;  %v551_v34 = vld [vmem:[%s8751_s11 + $0xa10] sm:$0xff] }
  0x65   : > { %548 = vst [vmem:[%s8756_s12 + $0x500] sm:$0xff] %v547_v32  ;;  %550 = vst [vmem:[%s8756_s12 + $0x508] sm:$0xff] %v549_v33  ;;  %v553_v35 = vld [vmem:[%s8751_s11 + $0xa18] sm:$0xff]  ;;  %v555_v36 = vld [vmem:[%s8751_s11 + $0xa40] sm:$0xff] }
  0x66   : > { %552 = vst [vmem:[%s8756_s12 + $0x510] sm:$0xff] %v551_v34  ;;  %554 = vst [vmem:[%s8756_s12 + $0x518] sm:$0xff] %v553_v35  ;;  %v557_v37 = vld [vmem:[%s8751_s11 + $0xa48] sm:$0xff]  ;;  %v559_v38 = vld [vmem:[%s8751_s11 + $0xa50] sm:$0xff] }
  0x67   : > { %556 = vst [vmem:[%s8756_s12 + $0x520] sm:$0xff] %v555_v36  ;;  %v561_v39 = vld [vmem:[%s8751_s11 + $0xa58] sm:$0xff]  ;;  %558 = vst [vmem:[%s8756_s12 + $0x528] sm:$0xff] %v557_v37  ;;  %v563_v40 = vld [vmem:[%s8751_s11 + $0xa80] sm:$0xff] }
  0x68   : > { %560 = vst [vmem:[%s8756_s12 + $0x530] sm:$0xff] %v559_v38  ;;  %562 = vst [vmem:[%s8756_s12 + $0x538] sm:$0xff] %v561_v39  ;;  %v565_v41 = vld [vmem:[%s8751_s11 + $0xa88] sm:$0xff]  ;;  %v567_v42 = vld [vmem:[%s8751_s11 + $0xa90] sm:$0xff] }
  0x69   : > { %564 = vst [vmem:[%s8756_s12 + $0x540] sm:$0xff] %v563_v40  ;;  %566 = vst [vmem:[%s8756_s12 + $0x548] sm:$0xff] %v565_v41  ;;  %v569_v43 = vld [vmem:[%s8751_s11 + $0xa98] sm:$0xff]  ;;  %v571_v44 = vld [vmem:[%s8751_s11 + $0xac0] sm:$0xff] }
  0x6a   : > { %568 = vst [vmem:[%s8756_s12 + $0x550] sm:$0xff] %v567_v42  ;;  %v573_v45 = vld [vmem:[%s8751_s11 + $0xac8] sm:$0xff]  ;;  %570 = vst [vmem:[%s8756_s12 + $0x558] sm:$0xff] %v569_v43  ;;  %v575_v46 = vld [vmem:[%s8751_s11 + $0xad0] sm:$0xff] }
  0x6b   : > { %572 = vst [vmem:[%s8756_s12 + $0x560] sm:$0xff] %v571_v44  ;;  %574 = vst [vmem:[%s8756_s12 + $0x568] sm:$0xff] %v573_v45  ;;  %v577_v47 = vld [vmem:[%s8751_s11 + $0xad8] sm:$0xff]  ;;  %v579_v48 = vld [vmem:[%s8751_s11 + $0xb00] sm:$0xff] }
  0x6c   : > { %576 = vst [vmem:[%s8756_s12 + $0x570] sm:$0xff] %v575_v46  ;;  %578 = vst [vmem:[%s8756_s12 + $0x578] sm:$0xff] %v577_v47  ;;  %v581_v49 = vld [vmem:[%s8751_s11 + $0xb08] sm:$0xff]  ;;  %v583_v50 = vld [vmem:[%s8751_s11 + $0xb10] sm:$0xff] }
  0x6d   : > { %580 = vst [vmem:[%s8756_s12 + $0x580] sm:$0xff] %v579_v48  ;;  %v585_v51 = vld [vmem:[%s8751_s11 + $0xb18] sm:$0xff]  ;;  %582 = vst [vmem:[%s8756_s12 + $0x588] sm:$0xff] %v581_v49  ;;  %v587_v52 = vld [vmem:[%s8751_s11 + $0xb40] sm:$0xff] }
  0x6e   : > { %584 = vst [vmem:[%s8756_s12 + $0x590] sm:$0xff] %v583_v50  ;;  %586 = vst [vmem:[%s8756_s12 + $0x598] sm:$0xff] %v585_v51  ;;  %v589_v53 = vld [vmem:[%s8751_s11 + $0xb48] sm:$0xff]  ;;  %v591_v54 = vld [vmem:[%s8751_s11 + $0xb50] sm:$0xff] }
  0x6f   : > { %588 = vst [vmem:[%s8756_s12 + $0x5a0] sm:$0xff] %v587_v52  ;;  %590 = vst [vmem:[%s8756_s12 + $0x5a8] sm:$0xff] %v589_v53  ;;  %v593_v55 = vld [vmem:[%s8751_s11 + $0xb58] sm:$0xff]  ;;  %v595_v56 = vld [vmem:[%s8751_s11 + $0xb80] sm:$0xff] }
  0x70   : > { %592 = vst [vmem:[%s8756_s12 + $0x5b0] sm:$0xff] %v591_v54  ;;  %v597_v57 = vld [vmem:[%s8751_s11 + $0xb88] sm:$0xff]  ;;  %594 = vst [vmem:[%s8756_s12 + $0x5b8] sm:$0xff] %v593_v55  ;;  %v599_v58 = vld [vmem:[%s8751_s11 + $0xb90] sm:$0xff] }
  0x71   : > { %596 = vst [vmem:[%s8756_s12 + $0x5c0] sm:$0xff] %v595_v56  ;;  %598 = vst [vmem:[%s8756_s12 + $0x5c8] sm:$0xff] %v597_v57  ;;  %v601_v59 = vld [vmem:[%s8751_s11 + $0xb98] sm:$0xff]  ;;  %v603_v60 = vld [vmem:[%s8751_s11 + $0xbc0] sm:$0xff] }
  0x72   : > { %600 = vst [vmem:[%s8756_s12 + $0x5d0] sm:$0xff] %v599_v58  ;;  %602 = vst [vmem:[%s8756_s12 + $0x5d8] sm:$0xff] %v601_v59  ;;  %v605_v61 = vld [vmem:[%s8751_s11 + $0xbc8] sm:$0xff]  ;;  %v607_v62 = vld [vmem:[%s8751_s11 + $0xbd0] sm:$0xff] }
  0x73   : > { %604 = vst [vmem:[%s8756_s12 + $0x5e0] sm:$0xff] %v603_v60  ;;  %v609_v63 = vld [vmem:[%s8751_s11 + $0xbd8] sm:$0xff]  ;;  %606 = vst [vmem:[%s8756_s12 + $0x5e8] sm:$0xff] %v605_v61  ;;  %v611_v0 = vld [vmem:[%s8751_s11 + $0xc00] sm:$0xff] }
  0x74   : > { %608 = vst [vmem:[%s8756_s12 + $0x5f0] sm:$0xff] %v607_v62  ;;  %610 = vst [vmem:[%s8756_s12 + $0x5f8] sm:$0xff] %v609_v63  ;;  %v613_v1 = vld [vmem:[%s8751_s11 + $0xc08] sm:$0xff]  ;;  %v615_v2 = vld [vmem:[%s8751_s11 + $0xc10] sm:$0xff] }
  0x75   : > { %612 = vst [vmem:[%s8756_s12 + $0x600] sm:$0xff] %v611_v0  ;;  %614 = vst [vmem:[%s8756_s12 + $0x608] sm:$0xff] %v613_v1  ;;  %v617_v3 = vld [vmem:[%s8751_s11 + $0xc18] sm:$0xff]  ;;  %v619_v4 = vld [vmem:[%s8751_s11 + $0xc40] sm:$0xff] }
  0x76   : > { %616 = vst [vmem:[%s8756_s12 + $0x610] sm:$0xff] %v615_v2  ;;  %v621_v5 = vld [vmem:[%s8751_s11 + $0xc48] sm:$0xff]  ;;  %618 = vst [vmem:[%s8756_s12 + $0x618] sm:$0xff] %v617_v3  ;;  %v623_v6 = vld [vmem:[%s8751_s11 + $0xc50] sm:$0xff] }
  0x77   : > { %620 = vst [vmem:[%s8756_s12 + $0x620] sm:$0xff] %v619_v4  ;;  %622 = vst [vmem:[%s8756_s12 + $0x628] sm:$0xff] %v621_v5  ;;  %v625_v7 = vld [vmem:[%s8751_s11 + $0xc58] sm:$0xff]  ;;  %v627_v8 = vld [vmem:[%s8751_s11 + $0xc80] sm:$0xff] }
  0x78   : > { %624 = vst [vmem:[%s8756_s12 + $0x630] sm:$0xff] %v623_v6  ;;  %626 = vst [vmem:[%s8756_s12 + $0x638] sm:$0xff] %v625_v7  ;;  %v629_v9 = vld [vmem:[%s8751_s11 + $0xc88] sm:$0xff]  ;;  %v631_v10 = vld [vmem:[%s8751_s11 + $0xc90] sm:$0xff] }
  0x79   : > { %628 = vst [vmem:[%s8756_s12 + $0x640] sm:$0xff] %v627_v8  ;;  %v633_v11 = vld [vmem:[%s8751_s11 + $0xc98] sm:$0xff]  ;;  %630 = vst [vmem:[%s8756_s12 + $0x648] sm:$0xff] %v629_v9  ;;  %v635_v12 = vld [vmem:[%s8751_s11 + $0xcc0] sm:$0xff] }
  0x7a   : > { %632 = vst [vmem:[%s8756_s12 + $0x650] sm:$0xff] %v631_v10  ;;  %634 = vst [vmem:[%s8756_s12 + $0x658] sm:$0xff] %v633_v11  ;;  %v637_v13 = vld [vmem:[%s8751_s11 + $0xcc8] sm:$0xff]  ;;  %v639_v14 = vld [vmem:[%s8751_s11 + $0xcd0] sm:$0xff] }
  0x7b   : > { %636 = vst [vmem:[%s8756_s12 + $0x660] sm:$0xff] %v635_v12  ;;  %638 = vst [vmem:[%s8756_s12 + $0x668] sm:$0xff] %v637_v13  ;;  %v641_v15 = vld [vmem:[%s8751_s11 + $0xcd8] sm:$0xff]  ;;  %v643_v16 = vld [vmem:[%s8751_s11 + $0xd00] sm:$0xff] }
  0x7c   : > { %640 = vst [vmem:[%s8756_s12 + $0x670] sm:$0xff] %v639_v14  ;;  %v645_v17 = vld [vmem:[%s8751_s11 + $0xd08] sm:$0xff]  ;;  %642 = vst [vmem:[%s8756_s12 + $0x678] sm:$0xff] %v641_v15  ;;  %v647_v18 = vld [vmem:[%s8751_s11 + $0xd10] sm:$0xff] }
  0x7d   : > { %644 = vst [vmem:[%s8756_s12 + $0x680] sm:$0xff] %v643_v16  ;;  %646 = vst [vmem:[%s8756_s12 + $0x688] sm:$0xff] %v645_v17  ;;  %v649_v19 = vld [vmem:[%s8751_s11 + $0xd18] sm:$0xff]  ;;  %v651_v20 = vld [vmem:[%s8751_s11 + $0xd40] sm:$0xff] }
  0x7e   : > { %648 = vst [vmem:[%s8756_s12 + $0x690] sm:$0xff] %v647_v18  ;;  %650 = vst [vmem:[%s8756_s12 + $0x698] sm:$0xff] %v649_v19  ;;  %v653_v21 = vld [vmem:[%s8751_s11 + $0xd48] sm:$0xff]  ;;  %v655_v22 = vld [vmem:[%s8751_s11 + $0xd50] sm:$0xff] }
  0x7f   : > { %652 = vst [vmem:[%s8756_s12 + $0x6a0] sm:$0xff] %v651_v20  ;;  %v657_v23 = vld [vmem:[%s8751_s11 + $0xd58] sm:$0xff]  ;;  %654 = vst [vmem:[%s8756_s12 + $0x6a8] sm:$0xff] %v653_v21  ;;  %v659_v24 = vld [vmem:[%s8751_s11 + $0xd80] sm:$0xff] }
  0x80   : > { %656 = vst [vmem:[%s8756_s12 + $0x6b0] sm:$0xff] %v655_v22  ;;  %658 = vst [vmem:[%s8756_s12 + $0x6b8] sm:$0xff] %v657_v23  ;;  %v661_v25 = vld [vmem:[%s8751_s11 + $0xd88] sm:$0xff]  ;;  %v663_v26 = vld [vmem:[%s8751_s11 + $0xd90] sm:$0xff] }
  0x81   : > { %660 = vst [vmem:[%s8756_s12 + $0x6c0] sm:$0xff] %v659_v24  ;;  %662 = vst [vmem:[%s8756_s12 + $0x6c8] sm:$0xff] %v661_v25  ;;  %v665_v27 = vld [vmem:[%s8751_s11 + $0xd98] sm:$0xff]  ;;  %v667_v28 = vld [vmem:[%s8751_s11 + $0xdc0] sm:$0xff] }
  0x82   : > { %664 = vst [vmem:[%s8756_s12 + $0x6d0] sm:$0xff] %v663_v26  ;;  %v669_v29 = vld [vmem:[%s8751_s11 + $0xdc8] sm:$0xff]  ;;  %666 = vst [vmem:[%s8756_s12 + $0x6d8] sm:$0xff] %v665_v27  ;;  %v671_v30 = vld [vmem:[%s8751_s11 + $0xdd0] sm:$0xff] }
  0x83   : > { %668 = vst [vmem:[%s8756_s12 + $0x6e0] sm:$0xff] %v667_v28  ;;  %670 = vst [vmem:[%s8756_s12 + $0x6e8] sm:$0xff] %v669_v29  ;;  %v673_v31 = vld [vmem:[%s8751_s11 + $0xdd8] sm:$0xff]  ;;  %v675_v32 = vld [vmem:[%s8751_s11 + $0xe00] sm:$0xff] }
  0x84   : > { %672 = vst [vmem:[%s8756_s12 + $0x6f0] sm:$0xff] %v671_v30  ;;  %674 = vst [vmem:[%s8756_s12 + $0x6f8] sm:$0xff] %v673_v31  ;;  %v677_v33 = vld [vmem:[%s8751_s11 + $0xe08] sm:$0xff]  ;;  %v679_v34 = vld [vmem:[%s8751_s11 + $0xe10] sm:$0xff] }
  0x85   : > { %676 = vst [vmem:[%s8756_s12 + $0x700] sm:$0xff] %v675_v32  ;;  %v681_v35 = vld [vmem:[%s8751_s11 + $0xe18] sm:$0xff]  ;;  %678 = vst [vmem:[%s8756_s12 + $0x708] sm:$0xff] %v677_v33  ;;  %v683_v36 = vld [vmem:[%s8751_s11 + $0xe40] sm:$0xff] }
  0x86   : > { %680 = vst [vmem:[%s8756_s12 + $0x710] sm:$0xff] %v679_v34  ;;  %682 = vst [vmem:[%s8756_s12 + $0x718] sm:$0xff] %v681_v35  ;;  %v685_v37 = vld [vmem:[%s8751_s11 + $0xe48] sm:$0xff]  ;;  %v687_v38 = vld [vmem:[%s8751_s11 + $0xe50] sm:$0xff] }
  0x87   : > { %684 = vst [vmem:[%s8756_s12 + $0x720] sm:$0xff] %v683_v36  ;;  %686 = vst [vmem:[%s8756_s12 + $0x728] sm:$0xff] %v685_v37  ;;  %v689_v39 = vld [vmem:[%s8751_s11 + $0xe58] sm:$0xff]  ;;  %v691_v40 = vld [vmem:[%s8751_s11 + $0xe80] sm:$0xff] }
  0x88   : > { %688 = vst [vmem:[%s8756_s12 + $0x730] sm:$0xff] %v687_v38  ;;  %v693_v41 = vld [vmem:[%s8751_s11 + $0xe88] sm:$0xff]  ;;  %690 = vst [vmem:[%s8756_s12 + $0x738] sm:$0xff] %v689_v39  ;;  %v695_v42 = vld [vmem:[%s8751_s11 + $0xe90] sm:$0xff] }
  0x89   : > { %692 = vst [vmem:[%s8756_s12 + $0x740] sm:$0xff] %v691_v40  ;;  %694 = vst [vmem:[%s8756_s12 + $0x748] sm:$0xff] %v693_v41  ;;  %v697_v43 = vld [vmem:[%s8751_s11 + $0xe98] sm:$0xff]  ;;  %v699_v44 = vld [vmem:[%s8751_s11 + $0xec0] sm:$0xff] }
  0x8a   : > { %696 = vst [vmem:[%s8756_s12 + $0x750] sm:$0xff] %v695_v42  ;;  %698 = vst [vmem:[%s8756_s12 + $0x758] sm:$0xff] %v697_v43  ;;  %v701_v45 = vld [vmem:[%s8751_s11 + $0xec8] sm:$0xff]  ;;  %v703_v46 = vld [vmem:[%s8751_s11 + $0xed0] sm:$0xff] }
  0x8b   : > { %700 = vst [vmem:[%s8756_s12 + $0x760] sm:$0xff] %v699_v44  ;;  %v705_v47 = vld [vmem:[%s8751_s11 + $0xed8] sm:$0xff]  ;;  %702 = vst [vmem:[%s8756_s12 + $0x768] sm:$0xff] %v701_v45  ;;  %v707_v48 = vld [vmem:[%s8751_s11 + $0xf00] sm:$0xff] }
  0x8c   : > { %704 = vst [vmem:[%s8756_s12 + $0x770] sm:$0xff] %v703_v46  ;;  %706 = vst [vmem:[%s8756_s12 + $0x778] sm:$0xff] %v705_v47  ;;  %v709_v49 = vld [vmem:[%s8751_s11 + $0xf08] sm:$0xff]  ;;  %v711_v50 = vld [vmem:[%s8751_s11 + $0xf10] sm:$0xff] }
  0x8d   : > { %708 = vst [vmem:[%s8756_s12 + $0x780] sm:$0xff] %v707_v48  ;;  %710 = vst [vmem:[%s8756_s12 + $0x788] sm:$0xff] %v709_v49  ;;  %v713_v51 = vld [vmem:[%s8751_s11 + $0xf18] sm:$0xff]  ;;  %v715_v52 = vld [vmem:[%s8751_s11 + $0xf40] sm:$0xff] }
  0x8e   : > { %712 = vst [vmem:[%s8756_s12 + $0x790] sm:$0xff] %v711_v50  ;;  %v717_v53 = vld [vmem:[%s8751_s11 + $0xf48] sm:$0xff]  ;;  %714 = vst [vmem:[%s8756_s12 + $0x798] sm:$0xff] %v713_v51  ;;  %v719_v54 = vld [vmem:[%s8751_s11 + $0xf50] sm:$0xff] }
  0x8f   : > { %716 = vst [vmem:[%s8756_s12 + $0x7a0] sm:$0xff] %v715_v52  ;;  %718 = vst [vmem:[%s8756_s12 + $0x7a8] sm:$0xff] %v717_v53  ;;  %v721_v55 = vld [vmem:[%s8751_s11 + $0xf58] sm:$0xff]  ;;  %v723_v56 = vld [vmem:[%s8751_s11 + $0xf80] sm:$0xff] }
  0x90   : > { %720 = vst [vmem:[%s8756_s12 + $0x7b0] sm:$0xff] %v719_v54  ;;  %722 = vst [vmem:[%s8756_s12 + $0x7b8] sm:$0xff] %v721_v55  ;;  %v725_v57 = vld [vmem:[%s8751_s11 + $0xf88] sm:$0xff]  ;;  %v727_v58 = vld [vmem:[%s8751_s11 + $0xf90] sm:$0xff] }
  0x91   : > { %724 = vst [vmem:[%s8756_s12 + $0x7c0] sm:$0xff] %v723_v56  ;;  %v729_v59 = vld [vmem:[%s8751_s11 + $0xf98] sm:$0xff]  ;;  %726 = vst [vmem:[%s8756_s12 + $0x7c8] sm:$0xff] %v725_v57  ;;  %v731_v60 = vld [vmem:[%s8751_s11 + $0xfc0] sm:$0xff] }
  0x92   : > { %728 = vst [vmem:[%s8756_s12 + $0x7d0] sm:$0xff] %v727_v58  ;;  %730 = vst [vmem:[%s8756_s12 + $0x7d8] sm:$0xff] %v729_v59  ;;  %v733_v61 = vld [vmem:[%s8751_s11 + $0xfc8] sm:$0xff]  ;;  %v735_v62 = vld [vmem:[%s8751_s11 + $0xfd0] sm:$0xff] }
  0x93   : > { %732 = vst [vmem:[%s8756_s12 + $0x7e0] sm:$0xff] %v731_v60  ;;  %734 = vst [vmem:[%s8756_s12 + $0x7e8] sm:$0xff] %v733_v61  ;;  %v737_v63 = vld [vmem:[%s8751_s11 + $0xfd8] sm:$0xff] }
  0x94   : > { %736 = vst [vmem:[%s8756_s12 + $0x7f0] sm:$0xff] %v735_v62  ;;  %738 = vst [vmem:[%s8756_s12 + $0x7f8] sm:$0xff] %v737_v63 }
  0x95 PF: > { %p7226_p7 = scmp.ge.s32.totalorder %s8673_s23, 1  ;;  %p751_p8 = scmp.lt.s32.totalorder %s8673_s23, 3 }
  0x97   : > { %p752_p9 = pnand %p7226_p7, %p751_p8 }
  0x99   : > { %755 = sbr.rel (%p752_p9) target bundleno = 1450 (0x5aa), region = 63 }
  0xa0   : > { %s758_s13 = sand.u32 1, %s8665_s21   ;;  %s7228_s14 = sshll.u32 %s8726_s24, 3 }
  0xa1   : > { %s7227_s15 = sshll.u32 %s758_s13, 11  ;;  %s8052_s16 = smul.u32 1600, %s758_s13 }
  0xa2   : > { %p792_p10 = scmp.lt.s32.totalorder %s7228_s14, 15  ;;  %s9276_s20 = scalar_lea.vmem [#allocation3], %s7227_s15 }
  0xa3   : > { %s9278_s26 = scalar_lea.vmem [#allocation4], %s8052_s16  ;;  %p7229_p11 = scmp.ne.s32.totalorder %s8726_s24, 0 }
  0xa4   : > { %s13788_s14 = smov (!%p792_p10, %s7228_s14), 15 }
  0xa5   : > { %s9274_s19 = scalar_lea.vmem %s13438_s5, %s13788_s14  ;;  %800 = sbr.rel (%p7229_p11) target bundleno = 608 (0x260), region = 71 }
  0xac   : > { %v805_v0 = vld [vmem:[%s13433_s0 + $0x20] sm:$0xff]  ;;  %v806_v1 = vld [vmem:[%s13433_s0 + $0x28] sm:$0xff]  ;;  %v807_v2 = vld [vmem:[%s13433_s0 + $0x30] sm:$0xff]  ;;  %vm1221_vm0 = vcmask 1043456  }
  0xad   : > { %v808_v3 = vld [vmem:[%s13433_s0 + $0x38] sm:$0xff]  ;;  %v905_v4 = vld [vmem:[%s13434_s1 + $0x20] sm:$0xff]  ;;  %v906_v5 = vld [vmem:[%s13434_s1 + $0x28] sm:$0xff] }
  0xae   : > { %v907_v6 = vld [vmem:[%s13434_s1 + $0x30] sm:$0xff]  ;;  %v908_v7 = vld [vmem:[%s13434_s1 + $0x38] sm:$0xff]  ;;  %v9305_v8 = vadd.f32 %v905_v4, %v805_v0  ;;  %v9307_v9 = vadd.f32 %v906_v5, %v806_v1  ;;  %v801_v10 = vld [vmem:[%s13433_s0] sm:$0xff] }
  0xaf   : > { %v9312_v11 = vadd.f32 %v907_v6, %v807_v2  ;;  %v802_v12 = vld [vmem:[%s13433_s0 + $0x8] sm:$0xff]  ;;  %v803_v13 = vld [vmem:[%s13433_s0 + $0x10] sm:$0xff]  ;;  %v804_v14 = vld [vmem:[%s13433_s0 + $0x18] sm:$0xff]  ;;  %v9323_v15 = vadd.f32 %v908_v7, %v808_v3 }
  0xb0   : > { %v1106_v16 = vadd.f32 %v9307_v9, %v9305_v8  ;;  %v901_v17 = vld [vmem:[%s13434_s1] sm:$0xff]  ;;  %v902_v18 = vld [vmem:[%s13434_s1 + $0x8] sm:$0xff]  ;;  %v903_v19 = vld [vmem:[%s13434_s1 + $0x10] sm:$0xff] }
  0xb1   : > { %v904_v20 = vld [vmem:[%s13434_s1 + $0x18] sm:$0xff]  ;;  %v9339_v21 = vadd.f32 %v901_v17, %v801_v10  ;;  %v9341_v22 = vadd.f32 %v902_v18, %v802_v12  ;;  %v9343_v23 = vadd.f32 %v903_v19, %v803_v13  ;;  %v809_v24 = vld [vmem:[%s13433_s0 + $0x40] sm:$0xff]  ;;  %v810_v25 = vld [vmem:[%s13433_s0 + $0x48] sm:$0xff] }
  0xb2   : > { %v1107_v26 = vadd.f32 %v1106_v16, %v9312_v11  ;;  %v811_v27 = vld [vmem:[%s13433_s0 + $0x50] sm:$0xff]  ;;  %v812_v28 = vld [vmem:[%s13433_s0 + $0x58] sm:$0xff]  ;;  %v909_v29 = vld [vmem:[%s13434_s1 + $0x40] sm:$0xff]  ;;  %v9361_v30 = vadd.f32 %v904_v20, %v804_v14 }
  0xb3   : > { %v1101_v31 = vadd.f32 %v9341_v22, %v9339_v21  ;;  %v910_v32 = vld [vmem:[%s13434_s1 + $0x48] sm:$0xff]  ;;  %v911_v33 = vld [vmem:[%s13434_s1 + $0x50] sm:$0xff]  ;;  %v912_v34 = vld [vmem:[%s13434_s1 + $0x58] sm:$0xff]  ;;  %v9374_v35 = vadd.f32 %v909_v29, %v809_v24 }
  0xb4   : > { %v1108_v36 = vadd.f32 %v1107_v26, %v9323_v15  ;;  %v9377_v37 = vadd.f32 %v910_v32, %v810_v25  ;;  %v9379_v38 = vadd.f32 %v911_v33, %v811_v27  ;;  %v813_v39 = vld [vmem:[%s13433_s0 + $0x60] sm:$0xff]  ;;  %v814_v40 = vld [vmem:[%s13433_s0 + $0x68] sm:$0xff]  ;;  %v815_v41 = vld [vmem:[%s13433_s0 + $0x70] sm:$0xff]  ;;  %v9400_v46 = vadd.f32 %v912_v34, %v812_v28 }
  0xb5   : > { %v1102_v42 = vadd.f32 %v1101_v31, %v9343_v23  ;;  %v816_v43 = vld [vmem:[%s13433_s0 + $0x78] sm:$0xff]  ;;  %v913_v44 = vld [vmem:[%s13434_s1 + $0x60] sm:$0xff]  ;;  %v914_v45 = vld [vmem:[%s13434_s1 + $0x68] sm:$0xff] }
  0xb6   : > { %1109 = vadd.xlane.f32.xlu1 %v1108_v36  ;;  %v1111_v47 = vadd.f32 %v9377_v37, %v9374_v35  ;;  %v915_v48 = vld [vmem:[%s13434_s1 + $0x70] sm:$0xff]  ;;  %v916_v49 = vld [vmem:[%s13434_s1 + $0x78] sm:$0xff]  ;;  %v9410_v50 = vadd.f32 %v913_v44, %v813_v39  ;;  %v9412_v51 = vadd.f32 %v914_v45, %v814_v40  ;;  %v817_v52 = vld [vmem:[%s13433_s0 + $0x80] sm:$0xff] }
  0xb7   : > { %v1103_v53 = vadd.f32 %v1102_v42, %v9361_v30  ;;  %v9418_v54 = vadd.f32 %v915_v48, %v815_v41  ;;  %v818_v55 = vld [vmem:[%s13433_s0 + $0x88] sm:$0xff]  ;;  %v819_v56 = vld [vmem:[%s13433_s0 + $0x90] sm:$0xff]  ;;  %v820_v57 = vld [vmem:[%s13433_s0 + $0x98] sm:$0xff]  ;;  %v9430_v59 = vadd.f32 %v916_v49, %v816_v43 }
  0xb8   : > { %v1112_v58 = vadd.f32 %v1111_v47, %v9379_v38  ;;  %v1116_v60 = vadd.f32 %v9412_v51, %v9410_v50  ;;  %v917_v61 = vld [vmem:[%s13434_s1 + $0x80] sm:$0xff]  ;;  %v918_v62 = vld [vmem:[%s13434_s1 + $0x88] sm:$0xff]  ;;  %v919_v63 = vld [vmem:[%s13434_s1 + $0x90] sm:$0xff] }
  0xb9   : > { %1104 = vadd.xlane.f32.xlu0 %v1103_v53  ;;  %v920_v0 = vld [vmem:[%s13434_s1 + $0x98] sm:$0xff]  ;;  %v9446_v1 = vadd.f32 %v917_v61, %v817_v52  ;;  %v9448_v2 = vadd.f32 %v918_v62, %v818_v55  ;;  %v9450_v3 = vadd.f32 %v919_v63, %v819_v56  ;;  %v897_v4 = vld [vmem:[%s13433_s0 + $0x300] sm:$0xf]  ;;  %v898_v5 = vld [vmem:[%s13433_s0 + $0x308] sm:$0xf] }
  0xba   : > { %v1113_v6 = vadd.f32 %v1112_v58, %v9400_v46  ;;  %v1117_v7 = vadd.f32 %v1116_v60, %v9418_v54  ;;  %v899_v10 = vld [vmem:[%s13433_s0 + $0x310] sm:$0xf]  ;;  %v900_v12 = vld [vmem:[%s13433_s0 + $0x318] sm:$0xf]  ;;  %v997_v13 = vld [vmem:[%s13434_s1 + $0x300] sm:$0xf]  ;;  %v9469_v14 = vadd.f32 %v920_v0, %v820_v57 }
  0xbb   : > { %v1121_v16 = vadd.f32 %v9448_v2, %v9446_v1  ;;  %v998_v17 = vld [vmem:[%s13434_s1 + $0x308] sm:$0xf]  ;;  %v999_v18 = vld [vmem:[%s13434_s1 + $0x310] sm:$0xf]  ;;  %v1000_v19 = vld [vmem:[%s13434_s1 + $0x318] sm:$0xf]  ;;  %v9482_v20 = vadd.f32 %v997_v13, %v897_v4 }
  0xbc   : > { %1114 = vadd.xlane.f32.xlu1 %v1113_v6  ;;  %v1118_v24 = vadd.f32 %v1117_v7, %v9430_v59  ;;  %v9485_v25 = vadd.f32 %v998_v17, %v898_v5  ;;  %v9487_v26 = vadd.f32 %v999_v18, %v899_v10  ;;  %v9489_v27 = vadd.f32 %v1000_v19, %v900_v12  ;;  %v825_v28 = vld [vmem:[%s13433_s0 + $0xc0] sm:$0xff]  ;;  %v826_v29 = vld [vmem:[%s13433_s0 + $0xc8] sm:$0xff]  ;;  %v827_v31 = vld [vmem:[%s13433_s0 + $0xd0] sm:$0xff] }
  0xbd   : > { %v1122_v32 = vadd.f32 %v1121_v16, %v9450_v3  ;;  %v1222_v33 = vsel %vm1221_vm0, %v9482_v20, 0.0  ;;  %v828_v34 = vld [vmem:[%s13433_s0 + $0xd8] sm:$0xff]  ;;  %v925_v36 = vld [vmem:[%s13434_s1 + $0xc0] sm:$0xff]  ;;  %v926_v39 = vld [vmem:[%s13434_s1 + $0xc8] sm:$0xff] }
  0xbe   : > { %13556 = vst [vmem:[#allocation5_spill] sm:$0xff] %v9489_v27  ;;  %1119 = vadd.xlane.f32.xlu0 %v1118_v24  ;;  %v1223_v40 = vsel %vm1221_vm0, %v9485_v25, 0.0  ;;  %v1225_v41 = vsel %vm1221_vm0, %v9487_v26, 0.0  ;;  %v927_v42 = vld [vmem:[%s13434_s1 + $0xd0] sm:$0xff]  ;;  %v928_v43 = vld [vmem:[%s13434_s1 + $0xd8] sm:$0xff]  ;;  %v9522_v44 = vadd.f32 %v925_v36, %v825_v28  ;;  %v821_v45 = vld [vmem:[%s13433_s0 + $0xa0] sm:$0xff]  ;;  %v9528_v49 = vadd.f32 %v926_v39, %v826_v29 }
  0xbf   : > { %v1123_v47 = vadd.f32 %v1122_v32, %v9469_v14  ;;  %v1224_v48 = vadd.f32 %v1223_v40, %v1222_v33  ;;  %v9530_v52 = vadd.f32 %v927_v42, %v827_v31  ;;  %v822_v53 = vld [vmem:[%s13433_s0 + $0xa8] sm:$0xff]  ;;  %v823_v55 = vld [vmem:[%s13433_s0 + $0xb0] sm:$0xff]  ;;  %v824_v56 = vld [vmem:[%s13433_s0 + $0xb8] sm:$0xff]  ;;  %v1227_v57 = vsel %vm1221_vm0, %v9489_v27, 0.0 }
  0xc0   : > { %v9543_v58 = vadd.f32 %v928_v43, %v828_v34  ;;  %v921_v60 = vld [vmem:[%s13434_s1 + $0xa0] sm:$0xff]  ;;  %v922_v61 = vld [vmem:[%s13434_s1 + $0xa8] sm:$0xff]  ;;  %v923_v62 = vld [vmem:[%s13434_s1 + $0xb0] sm:$0xff]  ;;  %v1131_v0 = vadd.f32 %v9528_v49, %v9522_v44 }
  0xc1   : > { %1124 = vadd.xlane.f32.xlu1 %v1123_v47  ;;  %v1226_v63 = vadd.f32 %v1225_v41, %v1224_v48  ;;  %v924_v4 = vld [vmem:[%s13434_s1 + $0xb8] sm:$0xff]  ;;  %v9559_v5 = vadd.f32 %v921_v60, %v821_v45  ;;  %v9561_v6 = vadd.f32 %v922_v61, %v822_v53  ;;  %v833_v7 = vld [vmem:[%s13433_s0 + $0x100] sm:$0xff]  ;;  %v834_v10 = vld [vmem:[%s13433_s0 + $0x108] sm:$0xff]  ;;  %v9569_v12 = vadd.f32 %v923_v62, %v823_v55 }
  0xc2   : > { %v9571_v13 = vadd.f32 %v924_v4, %v824_v56  ;;  %v835_v16 = vld [vmem:[%s13433_s0 + $0x110] sm:$0xff]  ;;  %v836_v17 = vld [vmem:[%s13433_s0 + $0x118] sm:$0xff]  ;;  %v933_v18 = vld [vmem:[%s13434_s1 + $0x100] sm:$0xff]  ;;  %v1132_v24 = vadd.f32 %v1131_v0, %v9530_v52 }
  0xc3   : > { %v1228_v19 = vadd.f32 %v1227_v57, %v1226_v63  ;;  %v1126_v28 = vadd.f32 %v9561_v6, %v9559_v5  ;;  %v934_v29 = vld [vmem:[%s13434_s1 + $0x108] sm:$0xff]  ;;  %v935_v31 = vld [vmem:[%s13434_s1 + $0x110] sm:$0xff]  ;;  %v936_v32 = vld [vmem:[%s13434_s1 + $0x118] sm:$0xff]  ;;  %v9594_v33 = vadd.f32 %v933_v18, %v833_v7 }
  0xc4   : > { %v9596_v34 = vadd.f32 %v934_v29, %v834_v10  ;;  %v9598_v36 = vadd.f32 %v935_v31, %v835_v16  ;;  %v829_v39 = vld [vmem:[%s13433_s0 + $0xe0] sm:$0xff]  ;;  %v830_v40 = vld [vmem:[%s13433_s0 + $0xe8] sm:$0xff]  ;;  %v831_v41 = vld [vmem:[%s13433_s0 + $0xf0] sm:$0xff]  ;;  %v1133_v42 = vadd.f32 %v1132_v24, %v9543_v58  ;;  %v9620_v53 = vadd.f32 %v936_v32, %v836_v17 }
  0xc5   : > { %1229 = vadd.xlane.f32.xlu0 %v1228_v19  ;;  %v1127_v43 = vadd.f32 %v1126_v28, %v9569_v12  ;;  %v832_v45 = vld [vmem:[%s13433_s0 + $0xf8] sm:$0xff]  ;;  %v929_v47 = vld [vmem:[%s13434_s1 + $0xe0] sm:$0xff]  ;;  %v930_v48 = vld [vmem:[%s13434_s1 + $0xe8] sm:$0xff] }
  0xc6   : > { %v1141_v55 = vadd.f32 %v9596_v34, %v9594_v33  ;;  %v931_v56 = vld [vmem:[%s13434_s1 + $0xf0] sm:$0xff]  ;;  %v932_v57 = vld [vmem:[%s13434_s1 + $0xf8] sm:$0xff]  ;;  %v9630_v60 = vadd.f32 %v929_v47, %v829_v39  ;;  %v9632_v61 = vadd.f32 %v930_v48, %v830_v40  ;;  %v841_v62 = vld [vmem:[%s13433_s0 + $0x140] sm:$0xff]  ;;  %1134 = vadd.xlane.f32.xlu1 %v1133_v42 }
  0xc7   : > { %v1128_v63 = vadd.f32 %v1127_v43, %v9571_v13  ;;  %v9638_v0 = vadd.f32 %v931_v56, %v831_v41  ;;  %v842_v4 = vld [vmem:[%s13433_s0 + $0x148] sm:$0xff]  ;;  %v843_v7 = vld [vmem:[%s13433_s0 + $0x150] sm:$0xff]  ;;  %v844_v10 = vld [vmem:[%s13433_s0 + $0x158] sm:$0xff]  ;;  %v9650_v17 = vadd.f32 %v932_v57, %v832_v45 }
  0xc8   : > { %v1142_v16 = vadd.f32 %v1141_v55, %v9598_v36  ;;  %v1136_v18 = vadd.f32 %v9632_v61, %v9630_v60  ;;  %v941_v19 = vld [vmem:[%s13434_s1 + $0x140] sm:$0xff]  ;;  %v942_v24 = vld [vmem:[%s13434_s1 + $0x148] sm:$0xff]  ;;  %v943_v28 = vld [vmem:[%s13434_s1 + $0x150] sm:$0xff] }
  0xc9   : > { %1129 = vadd.xlane.f32.xlu0 %v1128_v63  ;;  %v944_v29 = vld [vmem:[%s13434_s1 + $0x158] sm:$0xff]  ;;  %v9666_v31 = vadd.f32 %v941_v19, %v841_v62  ;;  %v9668_v32 = vadd.f32 %v942_v24, %v842_v4  ;;  %v9670_v39 = vadd.f32 %v943_v28, %v843_v7  ;;  %v837_v40 = vld [vmem:[%s13433_s0 + $0x120] sm:$0xff]  ;;  %v838_v41 = vld [vmem:[%s13433_s0 + $0x128] sm:$0xff] }
  0xca   : > { %v1143_v42 = vadd.f32 %v1142_v16, %v9620_v53  ;;  %v1137_v43 = vadd.f32 %v1136_v18, %v9638_v0  ;;  %v839_v45 = vld [vmem:[%s13433_s0 + $0x130] sm:$0xff]  ;;  %v840_v47 = vld [vmem:[%s13433_s0 + $0x138] sm:$0xff]  ;;  %v937_v48 = vld [vmem:[%s13434_s1 + $0x120] sm:$0xff]  ;;  %v9689_v55 = vadd.f32 %v944_v29, %v844_v10 }
  0xcb   : > { %v1151_v56 = vadd.f32 %v9668_v32, %v9666_v31  ;;  %v938_v57 = vld [vmem:[%s13434_s1 + $0x128] sm:$0xff]  ;;  %v939_v62 = vld [vmem:[%s13434_s1 + $0x130] sm:$0xff]  ;;  %v940_v63 = vld [vmem:[%s13434_s1 + $0x138] sm:$0xff]  ;;  %v9702_v4 = vadd.f32 %v937_v48, %v837_v40 }
  0xcc   : > { %13557 = vst [vmem:[#allocation6_spill] sm:$0xff] %v9689_v55  ;;  %1144 = vadd.xlane.f32.xlu1 %v1143_v42  ;;  %v1138_v7 = vadd.f32 %v1137_v43, %v9650_v17  ;;  %v9705_v10 = vadd.f32 %v938_v57, %v838_v41  ;;  %v9707_v16 = vadd.f32 %v939_v62, %v839_v45  ;;  %v849_v18 = vld [vmem:[%s13433_s0 + $0x180] sm:$0xff]  ;;  %v850_v19 = vld [vmem:[%s13433_s0 + $0x188] sm:$0xff]  ;;  %v851_v24 = vld [vmem:[%s13433_s0 + $0x190] sm:$0xff] }
  0xcd   : > { %13558 = vst [vmem:[#allocation7_spill] sm:$0xff] %v9702_v4  ;;  %v1152_v28 = vadd.f32 %v1151_v56, %v9670_v39  ;;  %v852_v29 = vld [vmem:[%s13433_s0 + $0x198] sm:$0xff]  ;;  %v949_v40 = vld [vmem:[%s13434_s1 + $0x180] sm:$0xff]  ;;  %v950_v41 = vld [vmem:[%s13434_s1 + $0x188] sm:$0xff]  ;;  %v9728_v42 = vadd.f32 %v940_v63, %v840_v47 }
  0xce   : > { %13559 = vst [vmem:[#allocation8_spill] sm:$0xff] %v9705_v10  ;;  %13560 = vst [vmem:[#allocation9_spill] sm:$0xff] %v9707_v16  ;;  %1139 = vadd.xlane.f32.xlu0 %v1138_v7  ;;  %v1146_v43 = vadd.f32 %v9705_v10, %v9702_v4  ;;  %v951_v45 = vld [vmem:[%s13434_s1 + $0x190] sm:$0xff]  ;;  %v952_v48 = vld [vmem:[%s13434_s1 + $0x198] sm:$0xff]  ;;  %v9738_v56 = vadd.f32 %v949_v40, %v849_v18  ;;  %v9740_v57 = vadd.f32 %v950_v41, %v850_v19 }
  0xcf   : > { %13561 = vst [vmem:[#allocation10_spill] sm:$0xff] %v9728_v42  ;;  %v845_v47 = vld [vmem:[%s13433_s0 + $0x160] sm:$0xff]  ;;  %v1153_v62 = vadd.f32 %v1152_v28, %v9689_v55  ;;  %v9746_v63 = vadd.f32 %v951_v45, %v851_v24  ;;  %v846_v7 = vld [vmem:[%s13433_s0 + $0x168] sm:$0xff]  ;;  %v847_v27 = vld [vmem:[%s13433_s0 + $0x170] sm:$0xff]  ;;  %v9758_v40 = vadd.f32 %v952_v48, %v852_v29 }
  0xd0   : > { %13562 = vst [vmem:[#allocation11_spill] sm:$0xff] %v9738_v56  ;;  %13563 = vst [vmem:[#allocation12_spill] sm:$0xff] %v9740_v57  ;;  %v848_v18 = vld [vmem:[%s13433_s0 + $0x178] sm:$0xff]  ;;  %v1147_v19 = vadd.f32 %v1146_v43, %v9707_v16  ;;  %v1161_v24 = vadd.f32 %v9740_v57, %v9738_v56  ;;  %v945_v28 = vld [vmem:[%s13434_s1 + $0x160] sm:$0xff] }
  0xd1   : > { %13564 = vst [vmem:[#allocation13_spill] sm:$0xff] %v9746_v63  ;;  %13565 = vst [vmem:[#allocation14_spill] sm:$0xff] %v9758_v40  ;;  %v946_v41 = vld [vmem:[%s13434_s1 + $0x168] sm:$0xff]  ;;  %v947_v45 = vld [vmem:[%s13434_s1 + $0x170] sm:$0xff]  ;;  %1154 = vadd.xlane.f32.xlu1 %v1153_v62  ;;  %v9774_v43 = vadd.f32 %v945_v28, %v845_v47 }
  0xd2   : > { %v948_v29 = vld [vmem:[%s13434_s1 + $0x178] sm:$0xff]  ;;  %v9776_v48 = vadd.f32 %v946_v41, %v846_v7  ;;  %v9778_v16 = vadd.f32 %v947_v45, %v847_v27  ;;  %v857_v57 = vld [vmem:[%s13433_s0 + $0x1c0] sm:$0xff]  ;;  %v858_v56 = vld [vmem:[%s13433_s0 + $0x1c8] sm:$0xff]  ;;  %v1148_v62 = vadd.f32 %v1147_v19, %v9728_v42  ;;  %v1162_v55 = vadd.f32 %v1161_v24, %v9746_v63 }
  0xd3   : > { %13566 = vst [vmem:[#allocation15_spill] sm:$0xff] %v9774_v43  ;;  %v859_v47 = vld [vmem:[%s13433_s0 + $0x1d0] sm:$0xff]  ;;  %v860_v27 = vld [vmem:[%s13433_s0 + $0x1d8] sm:$0xff]  ;;  %v957_v7 = vld [vmem:[%s13434_s1 + $0x1c0] sm:$0xff]  ;;  %v9797_v28 = vadd.f32 %v948_v29, %v848_v18 }
  0xd4   : > { %13567 = vst [vmem:[#allocation16_spill] sm:$0xff] %v9776_v48  ;;  %13568 = vst [vmem:[#allocation17_spill] sm:$0xff] %v9778_v16  ;;  %v1156_v41 = vadd.f32 %v9776_v48, %v9774_v43  ;;  %v958_v19 = vld [vmem:[%s13434_s1 + $0x1c8] sm:$0xff]  ;;  %v959_v24 = vld [vmem:[%s13434_s1 + $0x1d0] sm:$0xff]  ;;  %v9810_v63 = vadd.f32 %v957_v7, %v857_v57  ;;  %1149 = vadd.xlane.f32.xlu0 %v1148_v62  ;;  %v1163_v18 = vadd.f32 %v1162_v55, %v9758_v40 }
  0xd5   : > { %13569 = vst [vmem:[#allocation18_spill] sm:$0xff] %v9797_v28  ;;  %v960_v45 = vld [vmem:[%s13434_s1 + $0x1d8] sm:$0xff]  ;;  %v9813_v29 = vadd.f32 %v958_v19, %v858_v56  ;;  %v9815_v48 = vadd.f32 %v959_v24, %v859_v47  ;;  %v853_v43 = vld [vmem:[%s13433_s0 + $0x1a0] sm:$0xff]  ;;  %v854_v42 = vld [vmem:[%s13433_s0 + $0x1a8] sm:$0xff] }
  0xd6   : > { %13570 = vst [vmem:[#allocation19_spill] sm:$0xff] %v9810_v63  ;;  %v855_v57 = vld [vmem:[%s13433_s0 + $0x1b0] sm:$0xff]  ;;  %v1157_v62 = vadd.f32 %v1156_v41, %v9778_v16  ;;  %v856_v55 = vld [vmem:[%s13433_s0 + $0x1b8] sm:$0xff]  ;;  %v953_v56 = vld [vmem:[%s13434_s1 + $0x1a0] sm:$0xff]  ;;  %1164 = vadd.xlane.f32.xlu1 %v1163_v18  ;;  %v9836_v7 = vadd.f32 %v960_v45, %v860_v27 }
  0xd7   : > { %13571 = vst [vmem:[#allocation20_spill] sm:$0xff] %v9813_v29  ;;  %13572 = vst [vmem:[#allocation21_spill] sm:$0xff] %v9815_v48  ;;  %v954_v47 = vld [vmem:[%s13434_s1 + $0x1a8] sm:$0xff]  ;;  %v1171_v19 = vadd.f32 %v9813_v29, %v9810_v63  ;;  %v955_v41 = vld [vmem:[%s13434_s1 + $0x1b0] sm:$0xff]  ;;  %v9846_v16 = vadd.f32 %v953_v56, %v853_v43 }
  0xd8   : > { %13573 = vst [vmem:[#allocation22_spill] sm:$0xff] %v9836_v7  ;;  %v956_v24 = vld [vmem:[%s13434_s1 + $0x1b8] sm:$0xff]  ;;  %v9848_v40 = vadd.f32 %v954_v47, %v854_v42  ;;  %v865_v27 = vld [vmem:[%s13433_s0 + $0x200] sm:$0xff]  ;;  %v1158_v45 = vadd.f32 %v1157_v62, %v9797_v28  ;;  %v9854_v18 = vadd.f32 %v955_v41, %v855_v57  ;;  %v866_v29 = vld [vmem:[%s13433_s0 + $0x208] sm:$0xff] }
  0xd9   : > { %13574 = vst [vmem:[#allocation23_spill] sm:$0xff] %v9846_v16  ;;  %v867_v63 = vld [vmem:[%s13433_s0 + $0x210] sm:$0xff]  ;;  %v868_v42 = vld [vmem:[%s13433_s0 + $0x218] sm:$0xff]  ;;  %v1172_v43 = vadd.f32 %v1171_v19, %v9815_v48  ;;  %v9866_v56 = vadd.f32 %v956_v24, %v856_v55  ;;  %v965_v62 = vld [vmem:[%s13434_s1 + $0x200] sm:$0xff] }
  0xda   : > { %13575 = vst [vmem:[#allocation24_spill] sm:$0xff] %v9848_v40  ;;  %13576 = vst [vmem:[#allocation25_spill] sm:$0xff] %v9854_v18  ;;  %v1166_v57 = vadd.f32 %v9848_v40, %v9846_v16  ;;  %v966_v47 = vld [vmem:[%s13434_s1 + $0x208] sm:$0xff]  ;;  %v967_v41 = vld [vmem:[%s13434_s1 + $0x210] sm:$0xff]  ;;  %1159 = vadd.xlane.f32.xlu0 %v1158_v45  ;;  %v9882_v19 = vadd.f32 %v965_v62, %v865_v27 }
  0xdb   : > { %13577 = vst [vmem:[#allocation26_spill] sm:$0xff] %v9866_v56  ;;  %v968_v55 = vld [vmem:[%s13434_s1 + $0x218] sm:$0xff]  ;;  %v9884_v24 = vadd.f32 %v966_v47, %v866_v29  ;;  %v9886_v48 = vadd.f32 %v967_v41, %v867_v63  ;;  %v861_v40 = vld [vmem:[%s13433_s0 + $0x1e0] sm:$0xff]  ;;  %v862_v16 = vld [vmem:[%s13433_s0 + $0x1e8] sm:$0xff]  ;;  %v1173_v45 = vadd.f32 %v1172_v43, %v9836_v7 }
  0xdc   : > { %13578 = vst [vmem:[#allocation27_spill] sm:$0xff] %v9882_v19  ;;  %v1167_v28 = vadd.f32 %v1166_v57, %v9854_v18  ;;  %v863_v27 = vld [vmem:[%s13433_s0 + $0x1f0] sm:$0xff]  ;;  %v864_v63 = vld [vmem:[%s13433_s0 + $0x1f8] sm:$0xff]  ;;  %v961_v29 = vld [vmem:[%s13434_s1 + $0x1e0] sm:$0xff]  ;;  %v9905_v62 = vadd.f32 %v968_v55, %v868_v42 }
  0xdd   : > { %13579 = vst [vmem:[#allocation28_spill] sm:$0xff] %v9884_v24  ;;  %13580 = vst [vmem:[#allocation29_spill] sm:$0xff] %v9886_v48  ;;  %v1181_v47 = vadd.f32 %v9884_v24, %v9882_v19  ;;  %v962_v43 = vld [vmem:[%s13434_s1 + $0x1e8] sm:$0xff]  ;;  %v963_v57 = vld [vmem:[%s13434_s1 + $0x1f0] sm:$0xff]  ;;  %v9918_v18 = vadd.f32 %v961_v29, %v861_v40  ;;  %1174 = vadd.xlane.f32.xlu1 %v1173_v45 }
  0xde   : > { %13581 = vst [vmem:[#allocation30_spill] sm:$0xff] %v9905_v62  ;;  %v964_v41 = vld [vmem:[%s13434_s1 + $0x1f8] sm:$0xff]  ;;  %v1168_v42 = vadd.f32 %v1167_v28, %v9866_v56  ;;  %v9921_v55 = vadd.f32 %v962_v43, %v862_v16  ;;  %v9923_v24 = vadd.f32 %v963_v57, %v863_v27  ;;  %v873_v19 = vld [vmem:[%s13433_s0 + $0x240] sm:$0xff]  ;;  %v874_v7 = vld [vmem:[%s13433_s0 + $0x248] sm:$0xff] }
  0xdf   : > { %13582 = vst [vmem:[#allocation31_spill] sm:$0xff] %v9918_v18  ;;  %v875_v40 = vld [vmem:[%s13433_s0 + $0x250] sm:$0xff]  ;;  %v1182_v45 = vadd.f32 %v1181_v47, %v9886_v48  ;;  %v876_v16 = vld [vmem:[%s13433_s0 + $0x258] sm:$0xff]  ;;  %v973_v28 = vld [vmem:[%s13434_s1 + $0x240] sm:$0xff]  ;;  %v9944_v29 = vadd.f32 %v964_v41, %v864_v63 }
  0xe0   : > { %13583 = vst [vmem:[#allocation32_spill] sm:$0xff] %v9921_v55  ;;  %13584 = vst [vmem:[#allocation33_spill] sm:$0xff] %v9923_v24  ;;  %v974_v27 = vld [vmem:[%s13434_s1 + $0x248] sm:$0xff]  ;;  %1169 = vadd.xlane.f32.xlu0 %v1168_v42  ;;  %v1176_v43 = vadd.f32 %v9921_v55, %v9918_v18  ;;  %v975_v47 = vld [vmem:[%s13434_s1 + $0x250] sm:$0xff]  ;;  %v9954_v48 = vadd.f32 %v973_v28, %v873_v19 }
  0xe1   : > { %13585 = vst [vmem:[#allocation34_spill] sm:$0xff] %v9944_v29  ;;  %v976_v57 = vld [vmem:[%s13434_s1 + $0x258] sm:$0xff]  ;;  %v9956_v56 = vadd.f32 %v974_v27, %v874_v7  ;;  %v869_v63 = vld [vmem:[%s13433_s0 + $0x220] sm:$0xff]  ;;  %v1183_v41 = vadd.f32 %v1182_v45, %v9905_v62  ;;  %v9962_v42 = vadd.f32 %v975_v47, %v875_v40  ;;  %v870_v55 = vld [vmem:[%s13433_s0 + $0x228] sm:$0xff] }
  0xe2   : > { %13586 = vst [vmem:[#allocation35_spill] sm:$0xff] %v9954_v48  ;;  %v871_v18 = vld [vmem:[%s13433_s0 + $0x230] sm:$0xff]  ;;  %v872_v7 = vld [vmem:[%s13433_s0 + $0x238] sm:$0xff]  ;;  %v1177_v19 = vadd.f32 %v1176_v43, %v9923_v24  ;;  %v9974_v28 = vadd.f32 %v976_v57, %v876_v16  ;;  %v969_v45 = vld [vmem:[%s13434_s1 + $0x220] sm:$0xff] }
  0xe3   : > { %13587 = vst [vmem:[#allocation36_spill] sm:$0xff] %v9956_v56  ;;  %13588 = vst [vmem:[#allocation37_spill] sm:$0xff] %v9962_v42  ;;  %v1191_v40 = vadd.f32 %v9956_v56, %v9954_v48  ;;  %v970_v27 = vld [vmem:[%s13434_s1 + $0x228] sm:$0xff]  ;;  %v971_v47 = vld [vmem:[%s13434_s1 + $0x230] sm:$0xff]  ;;  %1184 = vadd.xlane.f32.xlu1 %v1183_v41  ;;  %v9990_v43 = vadd.f32 %v969_v45, %v869_v63 }
  0xe4   : > { %13589 = vst [vmem:[#allocation38_spill] sm:$0xff] %v9974_v28  ;;  %v972_v16 = vld [vmem:[%s13434_s1 + $0x238] sm:$0xff]  ;;  %v9992_v57 = vadd.f32 %v970_v27, %v870_v55  ;;  %v9994_v56 = vadd.f32 %v971_v47, %v871_v18  ;;  %v881_v24 = vld [vmem:[%s13433_s0 + $0x280] sm:$0xff]  ;;  %v882_v62 = vld [vmem:[%s13433_s0 + $0x288] sm:$0xff]  ;;  %v1178_v41 = vadd.f32 %v1177_v19, %v9944_v29 }
  0xe5   : > { %13590 = vst [vmem:[#allocation39_spill] sm:$0xff] %v9990_v43  ;;  %v1192_v48 = vadd.f32 %v1191_v40, %v9962_v42  ;;  %v883_v63 = vld [vmem:[%s13433_s0 + $0x290] sm:$0xff]  ;;  %v884_v18 = vld [vmem:[%s13433_s0 + $0x298] sm:$0xff]  ;;  %v981_v55 = vld [vmem:[%s13434_s1 + $0x280] sm:$0xff]  ;;  %v10013_v45 = vadd.f32 %v972_v16, %v872_v7 }
  0xe6   : > { %13591 = vst [vmem:[#allocation40_spill] sm:$0xff] %v9992_v57  ;;  %13592 = vst [vmem:[#allocation41_spill] sm:$0xff] %v9994_v56  ;;  %v1186_v27 = vadd.f32 %v9992_v57, %v9990_v43  ;;  %v982_v19 = vld [vmem:[%s13434_s1 + $0x288] sm:$0xff]  ;;  %v983_v40 = vld [vmem:[%s13434_s1 + $0x290] sm:$0xff]  ;;  %v10026_v42 = vadd.f32 %v981_v55, %v881_v24  ;;  %1179 = vadd.xlane.f32.xlu0 %v1178_v41 }
  0xe7   : > { %13593 = vst [vmem:[#allocation42_spill] sm:$0xff] %v10013_v45  ;;  %v984_v47 = vld [vmem:[%s13434_s1 + $0x298] sm:$0xff]  ;;  %v1193_v7 = vadd.f32 %v1192_v48, %v9974_v28  ;;  %v10029_v16 = vadd.f32 %v982_v19, %v882_v62  ;;  %v10031_v57 = vadd.f32 %v983_v40, %v883_v63  ;;  %v877_v29 = vld [vmem:[%s13433_s0 + $0x260] sm:$0xff]  ;;  %v878_v43 = vld [vmem:[%s13433_s0 + $0x268] sm:$0xff] }
  0xe8   : > { %13594 = vst [vmem:[#allocation43_spill] sm:$0xff] %v10026_v42  ;;  %v879_v24 = vld [vmem:[%s13433_s0 + $0x270] sm:$0xff]  ;;  %v1187_v41 = vadd.f32 %v1186_v27, %v9994_v56  ;;  %v880_v48 = vld [vmem:[%s13433_s0 + $0x278] sm:$0xff]  ;;  %v977_v62 = vld [vmem:[%s13434_s1 + $0x260] sm:$0xff]  ;;  %v10052_v55 = vadd.f32 %v984_v47, %v884_v18 }
  0xe9   : > { %13595 = vst [vmem:[#allocation44_spill] sm:$0xff] %v10029_v16  ;;  %13596 = vst [vmem:[#allocation45_spill] sm:$0xff] %v10031_v57  ;;  %v978_v63 = vld [vmem:[%s13434_s1 + $0x268] sm:$0xff]  ;;  %1194 = vadd.xlane.f32.xlu1 %v1193_v7  ;;  %v1201_v19 = vadd.f32 %v10029_v16, %v10026_v42  ;;  %v979_v27 = vld [vmem:[%s13434_s1 + $0x270] sm:$0xff]  ;;  %v10062_v56 = vadd.f32 %v977_v62, %v877_v29 }
  0xea   : > { %13597 = vst [vmem:[#allocation46_spill] sm:$0xff] %v10052_v55  ;;  %v980_v40 = vld [vmem:[%s13434_s1 + $0x278] sm:$0xff]  ;;  %v10064_v28 = vadd.f32 %v978_v63, %v878_v43  ;;  %v889_v18 = vld [vmem:[%s13433_s0 + $0x2c0] sm:$0xff]  ;;  %v1188_v47 = vadd.f32 %v1187_v41, %v10013_v45  ;;  %v10070_v7 = vadd.f32 %v979_v27, %v879_v24  ;;  %v890_v16 = vld [vmem:[%s13433_s0 + $0x2c8] sm:$0xff] }
  0xeb   : > { %13598 = vst [vmem:[#allocation47_spill] sm:$0xff] %v10062_v56  ;;  %v891_v42 = vld [vmem:[%s13433_s0 + $0x2d0] sm:$0xff]  ;;  %v892_v29 = vld [vmem:[%s13433_s0 + $0x2d8] sm:$0xff]  ;;  %v1202_v43 = vadd.f32 %v1201_v19, %v10031_v57  ;;  %v10082_v62 = vadd.f32 %v980_v40, %v880_v48  ;;  %v989_v41 = vld [vmem:[%s13434_s1 + $0x2c0] sm:$0xff] }
  0xec   : > { %13599 = vst [vmem:[#allocation48_spill] sm:$0xff] %v10064_v28  ;;  %13600 = vst [vmem:[#allocation49_spill] sm:$0xff] %v10070_v7  ;;  %v1196_v24 = vadd.f32 %v10064_v28, %v10062_v56  ;;  %v990_v63 = vld [vmem:[%s13434_s1 + $0x2c8] sm:$0xff]  ;;  %v991_v27 = vld [vmem:[%s13434_s1 + $0x2d0] sm:$0xff]  ;;  %1189 = vadd.xlane.f32.xlu0 %v1188_v47  ;;  %v10098_v19 = vadd.f32 %v989_v41, %v889_v18 }
  0xed   : > { %13601 = vst [vmem:[#allocation50_spill] sm:$0xff] %v10082_v62  ;;  %v992_v48 = vld [vmem:[%s13434_s1 + $0x2d8] sm:$0xff]  ;;  %v10100_v40 = vadd.f32 %v990_v63, %v890_v16  ;;  %v10102_v57 = vadd.f32 %v991_v27, %v891_v42  ;;  %v885_v45 = vld [vmem:[%s13433_s0 + $0x2a0] sm:$0xff]  ;;  %v886_v28 = vld [vmem:[%s13433_s0 + $0x2a8] sm:$0xff]  ;;  %v1203_v47 = vadd.f32 %v1202_v43, %v10052_v55 }
  0xee   : > { %13602 = vst [vmem:[#allocation51_spill] sm:$0xff] %v10098_v19  ;;  %v1197_v56 = vadd.f32 %v1196_v24, %v10070_v7  ;;  %v887_v18 = vld [vmem:[%s13433_s0 + $0x2b0] sm:$0xff]  ;;  %v888_v42 = vld [vmem:[%s13433_s0 + $0x2b8] sm:$0xff]  ;;  %v985_v16 = vld [vmem:[%s13434_s1 + $0x2a0] sm:$0xff]  ;;  %v10121_v41 = vadd.f32 %v992_v48, %v892_v29 }
  0xef   : > { %13603 = vst [vmem:[#allocation52_spill] sm:$0xff] %v10100_v40  ;;  %13604 = vst [vmem:[#allocation53_spill] sm:$0xff] %v10102_v57  ;;  %v1211_v63 = vadd.f32 %v10100_v40, %v10098_v19  ;;  %v986_v43 = vld [vmem:[%s13434_s1 + $0x2a8] sm:$0xff]  ;;  %v987_v24 = vld [vmem:[%s13434_s1 + $0x2b0] sm:$0xff]  ;;  %v10134_v7 = vadd.f32 %v985_v16, %v885_v45  ;;  %1204 = vadd.xlane.f32.xlu1 %v1203_v47 }
  0xf0   : > { %v988_v27 = vld [vmem:[%s13434_s1 + $0x2b8] sm:$0xff]  ;;  %v1198_v29 = vadd.f32 %v1197_v56, %v10082_v62  ;;  %v10137_v48 = vadd.f32 %v986_v43, %v886_v28  ;;  %v10139_v55 = vadd.f32 %v987_v24, %v887_v18  ;;  %v893_v40 = vld [vmem:[%s13433_s0 + $0x2e0] sm:$0xff]  ;;  %v894_v19 = vld [vmem:[%s13433_s0 + $0x2e8] sm:$0xff] }
  0xf1   : > { %13605 = vst [vmem:[#allocation54_spill] sm:$0xff] %v10134_v7  ;;  %v895_v45 = vld [vmem:[%s13433_s0 + $0x2f0] sm:$0xff]  ;;  %v1212_v47 = vadd.f32 %v1211_v63, %v10102_v57  ;;  %v896_v56 = vld [vmem:[%s13433_s0 + $0x2f8] sm:$0xff]  ;;  %v993_v28 = vld [vmem:[%s13434_s1 + $0x2e0] sm:$0xff]  ;;  %v10160_v16 = vadd.f32 %v988_v27, %v888_v42 }
  0xf2   : > { %13606 = vst [vmem:[#allocation55_spill] sm:$0xff] %v10137_v48  ;;  %v994_v18 = vld [vmem:[%s13434_s1 + $0x2e8] sm:$0xff]  ;;  %1199 = vadd.xlane.f32.xlu0 %v1198_v29  ;;  %v1206_v43 = vadd.f32 %v10137_v48, %v10134_v7  ;;  %v995_v63 = vld [vmem:[%s13434_s1 + $0x2f0] sm:$0xff]  ;;  %v996_v24 = vld [vmem:[%s13434_s1 + $0x2f8] sm:$0xff]  ;;  %v10170_v57 = vadd.f32 %v993_v28, %v893_v40 }
  0xf3   : > { %v10172_v62 = vadd.f32 %v994_v18, %v894_v19  ;;  %v1213_v10 = vadd.f32 %v1212_v47, %v10121_v41  ;;  %v10175_v29 = vadd.f32 %v995_v63, %v895_v45  ;;  %v10178_v27 = vadd.f32 %v996_v24, %v896_v56 }
  0xf4   : > { %v1207_v42 = vadd.f32 %v1206_v43, %v10139_v55 }
  0xf5   : > { %v1216_v48 = vadd.f32 %v10172_v62, %v10170_v57  ;;  %1214 = vadd.xlane.f32.xlu1 %v1213_v10 }
  0xf6   : > { %v1208_v7 = vadd.f32 %v1207_v42, %v10160_v16 }
  0xf7   : > { %v1217_v4 = vadd.f32 %v1216_v48, %v10175_v29 }
  0xf8   : > { %1209 = vadd.xlane.f32.xlu0 %v1208_v7 }
  0xf9   : > { %v1218_v19 = vadd.f32 %v1217_v4, %v10178_v27 }
  0xfc   : > { %1219 = vadd.xlane.f32.xlu0 %v1218_v19 }
 0x143   : > { %v1110_v40 = vpop.xlane.xlu1 %1109 }
 0x144   : > { %v1233_v47 = vmul.f32 0.001953125, %v1110_v40 }
 0x146   : > { %v10186_v45 = vsub.f32 %v9305_v8, %v1233_v47  ;;  %v10189_v56 = vsub.f32 %v9307_v9, %v1233_v47  ;;  %v1105_v28 = vpop.xlane.xlu0 %1104  ;;  %v10192_v18 = vsub.f32 %v9312_v11, %v1233_v47  ;;  %v10195_v43 = vsub.f32 %v9323_v15, %v1233_v47 }
 0x147   : > { %v1232_v10 = vmul.f32 0.001953125, %v1105_v28 }
 0x148   : > { %v1361_v4 = vmul.f32 %v10186_v45, %v10186_v45  ;;  %v1362_v7 = vmul.f32 %v10189_v56, %v10189_v56  ;;  %v1363_v24 = vmul.f32 %v10192_v18, %v10192_v18 }
 0x149   : > { %v10202_v8 = vsub.f32 %v9339_v21, %v1232_v10  ;;  %v10205_v9 = vsub.f32 %v9341_v22, %v1232_v10  ;;  %v1115_v48 = vpop.xlane.xlu1 %1114  ;;  %v10208_v11 = vsub.f32 %v9343_v23, %v1232_v10  ;;  %v10211_v63 = vsub.f32 %v9361_v30, %v1232_v10 }
 0x14a   : > { %v1234_v15 = vmul.f32 0.001953125, %v1115_v48  ;;  %v1462_v42 = vadd.f32 %v1362_v7, %v1361_v4  ;;  %v1364_v21 = vmul.f32 %v10195_v43, %v10195_v43 }
 0x14b   : > { %13607 = vst [vmem:[#allocation56_spill] sm:$0xff] %v10202_v8  ;;  %13608 = vst [vmem:[#allocation57_spill] sm:$0xff] %v10205_v9  ;;  %v1120_v19 = vpop.xlane.xlu0 %1119  ;;  %v1357_v22 = vmul.f32 %v10202_v8, %v10202_v8  ;;  %v1358_v40 = vmul.f32 %v10205_v9, %v10205_v9  ;;  %v1359_v10 = vmul.f32 %v10208_v11, %v10208_v11 }
 0x14c   : > { %13609 = vst [vmem:[#allocation58_spill] sm:$0xff] %v10208_v11  ;;  %v10222_v23 = vsub.f32 %v9374_v35, %v1234_v15  ;;  %v10225_v30 = vsub.f32 %v9377_v37, %v1234_v15  ;;  %v1235_v47 = vmul.f32 0.001953125, %v1120_v19  ;;  %v1463_v28 = vadd.f32 %v1462_v42, %v1363_v24 }
 0x14d   : > { %v1360_v4 = vmul.f32 %v10211_v63, %v10211_v63  ;;  %v1457_v7 = vadd.f32 %v1358_v40, %v1357_v22  ;;  %v10232_v48 = vsub.f32 %v9379_v38, %v1234_v15  ;;  %v10243_v11 = vsub.f32 %v9400_v46, %v1234_v15 }
 0x14e   : > { %v10235_v9 = vsub.f32 %v9410_v50, %v1235_v47  ;;  %v10238_v35 = vsub.f32 %v9412_v51, %v1235_v47  ;;  %v1125_v37 = vpop.xlane.xlu1 %1124  ;;  %v1464_v8 = vadd.f32 %v1463_v28, %v1364_v21  ;;  %v1365_v24 = vmul.f32 %v10222_v23, %v10222_v23 }
 0x14f   : > { %v1236_v42 = vmul.f32 0.001953125, %v1125_v37  ;;  %v1458_v19 = vadd.f32 %v1457_v7, %v1359_v10  ;;  %v1366_v38 = vmul.f32 %v10225_v30, %v10225_v30  ;;  %v1367_v50 = vmul.f32 %v10232_v48, %v10232_v48 }
 0x150   : > { %1465 = vadd.xlane.f32.xlu0 %v1464_v8  ;;  %v10250_v51 = vsub.f32 %v9418_v54, %v1235_v47  ;;  %v10253_v21 = vsub.f32 %v9430_v59, %v1235_v47  ;;  %v1369_v22 = vmul.f32 %v10235_v9, %v10235_v9  ;;  %v1370_v10 = vmul.f32 %v10238_v35, %v10238_v35 }
 0x151   : > { %v10258_v40 = vsub.f32 %v9446_v1, %v1236_v42  ;;  %v10261_v46 = vsub.f32 %v9448_v2, %v1236_v42  ;;  %v1459_v15 = vadd.f32 %v1458_v19, %v1360_v4  ;;  %v1467_v8 = vadd.f32 %v1366_v38, %v1365_v24 }
 0x152   : > { %v1230_v28 = vpop.xlane.xlu0 %1229  ;;  %v10266_v54 = vsub.f32 %v9450_v3, %v1236_v42  ;;  %v1368_v47 = vmul.f32 %v10243_v11, %v10243_v11  ;;  %v1371_v4 = vmul.f32 %v10250_v51, %v10250_v51  ;;  %v1472_v37 = vadd.f32 %v1370_v10, %v1369_v22 }
 0x153   : > { %13610 = vst [vmem:[#allocation59_spill] sm:$0xff] %v10261_v46  ;;  %v10268_v59 = vmul.f32 0.001953125, %v1230_v28  ;;  %1460 = vadd.xlane.f32.xlu1 %v1459_v15  ;;  %v1468_v1 = vadd.f32 %v1467_v8, %v1367_v50  ;;  %v1373_v2 = vmul.f32 %v10258_v40, %v10258_v40  ;;  %v1135_v7 = vpop.xlane.xlu1 %1134  ;;  %v10277_v24 = vsub.f32 %v9469_v14, %v1236_v42 }
 0x154   : > { %13611 = vst [vmem:[#allocation60_spill] sm:$0xff] %v10266_v54  ;;  %v1374_v3 = vmul.f32 %v10261_v46, %v10261_v46  ;;  %v1238_v19 = vmul.f32 0.001953125, %v1135_v7  ;;  %v1372_v15 = vmul.f32 %v10253_v21, %v10253_v21  ;;  %v1375_v50 = vmul.f32 %v10266_v54, %v10266_v54 }
 0x155   : > { %v1469_v38 = vadd.f32 %v1468_v1, %v1368_v47  ;;  %v10287_v8 = vsub.f32 %v9482_v20, %v10268_v59  ;;  %v10291_v22 = vsub.f32 %v9485_v25, %v10268_v59  ;;  %v1473_v42 = vadd.f32 %v1472_v37, %v1371_v4 }
 0x156   : > { %v1130_v14 = vpop.xlane.xlu0 %1129  ;;  %v1477_v28 = vadd.f32 %v1374_v3, %v1373_v2  ;;  %v10294_v10 = vsub.f32 %v9522_v44, %v1238_v19  ;;  %v10297_v47 = vsub.f32 %v9528_v49, %v1238_v19  ;;  %v10300_v7 = vsub.f32 %v9530_v52, %v1238_v19 }
 0x157   : > { %13612 = vst [vmem:[#allocation61_spill] sm:$0xff] %v10291_v22  ;;  %v1237_v1 = vmul.f32 0.001953125, %v1130_v14  ;;  %1470 = vadd.xlane.f32.xlu1 %v1469_v38  ;;  %v1474_v20 = vadd.f32 %v1473_v42, %v1372_v15  ;;  %v1376_v54 = vmul.f32 %v10277_v24, %v10277_v24  ;;  %v10305_v46 = vsub.f32 %v9543_v58, %v1238_v19 }
 0x158   : > { %v1478_v25 = vadd.f32 %v1477_v28, %v1375_v50  ;;  %v1381_v4 = vmul.f32 %v10294_v10, %v10294_v10  ;;  %v1382_v52 = vmul.f32 %v10297_v47, %v10297_v47  ;;  %v1383_v58 = vmul.f32 %v10300_v7, %v10300_v7 }
 0x159   : > { %v10308_v2 = vsub.f32 %v9559_v5, %v1237_v1  ;;  %v10311_v44 = vsub.f32 %v9561_v6, %v1237_v1  ;;  %v1145_v49 = vpop.xlane.xlu1 %1144  ;;  %1475 = vadd.xlane.f32.xlu0 %v1474_v20  ;;  %v10321_v5 = vsub.f32 %v9487_v26, %v10268_v59  ;;  %v10324_v38 = vsub.f32 %v9569_v12, %v1237_v1 }
 0x15a   : > { %v1240_v37 = vmul.f32 0.001953125, %v1145_v49  ;;  %v1479_v3 = vadd.f32 %v1478_v25, %v1376_v54  ;;  %v1487_v6 = vadd.f32 %v1382_v52, %v1381_v4  ;;  %v10327_v15 = vsub.f32 %v9571_v13, %v1237_v1 }
 0x15b   : > { %13613 = vst [vmem:[#allocation62_spill] sm:$0xff] %v10321_v5  ;;  %v1140_v19 = vpop.xlane.xlu0 %1139  ;;  %v1377_v50 = vmul.f32 %v10308_v2, %v10308_v2  ;;  %v1378_v26 = vmul.f32 %v10311_v44, %v10311_v44  ;;  %v1384_v12 = vmul.f32 %v10305_v46, %v10305_v46  ;;  %v1379_v13 = vmul.f32 %v10324_v38, %v10324_v38 }
 0x15c   : > { %13614 = vst [vmem:[#allocation63_spill] sm:$0xff] %v10327_v15  ;;  %v10332_v54 = vsub.f32 %v9594_v33, %v1240_v37  ;;  %v10335_v14 = vsub.f32 %v9596_v34, %v1240_v37  ;;  %v1239_v42 = vmul.f32 0.001953125, %v1140_v19  ;;  %1480 = vadd.xlane.f32.xlu1 %v1479_v3  ;;  %v1488_v28 = vadd.f32 %v1487_v6, %v1383_v58 }
 0x15d   : > { %v10344_v1 = vsub.f32 %v9598_v36, %v1240_v37  ;;  %v1482_v25 = vadd.f32 %v1378_v26, %v1377_v50  ;;  %v10353_v49 = vsub.f32 %v9620_v53, %v1240_v37 }
 0x15e   : > { %13615 = vst [vmem:[#allocation64_spill] sm:$0xff] %v10332_v54  ;;  %13616 = vst [vmem:[#allocation65_spill] sm:$0xff] %v10335_v14  ;;  %v10347_v33 = vsub.f32 %v9630_v60, %v1239_v42  ;;  %v10350_v34 = vsub.f32 %v9632_v61, %v1239_v42  ;;  %v1155_v20 = vpop.xlane.xlu1 %1154  ;;  %v1489_v52 = vadd.f32 %v1488_v28, %v1384_v12 }
 0x15f   : > { %13617 = vst [vmem:[#allocation66_spill] sm:$0xff] %v10344_v1  ;;  %13620 = vst [vmem:[#allocation69_spill] sm:$0xff] %v10353_v49  ;;  %v1242_v4 = vmul.f32 0.001953125, %v1155_v20  ;;  %v1389_v3 = vmul.f32 %v10332_v54, %v10332_v54  ;;  %v1390_v36 = vmul.f32 %v10335_v14, %v10335_v14  ;;  %v1380_v60 = vmul.f32 %v10327_v15, %v10327_v15 }
 0x160   : > { %13618 = vst [vmem:[#allocation67_spill] sm:$0xff] %v10347_v33  ;;  %13619 = vst [vmem:[#allocation68_spill] sm:$0xff] %v10350_v34  ;;  %v1483_v58 = vadd.f32 %v1482_v25, %v1379_v13  ;;  %v1391_v61 = vmul.f32 %v10344_v1, %v10344_v1  ;;  %v10364_v19 = vsub.f32 %v9638_v0, %v1239_v42  ;;  %1490 = vadd.xlane.f32.xlu1 %v1489_v52 }
 0x161   : > { %v10367_v53 = vsub.f32 %v9666_v31, %v1242_v4  ;;  %v10370_v37 = vsub.f32 %v9668_v32, %v1242_v4  ;;  %v1150_v6 = vpop.xlane.xlu0 %1149  ;;  %v1497_v50 = vadd.f32 %v1390_v36, %v1389_v3  ;;  %v10373_v26 = vsub.f32 %v9650_v17, %v1239_v42  ;;  %v13626_v17 = vld [vmem:[#allocation7_spill] sm:$0xff]  ;;  %v13628_v3 = vld [vmem:[#allocation8_spill] sm:$0xff] }
 0x162   : > { %13621 = vst [vmem:[#allocation70_spill] sm:$0xff] %v10364_v19  ;;  %v1241_v12 = vmul.f32 0.001953125, %v1150_v6  ;;  %v1484_v28 = vadd.f32 %v1483_v58, %v1380_v60  ;;  %v1385_v13 = vmul.f32 %v10347_v33, %v10347_v33  ;;  %v1386_v0 = vmul.f32 %v10350_v34, %v10350_v34  ;;  %v13630_v34 = vld [vmem:[#allocation6_spill] sm:$0xff] }
 0x163   : > { %13622 = vst [vmem:[#allocation71_spill] sm:$0xff] %v10367_v53  ;;  %13623 = vst [vmem:[#allocation72_spill] sm:$0xff] %v10370_v37  ;;  %v1165_v20 = vpop.xlane.xlu1 %1164  ;;  %v1392_v31 = vmul.f32 %v10353_v49, %v10353_v49  ;;  %v1498_v32 = vadd.f32 %v1497_v50, %v1391_v61  ;;  %v1387_v25 = vmul.f32 %v10364_v19, %v10364_v19  ;;  %v13632_v50 = vld [vmem:[#allocation11_spill] sm:$0xff] }
 0x164   : > { %13624 = vst [vmem:[#allocation73_spill] sm:$0xff] %v10373_v26  ;;  %v10384_v52 = vsub.f32 %v9670_v39, %v1242_v4  ;;  %v10387_v42 = vsub.f32 %v13626_v17, %v1241_v12  ;;  %v10390_v36 = vsub.f32 %v13628_v3, %v1241_v12  ;;  %v1244_v60 = vmul.f32 0.001953125, %v1165_v20  ;;  %1485 = vadd.xlane.f32.xlu0 %v1484_v28  ;;  %v13634_v17 = vld [vmem:[#allocation12_spill] sm:$0xff]  ;;  %v13636_v20 = vld [vmem:[#allocation9_spill] sm:$0xff] }
 0x165   : > { %v1492_v58 = vadd.f32 %v1386_v0, %v1385_v13  ;;  %v1499_v6 = vadd.f32 %v1498_v32, %v1392_v31  ;;  %v10393_v33 = vsub.f32 %v13630_v34, %v1242_v4  ;;  %v1397_v61 = vmul.f32 %v10367_v53, %v10367_v53 }
 0x166   : > { %13625 = vst [vmem:[#allocation74_spill] sm:$0xff] %v10384_v52  ;;  %13627 = vst [vmem:[#allocation7_spill] sm:$0xff] %v10387_v42  ;;  %v1398_v39 = vmul.f32 %v10370_v37, %v10370_v37  ;;  %v10400_v19 = vsub.f32 %v13632_v50, %v1244_v60  ;;  %v10403_v49 = vsub.f32 %v13634_v17, %v1244_v60  ;;  %v13638_v50 = vld [vmem:[#allocation10_spill] sm:$0xff] }
 0x167   : > { %13629 = vst [vmem:[#allocation8_spill] sm:$0xff] %v10390_v36  ;;  %13631 = vst [vmem:[#allocation6_spill] sm:$0xff] %v10393_v33  ;;  %v1160_v3 = vpop.xlane.xlu0 %1159  ;;  %v1388_v28 = vmul.f32 %v10373_v26, %v10373_v26  ;;  %v1493_v13 = vadd.f32 %v1492_v58, %v1387_v25  ;;  %1500 = vadd.xlane.f32.xlu1 %v1499_v6  ;;  %v1399_v34 = vmul.f32 %v10384_v52, %v10384_v52  ;;  %v13640_v25 = vld [vmem:[#allocation15_spill] sm:$0xff]  ;;  %v13642_v6 = vld [vmem:[#allocation16_spill] sm:$0xff] }
 0x168   : > { %13633 = vst [vmem:[#allocation11_spill] sm:$0xff] %v10400_v19  ;;  %13635 = vst [vmem:[#allocation12_spill] sm:$0xff] %v10403_v49  ;;  %v1243_v0 = vmul.f32 0.001953125, %v1160_v3  ;;  %v1507_v4 = vadd.f32 %v1398_v39, %v1397_v61  ;;  %v10410_v31 = vsub.f32 %v13636_v20, %v1241_v12  ;;  %v10413_v37 = vsub.f32 %v13638_v50, %v1241_v12  ;;  %v13644_v50 = vld [vmem:[#allocation13_spill] sm:$0xff]  ;;  %v13646_v52 = vld [vmem:[#allocation14_spill] sm:$0xff] }
 0x169   : > { %v1494_v32 = vadd.f32 %v1493_v13, %v1388_v28  ;;  %v1393_v17 = vmul.f32 %v10387_v42, %v10387_v42  ;;  %v1394_v53 = vmul.f32 %v10390_v36, %v10390_v36  ;;  %v1400_v39 = vmul.f32 %v10393_v33, %v10393_v33 }
 0x16a   : > { %13637 = vst [vmem:[#allocation9_spill] sm:$0xff] %v10410_v31  ;;  %13639 = vst [vmem:[#allocation10_spill] sm:$0xff] %v10413_v37  ;;  %v10420_v58 = vsub.f32 %v13640_v25, %v1243_v0  ;;  %v10423_v3 = vsub.f32 %v13642_v6, %v1243_v0  ;;  %v1175_v61 = vpop.xlane.xlu1 %1174  ;;  %v1508_v28 = vadd.f32 %v1507_v4, %v1399_v34 }
 0x16b   : > { %v1246_v13 = vmul.f32 0.001953125, %v1175_v61  ;;  %1495 = vadd.xlane.f32.xlu0 %v1494_v32  ;;  %v1395_v12 = vmul.f32 %v10410_v31, %v10410_v31  ;;  %v1502_v20 = vadd.f32 %v1394_v53, %v1393_v17  ;;  %v10430_v42 = vsub.f32 %v13644_v50, %v1244_v60  ;;  %v13648_v53 = vld [vmem:[#allocation5_spill] sm:$0xff]  ;;  %v13650_v50 = vld [vmem:[#allocation19_spill] sm:$0xff] }
 0x16c   : > { %13641 = vst [vmem:[#allocation15_spill] sm:$0xff] %v10420_v58  ;;  %13643 = vst [vmem:[#allocation16_spill] sm:$0xff] %v10423_v3  ;;  %v1509_v25 = vadd.f32 %v1508_v28, %v1400_v39  ;;  %v10433_v26 = vsub.f32 %v13646_v52, %v1244_v60  ;;  %v1405_v6 = vmul.f32 %v10400_v19, %v10400_v19  ;;  %v13652_v28 = vld [vmem:[#allocation17_spill] sm:$0xff] }
 0x16d   : > { %13645 = vst [vmem:[#allocation13_spill] sm:$0xff] %v10430_v42  ;;  %v1170_v36 = vpop.xlane.xlu0 %1169  ;;  %v1406_v34 = vmul.f32 %v10403_v49, %v10403_v49  ;;  %v1396_v32 = vmul.f32 %v10413_v37, %v10413_v37  ;;  %v1503_v61 = vadd.f32 %v1502_v20, %v1395_v12  ;;  %v10443_v17 = vsub.f32 %v13648_v53, %v10268_v59  ;;  %v13656_v20 = vld [vmem:[#allocation18_spill] sm:$0xff] }
 0x16e   : > { %13647 = vst [vmem:[#allocation14_spill] sm:$0xff] %v10433_v26  ;;  %v1245_v4 = vmul.f32 0.001953125, %v1170_v36  ;;  %v10446_v39 = vsub.f32 %v13650_v50, %v1246_v13  ;;  %1510 = vadd.xlane.f32.xlu1 %v1509_v25  ;;  %v1407_v52 = vmul.f32 %v10430_v42, %v10430_v42  ;;  %v10451_v19 = vsub.f32 %v13652_v28, %v1243_v0  ;;  %v13654_v36 = vld [vmem:[#allocation20_spill] sm:$0xff] }
 0x16f   : > { %13649 = vst [vmem:[#allocation5_spill] sm:$0xff] %v10443_v17  ;;  %v1517_v60 = vadd.f32 %v1406_v34, %v1405_v6  ;;  %v10454_v49 = vsub.f32 %v13654_v36, %v1246_v13  ;;  %v1504_v12 = vadd.f32 %v1503_v61, %v1396_v32  ;;  %v1408_v59 = vmul.f32 %v10433_v26, %v10433_v26  ;;  %v13658_v34 = vld [vmem:[#allocation23_spill] sm:$0xff]  ;;  %v13660_v36 = vld [vmem:[#allocation24_spill] sm:$0xff]  ;;  %v13662_v32 = vld [vmem:[#allocation21_spill] sm:$0xff] }
 0x170   : > { %13651 = vst [vmem:[#allocation19_spill] sm:$0xff] %v10446_v39  ;;  %13653 = vst [vmem:[#allocation17_spill] sm:$0xff] %v10451_v19  ;;  %v1185_v37 = vpop.xlane.xlu1 %1184  ;;  %v10459_v53 = vsub.f32 %v13656_v20, %v1243_v0  ;;  %v1401_v42 = vmul.f32 %v10420_v58, %v10420_v58  ;;  %v1402_v6 = vmul.f32 %v10423_v3, %v10423_v3  ;;  %v13664_v0 = vld [vmem:[#allocation22_spill] sm:$0xff]  ;;  %v13666_v58 = vld [vmem:[#allocation27_spill] sm:$0xff] }
 0x171   : > { %13655 = vst [vmem:[#allocation20_spill] sm:$0xff] %v10454_v49  ;;  %v1248_v50 = vmul.f32 0.001953125, %v1185_v37  ;;  %v1518_v25 = vadd.f32 %v1517_v60, %v1407_v52  ;;  %v10466_v28 = vsub.f32 %v13658_v34, %v1245_v4  ;;  %v10469_v31 = vsub.f32 %v13660_v36, %v1245_v4  ;;  %1505 = vadd.xlane.f32.xlu0 %v1504_v12 }
 0x172   : > { %13657 = vst [vmem:[#allocation18_spill] sm:$0xff] %v10459_v53  ;;  %v10472_v61 = vsub.f32 %v13662_v32, %v1246_v13  ;;  %v10475_v20 = vsub.f32 %v13664_v0, %v1246_v13  ;;  %v1403_v60 = vmul.f32 %v10451_v19, %v10451_v19  ;;  %v1404_v3 = vmul.f32 %v10459_v53, %v10459_v53  ;;  %v13668_v32 = vld [vmem:[#allocation28_spill] sm:$0xff]  ;;  %v13672_v19 = vld [vmem:[#allocation26_spill] sm:$0xff] }
 0x173   : > { %13659 = vst [vmem:[#allocation23_spill] sm:$0xff] %v10466_v28  ;;  %13661 = vst [vmem:[#allocation24_spill] sm:$0xff] %v10469_v31  ;;  %v1180_v37 = vpop.xlane.xlu0 %1179  ;;  %v1519_v52 = vadd.f32 %v1518_v25, %v1408_v59  ;;  %v1512_v34 = vadd.f32 %v1402_v6, %v1401_v42  ;;  %v10482_v26 = vsub.f32 %v13666_v58, %v1248_v50  ;;  %v13670_v42 = vld [vmem:[#allocation25_spill] sm:$0xff] }
 0x174   : > { %13663 = vst [vmem:[#allocation21_spill] sm:$0xff] %v10472_v61  ;;  %13665 = vst [vmem:[#allocation22_spill] sm:$0xff] %v10475_v20  ;;  %v1247_v36 = vmul.f32 0.001953125, %v1180_v37  ;;  %v1413_v12 = vmul.f32 %v10446_v39, %v10446_v39  ;;  %v1414_v13 = vmul.f32 %v10454_v49, %v10454_v49  ;;  %v10489_v0 = vsub.f32 %v13668_v32, %v1248_v50  ;;  %v13674_v49 = vld [vmem:[#allocation31_spill] sm:$0xff] }
 0x175   : > { %13667 = vst [vmem:[#allocation27_spill] sm:$0xff] %v10482_v26  ;;  %1520 = vadd.xlane.f32.xlu1 %v1519_v52  ;;  %v1513_v25 = vadd.f32 %v1512_v34, %v1403_v60  ;;  %v1415_v53 = vmul.f32 %v10472_v61, %v10472_v61  ;;  %v10494_v6 = vsub.f32 %v13670_v42, %v1245_v4  ;;  %v13676_v34 = vld [vmem:[#allocation32_spill] sm:$0xff] }
 0x176   : > { %13669 = vst [vmem:[#allocation28_spill] sm:$0xff] %v10489_v0  ;;  %v1195_v59 = vpop.xlane.xlu1 %1194  ;;  %v1416_v37 = vmul.f32 %v10475_v20, %v10475_v20  ;;  %v1527_v39 = vadd.f32 %v1414_v13, %v1413_v12  ;;  %v10499_v33 = vsub.f32 %v13672_v19, %v1245_v4  ;;  %v10502_v32 = vsub.f32 %v13674_v49, %v1247_v36  ;;  %v13680_v4 = vld [vmem:[#allocation29_spill] sm:$0xff] }
 0x177   : > { %13671 = vst [vmem:[#allocation25_spill] sm:$0xff] %v10494_v6  ;;  %v1250_v58 = vmul.f32 0.001953125, %v1195_v59  ;;  %v1514_v1 = vadd.f32 %v1513_v25, %v1404_v3  ;;  %v1409_v52 = vmul.f32 %v10466_v28, %v10466_v28  ;;  %v1410_v60 = vmul.f32 %v10469_v31, %v10469_v31  ;;  %v13678_v59 = vld [vmem:[#allocation35_spill] sm:$0xff]  ;;  %v13682_v28 = vld [vmem:[#allocation30_spill] sm:$0xff] }
 0x178   : > { %13673 = vst [vmem:[#allocation26_spill] sm:$0xff] %v10499_v33  ;;  %13675 = vst [vmem:[#allocation31_spill] sm:$0xff] %v10502_v32  ;;  %v10509_v42 = vsub.f32 %v13676_v34, %v1247_v36  ;;  %v1528_v13 = vadd.f32 %v1527_v39, %v1415_v53  ;;  %v1411_v19 = vmul.f32 %v10494_v6, %v10494_v6  ;;  %v13684_v39 = vld [vmem:[#allocation33_spill] sm:$0xff]  ;;  %v13686_v6 = vld [vmem:[#allocation36_spill] sm:$0xff] }
 0x179   : > { %v10512_v61 = vsub.f32 %v13678_v59, %v1250_v58  ;;  %v1190_v12 = vpop.xlane.xlu0 %1189  ;;  %1515 = vadd.xlane.f32.xlu0 %v1514_v1  ;;  %v1522_v3 = vadd.f32 %v1410_v60, %v1409_v52  ;;  %v10517_v25 = vsub.f32 %v13680_v4, %v1248_v50  ;;  %v10520_v20 = vsub.f32 %v13682_v28, %v1248_v50  ;;  %v13688_v1 = vld [vmem:[#allocation39_spill] sm:$0xff] }
 0x17a   : > { %13677 = vst [vmem:[#allocation32_spill] sm:$0xff] %v10509_v42  ;;  %v1249_v49 = vmul.f32 0.001953125, %v1190_v12  ;;  %v1529_v31 = vadd.f32 %v1528_v13, %v1416_v37  ;;  %v1421_v34 = vmul.f32 %v10482_v26, %v10482_v26  ;;  %v1422_v59 = vmul.f32 %v10489_v0, %v10489_v0  ;;  %v13690_v0 = vld [vmem:[#allocation34_spill] sm:$0xff]  ;;  %v13692_v26 = vld [vmem:[#allocation40_spill] sm:$0xff] }
 0x17b   : > { %13679 = vst [vmem:[#allocation35_spill] sm:$0xff] %v10512_v61  ;;  %13681 = vst [vmem:[#allocation29_spill] sm:$0xff] %v10517_v25  ;;  %v10527_v53 = vsub.f32 %v13684_v39, %v1247_v36  ;;  %v10530_v12 = vsub.f32 %v13686_v6, %v1250_v58  ;;  %v1412_v50 = vmul.f32 %v10499_v33, %v10499_v33  ;;  %v13713_v33 = vld [vmem:[#allocation49_spill] sm:$0xff] }
 0x17c   : > { %13683 = vst [vmem:[#allocation30_spill] sm:$0xff] %v10520_v20  ;;  %v10533_v52 = vsub.f32 %v13688_v1, %v1249_v49  ;;  %v1205_v60 = vpop.xlane.xlu1 %1204  ;;  %v1523_v28 = vadd.f32 %v1522_v3, %v1411_v19  ;;  %1530 = vadd.xlane.f32.xlu1 %v1529_v31  ;;  %v1423_v13 = vmul.f32 %v10517_v25, %v10517_v25 }
 0x17d   : > { %13685 = vst [vmem:[#allocation33_spill] sm:$0xff] %v10527_v53  ;;  %13687 = vst [vmem:[#allocation36_spill] sm:$0xff] %v10530_v12  ;;  %v1252_v37 = vmul.f32 0.001953125, %v1205_v60  ;;  %v1537_v4 = vadd.f32 %v1422_v59, %v1421_v34  ;;  %v10540_v39 = vsub.f32 %v13690_v0, %v1247_v36  ;;  %v10543_v6 = vsub.f32 %v13692_v26, %v1249_v49  ;;  %v13694_v0 = vld [vmem:[#allocation43_spill] sm:$0xff]  ;;  %v13696_v59 = vld [vmem:[#allocation37_spill] sm:$0xff] }
 0x17e   : > { %13689 = vst [vmem:[#allocation39_spill] sm:$0xff] %v10533_v52  ;;  %v1524_v1 = vadd.f32 %v1523_v28, %v1412_v50  ;;  %v1417_v54 = vmul.f32 %v10502_v32, %v10502_v32  ;;  %v1418_v19 = vmul.f32 %v10509_v42, %v10509_v42  ;;  %v1424_v31 = vmul.f32 %v10520_v20, %v10520_v20  ;;  %v13698_v28 = vld [vmem:[#allocation38_spill] sm:$0xff]  ;;  %v13700_v42 = vld [vmem:[#allocation44_spill] sm:$0xff] }
 0x17f   : > { %13691 = vst [vmem:[#allocation34_spill] sm:$0xff] %v10540_v39  ;;  %13693 = vst [vmem:[#allocation40_spill] sm:$0xff] %v10543_v6  ;;  %v1200_v14 = vpop.xlane.xlu0 %1199  ;;  %v1538_v60 = vadd.f32 %v1537_v4, %v1423_v13  ;;  %v1419_v36 = vmul.f32 %v10527_v53, %v10527_v53  ;;  %v10554_v34 = vsub.f32 %v13694_v0, %v1252_v37  ;;  %v13701_v0 = vld [vmem:[#allocation47_spill] sm:$0xff] }
 0x180   : > { %v1251_v3 = vmul.f32 0.001953125, %v1200_v14  ;;  %1525 = vadd.xlane.f32.xlu0 %v1524_v1  ;;  %v1532_v26 = vadd.f32 %v1418_v19, %v1417_v54  ;;  %v10557_v50 = vsub.f32 %v13696_v59, %v1250_v58  ;;  %v10560_v32 = vsub.f32 %v13698_v28, %v1250_v58  ;;  %v13702_v59 = vld [vmem:[#allocation48_spill] sm:$0xff] }
 0x181   : > { %13695 = vst [vmem:[#allocation43_spill] sm:$0xff] %v10554_v34  ;;  %v10563_v14 = vsub.f32 %v13700_v42, %v1252_v37  ;;  %v1539_v20 = vadd.f32 %v1538_v60, %v1424_v31  ;;  %v1420_v13 = vmul.f32 %v10540_v39, %v10540_v39  ;;  %v1429_v4 = vmul.f32 %v10512_v61, %v10512_v61  ;;  %v13703_v42 = vld [vmem:[#allocation41_spill] sm:$0xff]  ;;  %v13705_v60 = vld [vmem:[#allocation42_spill] sm:$0xff] }
 0x182   : > { %13697 = vst [vmem:[#allocation37_spill] sm:$0xff] %v10557_v50  ;;  %13699 = vst [vmem:[#allocation38_spill] sm:$0xff] %v10560_v32  ;;  %v1215_v25 = vpop.xlane.xlu1 %1214  ;;  %v10570_v1 = vsub.f32 %v13701_v0, %v1251_v3  ;;  %v1533_v19 = vadd.f32 %v1532_v26, %v1419_v36  ;;  %v1430_v58 = vmul.f32 %v10530_v12, %v10530_v12 }
 0x183   : > { %v1254_v54 = vmul.f32 0.001953125, %v1215_v25  ;;  %v10575_v28 = vsub.f32 %v13702_v59, %v1251_v3  ;;  %1540 = vadd.xlane.f32.xlu1 %v1539_v20  ;;  %v10578_v31 = vsub.f32 %v13703_v42, %v1249_v49  ;;  %v10581_v39 = vsub.f32 %v13705_v60, %v1249_v49  ;;  %v13707_v59 = vld [vmem:[#allocation51_spill] sm:$0xff]  ;;  %v13708_v42 = vld [vmem:[#allocation52_spill] sm:$0xff] }
 0x184   : > { %v1425_v61 = vmul.f32 %v10533_v52, %v10533_v52  ;;  %v1534_v53 = vadd.f32 %v1533_v19, %v1420_v13  ;;  %v1431_v25 = vmul.f32 %v10557_v50, %v10557_v50  ;;  %v1432_v36 = vmul.f32 %v10560_v32, %v10560_v32  ;;  %v13709_v19 = vld [vmem:[#allocation45_spill] sm:$0xff] }
 0x185   : > { %13704 = vst [vmem:[#allocation44_spill] sm:$0xff] %v10578_v31  ;;  %13706 = vst [vmem:[#allocation47_spill] sm:$0xff] %v10581_v39  ;;  %v1210_v0 = vpop.xlane.xlu0 %1209  ;;  %v1547_v26 = vadd.f32 %v1430_v58, %v1429_v4  ;;  %v10590_v20 = vsub.f32 %v13707_v59, %v1254_v54  ;;  %v10593_v12 = vsub.f32 %v13708_v42, %v1254_v54  ;;  %v13710_v42 = vld [vmem:[#allocation46_spill] sm:$0xff] }
 0x186   : > { %v1253_v49 = vmul.f32 0.001953125, %v1210_v0  ;;  %v1426_v60 = vmul.f32 %v10543_v6, %v10543_v6  ;;  %1535 = vadd.xlane.f32.xlu0 %v1534_v53  ;;  %v1427_v13 = vmul.f32 %v10578_v31, %v10578_v31  ;;  %v10600_v50 = vsub.f32 %v13709_v19, %v1252_v37  ;;  %v13712_v31 = vld [vmem:[#allocation55_spill] sm:$0xff] }
 0x187   : > { %v1548_v52 = vadd.f32 %v1547_v26, %v1431_v25  ;;  %v1437_v4 = vmul.f32 %v10554_v34, %v10554_v34  ;;  %v1428_v58 = vmul.f32 %v10581_v39, %v10581_v39  ;;  %v10607_v0 = vsub.f32 %v13710_v42, %v1252_v37  ;;  %v13711_v25 = vld [vmem:[#allocation54_spill] sm:$0xff] }
 0x188   : > { %v1542_v59 = vadd.f32 %v1426_v60, %v1425_v61  ;;  %v1438_v53 = vmul.f32 %v10563_v14, %v10563_v14  ;;  %v10612_v26 = vsub.f32 %v13711_v25, %v1253_v49  ;;  %v10615_v6 = vsub.f32 %v13712_v31, %v1253_v49  ;;  %v13714_v60 = vld [vmem:[#allocation50_spill] sm:$0xff] }
 0x189   : > { %v1220_v19 = vpop.xlane.xlu0 %1219  ;;  %v1549_v32 = vadd.f32 %v1548_v52, %v1432_v36  ;;  %v10618_v34 = vsub.f32 %v13713_v33, %v1251_v3  ;;  %v1439_v61 = vmul.f32 %v10600_v50, %v10600_v50  ;;  %v10623_v42 = vsub.f32 %v13714_v60, %v1251_v3  ;;  %v13715_v52 = vld [vmem:[#allocation53_spill] sm:$0xff] }
 0x18a   : > { %v1255_v15 = vmul.f32 0.001953125, %v1220_v19  ;;  %v1543_v39 = vadd.f32 %v1542_v59, %v1427_v13  ;;  %v1557_v37 = vadd.f32 %v1438_v53, %v1437_v4  ;;  %v1433_v25 = vmul.f32 %v10570_v1, %v10570_v1 }
 0x18b   : > { %1550 = vadd.xlane.f32.xlu1 %v1549_v32  ;;  %v1434_v31 = vmul.f32 %v10575_v28, %v10575_v28  ;;  %v10630_v36 = vsub.f32 %v13715_v52, %v1254_v54  ;;  %v1440_v13 = vmul.f32 %v10607_v0, %v10607_v0  ;;  %v1435_v32 = vmul.f32 %v10618_v34, %v10618_v34 }
 0x18c   : > { %v1544_v33 = vadd.f32 %v1543_v39, %v1428_v58  ;;  %v1558_v59 = vadd.f32 %v1557_v37, %v1439_v61  ;;  %v10637_v3 = vsub.f32 %v10170_v57, %v1255_v15  ;;  %v10640_v53 = vsub.f32 %v10121_v41, %v1254_v54 }
 0x18d   : > { %v1552_v4 = vadd.f32 %v1434_v31, %v1433_v25  ;;  %v1445_v19 = vmul.f32 %v10590_v20, %v10590_v20  ;;  %v10645_v60 = vsub.f32 %v10172_v62, %v1255_v15  ;;  %v1446_v58 = vmul.f32 %v10593_v12, %v10593_v12 }
 0x18e   : > { %13716 = vst [vmem:[#allocation48_spill] sm:$0xff] %v10637_v3  ;;  %1545 = vadd.xlane.f32.xlu0 %v1544_v33  ;;  %v1559_v39 = vadd.f32 %v1558_v59, %v1440_v13  ;;  %v10650_v61 = vsub.f32 %v10139_v55, %v1253_v49  ;;  %v1436_v57 = vmul.f32 %v10623_v42, %v10623_v42 }
 0x18f   : > { %13717 = vst [vmem:[#allocation41_spill] sm:$0xff] %v10645_v60  ;;  %v1553_v37 = vadd.f32 %v1552_v4, %v1435_v32  ;;  %v1447_v41 = vmul.f32 %v10630_v36, %v10630_v36  ;;  %v1441_v54 = vmul.f32 %v10612_v26, %v10612_v26  ;;  %v1567_v62 = vadd.f32 %v1446_v58, %v1445_v19 }
 0x190   : > { %1560 = vadd.xlane.f32.xlu1 %v1559_v39  ;;  %v10659_v25 = vsub.f32 %v10160_v16, %v1253_v49  ;;  %v1442_v31 = vmul.f32 %v10615_v6, %v10615_v6  ;;  %v1453_v55 = vmul.f32 %v10287_v8, %v10287_v8  ;;  %v1448_v33 = vmul.f32 %v10640_v53, %v10640_v53 }
 0x191   : > { %v1554_v52 = vadd.f32 %v1553_v37, %v1436_v57  ;;  %v1454_v13 = vmul.f32 %v10291_v22, %v10291_v22  ;;  %v1455_v59 = vmul.f32 %v10321_v5, %v10321_v5  ;;  %v1568_v32 = vadd.f32 %v1567_v62, %v1447_v41 }
 0x192   : > { %v1443_v16 = vmul.f32 %v10650_v61, %v10650_v61  ;;  %v1562_v49 = vadd.f32 %v1442_v31, %v1441_v54  ;;  %v1577_v4 = vsel %vm1221_vm0, %v1453_v55, 0.0  ;;  %v1456_v19 = vmul.f32 %v10443_v17, %v10443_v17 }
 0x193   : > { %1555 = vadd.xlane.f32.xlu0 %v1554_v52  ;;  %v1578_v39 = vsel %vm1221_vm0, %v1454_v13, 0.0  ;;  %v10678_v58 = vsub.f32 %v10175_v29, %v1255_v15  ;;  %v1569_v57 = vadd.f32 %v1568_v32, %v1448_v33  ;;  %v1444_v37 = vmul.f32 %v10659_v25, %v10659_v25 }
 0x194   : > { %v1563_v41 = vadd.f32 %v1562_v49, %v1443_v16  ;;  %v1579_v62 = vadd.f32 %v1578_v39, %v1577_v4  ;;  %v1580_v5 = vsel %vm1221_vm0, %v1455_v59, 0.0  ;;  %v10684_v54 = vsub.f32 %v10178_v27, %v1255_v15 }
 0x195   : > { %13718 = vst [vmem:[#allocation42_spill] sm:$0xff] %v10678_v58  ;;  %v1449_v31 = vmul.f32 %v10637_v3, %v10637_v3  ;;  %v1450_v55 = vmul.f32 %v10645_v60, %v10645_v60  ;;  %1570 = vadd.xlane.f32.xlu1 %v1569_v57  ;;  %v1582_v33 = vsel %vm1221_vm0, %v1456_v19, 0.0  ;;  %v1451_v13 = vmul.f32 %v10678_v58, %v10678_v58 }
 0x196   : > { %13719 = vst [vmem:[#allocation51_spill] sm:$0xff] %v10684_v54  ;;  %v1564_v29 = vadd.f32 %v1563_v41, %v1444_v37  ;;  %v1581_v52 = vadd.f32 %v1580_v5, %v1579_v62  ;;  %v1452_v27 = vmul.f32 %v10684_v54, %v10684_v54  ;;  %v1763_v4 = vlaneseq }
 0x197   : > { %v1572_v32 = vadd.f32 %v1450_v55, %v1449_v31 }
 0x198   : > { %1565 = vadd.xlane.f32.xlu0 %v1564_v29  ;;  %v1583_v59 = vadd.f32 %v1582_v33, %v1581_v52  ;;  %v1764_v19 = vshrl.u32 %v1763_v4, 7  ;;  %v1761_v52 = vld [vmem:[%s13435_s2] sm:$0xf] }
 0x199   : > { %v1573_v15 = vadd.f32 %v1572_v32, %v1451_v13 }
 0x19a   : > { %1584 = vadd.xlane.f32.xlu1 %v1583_v59  ;;  %v1765_v55 = vsub.s32 0, %v1764_v19  ;;  %v1769_v29 = vsub.s32 1, %v1764_v19  ;;  %v1773_v33 = vsub.s32 2, %v1764_v19  ;;  %v1777_v13 = vsub.s32 3, %v1764_v19 }
 0x19b   : > { %v1574_v16 = vadd.f32 %v1573_v15, %v1452_v27  ;;  %v1883_v27 = vld [vmem:[%s13436_s3] sm:$0xf] }
 0x19c   : > { %v10703_v4 = vrot.slane %v1761_v52, %v1769_v29  ;;  %v10709_v19 = vrot.slane %v1883_v27, %v1765_v55 }
 0x19d   : > { %1575 = vadd.xlane.f32.xlu0 %v1574_v16 }
 0x1dd   : > { %v1466_v49 = vpop.xlane.xlu0 %1465 }
 0x1de   : > { %v1587_v39 = vmul.f32 0.001953125, %v1466_v49  ;;  %v10701_v49 = vrot.slane %v1761_v52, %v1765_v55 }
 0x1e0   : > { %v1461_v57 = vpop.xlane.xlu1 %1460  ;;  %v1612_v5 = vadd.f32 1e-05, %v1587_v39 }
 0x1e1   : > { %v1586_v37 = vmul.f32 0.001953125, %v1461_v57 }
 0x1e2   : > { %8077 = vrsqrt.f32 %v1612_v5  ;;  %v10705_v5 = vrot.slane %v1761_v52, %v1773_v33 }
 0x1e3   : > { %v1611_v41 = vadd.f32 1e-05, %v1586_v37  ;;  %v10707_v37 = vrot.slane %v1761_v52, %v1777_v13 }
 0x1e4   : > { %v1471_v62 = vpop.xlane.xlu1 %1470 }
 0x1e5   : > { %8079 = vrsqrt.f32 %v1611_v41  ;;  %v1588_v31 = vmul.f32 0.001953125, %v1471_v62  ;;  %v10711_v41 = vrot.slane %v1883_v27, %v1769_v29 }
 0x1e6   : > { %v1476_v59 = vpop.xlane.xlu0 %1475 }
 0x1e7   : > { %v1613_v32 = vadd.f32 1e-05, %v1588_v31  ;;  %v1589_v15 = vmul.f32 0.001953125, %v1476_v59  ;;  %v10713_v31 = vrot.slane %v1883_v27, %v1773_v33  ;;  %v10715_v59 = vrot.slane %v1883_v27, %v1777_v13 }
 0x1e9   : > { %8081 = vrsqrt.f32 %v1613_v32  ;;  %v1481_v16 = vpop.xlane.xlu1 %1480  ;;  %v1614_v39 = vadd.f32 1e-05, %v1589_v15 }
 0x1ea   : > { %v1590_v57 = vmul.f32 0.001953125, %v1481_v16 }
 0x1eb   : > { %8083 = vrsqrt.f32 %v1614_v39  ;;  %v13720_v39 = vld [vmem:[#allocation56_spill] sm:$0xff] }
 0x1ec   : > { %v8078_v62 = vpop.eup %8077  ;;  %v1615_v32 = vadd.f32 1e-05, %v1590_v57 }
 0x1ed   : > { %v1665_v54 = vmul.f32 %v8078_v62, %v10186_v45  ;;  %v1666_v15 = vmul.f32 %v8078_v62, %v10189_v56  ;;  %v1667_v16 = vmul.f32 %v8078_v62, %v10192_v18  ;;  %v1668_v52 = vmul.f32 %v8078_v62, %v10195_v43  ;;  %v1491_v55 = vpop.xlane.xlu1 %1490  ;;  %v13721_v45 = vld [vmem:[#allocation57_spill] sm:$0xff]  ;;  %v13722_v56 = vld [vmem:[#allocation58_spill] sm:$0xff] }
 0x1ee   : > { %8085 = vrsqrt.f32 %v1615_v32 }
 0x1ef   : > { %v8080_v58 = vpop.eup %8079  ;;  %v1787_v29 = vmul.f32 %v10701_v49, %v1665_v54  ;;  %v1788_v33 = vmul.f32 %v10703_v4, %v1666_v15  ;;  %v1789_v13 = vmul.f32 %v10705_v5, %v1667_v16  ;;  %v1790_v27 = vmul.f32 %v10707_v37, %v1668_v52 }
 0x1f0   : > { %v1661_v57 = vmul.f32 %v8080_v58, %v13720_v39  ;;  %v1662_v60 = vmul.f32 %v8080_v58, %v13721_v45  ;;  %v1663_v3 = vmul.f32 %v8080_v58, %v13722_v56  ;;  %v1664_v18 = vmul.f32 %v8080_v58, %v10211_v63 }
 0x1f1   : > { %v1909_v43 = vadd.f32 %v10709_v19, %v1787_v29  ;;  %v1910_v62 = vadd.f32 %v10711_v41, %v1788_v33  ;;  %v1911_v54 = vadd.f32 %v10713_v31, %v1789_v13  ;;  %v1912_v32 = vadd.f32 %v10715_v59, %v1790_v27  ;;  %v1486_v15 = vpop.xlane.xlu0 %1485 }
 0x1f2   : > { %v1783_v16 = vmul.f32 %v10701_v49, %v1661_v57  ;;  %v1784_v52 = vmul.f32 %v10703_v4, %v1662_v60  ;;  %v1785_v39 = vmul.f32 %v10705_v5, %v1663_v3  ;;  %v1786_v45 = vmul.f32 %v10707_v37, %v1664_v18 }
 0x1f3   : > { %v8082_v56 = vpop.eup %8081  ;;  %v7595_v17 = vpack.c.bf16 %v1910_v62, %v1909_v43  ;;  %v7596_v63 = vpack.c.bf16 %v1912_v32, %v1911_v54  ;;  %v1592_v58 = vmul.f32 0.001953125, %v1491_v55  ;;  %v1591_v29 = vmul.f32 0.001953125, %v1486_v15 }
 0x1f4   : > { %v1905_v33 = vadd.f32 %v10709_v19, %v1783_v16  ;;  %v1906_v13 = vadd.f32 %v10711_v41, %v1784_v52  ;;  %v1907_v27 = vadd.f32 %v10713_v31, %v1785_v39  ;;  %v1908_v22 = vadd.f32 %v10715_v59, %v1786_v45  ;;  %v1501_v57 = vpop.xlane.xlu1 %1500 }
 0x1f5   : > { %2311 = vst [vmem:[#allocation2 + $0x10] sm:$0xff] %v7595_v17  ;;  %2312 = vst [vmem:[#allocation2 + $0x18] sm:$0xff] %v7596_v63  ;;  %v1669_v3 = vmul.f32 %v8082_v56, %v10222_v23  ;;  %v1670_v60 = vmul.f32 %v8082_v56, %v10225_v30  ;;  %v1671_v18 = vmul.f32 %v8082_v56, %v10232_v48  ;;  %v8084_v43 = vpop.eup %8083  ;;  %v1617_v32 = vadd.f32 1e-05, %v1592_v58 }
 0x1f6   : > { %v1672_v55 = vmul.f32 %v8082_v56, %v10243_v11  ;;  %v7593_v62 = vpack.c.bf16 %v1906_v13, %v1905_v33  ;;  %v7594_v54 = vpack.c.bf16 %v1908_v22, %v1907_v27  ;;  %v1616_v15 = vadd.f32 1e-05, %v1591_v29 }
 0x1f7   : > { %v1791_v16 = vmul.f32 %v10701_v49, %v1669_v3  ;;  %v1792_v52 = vmul.f32 %v10703_v4, %v1670_v60  ;;  %v1793_v17 = vmul.f32 %v10705_v5, %v1671_v18  ;;  %v1673_v30 = vmul.f32 %v8084_v43, %v10235_v9  ;;  %v13723_v60 = vld [vmem:[#allocation59_spill] sm:$0xff] }
 0x1f8   : > { %v1794_v39 = vmul.f32 %v10707_v37, %v1672_v55  ;;  %v8086_v23 = vpop.eup %8085  ;;  %2309 = vst [vmem:[#allocation2] sm:$0xff] %v7593_v62  ;;  %2310 = vst [vmem:[#allocation2 + $0x8] sm:$0xff] %v7594_v54  ;;  %v1674_v11 = vmul.f32 %v8084_v43, %v10238_v35  ;;  %v1675_v48 = vmul.f32 %v8084_v43, %v10250_v51  ;;  %v1496_v45 = vpop.xlane.xlu0 %1495  ;;  %8087 = vrsqrt.f32 %v1617_v32 }
 0x1f9   : > { %v1676_v22 = vmul.f32 %v8084_v43, %v10253_v21  ;;  %v1913_v56 = vadd.f32 %v10709_v19, %v1791_v16  ;;  %v1914_v63 = vadd.f32 %v10711_v41, %v1792_v52  ;;  %v1915_v58 = vadd.f32 %v10713_v31, %v1793_v17  ;;  %v13724_v16 = vld [vmem:[#allocation60_spill] sm:$0xff] }
 0x1fa   : > { %v1916_v29 = vadd.f32 %v10715_v59, %v1794_v39  ;;  %v1795_v33 = vmul.f32 %v10701_v49, %v1673_v30  ;;  %v1796_v13 = vmul.f32 %v10703_v4, %v1674_v11  ;;  %v1797_v9 = vmul.f32 %v10705_v5, %v1675_v48 }
 0x1fb   : > { %v1798_v35 = vmul.f32 %v10707_v37, %v1676_v22  ;;  %v1511_v51 = vpop.xlane.xlu1 %1510  ;;  %v7597_v27 = vpack.c.bf16 %v1914_v63, %v1913_v56  ;;  %v1677_v3 = vmul.f32 %v8086_v23, %v10258_v40  ;;  %v1678_v18 = vmul.f32 %v8086_v23, %v13723_v60 }
 0x1fc   : > { %v7598_v21 = vpack.c.bf16 %v1916_v29, %v1915_v58  ;;  %v1917_v55 = vadd.f32 %v10709_v19, %v1795_v33  ;;  %v1918_v43 = vadd.f32 %v10711_v41, %v1796_v13  ;;  %v1919_v62 = vadd.f32 %v10713_v31, %v1797_v9 }
 0x1fd   : > { %v1920_v54 = vadd.f32 %v10715_v59, %v1798_v35  ;;  %2313 = vst [vmem:[#allocation2 + $0x20] sm:$0xff] %v7597_v27  ;;  %v1679_v52 = vmul.f32 %v8086_v23, %v13724_v16  ;;  %v1680_v17 = vmul.f32 %v8086_v23, %v10277_v24  ;;  %v1799_v39 = vmul.f32 %v10701_v49, %v1677_v3 }
 0x1fe   : > { %2314 = vst [vmem:[#allocation2 + $0x28] sm:$0xff] %v7598_v21  ;;  %v1800_v40 = vmul.f32 %v10703_v4, %v1678_v18  ;;  %v7599_v30 = vpack.c.bf16 %v1918_v43, %v1917_v55  ;;  %v1594_v48 = vmul.f32 0.001953125, %v1501_v57  ;;  %v1506_v22 = vpop.xlane.xlu0 %1505  ;;  %8089 = vrsqrt.f32 %v1616_v15 }
 0x1ff   : > { %v7600_v11 = vpack.c.bf16 %v1920_v54, %v1919_v62  ;;  %v1801_v56 = vmul.f32 %v10705_v5, %v1679_v52  ;;  %v1802_v63 = vmul.f32 %v10707_v37, %v1680_v17  ;;  %v1921_v58 = vadd.f32 %v10709_v19, %v1799_v39 }
 0x200   : > { %v1922_v29 = vadd.f32 %v10711_v41, %v1800_v40  ;;  %2315 = vst [vmem:[#allocation2 + $0x30] sm:$0xff] %v7599_v30  ;;  %v1619_v24 = vadd.f32 1e-05, %v1594_v48  ;;  %v1593_v23 = vmul.f32 0.001953125, %v1496_v45  ;;  %v1596_v33 = vmul.f32 0.001953125, %v1511_v51 }
 0x201   : > { %2316 = vst [vmem:[#allocation2 + $0x38] sm:$0xff] %v7600_v11  ;;  %v1923_v9 = vadd.f32 %v10713_v31, %v1801_v56  ;;  %v1924_v57 = vadd.f32 %v10715_v59, %v1802_v63  ;;  %v1595_v35 = vmul.f32 0.001953125, %v1506_v22 }
 0x202   : > { %v1521_v13 = vpop.xlane.xlu1 %1520  ;;  %v7601_v32 = vpack.c.bf16 %v1922_v29, %v1921_v58  ;;  %8091 = vrsqrt.f32 %v1619_v24  ;;  %v1618_v27 = vadd.f32 1e-05, %v1593_v23  ;;  %v1621_v21 = vadd.f32 1e-05, %v1596_v33  ;;  %v8088_v62 = vpop.eup %8087 }
 0x203   : > { %v1598_v3 = vmul.f32 0.001953125, %v1521_v13  ;;  %v7602_v60 = vpack.c.bf16 %v1924_v57, %v1923_v9  ;;  %v1620_v18 = vadd.f32 1e-05, %v1595_v35  ;;  %v1685_v16 = vmul.f32 %v8088_v62, %v10294_v10 }
 0x204   : > { %2317 = vst [vmem:[#allocation2 + $0x40] sm:$0xff] %v7601_v32  ;;  %8093 = vrsqrt.f32 %v1618_v27  ;;  %v1686_v52 = vmul.f32 %v8088_v62, %v10297_v47  ;;  %v1687_v17 = vmul.f32 %v8088_v62, %v10300_v7  ;;  %v1688_v39 = vmul.f32 %v8088_v62, %v10305_v46  ;;  %v13725_v46 = vld [vmem:[#allocation63_spill] sm:$0xff]  ;;  %v13726_v27 = vld [vmem:[#allocation64_spill] sm:$0xff]  ;;  %v13728_v62 = vld [vmem:[#allocation66_spill] sm:$0xff] }
 0x205   : > { %v1623_v55 = vadd.f32 1e-05, %v1598_v3  ;;  %2318 = vst [vmem:[#allocation2 + $0x48] sm:$0xff] %v7602_v60  ;;  %8095 = vrsqrt.f32 %v1621_v21  ;;  %v1807_v11 = vmul.f32 %v10701_v49, %v1685_v16  ;;  %v13727_v3 = vld [vmem:[#allocation65_spill] sm:$0xff] }
 0x206   : > { %v1516_v43 = vpop.xlane.xlu0 %1515  ;;  %8097 = vrsqrt.f32 %v1620_v18  ;;  %v1808_v48 = vmul.f32 %v10703_v4, %v1686_v52  ;;  %v1809_v22 = vmul.f32 %v10705_v5, %v1687_v17  ;;  %v1810_v56 = vmul.f32 %v10707_v37, %v1688_v39  ;;  %v13729_v16 = vld [vmem:[#allocation69_spill] sm:$0xff] }
 0x207   : > { %v1597_v15 = vmul.f32 0.001953125, %v1516_v43  ;;  %8099 = vrsqrt.f32 %v1623_v55  ;;  %v1929_v24 = vadd.f32 %v10709_v19, %v1807_v11 }
 0x208   : > { %v8090_v40 = vpop.eup %8089  ;;  %v1930_v23 = vadd.f32 %v10711_v41, %v1808_v48  ;;  %v1931_v33 = vadd.f32 %v10713_v31, %v1809_v22  ;;  %v1932_v13 = vadd.f32 %v10715_v59, %v1810_v56  ;;  %v13730_v22 = vld [vmem:[#allocation67_spill] sm:$0xff] }
 0x209   : > { %v1622_v45 = vadd.f32 1e-05, %v1597_v15  ;;  %v1531_v51 = vpop.xlane.xlu1 %1530  ;;  %v1681_v10 = vmul.f32 %v8090_v40, %v10308_v2  ;;  %v1682_v47 = vmul.f32 %v8090_v40, %v10311_v44  ;;  %v1683_v7 = vmul.f32 %v8090_v40, %v10324_v38 }
 0x20a   : > { %v1600_v54 = vmul.f32 0.001953125, %v1531_v51  ;;  %v1684_v58 = vmul.f32 %v8090_v40, %v13725_v46  ;;  %v7605_v32 = vpack.c.bf16 %v1930_v23, %v1929_v24  ;;  %v7606_v35 = vpack.c.bf16 %v1932_v13, %v1931_v33  ;;  %v13732_v13 = vld [vmem:[#allocation70_spill] sm:$0xff] }
 0x20b   : > { %8101 = vrsqrt.f32 %v1622_v45  ;;  %v1803_v9 = vmul.f32 %v10701_v49, %v1681_v10  ;;  %v1804_v2 = vmul.f32 %v10703_v4, %v1682_v47  ;;  %v1805_v44 = vmul.f32 %v10705_v5, %v1683_v7  ;;  %v13731_v10 = vld [vmem:[#allocation68_spill] sm:$0xff] }
 0x20c   : > { %v10781_v30 = vadd.f32 1e-05, %v1600_v54  ;;  %v8092_v63 = vpop.eup %8091  ;;  %v1806_v38 = vmul.f32 %v10707_v37, %v1684_v58  ;;  %2321 = vst [vmem:[#allocation2 + $0x60] sm:$0xff] %v7605_v32  ;;  %2322 = vst [vmem:[#allocation2 + $0x68] sm:$0xff] %v7606_v35 }
 0x20d   : > { %v10791_v29 = vpop.xlane.xlu0 %1525  ;;  %v1693_v21 = vmul.f32 %v8092_v63, %v13726_v27  ;;  %v1694_v60 = vmul.f32 %v8092_v63, %v13727_v3  ;;  %v1925_v55 = vadd.f32 %v10709_v19, %v1803_v9  ;;  %v1926_v43 = vadd.f32 %v10711_v41, %v1804_v2  ;;  %v13733_v2 = vld [vmem:[#allocation73_spill] sm:$0xff]  ;;  %v13734_v3 = vld [vmem:[#allocation71_spill] sm:$0xff] }
 0x20e   : > { %v8094_v57 = vpop.eup %8093  ;;  %v1927_v15 = vadd.f32 %v10713_v31, %v1805_v44  ;;  %v1928_v45 = vadd.f32 %v10715_v59, %v1806_v38  ;;  %v1695_v54 = vmul.f32 %v8092_v63, %v13728_v62  ;;  %v1696_v52 = vmul.f32 %v8092_v63, %v13729_v16  ;;  %v13735_v62 = vld [vmem:[#allocation72_spill] sm:$0xff]  ;;  %v13736_v16 = vld [vmem:[#allocation74_spill] sm:$0xff] }
 0x20f   : > { %v8096_v18 = vpop.eup %8095  ;;  %v1815_v17 = vmul.f32 %v10701_v49, %v1693_v21  ;;  %v1816_v39 = vmul.f32 %v10703_v4, %v1694_v60  ;;  %v7603_v11 = vpack.c.bf16 %v1926_v43, %v1925_v55  ;;  %v1689_v56 = vmul.f32 %v8094_v57, %v13730_v22 }
 0x210   : > { %v8098_v51 = vpop.eup %8097  ;;  %v7604_v48 = vpack.c.bf16 %v1928_v45, %v1927_v15  ;;  %v1690_v47 = vmul.f32 %v8094_v57, %v13731_v10  ;;  %v10815_v7 = vpop.xlane.xlu1 %1540  ;;  %v1817_v58 = vmul.f32 %v10705_v5, %v1695_v54  ;;  %v1818_v63 = vmul.f32 %v10707_v37, %v1696_v52 }
 0x211   : > { %v10811_v40 = vpop.eup %8099  ;;  %v1937_v24 = vadd.f32 %v10709_v19, %v1815_v17  ;;  %v1938_v23 = vadd.f32 %v10711_v41, %v1816_v39  ;;  %2319 = vst [vmem:[#allocation2 + $0x50] sm:$0xff] %v7603_v11  ;;  %v1691_v9 = vmul.f32 %v8094_v57, %v13732_v13  ;;  %v1692_v44 = vmul.f32 %v8094_v57, %v13733_v2  ;;  %v13737_v17 = vld [vmem:[#allocation6_spill] sm:$0xff]  ;;  %v13739_v2 = vld [vmem:[#allocation8_spill] sm:$0xff] }
 0x212   : > { %2320 = vst [vmem:[#allocation2 + $0x58] sm:$0xff] %v7604_v48  ;;  %v1811_v38 = vmul.f32 %v10701_v49, %v1689_v56  ;;  %v1812_v32 = vmul.f32 %v10703_v4, %v1690_v47  ;;  %v1939_v35 = vadd.f32 %v10713_v31, %v1817_v58  ;;  %v1940_v27 = vadd.f32 %v10715_v59, %v1818_v63 }
 0x213   : > { %v10817_v46 = vpop.xlane.xlu0 %1535  ;;  %v7609_v21 = vpack.c.bf16 %v1938_v23, %v1937_v24  ;;  %v1701_v60 = vmul.f32 %v8096_v18, %v13734_v3  ;;  %v1813_v55 = vmul.f32 %v10705_v5, %v1691_v9  ;;  %v1814_v43 = vmul.f32 %v10707_v37, %v1692_v44  ;;  %v13738_v23 = vld [vmem:[#allocation7_spill] sm:$0xff]  ;;  %v13741_v3 = vld [vmem:[#allocation10_spill] sm:$0xff] }
 0x214   : > { %v1933_v15 = vadd.f32 %v10709_v19, %v1811_v38  ;;  %v1934_v45 = vadd.f32 %v10711_v41, %v1812_v32  ;;  %v7610_v57 = vpack.c.bf16 %v1940_v27, %v1939_v35  ;;  %v1702_v54 = vmul.f32 %v8096_v18, %v13735_v62  ;;  %v13740_v38 = vld [vmem:[#allocation9_spill] sm:$0xff] }
 0x215   : > { %v10823_v33 = vpop.eup %8101  ;;  %2325 = vst [vmem:[#allocation2 + $0x80] sm:$0xff] %v7609_v21  ;;  %v1703_v52 = vmul.f32 %v8096_v18, %v13736_v16  ;;  %v1704_v39 = vmul.f32 %v8096_v18, %v13737_v17  ;;  %v1935_v11 = vadd.f32 %v10713_v31, %v1813_v55  ;;  %v1936_v48 = vadd.f32 %v10715_v59, %v1814_v43 }
 0x216   : > { %v7607_v22 = vpack.c.bf16 %v1934_v45, %v1933_v15  ;;  %v1823_v56 = vmul.f32 %v10701_v49, %v1701_v60  ;;  %2326 = vst [vmem:[#allocation2 + $0x88] sm:$0xff] %v7610_v57  ;;  %v1824_v58 = vmul.f32 %v10703_v4, %v1702_v54  ;;  %v1697_v18 = vmul.f32 %v8098_v51, %v13738_v23  ;;  %v13742_v45 = vld [vmem:[#allocation11_spill] sm:$0xff] }
 0x217   : > { %v1825_v63 = vmul.f32 %v10705_v5, %v1703_v52  ;;  %v1826_v24 = vmul.f32 %v10707_v37, %v1704_v39  ;;  %v7608_v13 = vpack.c.bf16 %v1936_v48, %v1935_v11  ;;  %v1698_v44 = vmul.f32 %v8098_v51, %v13739_v2  ;;  %v13743_v52 = vld [vmem:[#allocation12_spill] sm:$0xff]  ;;  %v13744_v48 = vld [vmem:[#allocation13_spill] sm:$0xff] }
 0x218   : > { %v10842_v10 = vpop.xlane.xlu1 %1550  ;;  %2323 = vst [vmem:[#allocation2 + $0x70] sm:$0xff] %v7607_v22  ;;  %v1945_v9 = vadd.f32 %v10709_v19, %v1823_v56  ;;  %v1699_v32 = vmul.f32 %v8098_v51, %v13740_v38  ;;  %v1946_v35 = vadd.f32 %v10711_v41, %v1824_v58  ;;  %v1700_v60 = vmul.f32 %v8098_v51, %v13741_v3 }
 0x219   : > { %v1947_v27 = vadd.f32 %v10713_v31, %v1825_v63  ;;  %v1948_v21 = vadd.f32 %v10715_v59, %v1826_v24  ;;  %2324 = vst [vmem:[#allocation2 + $0x78] sm:$0xff] %v7608_v13  ;;  %v1819_v55 = vmul.f32 %v10701_v49, %v1697_v18  ;;  %v1820_v43 = vmul.f32 %v10703_v4, %v1698_v44  ;;  %v13745_v24 = vld [vmem:[#allocation14_spill] sm:$0xff]  ;;  %v13746_v44 = vld [vmem:[#allocation15_spill] sm:$0xff] }
 0x21a   : > { %v1821_v15 = vmul.f32 %v10705_v5, %v1699_v32  ;;  %v1709_v57 = vmul.f32 %v10811_v40, %v13742_v45  ;;  %v7613_v62 = vpack.c.bf16 %v1946_v35, %v1945_v9  ;;  %v1822_v16 = vmul.f32 %v10707_v37, %v1700_v60  ;;  %v13747_v32 = vld [vmem:[#allocation16_spill] sm:$0xff] }
 0x21b   : > { %v10844_v47 = vpop.xlane.xlu0 %1545  ;;  %v7614_v54 = vpack.c.bf16 %v1948_v21, %v1947_v27  ;;  %v1710_v17 = vmul.f32 %v10811_v40, %v13743_v52  ;;  %v1941_v39 = vadd.f32 %v10709_v19, %v1819_v55  ;;  %v1942_v51 = vadd.f32 %v10711_v41, %v1820_v43  ;;  %v13748_v55 = vld [vmem:[#allocation17_spill] sm:$0xff] }
 0x21c   : > { %v1943_v11 = vadd.f32 %v10713_v31, %v1821_v15  ;;  %v1711_v22 = vmul.f32 %v10811_v40, %v13744_v48  ;;  %2329 = vst [vmem:[#allocation2 + $0xa0] sm:$0xff] %v7613_v62  ;;  %v1944_v63 = vadd.f32 %v10715_v59, %v1822_v16  ;;  %v1712_v23 = vmul.f32 %v10811_v40, %v13745_v24  ;;  %v13749_v15 = vld [vmem:[#allocation18_spill] sm:$0xff] }
 0x21d   : > { %v1561_v56 = vpop.xlane.xlu1 %1560  ;;  %2330 = vst [vmem:[#allocation2 + $0xa8] sm:$0xff] %v7614_v54  ;;  %v1831_v18 = vmul.f32 %v10701_v49, %v1709_v57  ;;  %v1832_v13 = vmul.f32 %v10703_v4, %v1710_v17  ;;  %v7611_v9 = vpack.c.bf16 %v1942_v51, %v1941_v39  ;;  %v1705_v38 = vmul.f32 %v10823_v33, %v13746_v44 }
 0x21e   : > { %v1833_v2 = vmul.f32 %v10705_v5, %v1711_v22  ;;  %v1706_v35 = vmul.f32 %v10823_v33, %v13747_v32  ;;  %v7612_v27 = vpack.c.bf16 %v1944_v63, %v1943_v11  ;;  %v1834_v21 = vmul.f32 %v10707_v37, %v1712_v23 }
 0x21f   : > { %v1953_v3 = vadd.f32 %v10709_v19, %v1831_v18  ;;  %v1954_v40 = vadd.f32 %v10711_v41, %v1832_v13  ;;  %2327 = vst [vmem:[#allocation2 + $0x90] sm:$0xff] %v7611_v9  ;;  %v1707_v43 = vmul.f32 %v10823_v33, %v13748_v55  ;;  %v1708_v45 = vmul.f32 %v10823_v33, %v13749_v15 }
 0x220   : > { %v1556_v58 = vpop.xlane.xlu0 %1555  ;;  %v1955_v60 = vadd.f32 %v10713_v31, %v1833_v2  ;;  %v1827_v57 = vmul.f32 %v10701_v49, %v1705_v38  ;;  %2328 = vst [vmem:[#allocation2 + $0x98] sm:$0xff] %v7612_v27  ;;  %v1956_v62 = vadd.f32 %v10715_v59, %v1834_v21  ;;  %v1828_v16 = vmul.f32 %v10703_v4, %v1706_v35 }
 0x221   : > { %v7617_v54 = vpack.c.bf16 %v1954_v40, %v1953_v3  ;;  %8103 = vrsqrt.f32 %v10781_v30  ;;  %v1829_v52 = vmul.f32 %v10705_v5, %v1707_v43  ;;  %v1830_v17 = vmul.f32 %v10707_v37, %v1708_v45 }
 0x222   : > { %v1949_v39 = vadd.f32 %v10709_v19, %v1827_v57  ;;  %v1599_v51 = vmul.f32 0.001953125, %v10791_v29  ;;  %v1571_v11 = vpop.xlane.xlu1 %1570  ;;  %v7618_v48 = vpack.c.bf16 %v1956_v62, %v1955_v60  ;;  %v1950_v22 = vadd.f32 %v10711_v41, %v1828_v16  ;;  %v13751_v57 = vld [vmem:[#allocation20_spill] sm:$0xff]  ;;  %v13753_v16 = vld [vmem:[#allocation22_spill] sm:$0xff] }
 0x223   : > { %2333 = vst [vmem:[#allocation2 + $0xc0] sm:$0xff] %v7617_v54  ;;  %v1602_v63 = vmul.f32 0.001953125, %v10815_v7  ;;  %v1601_v24 = vmul.f32 0.001953125, %v10817_v46  ;;  %v1951_v30 = vadd.f32 %v10713_v31, %v1829_v52  ;;  %v1952_v23 = vadd.f32 %v10715_v59, %v1830_v17 }
 0x224   : > { %v1624_v18 = vadd.f32 1e-05, %v1599_v51  ;;  %v1604_v13 = vmul.f32 0.001953125, %v10842_v10  ;;  %2334 = vst [vmem:[#allocation2 + $0xc8] sm:$0xff] %v7618_v48  ;;  %v7615_v9 = vpack.c.bf16 %v1950_v22, %v1949_v39  ;;  %v1603_v44 = vmul.f32 0.001953125, %v10844_v47 }
 0x225   : > { %v1566_v33 = vpop.xlane.xlu0 %1565  ;;  %v1627_v29 = vadd.f32 1e-05, %v1602_v63  ;;  %v1626_v2 = vadd.f32 1e-05, %v1601_v24  ;;  %v7616_v38 = vpack.c.bf16 %v1952_v23, %v1951_v30  ;;  %v1606_v35 = vmul.f32 0.001953125, %v1561_v56  ;;  %v13750_v56 = vld [vmem:[#allocation19_spill] sm:$0xff] }
 0x226   : > { %8105 = vrsqrt.f32 %v1624_v18  ;;  %v1629_v32 = vadd.f32 1e-05, %v1604_v13  ;;  %2331 = vst [vmem:[#allocation2 + $0xb0] sm:$0xff] %v7615_v9  ;;  %v1628_v7 = vadd.f32 1e-05, %v1603_v44  ;;  %v1605_v46 = vmul.f32 0.001953125, %v1556_v58 }
 0x227   : > { %8107 = vrsqrt.f32 %v1627_v29  ;;  %v1608_v27 = vmul.f32 0.001953125, %v1571_v11  ;;  %2332 = vst [vmem:[#allocation2 + $0xb8] sm:$0xff] %v7616_v38  ;;  %v1631_v21 = vadd.f32 1e-05, %v1606_v35  ;;  %v1585_v3 = vpop.xlane.xlu1 %1584  ;;  %v1607_v60 = vmul.f32 0.001953125, %v1566_v33  ;;  %v13752_v58 = vld [vmem:[#allocation21_spill] sm:$0xff] }
 0x228   : > { %8109 = vrsqrt.f32 %v1626_v2  ;;  %v1630_v40 = vadd.f32 1e-05, %v1605_v46  ;;  %v1610_v43 = vmul.f32 0.001953125, %v1585_v3  ;;  %v13754_v9 = vld [vmem:[#allocation23_spill] sm:$0xff]  ;;  %v13755_v2 = vld [vmem:[#allocation24_spill] sm:$0xff]  ;;  %v13756_v38 = vld [vmem:[#allocation25_spill] sm:$0xff] }
 0x229   : > { %8111 = vrsqrt.f32 %v1629_v32  ;;  %v1633_v47 = vadd.f32 1e-05, %v1608_v27  ;;  %v10911_v33 = vadd.f32 1e-05, %v1607_v60  ;;  %v13757_v35 = vld [vmem:[#allocation26_spill] sm:$0xff]  ;;  %v13758_v3 = vld [vmem:[#allocation27_spill] sm:$0xff] }
 0x22a   : > { %v1576_v10 = vpop.xlane.xlu0 %1575  ;;  %8113 = vrsqrt.f32 %v1628_v7  ;;  %v10913_v48 = vadd.f32 1e-05, %v1610_v43 }
 0x22b   : > { %v8104_v55 = vpop.eup %8103  ;;  %8115 = vrsqrt.f32 %v1631_v21  ;;  %v1609_v15 = vmul.f32 0.001953125, %v1576_v10 }
 0x22c   : > { %v1717_v45 = vmul.f32 %v8104_v55, %v13750_v56  ;;  %v1718_v62 = vmul.f32 %v8104_v55, %v13751_v57  ;;  %v1719_v54 = vmul.f32 %v8104_v55, %v13752_v58  ;;  %v1720_v52 = vmul.f32 %v8104_v55, %v13753_v16  ;;  %v13760_v57 = vld [vmem:[#allocation29_spill] sm:$0xff]  ;;  %v13761_v58 = vld [vmem:[#allocation30_spill] sm:$0xff] }
 0x22d   : > { %8117 = vrsqrt.f32 %v1630_v40  ;;  %v10915_v22 = vadd.f32 1e-05, %v1609_v15  ;;  %v13759_v40 = vld [vmem:[#allocation28_spill] sm:$0xff] }
 0x22e   : > { %v1839_v17 = vmul.f32 %v10701_v49, %v1717_v45  ;;  %v1840_v39 = vmul.f32 %v10703_v4, %v1718_v62  ;;  %v1841_v51 = vmul.f32 %v10705_v5, %v1719_v54  ;;  %v1842_v11 = vmul.f32 %v10707_v37, %v1720_v52 }
 0x22f   : > { %8119 = vrsqrt.f32 %v1633_v47 }
 0x230   : > { %v8106_v63 = vpop.eup %8105  ;;  %v1961_v24 = vadd.f32 %v10709_v19, %v1839_v17  ;;  %v1962_v30 = vadd.f32 %v10711_v41, %v1840_v39  ;;  %v1963_v23 = vadd.f32 %v10713_v31, %v1841_v51  ;;  %v1964_v18 = vadd.f32 %v10715_v59, %v1842_v11 }
 0x231   : > { %v8108_v13 = vpop.eup %8107  ;;  %v1713_v29 = vmul.f32 %v8106_v63, %v13754_v9  ;;  %v1714_v44 = vmul.f32 %v8106_v63, %v13755_v2  ;;  %v1715_v32 = vmul.f32 %v8106_v63, %v13756_v38  ;;  %v1716_v7 = vmul.f32 %v8106_v63, %v13757_v35  ;;  %v13762_v2 = vld [vmem:[#allocation31_spill] sm:$0xff]  ;;  %v13763_v38 = vld [vmem:[#allocation32_spill] sm:$0xff] }
 0x232   : > { %v8110_v46 = vpop.eup %8109  ;;  %v7621_v27 = vpack.c.bf16 %v1962_v30, %v1961_v24  ;;  %v7622_v21 = vpack.c.bf16 %v1964_v18, %v1963_v23  ;;  %v1725_v10 = vmul.f32 %v8108_v13, %v13758_v3  ;;  %v1726_v60 = vmul.f32 %v8108_v13, %v13759_v40  ;;  %v13765_v40 = vld [vmem:[#allocation34_spill] sm:$0xff] }
 0x233   : > { %v8112_v55 = vpop.eup %8111  ;;  %v1835_v47 = vmul.f32 %v10701_v49, %v1713_v29  ;;  %v1836_v43 = vmul.f32 %v10703_v4, %v1714_v44  ;;  %v1837_v15 = vmul.f32 %v10705_v5, %v1715_v32  ;;  %v1838_v56 = vmul.f32 %v10707_v37, %v1716_v7 }
 0x234   : > { %v8114_v45 = vpop.eup %8113  ;;  %2337 = vst [vmem:[#allocation2 + $0xe0] sm:$0xff] %v7621_v27  ;;  %2338 = vst [vmem:[#allocation2 + $0xe8] sm:$0xff] %v7622_v21  ;;  %v1727_v62 = vmul.f32 %v8108_v13, %v13760_v57  ;;  %v1728_v54 = vmul.f32 %v8108_v13, %v13761_v58  ;;  %v1847_v16 = vmul.f32 %v10701_v49, %v1725_v10  ;;  %v13764_v21 = vld [vmem:[#allocation33_spill] sm:$0xff]  ;;  %v13767_v58 = vld [vmem:[#allocation36_spill] sm:$0xff]  ;;  %8121 = vrsqrt.f32 %v10911_v33 }
 0x235   : > { %v1848_v52 = vmul.f32 %v10703_v4, %v1726_v60  ;;  %v10935_v17 = vpop.eup %8115  ;;  %v1957_v39 = vadd.f32 %v10709_v19, %v1835_v47  ;;  %v1958_v51 = vadd.f32 %v10711_v41, %v1836_v43  ;;  %v1959_v11 = vadd.f32 %v10713_v31, %v1837_v15  ;;  %v13766_v15 = vld [vmem:[#allocation35_spill] sm:$0xff] }
 0x236   : > { %v1960_v63 = vadd.f32 %v10715_v59, %v1838_v56  ;;  %v1849_v24 = vmul.f32 %v10705_v5, %v1727_v62  ;;  %v1850_v30 = vmul.f32 %v10707_v37, %v1728_v54  ;;  %v1969_v23 = vadd.f32 %v10709_v19, %v1847_v16  ;;  %v13768_v16 = vld [vmem:[#allocation37_spill] sm:$0xff] }
 0x237   : > { %v1970_v18 = vadd.f32 %v10711_v41, %v1848_v52  ;;  %v10945_v13 = vpop.eup %8117  ;;  %v7619_v9 = vpack.c.bf16 %v1958_v51, %v1957_v39  ;;  %v1721_v44 = vmul.f32 %v8110_v46, %v13762_v2  ;;  %v1722_v32 = vmul.f32 %v8110_v46, %v13763_v38 }
 0x238   : > { %v7620_v29 = vpack.c.bf16 %v1960_v63, %v1959_v11  ;;  %v1971_v35 = vadd.f32 %v10713_v31, %v1849_v24  ;;  %v1972_v7 = vadd.f32 %v10715_v59, %v1850_v30  ;;  %v1723_v3 = vmul.f32 %v8110_v46, %v13764_v21  ;;  %v13769_v11 = vld [vmem:[#allocation38_spill] sm:$0xff] }
 0x239   : > { %v7625_v27 = vpack.c.bf16 %v1970_v18, %v1969_v23  ;;  %v10952_v10 = vpop.eup %8119  ;;  %2335 = vst [vmem:[#allocation2 + $0xd0] sm:$0xff] %v7619_v9  ;;  %v1724_v60 = vmul.f32 %v8110_v46, %v13765_v40  ;;  %v1843_v47 = vmul.f32 %v10701_v49, %v1721_v44  ;;  %v1844_v43 = vmul.f32 %v10703_v4, %v1722_v32  ;;  %v13770_v44 = vld [vmem:[#allocation39_spill] sm:$0xff]  ;;  %v13772_v40 = vld [vmem:[#allocation44_spill] sm:$0xff] }
 0x23a   : > { %2336 = vst [vmem:[#allocation2 + $0xd8] sm:$0xff] %v7620_v29  ;;  %v1733_v56 = vmul.f32 %v8112_v55, %v13766_v15  ;;  %v7626_v57 = vpack.c.bf16 %v1972_v7, %v1971_v35  ;;  %v1845_v62 = vmul.f32 %v10705_v5, %v1723_v3  ;;  %v1734_v54 = vmul.f32 %v8112_v55, %v13767_v58  ;;  %v13771_v7 = vld [vmem:[#allocation40_spill] sm:$0xff] }
 0x23b   : > { %2341 = vst [vmem:[#allocation2 + $0x100] sm:$0xff] %v7625_v27  ;;  %v1735_v52 = vmul.f32 %v8112_v55, %v13768_v16  ;;  %v1846_v39 = vmul.f32 %v10707_v37, %v1724_v60  ;;  %v1965_v51 = vadd.f32 %v10709_v19, %v1843_v47  ;;  %v1966_v46 = vadd.f32 %v10711_v41, %v1844_v43  ;;  %v13773_v47 = vld [vmem:[#allocation47_spill] sm:$0xff] }
 0x23c   : > { %v1736_v63 = vmul.f32 %v8112_v55, %v13769_v11  ;;  %2342 = vst [vmem:[#allocation2 + $0x108] sm:$0xff] %v7626_v57  ;;  %v1967_v24 = vadd.f32 %v10713_v31, %v1845_v62  ;;  %v1855_v30 = vmul.f32 %v10701_v49, %v1733_v56  ;;  %v1856_v23 = vmul.f32 %v10703_v4, %v1734_v54  ;;  %v13774_v62 = vld [vmem:[#allocation43_spill] sm:$0xff] }
 0x23d   : > { %v1857_v18 = vmul.f32 %v10705_v5, %v1735_v52  ;;  %v1968_v9 = vadd.f32 %v10715_v59, %v1846_v39  ;;  %v7623_v29 = vpack.c.bf16 %v1966_v46, %v1965_v51  ;;  %v1729_v38 = vmul.f32 %v8114_v45, %v13770_v44 }
 0x23e   : > { %v1858_v2 = vmul.f32 %v10707_v37, %v1736_v63  ;;  %v1977_v32 = vadd.f32 %v10709_v19, %v1855_v30  ;;  %v1978_v55 = vadd.f32 %v10711_v41, %v1856_v23  ;;  %v1730_v27 = vmul.f32 %v8114_v45, %v13771_v7  ;;  %v8122_v33 = vpop.eup %8121 }
 0x23f   : > { %v1979_v35 = vadd.f32 %v10713_v31, %v1857_v18  ;;  %v7624_v21 = vpack.c.bf16 %v1968_v9, %v1967_v24  ;;  %2339 = vst [vmem:[#allocation2 + $0xf0] sm:$0xff] %v7623_v29  ;;  %v1731_v60 = vmul.f32 %v8114_v45, %v13772_v40  ;;  %v1732_v43 = vmul.f32 %v8114_v45, %v13773_v47 }
 0x240   : > { %v1980_v3 = vadd.f32 %v10715_v59, %v1858_v2  ;;  %v7629_v15 = vpack.c.bf16 %v1978_v55, %v1977_v32  ;;  %v1851_v56 = vmul.f32 %v10701_v49, %v1729_v38  ;;  %v1852_v57 = vmul.f32 %v10703_v4, %v1730_v27 }
 0x241   : > { %v1741_v58 = vmul.f32 %v10935_v17, %v13774_v62  ;;  %2340 = vst [vmem:[#allocation2 + $0xf8] sm:$0xff] %v7624_v21  ;;  %v1853_v16 = vmul.f32 %v10705_v5, %v1731_v60  ;;  %v1854_v52 = vmul.f32 %v10707_v37, %v1732_v43  ;;  %v1742_v39 = vmul.f32 %v10935_v17, %v10563_v14 }
 0x242   : > { %v7630_v54 = vpack.c.bf16 %v1980_v3, %v1979_v35  ;;  %2345 = vst [vmem:[#allocation2 + $0x120] sm:$0xff] %v7629_v15  ;;  %v1973_v45 = vadd.f32 %v10709_v19, %v1851_v56  ;;  %v1974_v51 = vadd.f32 %v10711_v41, %v1852_v57  ;;  %v1743_v46 = vmul.f32 %v10935_v17, %v10600_v50 }
 0x243   : > { %v1744_v11 = vmul.f32 %v10935_v17, %v10607_v0  ;;  %v1975_v63 = vadd.f32 %v10713_v31, %v1853_v16  ;;  %v1976_v24 = vadd.f32 %v10715_v59, %v1854_v52  ;;  %v1863_v30 = vmul.f32 %v10701_v49, %v1741_v58 }
 0x244   : > { %2346 = vst [vmem:[#allocation2 + $0x128] sm:$0xff] %v7630_v54  ;;  %v1864_v14 = vmul.f32 %v10703_v4, %v1742_v39  ;;  %v7627_v23 = vpack.c.bf16 %v1974_v51, %v1973_v45  ;;  %v1865_v18 = vmul.f32 %v10705_v5, %v1743_v46  ;;  %v1737_v50 = vmul.f32 %v10945_v13, %v10570_v1 }
 0x245   : > { %v1866_v9 = vmul.f32 %v10707_v37, %v1744_v11  ;;  %v7628_v29 = vpack.c.bf16 %v1976_v24, %v1975_v63  ;;  %v1985_v0 = vadd.f32 %v10709_v19, %v1863_v30  ;;  %v1738_v2 = vmul.f32 %v10945_v13, %v10575_v28  ;;  %v13775_v11 = vld [vmem:[#allocation61_spill] sm:$0xff]  ;;  %v13776_v24 = vld [vmem:[#allocation62_spill] sm:$0xff] }
 0x246   : > { %v1986_v17 = vadd.f32 %v10711_v41, %v1864_v14  ;;  %2343 = vst [vmem:[#allocation2 + $0x110] sm:$0xff] %v7627_v23  ;;  %v1987_v44 = vadd.f32 %v10713_v31, %v1865_v18  ;;  %v1739_v32 = vmul.f32 %v10945_v13, %v10618_v34  ;;  %v1740_v55 = vmul.f32 %v10945_v13, %v10623_v42  ;;  %v13777_v14 = vld [vmem:[#allocation5_spill] sm:$0xff] }
 0x247   : > { %v1988_v38 = vadd.f32 %v10715_v59, %v1866_v9  ;;  %2344 = vst [vmem:[#allocation2 + $0x118] sm:$0xff] %v7628_v29  ;;  %v1859_v35 = vmul.f32 %v10701_v49, %v1737_v50  ;;  %v1860_v7 = vmul.f32 %v10703_v4, %v1738_v2  ;;  %v1749_v28 = vmul.f32 %v10952_v10, %v10590_v20 }
 0x248   : > { %v7633_v1 = vpack.c.bf16 %v1986_v17, %v1985_v0  ;;  %v1861_v21 = vmul.f32 %v10705_v5, %v1739_v32  ;;  %v1862_v3 = vmul.f32 %v10707_v37, %v1740_v55  ;;  %v1750_v34 = vmul.f32 %v10952_v10, %v10593_v12 }
 0x249   : > { %v7634_v27 = vpack.c.bf16 %v1988_v38, %v1987_v44  ;;  %v1981_v42 = vadd.f32 %v10709_v19, %v1859_v35  ;;  %v1982_v13 = vadd.f32 %v10711_v41, %v1860_v7  ;;  %v1751_v40 = vmul.f32 %v10952_v10, %v10630_v36  ;;  %v13778_v7 = vld [vmem:[#allocation48_spill] sm:$0xff] }
 0x24a   : > { %2349 = vst [vmem:[#allocation2 + $0x140] sm:$0xff] %v7633_v1  ;;  %v1752_v60 = vmul.f32 %v10952_v10, %v10640_v53  ;;  %v1983_v20 = vadd.f32 %v10713_v31, %v1861_v21  ;;  %v1984_v47 = vadd.f32 %v10715_v59, %v1862_v3  ;;  %v1871_v43 = vmul.f32 %v10701_v49, %v1749_v28 }
 0x24b   : > { %2350 = vst [vmem:[#allocation2 + $0x148] sm:$0xff] %v7634_v27  ;;  %v1872_v12 = vmul.f32 %v10703_v4, %v1750_v34  ;;  %v7631_v15 = vpack.c.bf16 %v1982_v13, %v1981_v42  ;;  %v1873_v56 = vmul.f32 %v10705_v5, %v1751_v40  ;;  %8123 = vrsqrt.f32 %v10913_v48  ;;  %v13779_v27 = vld [vmem:[#allocation41_spill] sm:$0xff]  ;;  %v13780_v42 = vld [vmem:[#allocation42_spill] sm:$0xff]  ;;  %v13781_v40 = vld [vmem:[#allocation51_spill] sm:$0xff] }
 0x24c   : > { %v1874_v57 = vmul.f32 %v10707_v37, %v1752_v60  ;;  %v7632_v36 = vpack.c.bf16 %v1984_v47, %v1983_v20  ;;  %v1993_v62 = vadd.f32 %v10709_v19, %v1871_v43  ;;  %8125 = vrsqrt.f32 %v10915_v22 }
 0x24d   : > { %v1994_v53 = vadd.f32 %v10711_v41, %v1872_v12  ;;  %2347 = vst [vmem:[#allocation2 + $0x130] sm:$0xff] %v7631_v15  ;;  %v1995_v10 = vadd.f32 %v10713_v31, %v1873_v56  ;;  %v1745_v39 = vmul.f32 %v8122_v33, %v10612_v26  ;;  %v1746_v45 = vmul.f32 %v8122_v33, %v10615_v6 }
 0x24e   : > { %v1996_v58 = vadd.f32 %v10715_v59, %v1874_v57  ;;  %2348 = vst [vmem:[#allocation2 + $0x138] sm:$0xff] %v7632_v36  ;;  %v1747_v48 = vmul.f32 %v8122_v33, %v10650_v61  ;;  %v1748_v51 = vmul.f32 %v8122_v33, %v10659_v25 }
 0x24f   : > { %v7637_v54 = vpack.c.bf16 %v1994_v53, %v1993_v62  ;;  %v1867_v23 = vmul.f32 %v10701_v49, %v1745_v39  ;;  %v1868_v18 = vmul.f32 %v10703_v4, %v1746_v45 }
 0x250   : > { %v7638_v16 = vpack.c.bf16 %v1996_v58, %v1995_v10  ;;  %v1869_v26 = vmul.f32 %v10705_v5, %v1747_v48  ;;  %v1870_v6 = vmul.f32 %v10707_v37, %v1748_v51 }
 0x251   : > { %2353 = vst [vmem:[#allocation2 + $0x160] sm:$0xff] %v7637_v54  ;;  %v1989_v29 = vadd.f32 %v10709_v19, %v1867_v23  ;;  %v1990_v0 = vadd.f32 %v10711_v41, %v1868_v18 }
 0x252   : > { %2354 = vst [vmem:[#allocation2 + $0x168] sm:$0xff] %v7638_v16  ;;  %v1991_v17 = vadd.f32 %v10713_v31, %v1869_v26  ;;  %v1992_v2 = vadd.f32 %v10715_v59, %v1870_v6 }
 0x253   : > { %v7635_v1 = vpack.c.bf16 %v1990_v0, %v1989_v29 }
 0x254   : > { %v7636_v35 = vpack.c.bf16 %v1992_v2, %v1991_v17 }
 0x255   : > { %v8124_v52 = vpop.eup %8123  ;;  %2351 = vst [vmem:[#allocation2 + $0x150] sm:$0xff] %v7635_v1 }
 0x256   : > { %v1757_v46 = vmul.f32 %v8124_v52, %v10287_v8  ;;  %v1758_v63 = vmul.f32 %v8124_v52, %v13775_v11  ;;  %v1759_v30 = vmul.f32 %v8124_v52, %v13776_v24  ;;  %v1760_v22 = vmul.f32 %v8124_v52, %v13777_v14  ;;  %v8126_v9 = vpop.eup %8125  ;;  %2352 = vst [vmem:[#allocation2 + $0x158] sm:$0xff] %v7636_v35 }
 0x257   : > { %v1753_v28 = vmul.f32 %v8126_v9, %v13778_v7  ;;  %v1754_v21 = vmul.f32 %v8126_v9, %v13779_v27  ;;  %v1755_v13 = vmul.f32 %v8126_v9, %v13780_v42  ;;  %v1756_v60 = vmul.f32 %v8126_v9, %v13781_v40 }
 0x258   : > { %v1879_v61 = vmul.f32 %v10701_v49, %v1757_v46  ;;  %v1880_v25 = vmul.f32 %v10703_v4, %v1758_v63  ;;  %v1881_v8 = vmul.f32 %v10705_v5, %v1759_v30  ;;  %v1882_v50 = vmul.f32 %v10707_v37, %v1760_v22 }
 0x259   : > { %v1875_v20 = vmul.f32 %v10701_v49, %v1753_v28  ;;  %v1876_v47 = vmul.f32 %v10703_v4, %v1754_v21  ;;  %v1877_v43 = vmul.f32 %v10705_v5, %v1755_v13  ;;  %v1878_v12 = vmul.f32 %v10707_v37, %v1756_v60 }
 0x25a   : > { %v2001_v44 = vadd.f32 %v10709_v19, %v1879_v61  ;;  %v2002_v38 = vadd.f32 %v10711_v41, %v1880_v25  ;;  %v2003_v32 = vadd.f32 %v10713_v31, %v1881_v8  ;;  %v2004_v55 = vadd.f32 %v10715_v59, %v1882_v50 }
 0x25b   : > { %v1997_v15 = vadd.f32 %v10709_v19, %v1875_v20  ;;  %v1998_v56 = vadd.f32 %v10711_v41, %v1876_v47  ;;  %v1999_v57 = vadd.f32 %v10713_v31, %v1877_v43  ;;  %v2000_v36 = vadd.f32 %v10715_v59, %v1878_v12 }
 0x25c   : > { %v7641_v3 = vpack.c.bf16 %v2002_v38, %v2001_v44  ;;  %v7642_v34 = vpack.c.bf16 %v2004_v55, %v2003_v32 }
 0x25d   : > { %v7639_v62 = vpack.c.bf16 %v1998_v56, %v1997_v15  ;;  %v7640_v53 = vpack.c.bf16 %v2000_v36, %v1999_v57 }
 0x25e   : > { %2357 = vst [vmem:[#allocation2 + $0x180] sm:$0x33] %v7641_v3  ;;  %2358 = vst [vmem:[#allocation2 + $0x188] sm:$0x33] %v7642_v34 }
 0x25f   : > { %2355 = vst [vmem:[#allocation2 + $0x170] sm:$0xff] %v7639_v62  ;;  %2356 = vst [vmem:[#allocation2 + $0x178] sm:$0xff] %v7640_v53 }
 0x260 PF: > { %v2409_v49 = vld [vmem:[%s9276_s20] sm:$0xff]  ;;  %v2410_v5 = vld [vmem:[%s9276_s20 + $0x8] sm:$0xff] }
 0x261   : > { %v2413_v4 = vld [vmem:[%s9276_s20 + $0x20] sm:$0xff]  ;;  %v2414_v19 = vld [vmem:[%s9276_s20 + $0x28] sm:$0xff] }
 0x262   : > { %v7333_v37 = vcombine.high %v2409_v49, %v2413_v4  ;;  %v7332_v41 = vcombine.low %v2409_v49, %v2413_v4  ;;  %v2417_v31 = vld [vmem:[%s9276_s20 + $0x40] sm:$0xff]  ;;  %v7335_v10 = vcombine.high %v2410_v5, %v2414_v19  ;;  %v7334_v58 = vcombine.low %v2410_v5, %v2414_v19  ;;  %v2418_v16 = vld [vmem:[%s9276_s20 + $0x48] sm:$0xff] }
 0x263   : > { %v2421_v59 = vld [vmem:[%s9276_s20 + $0x60] sm:$0xff]  ;;  %v2422_v33 = vld [vmem:[%s9276_s20 + $0x68] sm:$0xff] }
 0x264   : > { %v7341_v54 = vcombine.high %v2417_v31, %v2421_v59  ;;  %v2425_v52 = vld [vmem:[%s9276_s20 + $0x80] sm:$0xff]  ;;  %4241 = vmatprep.subr.bf16.mxu0 %v7333_v37  ;;  %v7343_v39 = vcombine.high %v2418_v16, %v2422_v33  ;;  %v2426_v48 = vld [vmem:[%s9276_s20 + $0x88] sm:$0xff]  ;;  %4563 = vmatprep.subr.bf16.mxu1 %v7335_v10  ;;  %v7340_v46 = vcombine.low %v2417_v31, %v2421_v59 }
 0x265   : > { %v2429_v45 = vld [vmem:[%s9276_s20 + $0xa0] sm:$0xff]  ;;  %v2430_v51 = vld [vmem:[%s9276_s20 + $0xa8] sm:$0xff]  ;;  %4242 = vmatpush1.bf16.msra.mxu0 %v7332_v41  ;;  %4564 = vmatpush1.bf16.msra.mxu1 %v7334_v58  ;;  %v7342_v11 = vcombine.low %v2418_v16, %v2422_v33 }
 0x266   : > { %4243 = vmatprep.subr.bf16.mxu0 %v7341_v54  ;;  %v7349_v63 = vcombine.high %v2425_v52, %v2429_v45  ;;  %4565 = vmatprep.subr.bf16.mxu1 %v7343_v39  ;;  %v7351_v24 = vcombine.high %v2426_v48, %v2430_v51  ;;  %v2433_v30 = vld [vmem:[%s9276_s20 + $0xc0] sm:$0xff]  ;;  %v2434_v22 = vld [vmem:[%s9276_s20 + $0xc8] sm:$0xff]  ;;  %v7348_v18 = vcombine.low %v2425_v52, %v2429_v45 }
 0x267   : > { %v2437_v14 = vld [vmem:[%s9276_s20 + $0xe0] sm:$0xff]  ;;  %v2438_v23 = vld [vmem:[%s9276_s20 + $0xe8] sm:$0xff]  ;;  %v7350_v26 = vcombine.low %v2426_v48, %v2430_v51 }
 0x268   : > { %v7357_v6 = vcombine.high %v2433_v30, %v2437_v14  ;;  %v7359_v9 = vcombine.high %v2434_v22, %v2438_v23  ;;  %v2441_v61 = vld [vmem:[%s9276_s20 + $0x100] sm:$0xff]  ;;  %v2442_v8 = vld [vmem:[%s9276_s20 + $0x108] sm:$0xff]  ;;  %v7356_v29 = vcombine.low %v2433_v30, %v2437_v14  ;;  %v7358_v0 = vcombine.low %v2434_v22, %v2438_v23 }
 0x269   : > { %4244 = vmatpush1.bf16.msra.mxu0 %v7340_v46  ;;  %4566 = vmatpush1.bf16.msra.mxu1 %v7342_v11  ;;  %v2445_v25 = vld [vmem:[%s9276_s20 + $0x120] sm:$0xff]  ;;  %v2446_v50 = vld [vmem:[%s9276_s20 + $0x128] sm:$0xff] }
 0x26a   : > { %4245 = vmatprep.subr.bf16.mxu0 %v7349_v63  ;;  %4567 = vmatprep.subr.bf16.mxu1 %v7351_v24  ;;  %v7365_v17 = vcombine.high %v2441_v61, %v2445_v25  ;;  %v7367_v2 = vcombine.high %v2442_v8, %v2446_v50  ;;  %v2449_v44 = vld [vmem:[%s9276_s20 + $0x140] sm:$0xff]  ;;  %v2450_v32 = vld [vmem:[%s9276_s20 + $0x148] sm:$0xff]  ;;  %v7364_v1 = vcombine.low %v2441_v61, %v2445_v25 }
 0x26b   : > { %v2453_v38 = vld [vmem:[%s9276_s20 + $0x160] sm:$0xff]  ;;  %v2454_v55 = vld [vmem:[%s9276_s20 + $0x168] sm:$0xff]  ;;  %v7366_v35 = vcombine.low %v2442_v8, %v2446_v50 }
 0x26c   : > { %v7373_v7 = vcombine.high %v2449_v44, %v2453_v38  ;;  %v7375_v28 = vcombine.high %v2450_v32, %v2454_v55  ;;  %v2457_v27 = vld [vmem:[%s9276_s20 + $0x180] sm:$0xff]  ;;  %v2458_v3 = vld [vmem:[%s9276_s20 + $0x188] sm:$0xff]  ;;  %v7372_v42 = vcombine.low %v2449_v44, %v2453_v38  ;;  %v7374_v13 = vcombine.low %v2450_v32, %v2454_v55 }
 0x26d   : > { %4246 = vmatpush1.bf16.msra.mxu0 %v7348_v18  ;;  %4568 = vmatpush1.bf16.msra.mxu1 %v7350_v26  ;;  %v2461_v21 = vld [vmem:[%s9276_s20 + $0x1a0] sm:$0xff]  ;;  %v2462_v34 = vld [vmem:[%s9276_s20 + $0x1a8] sm:$0xff] }
 0x26e   : > { %4247 = vmatprep.subr.bf16.mxu0 %v7357_v6  ;;  %4569 = vmatprep.subr.bf16.mxu1 %v7359_v9  ;;  %v7381_v40 = vcombine.high %v2457_v27, %v2461_v21  ;;  %v7383_v60 = vcombine.high %v2458_v3, %v2462_v34  ;;  %v2465_v20 = vld [vmem:[%s9276_s20 + $0x1c0] sm:$0xff]  ;;  %v2466_v12 = vld [vmem:[%s9276_s20 + $0x1c8] sm:$0xff]  ;;  %v7380_v56 = vcombine.low %v2457_v27, %v2461_v21 }
 0x26f   : > { %v2469_v47 = vld [vmem:[%s9276_s20 + $0x1e0] sm:$0xff]  ;;  %v2470_v15 = vld [vmem:[%s9276_s20 + $0x1e8] sm:$0xff]  ;;  %v7382_v57 = vcombine.low %v2458_v3, %v2462_v34 }
 0x270   : > { %v8127_v43 = vld [vmem:[#allocation2 + $0x4] ss:$16 sps:$4 sm:$0xff]   ;;  %v7389_v36 = vcombine.high %v2465_v20, %v2469_v47  ;;  %v7391_v62 = vcombine.high %v2466_v12, %v2470_v15  ;;  %v2474_v4 = vld [vmem:[%s9276_s20 + $0x208] sm:$0xff]  ;;  %v7388_v37 = vcombine.low %v2465_v20, %v2469_v47  ;;  %v7390_v19 = vcombine.low %v2466_v12, %v2470_v15 }
 0x271   : > { %4248 = vmatpush1.bf16.msra.mxu0 %v7356_v29  ;;  %4570 = vmatpush1.bf16.msra.mxu1 %v7358_v0  ;;  %v2473_v53 = vld [vmem:[%s9276_s20 + $0x200] sm:$0xff]  ;;  %v2478_v5 = vld [vmem:[%s9276_s20 + $0x228] sm:$0xff] }
 0x272   : > { %4249 = vmatprep.subr.bf16.mxu0 %v7365_v17  ;;  %4571 = vmatprep.subr.bf16.mxu1 %v7367_v2  ;;  %v2477_v49 = vld [vmem:[%s9276_s20 + $0x220] sm:$0xff]  ;;  %v7399_v31 = vcombine.high %v2474_v4, %v2478_v5  ;;  %v2482_v58 = vld [vmem:[%s9276_s20 + $0x248] sm:$0xff]  ;;  %v7398_v33 = vcombine.low %v2474_v4, %v2478_v5 }
 0x273   : > { %4273 = vmatprep.mubr.bf16.mxu0 %v8127_v43  ;;  %4595 = vmatprep.mubr.bf16.mxu1 %v8127_v43  ;;  %v7397_v41 = vcombine.high %v2473_v53, %v2477_v49  ;;  %v2481_v59 = vld [vmem:[%s9276_s20 + $0x240] sm:$0xff]  ;;  %v2486_v54 = vld [vmem:[%s9276_s20 + $0x268] sm:$0xff]  ;;  %v7396_v16 = vcombine.low %v2473_v53, %v2477_v49 }
 0x274   : > { %v2485_v10 = vld [vmem:[%s9276_s20 + $0x260] sm:$0xff]  ;;  %v7407_v39 = vcombine.high %v2482_v58, %v2486_v54  ;;  %v2490_v51 = vld [vmem:[%s9276_s20 + $0x288] sm:$0xff]  ;;  %v7406_v63 = vcombine.low %v2482_v58, %v2486_v54 }
 0x275   : > { %4250 = vmatpush1.bf16.msra.mxu0 %v7364_v1  ;;  %4572 = vmatpush1.bf16.msra.mxu1 %v7366_v35  ;;  %v7405_v52 = vcombine.high %v2481_v59, %v2485_v10  ;;  %v2489_v45 = vld [vmem:[%s9276_s20 + $0x280] sm:$0xff]  ;;  %v2494_v46 = vld [vmem:[%s9276_s20 + $0x2a8] sm:$0xff]  ;;  %v7404_v11 = vcombine.low %v2481_v59, %v2485_v10 }
 0x276   : > { %4251 = vmatprep.subr.bf16.mxu0 %v7373_v7  ;;  %4573 = vmatprep.subr.bf16.mxu1 %v7375_v28  ;;  %v2493_v48 = vld [vmem:[%s9276_s20 + $0x2a0] sm:$0xff]  ;;  %v7415_v30 = vcombine.high %v2490_v51, %v2494_v46  ;;  %v2498_v23 = vld [vmem:[%s9276_s20 + $0x2c8] sm:$0xff]  ;;  %v7414_v6 = vcombine.low %v2490_v51, %v2494_v46 }
 0x277   : > { %v7413_v24 = vcombine.high %v2489_v45, %v2493_v48  ;;  %v2497_v14 = vld [vmem:[%s9276_s20 + $0x2c0] sm:$0xff]  ;;  %v2502_v18 = vld [vmem:[%s9276_s20 + $0x2e8] sm:$0xff]  ;;  %v7412_v26 = vcombine.low %v2489_v45, %v2493_v48 }
 0x278   : > { %v2501_v22 = vld [vmem:[%s9276_s20 + $0x2e0] sm:$0xff]  ;;  %v7423_v61 = vcombine.high %v2498_v23, %v2502_v18  ;;  %v2506_v50 = vld [vmem:[%s9276_s20 + $0x308] sm:$0xff]  ;;  %v7422_v17 = vcombine.low %v2498_v23, %v2502_v18 }
 0x279   : > { %4252 = vmatpush1.bf16.msra.mxu0 %v7372_v42  ;;  %4574 = vmatpush1.bf16.msra.mxu1 %v7374_v13  ;;  %v7421_v9 = vcombine.high %v2497_v14, %v2501_v22  ;;  %v2505_v25 = vld [vmem:[%s9276_s20 + $0x300] sm:$0xff]  ;;  %v2510_v29 = vld [vmem:[%s9276_s20 + $0x328] sm:$0xff]  ;;  %v7420_v0 = vcombine.low %v2497_v14, %v2501_v22 }
 0x27a   : > { %4253 = vmatprep.subr.bf16.mxu0 %v7381_v40  ;;  %4575 = vmatprep.subr.bf16.mxu1 %v7383_v60  ;;  %v2509_v8 = vld [vmem:[%s9276_s20 + $0x320] sm:$0xff]  ;;  %v7431_v44 = vcombine.high %v2506_v50, %v2510_v29  ;;  %v2514_v55 = vld [vmem:[%s9276_s20 + $0x348] sm:$0xff]  ;;  %v7430_v7 = vcombine.low %v2506_v50, %v2510_v29 }
 0x27b   : > { %v7429_v2 = vcombine.high %v2505_v25, %v2509_v8  ;;  %v2513_v38 = vld [vmem:[%s9276_s20 + $0x340] sm:$0xff]  ;;  %v2518_v1 = vld [vmem:[%s9276_s20 + $0x368] sm:$0xff]  ;;  %v7428_v35 = vcombine.low %v2505_v25, %v2509_v8 }
 0x27c   : > { %v2517_v32 = vld [vmem:[%s9276_s20 + $0x360] sm:$0xff]  ;;  %v7439_v27 = vcombine.high %v2514_v55, %v2518_v1  ;;  %v2522_v34 = vld [vmem:[%s9276_s20 + $0x388] sm:$0xff]  ;;  %v7438_v40 = vcombine.low %v2514_v55, %v2518_v1 }
 0x27d   : > { %4254 = vmatpush1.bf16.msra.mxu0 %v7380_v56  ;;  %4576 = vmatpush1.bf16.msra.mxu1 %v7382_v57  ;;  %v7437_v28 = vcombine.high %v2513_v38, %v2517_v32  ;;  %v2521_v21 = vld [vmem:[%s9276_s20 + $0x380] sm:$0xff]  ;;  %v2526_v42 = vld [vmem:[%s9276_s20 + $0x3a8] sm:$0xff]  ;;  %v7436_v13 = vcombine.low %v2513_v38, %v2517_v32 }
 0x27e   : > { %4255 = vmatprep.subr.bf16.mxu0 %v7389_v36  ;;  %4577 = vmatprep.subr.bf16.mxu1 %v7391_v62  ;;  %v2525_v3 = vld [vmem:[%s9276_s20 + $0x3a0] sm:$0xff]  ;;  %v7447_v20 = vcombine.high %v2522_v34, %v2526_v42  ;;  %v2530_v12 = vld [vmem:[%s9276_s20 + $0x3c8] sm:$0xff]  ;;  %v7446_v57 = vcombine.low %v2522_v34, %v2526_v42 }
 0x27f   : > { %v7445_v60 = vcombine.high %v2521_v21, %v2525_v3  ;;  %v2529_v47 = vld [vmem:[%s9276_s20 + $0x3c0] sm:$0xff]  ;;  %v2534_v15 = vld [vmem:[%s9276_s20 + $0x3e8] sm:$0xff]  ;;  %v7444_v56 = vcombine.low %v2521_v21, %v2525_v3 }
 0x280   : > { %v2533_v43 = vld [vmem:[%s9276_s20 + $0x3e0] sm:$0xff]  ;;  %v7455_v62 = vcombine.high %v2530_v12, %v2534_v15  ;;  %v2538_v4 = vld [vmem:[%s9276_s20 + $0x408] sm:$0xff] }
 0x281   : > { %4256 = vmatpush1.bf16.msra.mxu0 %v7388_v37  ;;  %4578 = vmatpush1.bf16.msra.mxu1 %v7390_v19  ;;  %v7453_v36 = vcombine.high %v2529_v47, %v2533_v43  ;;  %v2537_v53 = vld [vmem:[%s9276_s20 + $0x400] sm:$0xff]  ;;  %v2542_v5 = vld [vmem:[%s9276_s20 + $0x428] sm:$0xff]  ;;  %v7452_v37 = vcombine.low %v2529_v47, %v2533_v43  ;;  %v7454_v19 = vcombine.low %v2530_v12, %v2534_v15 }
 0x282   : > { %4257 = vmatprep.subr.bf16.mxu0 %v7397_v41  ;;  %4579 = vmatprep.subr.bf16.mxu1 %v7399_v31  ;;  %v2541_v49 = vld [vmem:[%s9276_s20 + $0x420] sm:$0xff]  ;;  %v7463_v31 = vcombine.high %v2538_v4, %v2542_v5  ;;  %v2578_v21 = vld [vmem:[%s9276_s20 + $0x548] sm:$0xff] }
 0x283   : > { %v7461_v41 = vcombine.high %v2537_v53, %v2541_v49  ;;  %v8129_v59 = vld [vmem:[#allocation2] ss:$16 sps:$4 sm:$0xff]   ;;  %v7460_v54 = vcombine.low %v2537_v53, %v2541_v49  ;;  %v2582_v3 = vld [vmem:[%s9276_s20 + $0x568] sm:$0xff]  ;;  %v8139_v49 = vld [vmem:[#allocation2 + $0x84] ss:$16 sps:$4 sm:$0xff]  }
 0x284   : > { %v2545_v10 = vld [vmem:[%s9276_s20 + $0x440] sm:$0xff]  ;;  %v2586_v47 = vld [vmem:[%s9276_s20 + $0x588] sm:$0xff]  ;;  %v7502_v15 = vcombine.low %v2578_v21, %v2582_v3 }
 0x285   : > { %4258 = vmatpush1.bf16.msra.mxu0 %v7396_v16  ;;  %4580 = vmatpush1.bf16.msra.mxu1 %v7398_v33  ;;  %v2549_v58 = vld [vmem:[%s9276_s20 + $0x460] sm:$0xff]  ;;  %v2546_v16 = vld [vmem:[%s9276_s20 + $0x448] sm:$0xff] }
 0x286   : > { %4259 = vmatprep.subr.bf16.mxu0 %v7405_v52  ;;  %4581 = vmatprep.subr.bf16.mxu1 %v7407_v39  ;;  %v2550_v33 = vld [vmem:[%s9276_s20 + $0x468] sm:$0xff]  ;;  %v7462_v52 = vcombine.low %v2538_v4, %v2542_v5  ;;  %v8130_v39 = vld [vmem:[#allocation2 + $0x24] ss:$16 sps:$4 sm:$0xff]   ;;  %v7469_v45 = vcombine.high %v2545_v10, %v2549_v58  ;;  %v8132_v14 = vld [vmem:[#allocation2 + $0x20] ss:$16 sps:$4 sm:$0xff]  }
 0x287   : > { %v2553_v48 = vld [vmem:[%s9276_s20 + $0x480] sm:$0xff]  ;;  %v7471_v46 = vcombine.high %v2546_v16, %v2550_v33  ;;  %v2590_v43 = vld [vmem:[%s9276_s20 + $0x5a8] sm:$0xff] }
 0x288   : > { %v2557_v51 = vld [vmem:[%s9276_s20 + $0x4a0] sm:$0xff]  ;;  %v2594_v4 = vld [vmem:[%s9276_s20 + $0x5c8] sm:$0xff] }
 0x289   : > { %4260 = vmatpush1.bf16.msra.mxu0 %v7404_v11  ;;  %4582 = vmatpush1.bf16.msra.mxu1 %v7406_v63  ;;  %v2554_v11 = vld [vmem:[%s9276_s20 + $0x488] sm:$0xff]  ;;  %v7477_v22 = vcombine.high %v2553_v48, %v2557_v51  ;;  %v2561_v18 = vld [vmem:[%s9276_s20 + $0x4c0] sm:$0xff]  ;;  %v7476_v25 = vcombine.low %v2553_v48, %v2557_v51 }
 0x28a   : > { %4261 = vmatprep.subr.bf16.mxu0 %v7413_v24  ;;  %4583 = vmatprep.subr.bf16.mxu1 %v7415_v30  ;;  %v2558_v63 = vld [vmem:[%s9276_s20 + $0x4a8] sm:$0xff]  ;;  %v7468_v24 = vcombine.low %v2545_v10, %v2549_v58  ;;  %v7470_v30 = vcombine.low %v2546_v16, %v2550_v33  ;;  %v2569_v8 = vld [vmem:[%s9276_s20 + $0x500] sm:$0xff] }
 0x28b   : > { %v7479_v23 = vcombine.high %v2554_v11, %v2558_v63  ;;  %v2573_v50 = vld [vmem:[%s9276_s20 + $0x520] sm:$0xff]  ;;  %v7478_v29 = vcombine.low %v2554_v11, %v2558_v63  ;;  %v2598_v5 = vld [vmem:[%s9276_s20 + $0x5e8] sm:$0xff] }
 0x28c   : > { %v7493_v55 = vcombine.high %v2569_v8, %v2573_v50  ;;  %v8135_v1 = vld [vmem:[#allocation2 + $0x40] ss:$16 sps:$4 sm:$0xff]   ;;  %v7492_v34 = vcombine.low %v2569_v8, %v2573_v50  ;;  %v2602_v58 = vld [vmem:[%s9276_s20 + $0x608] sm:$0xff]  ;;  %v7518_v33 = vcombine.low %v2594_v4, %v2598_v5 }
 0x28d   : > { %4262 = vmatpush1.bf16.msra.mxu0 %v7412_v26  ;;  %4584 = vmatpush1.bf16.msra.mxu1 %v7414_v6  ;;  %v2565_v26 = vld [vmem:[%s9276_s20 + $0x4e0] sm:$0xff]  ;;  %v2562_v6 = vld [vmem:[%s9276_s20 + $0x4c8] sm:$0xff] }
 0x28e   : > { %4263 = vmatprep.subr.bf16.mxu0 %v7421_v9  ;;  %4585 = vmatprep.subr.bf16.mxu1 %v7423_v61  ;;  %v8133_v9 = vld [vmem:[#allocation2 + $0x44] ss:$16 sps:$4 sm:$0xff]   ;;  %v2566_v61 = vld [vmem:[%s9276_s20 + $0x4e8] sm:$0xff]  ;;  %v7484_v38 = vcombine.low %v2561_v18, %v2565_v26  ;;  %v8144_v8 = vld [vmem:[#allocation2 + $0xa0] ss:$16 sps:$4 sm:$0xff]  }
 0x28f   : > { %v7486_v32 = vcombine.low %v2562_v6, %v2566_v61  ;;  %v2597_v53 = vld [vmem:[%s9276_s20 + $0x5e0] sm:$0xff]  ;;  %v2610_v11 = vld [vmem:[%s9276_s20 + $0x648] sm:$0xff] }
 0x290   : > { %v2605_v10 = vld [vmem:[%s9276_s20 + $0x620] sm:$0xff]  ;;  %v2614_v63 = vld [vmem:[%s9276_s20 + $0x668] sm:$0xff] }
 0x291   : > { %4264 = vmatpush1.bf16.msra.mxu0 %v7420_v0  ;;  %4586 = vmatpush1.bf16.msra.mxu1 %v7422_v17  ;;  %v2570_v0 = vld [vmem:[%s9276_s20 + $0x508] sm:$0xff]  ;;  %v2609_v48 = vld [vmem:[%s9276_s20 + $0x640] sm:$0xff] }
 0x292   : > { %4265 = vmatprep.subr.bf16.mxu0 %v7429_v2  ;;  %4587 = vmatprep.subr.bf16.mxu1 %v7431_v44  ;;  %v2574_v17 = vld [vmem:[%s9276_s20 + $0x528] sm:$0xff]  ;;  %v7485_v2 = vcombine.high %v2561_v18, %v2565_v26  ;;  %v7487_v44 = vcombine.high %v2562_v6, %v2566_v61  ;;  %v2613_v51 = vld [vmem:[%s9276_s20 + $0x660] sm:$0xff]  ;;  %v7534_v61 = vcombine.low %v2610_v11, %v2614_v63 }
 0x293   : > { %v7494_v42 = vcombine.low %v2570_v0, %v2574_v17  ;;  %v2621_v18 = vld [vmem:[%s9276_s20 + $0x6a0] sm:$0xff]  ;;  %v2618_v26 = vld [vmem:[%s9276_s20 + $0x688] sm:$0xff] }
 0x294   : > { %v2622_v6 = vld [vmem:[%s9276_s20 + $0x6a8] sm:$0xff] }
 0x295   : > { %4266 = vmatpush1.bf16.msra.mxu0 %v7428_v35  ;;  %4588 = vmatpush1.bf16.msra.mxu1 %v7430_v7  ;;  %v8136_v35 = vld [vmem:[#allocation2 + $0x64] ss:$16 sps:$4 sm:$0xff]   ;;  %v7495_v7 = vcombine.high %v2570_v0, %v2574_v17  ;;  %v7543_v50 = vcombine.high %v2618_v26, %v2622_v6 }
 0x296   : > { %4267 = vmatprep.subr.bf16.mxu0 %v7437_v28  ;;  %4589 = vmatprep.subr.bf16.mxu1 %v7439_v27  ;;  %v2577_v28 = vld [vmem:[%s9276_s20 + $0x540] sm:$0xff] }
 0x297   : > { %v2581_v27 = vld [vmem:[%s9276_s20 + $0x560] sm:$0xff] }
 0x298   : > { %v7500_v12 = vcombine.low %v2577_v28, %v2581_v27  ;;  %v2629_v0 = vld [vmem:[%s9276_s20 + $0x6e0] sm:$0xff] }
 0x299   : > { %4268 = vmatpush1.bf16.msra.mxu0 %v7436_v13  ;;  %4590 = vmatpush1.bf16.msra.mxu1 %v7438_v40  ;;  %v7501_v13 = vcombine.high %v2577_v28, %v2581_v27  ;;  %v7503_v40 = vcombine.high %v2578_v21, %v2582_v3  ;;  %v8145_v17 = vld [vmem:[#allocation2 + $0xc4] ss:$16 sps:$4 sm:$0xff]   ;;  %v2634_v28 = vld [vmem:[%s9276_s20 + $0x708] sm:$0xff] }
 0x29a   : > { %4269 = vmatprep.subr.bf16.mxu0 %v7445_v60  ;;  %4591 = vmatprep.subr.bf16.mxu1 %v7447_v20  ;;  %v2585_v60 = vld [vmem:[%s9276_s20 + $0x580] sm:$0xff]  ;;  %v2638_v27 = vld [vmem:[%s9276_s20 + $0x728] sm:$0xff] }
 0x29b   : > { %v2589_v20 = vld [vmem:[%s9276_s20 + $0x5a0] sm:$0xff] }
 0x29d   : > { %4270 = vmatpush1.bf16.msra.mxu0 %v7444_v56  ;;  %4592 = vmatpush1.bf16.msra.mxu1 %v7446_v57  ;;  %v7509_v56 = vcombine.high %v2585_v60, %v2589_v20  ;;  %v8138_v57 = vld [vmem:[#allocation2 + $0x60] ss:$16 sps:$4 sm:$0xff]  }
 0x29e   : > { %4271 = vmatprep.subr.bf16.mxu0 %v7453_v36  ;;  %4593 = vmatprep.subr.bf16.mxu1 %v7455_v62  ;;  %v7511_v36 = vcombine.high %v2586_v47, %v2590_v43  ;;  %v2593_v62 = vld [vmem:[%s9276_s20 + $0x5c0] sm:$0xff] }
 0x29f   : > { %v7516_v16 = vcombine.low %v2593_v62, %v2597_v53 }
 0x2a1   : > { %4272 = vmatpush1.bf16.msra.mxu0 %v7452_v37  ;;  %4594 = vmatpush1.bf16.msra.mxu1 %v7454_v19  ;;  %v7508_v37 = vcombine.low %v2585_v60, %v2589_v20  ;;  %v7510_v19 = vcombine.low %v2586_v47, %v2590_v43  ;;  %v2645_v60 = vld [vmem:[%s9276_s20 + $0x760] sm:$0xff]  ;;  %v2642_v47 = vld [vmem:[%s9276_s20 + $0x748] sm:$0xff] }
 0x2a2   : > { %4402 = vmatprep.subr.bf16.mxu0 %v7461_v41  ;;  %4724 = vmatprep.subr.bf16.mxu1 %v7463_v31  ;;  %v7517_v41 = vcombine.high %v2593_v62, %v2597_v53  ;;  %v7519_v31 = vcombine.high %v2594_v4, %v2598_v5  ;;  %v8148_v20 = vld [vmem:[#allocation2 + $0xe4] ss:$16 sps:$4 sm:$0xff]   ;;  %v2646_v43 = vld [vmem:[%s9276_s20 + $0x768] sm:$0xff] }
 0x2a3   : > { %v2653_v62 = vld [vmem:[%s9276_s20 + $0x7a0] sm:$0xff]  ;;  %v2650_v53 = vld [vmem:[%s9276_s20 + $0x788] sm:$0xff]  ;;  %v7566_v5 = vcombine.low %v2642_v47, %v2646_v43 }
 0x2a4   : > { %4274 = vmatmul.mubr.bf16.vlgmr.msra.gmra.mrb[0].mxu0 %v8129_v59  ;;  %4596 = vmatmul.mubr.bf16.vlgmr.msra.gmra.mrb[0].mxu1 %v8129_v59  ;;  %v2601_v59 = vld [vmem:[%s9276_s20 + $0x600] sm:$0xff] }
 0x2a5   : > { %4403 = vmatpush1.bf16.msra.mxu0 %v7460_v54  ;;  %4725 = vmatpush1.bf16.msra.mxu1 %v7462_v52  ;;  %v2606_v54 = vld [vmem:[%s9276_s20 + $0x628] sm:$0xff]  ;;  %v7525_v52 = vcombine.high %v2601_v59, %v2605_v10 }
 0x2a6   : > { %4283 = vmatprep.mubr.bf16.mxu0 %v8130_v39  ;;  %4404 = vmatprep.subr.bf16.mxu0 %v7469_v45  ;;  %v7527_v45 = vcombine.high %v2602_v58, %v2606_v54 }
 0x2a7   : > { %4605 = vmatprep.mubr.bf16.mxu1 %v8130_v39  ;;  %4726 = vmatprep.subr.bf16.mxu1 %v7471_v46  ;;  %v8141_v39 = vld [vmem:[#allocation2 + $0x80] ss:$16 sps:$4 sm:$0xff]   ;;  %v8142_v46 = vld [vmem:[#allocation2 + $0xa4] ss:$16 sps:$4 sm:$0xff]  }
 0x2a9   : > { %4405 = vmatpush1.bf16.msra.mxu0 %v7468_v24  ;;  %4727 = vmatpush1.bf16.msra.mxu1 %v7470_v30  ;;  %v7524_v24 = vcombine.low %v2601_v59, %v2605_v10  ;;  %v7526_v30 = vcombine.low %v2602_v58, %v2606_v54  ;;  %v2661_v59 = vld [vmem:[%s9276_s20 + $0x7e0] sm:$0xff]  ;;  %v2658_v58 = vld [vmem:[%s9276_s20 + $0x7c8] sm:$0xff] }
 0x2aa   : > { %4406 = vmatprep.subr.bf16.mxu0 %v7477_v22  ;;  %4728 = vmatprep.subr.bf16.mxu1 %v7479_v23  ;;  %v7535_v22 = vcombine.high %v2610_v11, %v2614_v63  ;;  %v2617_v23 = vld [vmem:[%s9276_s20 + $0x680] sm:$0xff]  ;;  %v2662_v54 = vld [vmem:[%s9276_s20 + $0x7e8] sm:$0xff] }
 0x2ab   : > { %v8151_v10 = vld [vmem:[#allocation2 + $0x104] ss:$16 sps:$4 sm:$0xff]   ;;  %v7582_v63 = vcombine.low %v2658_v58, %v2662_v54 }
 0x2ac   : > { %4284 = vmatmul.mubr.bf16.gmra.mrb[4].mxu0 %v8132_v14  ;;  %4606 = vmatmul.mubr.bf16.gmra.mrb[4].mxu1 %v8132_v14  ;;  %v7533_v14 = vcombine.high %v2609_v48, %v2613_v51 }
 0x2ad   : > { %4407 = vmatpush1.bf16.msra.mxu0 %v7476_v25  ;;  %4729 = vmatpush1.bf16.msra.mxu1 %v7478_v29  ;;  %v7541_v25 = vcombine.high %v2617_v23, %v2621_v18  ;;  %v2625_v29 = vld [vmem:[%s9276_s20 + $0x6c0] sm:$0xff] }
 0x2ae   : > { %4293 = vmatprep.mubr.bf16.mxu0 %v8133_v9  ;;  %4615 = vmatprep.mubr.bf16.mxu1 %v8133_v9  ;;  %v7532_v9 = vcombine.low %v2609_v48, %v2613_v51  ;;  %v7548_v21 = vcombine.low %v2625_v29, %v2629_v0  ;;  %v11206_v48 = vld [vmem:[%s9276_s20 + $0x30] sm:$0xff]  ;;  %v11209_v51 = vld [vmem:[%s9276_s20 + $0x18] sm:$0xff] }
 0x2af   : > { %4408 = vmatprep.subr.bf16.mxu0 %v7485_v2  ;;  %4730 = vmatprep.subr.bf16.mxu1 %v7487_v44  ;;  %v2626_v2 = vld [vmem:[%s9276_s20 + $0x6c8] sm:$0xff] }
 0x2b0   : > { %v2630_v44 = vld [vmem:[%s9276_s20 + $0x6e8] sm:$0xff] }
 0x2b1   : > { %4409 = vmatpush1.bf16.msra.mxu0 %v7484_v38  ;;  %4731 = vmatpush1.bf16.msra.mxu1 %v7486_v32  ;;  %v7540_v38 = vcombine.low %v2617_v23, %v2621_v18  ;;  %v7542_v32 = vcombine.low %v2618_v26, %v2622_v6  ;;  %v7550_v3 = vcombine.low %v2626_v2, %v2630_v44  ;;  %v8156_v23 = vld [vmem:[#allocation2 + $0x120] ss:$16 sps:$4 sm:$0xff]   ;;  %v8157_v18 = vld [vmem:[#allocation2 + $0x144] ss:$16 sps:$4 sm:$0xff]  }
 0x2b2   : > { %4410 = vmatprep.subr.bf16.mxu0 %v7493_v55  ;;  %4732 = vmatprep.subr.bf16.mxu1 %v7495_v7  ;;  %v7549_v55 = vcombine.high %v2625_v29, %v2629_v0  ;;  %v2637_v7 = vld [vmem:[%s9276_s20 + $0x720] sm:$0xff]  ;;  %v8165_v29 = vld [vmem:[#allocation2 + $0x8] ss:$16 sps:$4 sm:$0xff]   ;;  %v2419_v0 = vld [vmem:[%s9276_s20 + $0x50] sm:$0xff] }
 0x2b3   : > { %v8159_v26 = vld [vmem:[#allocation2 + $0x140] ss:$16 sps:$4 sm:$0xff]   ;;  %v8160_v6 = vld [vmem:[#allocation2 + $0x164] ss:$16 sps:$4 sm:$0xff]  }
 0x2b4   : > { %4294 = vmatmul.mubr.bf16.gmra.mrb[8].mxu0 %v8135_v1  ;;  %4616 = vmatmul.mubr.bf16.gmra.mrb[8].mxu1 %v8135_v1  ;;  %v7551_v1 = vcombine.high %v2626_v2, %v2630_v44  ;;  %v2420_v44 = vld [vmem:[%s9276_s20 + $0x58] sm:$0xff] }
 0x2b5   : > { %4303 = vmatprep.mubr.bf16.mxu0 %v8136_v35  ;;  %4625 = vmatprep.mubr.bf16.mxu1 %v8136_v35  ;;  %v2633_v35 = vld [vmem:[%s9276_s20 + $0x700] sm:$0xff] }
 0x2b6   : > { %4411 = vmatpush1.bf16.msra.mxu0 %v7492_v34  ;;  %4733 = vmatpush1.bf16.msra.mxu1 %v7494_v42  ;;  %v7557_v34 = vcombine.high %v2633_v35, %v2637_v7  ;;  %v8147_v42 = vld [vmem:[#allocation2 + $0xc0] ss:$16 sps:$4 sm:$0xff]  }
 0x2b7   : > { %4412 = vmatprep.subr.bf16.mxu0 %v7501_v13  ;;  %4734 = vmatprep.subr.bf16.mxu1 %v7503_v40  ;;  %v7559_v13 = vcombine.high %v2634_v28, %v2638_v27  ;;  %v2641_v40 = vld [vmem:[%s9276_s20 + $0x740] sm:$0xff] }
 0x2b8   : > { %v7564_v4 = vcombine.low %v2641_v40, %v2645_v60 }
 0x2ba   : > { %4413 = vmatpush1.bf16.msra.mxu0 %v7500_v12  ;;  %4735 = vmatpush1.bf16.msra.mxu1 %v7502_v15  ;;  %v7556_v12 = vcombine.low %v2633_v35, %v2637_v7  ;;  %v7558_v15 = vcombine.low %v2634_v28, %v2638_v27  ;;  %v2427_v35 = vld [vmem:[%s9276_s20 + $0x90] sm:$0xff]  ;;  %v2428_v27 = vld [vmem:[%s9276_s20 + $0x98] sm:$0xff] }
 0x2bb   : > { %4414 = vmatprep.subr.bf16.mxu0 %v7509_v56  ;;  %4736 = vmatprep.subr.bf16.mxu1 %v7511_v36  ;;  %v7565_v56 = vcombine.high %v2641_v40, %v2645_v60  ;;  %v2649_v36 = vld [vmem:[%s9276_s20 + $0x780] sm:$0xff]  ;;  %v2431_v7 = vld [vmem:[%s9276_s20 + $0xb0] sm:$0xff]  ;;  %v8170_v40 = vld [vmem:[#allocation2 + $0x28] ss:$16 sps:$4 sm:$0xff]  }
 0x2bc   : > { %4304 = vmatmul.mubr.bf16.gmra.mrb[12].mxu0 %v8138_v57  ;;  %4626 = vmatmul.mubr.bf16.gmra.mrb[12].mxu1 %v8138_v57  ;;  %v7567_v57 = vcombine.high %v2642_v47, %v2646_v43  ;;  %v2435_v60 = vld [vmem:[%s9276_s20 + $0xd0] sm:$0xff]  ;;  %v7352_v47 = vcombine.low %v2427_v35, %v2431_v7  ;;  %v2436_v43 = vld [vmem:[%s9276_s20 + $0xd8] sm:$0xff] }
 0x2bd   : > { %4313 = vmatprep.mubr.bf16.mxu0 %v8139_v49  ;;  %4635 = vmatprep.mubr.bf16.mxu1 %v8139_v49  ;;  %v2654_v49 = vld [vmem:[%s9276_s20 + $0x7a8] sm:$0xff] }
 0x2be   : > { %4415 = vmatpush1.bf16.msra.mxu0 %v7508_v37  ;;  %4737 = vmatpush1.bf16.msra.mxu1 %v7510_v19  ;;  %v7573_v37 = vcombine.high %v2649_v36, %v2653_v62  ;;  %v8150_v19 = vld [vmem:[#allocation2 + $0xe0] ss:$16 sps:$4 sm:$0xff]  }
 0x2bf   : > { %4416 = vmatprep.subr.bf16.mxu0 %v7517_v41  ;;  %4738 = vmatprep.subr.bf16.mxu1 %v7519_v31  ;;  %v7575_v41 = vcombine.high %v2650_v53, %v2654_v49  ;;  %v2657_v31 = vld [vmem:[%s9276_s20 + $0x7c0] sm:$0xff] }
 0x2c0   : > { %v7580_v11 = vcombine.low %v2657_v31, %v2661_v59 }
 0x2c2   : > { %4417 = vmatpush1.bf16.msra.mxu0 %v7516_v16  ;;  %4739 = vmatpush1.bf16.msra.mxu1 %v7518_v33  ;;  %v7572_v16 = vcombine.low %v2649_v36, %v2653_v62  ;;  %v7574_v33 = vcombine.low %v2650_v53, %v2654_v49  ;;  %v2443_v36 = vld [vmem:[%s9276_s20 + $0x110] sm:$0xff]  ;;  %v2444_v49 = vld [vmem:[%s9276_s20 + $0x118] sm:$0xff] }
 0x2c3   : > { %4418 = vmatprep.subr.bf16.mxu0 %v7525_v52  ;;  %4740 = vmatprep.subr.bf16.mxu1 %v7527_v45  ;;  %v7581_v52 = vcombine.high %v2657_v31, %v2661_v59  ;;  %v11203_v45 = vld [vmem:[%s9276_s20 + $0x10] sm:$0xff]  ;;  %v8173_v31 = vld [vmem:[#allocation2 + $0x48] ss:$16 sps:$4 sm:$0xff]  }
 0x2c4   : > { %4314 = vmatmul.mubr.bf16.gmra.mrb[16].mxu0 %v8141_v39  ;;  %4636 = vmatmul.mubr.bf16.gmra.mrb[16].mxu1 %v8141_v39  ;;  %v7583_v39 = vcombine.high %v2658_v58, %v2662_v54  ;;  %v7336_v2 = vcombine.low %v11203_v45, %v11206_v48  ;;  %v2447_v62 = vld [vmem:[%s9276_s20 + $0x130] sm:$0xff]  ;;  %v8174_v58 = vld [vmem:[#allocation2 + $0x6c] ss:$16 sps:$4 sm:$0xff]  }
 0x2c5   : > { %4323 = vmatprep.mubr.bf16.mxu0 %v8142_v46  ;;  %4645 = vmatprep.mubr.bf16.mxu1 %v8142_v46  ;;  %v11212_v46 = vld [vmem:[%s9276_s20 + $0x38] sm:$0xff]  ;;  %v2451_v59 = vld [vmem:[%s9276_s20 + $0x150] sm:$0xff] }
 0x2c6   : > { %4419 = vmatpush1.bf16.msra.mxu0 %v7524_v24  ;;  %4741 = vmatpush1.bf16.msra.mxu1 %v7526_v30  ;;  %v7337_v24 = vcombine.high %v11203_v45, %v11206_v48  ;;  %v8153_v30 = vld [vmem:[#allocation2 + $0x100] ss:$16 sps:$4 sm:$0xff]   ;;  %v2452_v54 = vld [vmem:[%s9276_s20 + $0x158] sm:$0xff] }
 0x2c7   : > { %4420 = vmatprep.subr.bf16.mxu0 %v7533_v14  ;;  %4742 = vmatprep.subr.bf16.mxu1 %v7535_v22  ;;  %v7339_v14 = vcombine.high %v11209_v51, %v11212_v46  ;;  %v8154_v22 = vld [vmem:[#allocation2 + $0x124] ss:$16 sps:$4 sm:$0xff]  }
 0x2c8   : > { %v2459_v48 = vld [vmem:[%s9276_s20 + $0x190] sm:$0xff] }
 0x2ca   : > { %4421 = vmatpush1.bf16.msra.mxu0 %v7532_v9  ;;  %4743 = vmatpush1.bf16.msra.mxu1 %v7534_v61  ;;  %v2407_v9 = vld [vmem:[#allocation2 + $0x180] sm:$0x33] }
 0x2cb   : > { %4422 = vmatprep.subr.bf16.mxu0 %v7541_v25  ;;  %4744 = vmatprep.subr.bf16.mxu1 %v7543_v50  ;;  %v11218_v61 = vld [vmem:[#allocation2 + $0x160] ss:$16 sps:$4 sm:$0xff]   ;;  %v11220_v25 = vcombine.high %v2407_v9, %v2407_v9  ;;  %v11228_v50 = vld [vmem:[#allocation2 + $0xc] ss:$16 sps:$4 sm:$0xff]  }
 0x2cc   : > { %4324 = vmatmul.mubr.bf16.gmra.mrb[20].mxu0 %v8144_v8  ;;  %4646 = vmatmul.mubr.bf16.gmra.mrb[20].mxu1 %v8144_v8  ;;  %v11226_v8 = vcombine.low %v2407_v9, %v2407_v9  ;;  %v2472_v9 = vld [vmem:[%s9276_s20 + $0x1f8] sm:$0xff] }
 0x2cd   : > { %4333 = vmatprep.mubr.bf16.mxu0 %v8145_v17  ;;  %4655 = vmatprep.mubr.bf16.mxu1 %v8145_v17  ;;  %v2423_v17 = vld [vmem:[%s9276_s20 + $0x70] sm:$0xff] }
 0x2ce   : > { %4423 = vmatpush1.bf16.msra.mxu0 %v7540_v38  ;;  %4745 = vmatpush1.bf16.msra.mxu1 %v7542_v32  ;;  %v2424_v38 = vld [vmem:[%s9276_s20 + $0x78] sm:$0xff]  ;;  %v7338_v32 = vcombine.low %v11209_v51, %v11212_v46  ;;  %v2463_v51 = vld [vmem:[%s9276_s20 + $0x1b0] sm:$0xff] }
 0x2cf   : > { %4424 = vmatprep.subr.bf16.mxu0 %v7549_v55  ;;  %4746 = vmatprep.subr.bf16.mxu1 %v7551_v1  ;;  %v11242_v55 = vld [vmem:[#allocation2 + $0x2c] ss:$16 sps:$4 sm:$0xff]   ;;  %v7345_v1 = vcombine.high %v2419_v0, %v2423_v17  ;;  %v7347_v28 = vcombine.high %v2420_v44, %v2424_v38 }
 0x2d0   : > { %v2460_v46 = vld [vmem:[%s9276_s20 + $0x198] sm:$0xff] }
 0x2d2   : > { %4425 = vmatpush1.bf16.msra.mxu0 %v7548_v21  ;;  %4747 = vmatpush1.bf16.msra.mxu1 %v7550_v3  ;;  %v2432_v21 = vld [vmem:[%s9276_s20 + $0xb8] sm:$0xff]  ;;  %v7344_v3 = vcombine.low %v2419_v0, %v2423_v17 }
 0x2d3   : > { %4426 = vmatprep.subr.bf16.mxu0 %v7557_v34  ;;  %4748 = vmatprep.subr.bf16.mxu1 %v7559_v13  ;;  %v7346_v34 = vcombine.low %v2420_v44, %v2424_v38  ;;  %v7355_v13 = vcombine.high %v2428_v27, %v2432_v21  ;;  %v2475_v44 = vld [vmem:[%s9276_s20 + $0x210] sm:$0xff] }
 0x2d4   : > { %4334 = vmatmul.mubr.bf16.gmra.mrb[24].mxu0 %v8147_v42  ;;  %4656 = vmatmul.mubr.bf16.gmra.mrb[24].mxu1 %v8147_v42  ;;  %v7353_v42 = vcombine.high %v2427_v35, %v2431_v7  ;;  %v2479_v38 = vld [vmem:[%s9276_s20 + $0x230] sm:$0xff] }
 0x2d5   : > { %4343 = vmatprep.mubr.bf16.mxu0 %v8148_v20  ;;  %4665 = vmatprep.mubr.bf16.mxu1 %v8148_v20  ;;  %v2439_v20 = vld [vmem:[%s9276_s20 + $0xf0] sm:$0xff] }
 0x2d6   : > { %4427 = vmatpush1.bf16.msra.mxu0 %v7556_v12  ;;  %4749 = vmatpush1.bf16.msra.mxu1 %v7558_v15  ;;  %v2440_v12 = vld [vmem:[%s9276_s20 + $0xf8] sm:$0xff]  ;;  %v7354_v15 = vcombine.low %v2428_v27, %v2432_v21 }
 0x2d7   : > { %4428 = vmatprep.subr.bf16.mxu0 %v7565_v56  ;;  %4750 = vmatprep.subr.bf16.mxu1 %v7567_v57  ;;  %v11254_v56 = vld [vmem:[#allocation2 + $0x4c] ss:$16 sps:$4 sm:$0xff]   ;;  %v7361_v57 = vcombine.high %v2435_v60, %v2439_v20  ;;  %v7363_v53 = vcombine.high %v2436_v43, %v2440_v12  ;;  %v8179_v27 = vld [vmem:[#allocation2 + $0x88] ss:$16 sps:$4 sm:$0xff]  }
 0x2da   : > { %4429 = vmatpush1.bf16.msra.mxu0 %v7564_v4  ;;  %4751 = vmatpush1.bf16.msra.mxu1 %v7566_v5  ;;  %v2448_v4 = vld [vmem:[%s9276_s20 + $0x138] sm:$0xff]  ;;  %v7360_v5 = vcombine.low %v2435_v60, %v2439_v20  ;;  %v7400_v60 = vcombine.low %v2475_v44, %v2479_v38 }
 0x2db   : > { %4430 = vmatprep.subr.bf16.mxu0 %v7573_v37  ;;  %4752 = vmatprep.subr.bf16.mxu1 %v7575_v41  ;;  %v7362_v37 = vcombine.low %v2436_v43, %v2440_v12  ;;  %v7371_v41 = vcombine.high %v2444_v49, %v2448_v4  ;;  %v2491_v12 = vld [vmem:[%s9276_s20 + $0x290] sm:$0xff] }
 0x2dc   : > { %4344 = vmatmul.mubr.bf16.gmra.mrb[28].mxu0 %v8150_v19  ;;  %4666 = vmatmul.mubr.bf16.gmra.mrb[28].mxu1 %v8150_v19  ;;  %v7369_v19 = vcombine.high %v2443_v36, %v2447_v62 }
 0x2dd   : > { %4353 = vmatprep.mubr.bf16.mxu0 %v8151_v10  ;;  %4675 = vmatprep.mubr.bf16.mxu1 %v8151_v10  ;;  %v2455_v10 = vld [vmem:[%s9276_s20 + $0x170] sm:$0xff] }
 0x2de   : > { %4431 = vmatpush1.bf16.msra.mxu0 %v7572_v16  ;;  %4753 = vmatpush1.bf16.msra.mxu1 %v7574_v33  ;;  %v2456_v16 = vld [vmem:[%s9276_s20 + $0x178] sm:$0xff]  ;;  %v7368_v33 = vcombine.low %v2443_v36, %v2447_v62 }
 0x2df   : > { %4432 = vmatprep.subr.bf16.mxu0 %v7581_v52  ;;  %4754 = vmatprep.subr.bf16.mxu1 %v7583_v39  ;;  %v7370_v52 = vcombine.low %v2444_v49, %v2448_v4  ;;  %v7377_v39 = vcombine.high %v2451_v59, %v2455_v10  ;;  %v7379_v45 = vcombine.high %v2452_v54, %v2456_v16  ;;  %v2496_v36 = vld [vmem:[%s9276_s20 + $0x2b8] sm:$0xff] }
 0x2e0   : > { %v8182_v4 = vld [vmem:[#allocation2 + $0xa8] ss:$16 sps:$4 sm:$0xff]  }
 0x2e2   : > { %4433 = vmatpush1.bf16.msra.mxu0 %v7580_v11  ;;  %4755 = vmatpush1.bf16.msra.mxu1 %v7582_v63  ;;  %v2464_v11 = vld [vmem:[%s9276_s20 + $0x1b8] sm:$0xff]  ;;  %v7376_v63 = vcombine.low %v2451_v59, %v2455_v10 }
 0x2e3   : > { %4885 = vmatprep.subr.bf16.mxu0 %v7337_v24  ;;  %5207 = vmatprep.subr.bf16.mxu1 %v7339_v14  ;;  %v7378_v24 = vcombine.low %v2452_v54, %v2456_v16  ;;  %v8176_v14 = vld [vmem:[#allocation2 + $0x68] ss:$16 sps:$4 sm:$0xff]   ;;  %v7386_v0 = vcombine.low %v2460_v46, %v2464_v11 }
 0x2e4   : > { %4354 = vmatmul.mubr.bf16.gmra.mrb[32].mxu0 %v8153_v30  ;;  %4676 = vmatmul.mubr.bf16.gmra.mrb[32].mxu1 %v8153_v30  ;;  %v7385_v30 = vcombine.high %v2459_v48, %v2463_v51  ;;  %v2504_v59 = vld [vmem:[%s9276_s20 + $0x2f8] sm:$0xff] }
 0x2e5   : > { %4363 = vmatprep.mubr.bf16.mxu0 %v8154_v22  ;;  %4685 = vmatprep.mubr.bf16.mxu1 %v8154_v22  ;;  %v7387_v22 = vcombine.high %v2460_v46, %v2464_v11  ;;  %v8185_v11 = vld [vmem:[#allocation2 + $0xc8] ss:$16 sps:$4 sm:$0xff]  }
 0x2ec   : > { %4364 = vmatmul.mubr.bf16.gmra.mrb[36].mxu0 %v8156_v23  ;;  %4686 = vmatmul.mubr.bf16.gmra.mrb[36].mxu1 %v8156_v23  ;;  %v2467_v23 = vld [vmem:[%s9276_s20 + $0x1d0] sm:$0xff] }
 0x2ed   : > { %4373 = vmatprep.mubr.bf16.mxu0 %v8157_v18  ;;  %4695 = vmatprep.mubr.bf16.mxu1 %v8157_v18  ;;  %v2471_v18 = vld [vmem:[%s9276_s20 + $0x1f0] sm:$0xff] }
 0x2ee   : > { %v7393_v17 = vcombine.high %v2467_v23, %v2471_v18  ;;  %v7392_v35 = vcombine.low %v2467_v23, %v2471_v18  ;;  %v2520_v23 = vld [vmem:[%s9276_s20 + $0x378] sm:$0xff] }
 0x2f4   : > { %4374 = vmatmul.mubr.bf16.gmra.mrb[40].mxu0 %v8159_v26  ;;  %4696 = vmatmul.mubr.bf16.gmra.mrb[40].mxu1 %v8159_v26  ;;  %v8177_v26 = vld [vmem:[#allocation2 + $0x8c] ss:$16 sps:$4 sm:$0xff]  }
 0x2f5   : > { %4383 = vmatprep.mubr.bf16.mxu0 %v8160_v6  ;;  %4705 = vmatprep.mubr.bf16.mxu1 %v8160_v6  ;;  %v2468_v6 = vld [vmem:[%s9276_s20 + $0x1d8] sm:$0xff] }
 0x2f6   : > { %v7394_v7 = vcombine.low %v2468_v6, %v2472_v9 }
 0x2fc   : > { %4384 = vmatmul.mubr.bf16.gmra.mrb[44].mxu0 %v11218_v61  ;;  %4706 = vmatmul.mubr.bf16.gmra.mrb[44].mxu1 %v11218_v61 }
 0x2fd   : > { %4393 = vmatprep.mubr.bf16.mxu0 %v11220_v25  ;;  %4715 = vmatprep.mubr.bf16.mxu1 %v11220_v25 }
 0x304   : > { %4394 = vmatmul.mubr.bf16.gmra.mrb[48].mxu0 %v11226_v8  ;;  %4716 = vmatmul.mubr.bf16.gmra.mrb[48].mxu1 %v11226_v8 }
 0x305   : > { %4434 = vmatprep.mubr.bf16.mxu0 %v11228_v50  ;;  %4756 = vmatprep.mubr.bf16.mxu1 %v11228_v50 }
 0x30c   : > { %4435 = vmatmul.mubr.bf16.vlgmr.msra.gmra.mrb[0].mxu0 %v8165_v29  ;;  %4757 = vmatmul.mubr.bf16.vlgmr.msra.gmra.mrb[0].mxu1 %v8165_v29  ;;  %v7384_v29 = vcombine.low %v2459_v48, %v2463_v51 }
 0x30d   : > { %4886 = vmatpush1.bf16.msra.mxu0 %v7336_v2  ;;  %5208 = vmatpush1.bf16.msra.mxu1 %v7338_v32  ;;  %v7395_v2 = vcombine.high %v2468_v6, %v2472_v9  ;;  %v2476_v32 = vld [vmem:[%s9276_s20 + $0x218] sm:$0xff] }
 0x30e   : > { %4444 = vmatprep.mubr.bf16.mxu0 %v11242_v55  ;;  %4766 = vmatprep.mubr.bf16.mxu1 %v11242_v55 }
 0x30f   : > { %4887 = vmatprep.subr.bf16.mxu0 %v7345_v1  ;;  %5209 = vmatprep.subr.bf16.mxu1 %v7347_v28  ;;  %v2480_v1 = vld [vmem:[%s9276_s20 + $0x238] sm:$0xff]  ;;  %v7401_v28 = vcombine.high %v2475_v44, %v2479_v38 }
 0x310   : > { %v7403_v21 = vcombine.high %v2476_v32, %v2480_v1  ;;  %v7402_v20 = vcombine.low %v2476_v32, %v2480_v1  ;;  %v8188_v1 = vld [vmem:[#allocation2 + $0xe8] ss:$16 sps:$4 sm:$0xff]  }
 0x311   : > { %4888 = vmatpush1.bf16.msra.mxu0 %v7344_v3  ;;  %5210 = vmatpush1.bf16.msra.mxu1 %v7346_v34  ;;  %v2483_v3 = vld [vmem:[%s9276_s20 + $0x250] sm:$0xff] }
 0x312   : > { %4889 = vmatprep.subr.bf16.mxu0 %v7353_v42  ;;  %5211 = vmatprep.subr.bf16.mxu1 %v7355_v13  ;;  %v2487_v34 = vld [vmem:[%s9276_s20 + $0x270] sm:$0xff]  ;;  %v8180_v42 = vld [vmem:[#allocation2 + $0xac] ss:$16 sps:$4 sm:$0xff]  }
 0x313   : > { %v2484_v13 = vld [vmem:[%s9276_s20 + $0x258] sm:$0xff]  ;;  %v7408_v62 = vcombine.low %v2483_v3, %v2487_v34 }
 0x314   : > { %4445 = vmatmul.mubr.bf16.gmra.mrb[4].mxu0 %v8170_v40  ;;  %4767 = vmatmul.mubr.bf16.gmra.mrb[4].mxu1 %v8170_v40  ;;  %v2488_v40 = vld [vmem:[%s9276_s20 + $0x278] sm:$0xff] }
 0x315   : > { %4890 = vmatpush1.bf16.msra.mxu0 %v7352_v47  ;;  %5212 = vmatpush1.bf16.msra.mxu1 %v7354_v15  ;;  %v7409_v47 = vcombine.high %v2483_v3, %v2487_v34  ;;  %v7411_v43 = vcombine.high %v2484_v13, %v2488_v40  ;;  %v2495_v15 = vld [vmem:[%s9276_s20 + $0x2b0] sm:$0xff]  ;;  %v2536_v3 = vld [vmem:[%s9276_s20 + $0x3f8] sm:$0xff] }
 0x316   : > { %4454 = vmatprep.mubr.bf16.mxu0 %v11254_v56  ;;  %4776 = vmatprep.mubr.bf16.mxu1 %v11254_v56  ;;  %v7417_v49 = vcombine.high %v2491_v12, %v2495_v15  ;;  %v7416_v10 = vcombine.low %v2491_v12, %v2495_v15 }
 0x317   : > { %4891 = vmatprep.subr.bf16.mxu0 %v7361_v57  ;;  %5213 = vmatprep.subr.bf16.mxu1 %v7363_v53  ;;  %v2492_v57 = vld [vmem:[%s9276_s20 + $0x298] sm:$0xff]  ;;  %v7410_v53 = vcombine.low %v2484_v13, %v2488_v40 }
 0x319   : > { %4892 = vmatpush1.bf16.msra.mxu0 %v7360_v5  ;;  %5214 = vmatpush1.bf16.msra.mxu1 %v7362_v37  ;;  %v7419_v5 = vcombine.high %v2492_v57, %v2496_v36  ;;  %v2499_v37 = vld [vmem:[%s9276_s20 + $0x2d0] sm:$0xff] }
 0x31a   : > { %4893 = vmatprep.subr.bf16.mxu0 %v7369_v19  ;;  %5215 = vmatprep.subr.bf16.mxu1 %v7371_v41  ;;  %v2503_v19 = vld [vmem:[%s9276_s20 + $0x2f0] sm:$0xff]  ;;  %v8183_v41 = vld [vmem:[#allocation2 + $0xcc] ss:$16 sps:$4 sm:$0xff]  }
 0x31b   : > { %v7425_v54 = vcombine.high %v2499_v37, %v2503_v19  ;;  %v7424_v48 = vcombine.low %v2499_v37, %v2503_v19  ;;  %v8198_v37 = vld [vmem:[#allocation2 + $0x16c] ss:$16 sps:$4 sm:$0xff]  }
 0x31c   : > { %4455 = vmatmul.mubr.bf16.gmra.mrb[8].mxu0 %v8173_v31  ;;  %4777 = vmatmul.mubr.bf16.gmra.mrb[8].mxu1 %v8173_v31  ;;  %v2500_v31 = vld [vmem:[%s9276_s20 + $0x2d8] sm:$0xff] }
 0x31d   : > { %4464 = vmatprep.mubr.bf16.mxu0 %v8174_v58  ;;  %4786 = vmatprep.mubr.bf16.mxu1 %v8174_v58  ;;  %v7418_v58 = vcombine.low %v2492_v57, %v2496_v36  ;;  %v7427_v16 = vcombine.high %v2500_v31, %v2504_v59  ;;  %v7426_v51 = vcombine.low %v2500_v31, %v2504_v59  ;;  %v8191_v36 = vld [vmem:[#allocation2 + $0x108] ss:$16 sps:$4 sm:$0xff]  }
 0x31e   : > { %4894 = vmatpush1.bf16.msra.mxu0 %v7368_v33  ;;  %5216 = vmatpush1.bf16.msra.mxu1 %v7370_v52  ;;  %v2507_v33 = vld [vmem:[%s9276_s20 + $0x310] sm:$0xff]  ;;  %v2408_v19 = vld [vmem:[#allocation2 + $0x188] sm:$0x33] }
 0x31f   : > { %4895 = vmatprep.subr.bf16.mxu0 %v7377_v39  ;;  %5217 = vmatprep.subr.bf16.mxu1 %v7379_v45  ;;  %v2511_v52 = vld [vmem:[%s9276_s20 + $0x330] sm:$0xff]  ;;  %v2508_v39 = vld [vmem:[%s9276_s20 + $0x318] sm:$0xff]  ;;  %v11319_v31 = vcombine.high %v2408_v19, %v2408_v19  ;;  %v11323_v59 = vcombine.low %v2408_v19, %v2408_v19 }
 0x320   : > { %v2512_v45 = vld [vmem:[%s9276_s20 + $0x338] sm:$0xff]  ;;  %v7433_v46 = vcombine.high %v2507_v33, %v2511_v52  ;;  %v7432_v18 = vcombine.low %v2507_v33, %v2511_v52 }
 0x321   : > { %v2548_v33 = vld [vmem:[%s9276_s20 + $0x458] sm:$0xff] }
 0x322   : > { %4896 = vmatpush1.bf16.msra.mxu0 %v7376_v63  ;;  %5218 = vmatpush1.bf16.msra.mxu1 %v7378_v24  ;;  %v7435_v63 = vcombine.high %v2508_v39, %v2512_v45  ;;  %v2515_v24 = vld [vmem:[%s9276_s20 + $0x350] sm:$0xff]  ;;  %v2552_v52 = vld [vmem:[%s9276_s20 + $0x478] sm:$0xff] }
 0x323   : > { %4897 = vmatprep.subr.bf16.mxu0 %v7385_v30  ;;  %5219 = vmatprep.subr.bf16.mxu1 %v7387_v22  ;;  %v2519_v30 = vld [vmem:[%s9276_s20 + $0x370] sm:$0xff]  ;;  %v2516_v22 = vld [vmem:[%s9276_s20 + $0x358] sm:$0xff] }
 0x324   : > { %4465 = vmatmul.mubr.bf16.gmra.mrb[12].mxu0 %v8176_v14  ;;  %4787 = vmatmul.mubr.bf16.gmra.mrb[12].mxu1 %v8176_v14  ;;  %v8186_v14 = vld [vmem:[#allocation2 + $0xec] ss:$16 sps:$4 sm:$0xff]   ;;  %v7441_v6 = vcombine.high %v2515_v24, %v2519_v30  ;;  %v7443_v9 = vcombine.high %v2516_v22, %v2520_v23  ;;  %v7440_v44 = vcombine.low %v2515_v24, %v2519_v30 }
 0x325   : > { %4474 = vmatprep.mubr.bf16.mxu0 %v8177_v26  ;;  %4796 = vmatprep.mubr.bf16.mxu1 %v8177_v26  ;;  %v7434_v26 = vcombine.low %v2508_v39, %v2512_v45  ;;  %v7442_v38 = vcombine.low %v2516_v22, %v2520_v23  ;;  %v2560_v24 = vld [vmem:[%s9276_s20 + $0x4b8] sm:$0xff]  ;;  %v7474_v22 = vcombine.low %v2548_v33, %v2552_v52 }
 0x326   : > { %4898 = vmatpush1.bf16.msra.mxu0 %v7384_v29  ;;  %5220 = vmatpush1.bf16.msra.mxu1 %v7386_v0  ;;  %v2523_v29 = vld [vmem:[%s9276_s20 + $0x390] sm:$0xff] }
 0x327   : > { %4899 = vmatprep.subr.bf16.mxu0 %v7393_v17  ;;  %5221 = vmatprep.subr.bf16.mxu1 %v7395_v2  ;;  %v2527_v0 = vld [vmem:[%s9276_s20 + $0x3b0] sm:$0xff]  ;;  %v2524_v17 = vld [vmem:[%s9276_s20 + $0x398] sm:$0xff] }
 0x328   : > { %v2528_v2 = vld [vmem:[%s9276_s20 + $0x3b8] sm:$0xff]  ;;  %v7449_v32 = vcombine.high %v2523_v29, %v2527_v0  ;;  %v7448_v34 = vcombine.low %v2523_v29, %v2527_v0 }
 0x329   : > { %v2564_v29 = vld [vmem:[%s9276_s20 + $0x4d8] sm:$0xff] }
 0x32a   : > { %4900 = vmatpush1.bf16.msra.mxu0 %v7392_v35  ;;  %5222 = vmatpush1.bf16.msra.mxu1 %v7394_v7  ;;  %v7451_v35 = vcombine.high %v2524_v17, %v2528_v2  ;;  %v2531_v7 = vld [vmem:[%s9276_s20 + $0x3d0] sm:$0xff]  ;;  %v2568_v0 = vld [vmem:[%s9276_s20 + $0x4f8] sm:$0xff] }
 0x32b   : > { %4901 = vmatprep.subr.bf16.mxu0 %v7401_v28  ;;  %5223 = vmatprep.subr.bf16.mxu1 %v7403_v21  ;;  %v2535_v28 = vld [vmem:[%s9276_s20 + $0x3f0] sm:$0xff]  ;;  %v2532_v21 = vld [vmem:[%s9276_s20 + $0x3d8] sm:$0xff] }
 0x32c   : > { %4475 = vmatmul.mubr.bf16.gmra.mrb[16].mxu0 %v8179_v27  ;;  %4797 = vmatmul.mubr.bf16.gmra.mrb[16].mxu1 %v8179_v27  ;;  %v8189_v27 = vld [vmem:[#allocation2 + $0x10c] ss:$16 sps:$4 sm:$0xff]   ;;  %v7457_v13 = vcombine.high %v2531_v7, %v2535_v28  ;;  %v7459_v40 = vcombine.high %v2532_v21, %v2536_v3  ;;  %v7456_v12 = vcombine.low %v2531_v7, %v2535_v28 }
 0x32d   : > { %4484 = vmatprep.mubr.bf16.mxu0 %v8180_v42  ;;  %4806 = vmatprep.mubr.bf16.mxu1 %v8180_v42  ;;  %v7450_v42 = vcombine.low %v2524_v17, %v2528_v2  ;;  %v7458_v15 = vcombine.low %v2532_v21, %v2536_v3  ;;  %v2576_v7 = vld [vmem:[%s9276_s20 + $0x538] sm:$0xff]  ;;  %v7490_v21 = vcombine.low %v2564_v29, %v2568_v0 }
 0x32e   : > { %4902 = vmatpush1.bf16.msra.mxu0 %v7400_v60  ;;  %5224 = vmatpush1.bf16.msra.mxu1 %v7402_v20  ;;  %v11307_v60 = vld [vmem:[%s9276_s20 + $0x410] sm:$0xff] }
 0x32f   : > { %4903 = vmatprep.subr.bf16.mxu0 %v7409_v47  ;;  %5225 = vmatprep.subr.bf16.mxu1 %v7411_v43  ;;  %v11310_v20 = vld [vmem:[%s9276_s20 + $0x430] sm:$0xff]  ;;  %v11313_v47 = vld [vmem:[%s9276_s20 + $0x418] sm:$0xff] }
 0x330   : > { %v2544_v43 = vld [vmem:[%s9276_s20 + $0x438] sm:$0xff]  ;;  %v7465_v57 = vcombine.high %v11307_v60, %v11310_v20 }
 0x331   : > { %v7466_v39 = vcombine.low %v11313_v47, %v2544_v43 }
 0x332   : > { %4904 = vmatpush1.bf16.msra.mxu0 %v7408_v62  ;;  %5226 = vmatpush1.bf16.msra.mxu1 %v7410_v53  ;;  %v7467_v62 = vcombine.high %v11313_v47, %v2544_v43  ;;  %v8192_v53 = vld [vmem:[#allocation2 + $0x12c] ss:$16 sps:$4 sm:$0xff]  }
 0x333   : > { %4905 = vmatprep.subr.bf16.mxu0 %v7417_v49  ;;  %5227 = vmatprep.subr.bf16.mxu1 %v7419_v5  ;;  %v8194_v49 = vld [vmem:[#allocation2 + $0x128] ss:$16 sps:$4 sm:$0xff]  }
 0x334   : > { %4485 = vmatmul.mubr.bf16.gmra.mrb[20].mxu0 %v8182_v4  ;;  %4807 = vmatmul.mubr.bf16.gmra.mrb[20].mxu1 %v8182_v4  ;;  %v8195_v4 = vld [vmem:[#allocation2 + $0x14c] ss:$16 sps:$4 sm:$0xff]   ;;  %v8197_v5 = vld [vmem:[#allocation2 + $0x148] ss:$16 sps:$4 sm:$0xff]  }
 0x335   : > { %4494 = vmatprep.mubr.bf16.mxu0 %v8183_v41  ;;  %4816 = vmatprep.mubr.bf16.mxu1 %v8183_v41  ;;  %v8200_v41 = vld [vmem:[#allocation2 + $0x168] ss:$16 sps:$4 sm:$0xff]  }
 0x336   : > { %4906 = vmatpush1.bf16.msra.mxu0 %v7416_v10  ;;  %5228 = vmatpush1.bf16.msra.mxu1 %v7418_v58  ;;  %v8603_v10 = vld [vmem:[#allocation2 + $0x4] ss:$16 sps:$4 sm:$0xff]  }
 0x337   : > { %4907 = vmatprep.subr.bf16.mxu0 %v7425_v54  ;;  %5229 = vmatprep.subr.bf16.mxu1 %v7427_v16  ;;  %v2547_v58 = vld [vmem:[%s9276_s20 + $0x450] sm:$0xff]  ;;  %v7464_v16 = vcombine.low %v11307_v60, %v11310_v20  ;;  %v2584_v60 = vld [vmem:[%s9276_s20 + $0x578] sm:$0xff] }
 0x338   : > { %v2551_v54 = vld [vmem:[%s9276_s20 + $0x470] sm:$0xff] }
 0x339   : > { %v7473_v45 = vcombine.high %v2547_v58, %v2551_v54  ;;  %v7472_v30 = vcombine.low %v2547_v58, %v2551_v54  ;;  %v2596_v58 = vld [vmem:[%s9276_s20 + $0x5d8] sm:$0xff] }
 0x33a   : > { %4908 = vmatpush1.bf16.msra.mxu0 %v7424_v48  ;;  %5230 = vmatpush1.bf16.msra.mxu1 %v7426_v51  ;;  %v2555_v48 = vld [vmem:[%s9276_s20 + $0x490] sm:$0xff]  ;;  %v2600_v54 = vld [vmem:[%s9276_s20 + $0x5f8] sm:$0xff] }
 0x33b   : > { %4909 = vmatprep.subr.bf16.mxu0 %v7433_v46  ;;  %5231 = vmatprep.subr.bf16.mxu1 %v7435_v63  ;;  %v2559_v51 = vld [vmem:[%s9276_s20 + $0x4b0] sm:$0xff]  ;;  %v2556_v63 = vld [vmem:[%s9276_s20 + $0x498] sm:$0xff] }
 0x33c   : > { %4495 = vmatmul.mubr.bf16.gmra.mrb[24].mxu0 %v8185_v11  ;;  %4817 = vmatmul.mubr.bf16.gmra.mrb[24].mxu1 %v8185_v11  ;;  %v8604_v46 = vld [vmem:[#allocation2] ss:$16 sps:$4 sm:$0xff]   ;;  %v7475_v11 = vcombine.high %v2548_v33, %v2552_v52  ;;  %v7481_v23 = vcombine.high %v2555_v48, %v2559_v51  ;;  %v7482_v17 = vcombine.low %v2556_v63, %v2560_v24 }
 0x33d   : > { %4504 = vmatprep.mubr.bf16.mxu0 %v8186_v14  ;;  %4826 = vmatprep.mubr.bf16.mxu1 %v8186_v14  ;;  %v8605_v14 = vld [vmem:[#allocation2 + $0x24] ss:$16 sps:$4 sm:$0xff]  }
 0x33e   : > { %4910 = vmatpush1.bf16.msra.mxu0 %v7432_v18  ;;  %5232 = vmatpush1.bf16.msra.mxu1 %v7434_v26  ;;  %v7483_v18 = vcombine.high %v2556_v63, %v2560_v24  ;;  %v2563_v26 = vld [vmem:[%s9276_s20 + $0x4d0] sm:$0xff]  ;;  %v2608_v63 = vld [vmem:[%s9276_s20 + $0x638] sm:$0xff] }
 0x33f   : > { %4911 = vmatprep.subr.bf16.mxu0 %v7441_v6  ;;  %5233 = vmatprep.subr.bf16.mxu1 %v7443_v9  ;;  %v2567_v6 = vld [vmem:[%s9276_s20 + $0x4f0] sm:$0xff]  ;;  %v7480_v9 = vcombine.low %v2555_v48, %v2559_v51 }
 0x340   : > { %v7489_v2 = vcombine.high %v2563_v26, %v2567_v6  ;;  %v7488_v28 = vcombine.low %v2563_v26, %v2567_v6  ;;  %v2603_v48 = vld [vmem:[%s9276_s20 + $0x610] sm:$0xff]  ;;  %v2612_v26 = vld [vmem:[%s9276_s20 + $0x658] sm:$0xff] }
 0x341   : > { %v2607_v51 = vld [vmem:[%s9276_s20 + $0x630] sm:$0xff]  ;;  %v2616_v6 = vld [vmem:[%s9276_s20 + $0x678] sm:$0xff] }
 0x342   : > { %4912 = vmatpush1.bf16.msra.mxu0 %v7440_v44  ;;  %5234 = vmatpush1.bf16.msra.mxu1 %v7442_v38  ;;  %v2571_v44 = vld [vmem:[%s9276_s20 + $0x510] sm:$0xff] }
 0x343   : > { %4913 = vmatprep.subr.bf16.mxu0 %v7449_v32  ;;  %5235 = vmatprep.subr.bf16.mxu1 %v7451_v35  ;;  %v2575_v38 = vld [vmem:[%s9276_s20 + $0x530] sm:$0xff]  ;;  %v2572_v35 = vld [vmem:[%s9276_s20 + $0x518] sm:$0xff] }
 0x344   : > { %4505 = vmatmul.mubr.bf16.gmra.mrb[28].mxu0 %v8188_v1  ;;  %4827 = vmatmul.mubr.bf16.gmra.mrb[28].mxu1 %v8188_v1  ;;  %v8606_v32 = vld [vmem:[#allocation2 + $0x20] ss:$16 sps:$4 sm:$0xff]   ;;  %v7491_v1 = vcombine.high %v2564_v29, %v2568_v0  ;;  %v7497_v3 = vcombine.high %v2571_v44, %v2575_v38  ;;  %v7496_v20 = vcombine.low %v2571_v44, %v2575_v38 }
 0x345   : > { %4514 = vmatprep.mubr.bf16.mxu0 %v8189_v27  ;;  %4836 = vmatprep.mubr.bf16.mxu1 %v8189_v27  ;;  %v8607_v27 = vld [vmem:[#allocation2 + $0x44] ss:$16 sps:$4 sm:$0xff]   ;;  %v7498_v47 = vcombine.low %v2572_v35, %v2576_v7 }
 0x346   : > { %4914 = vmatpush1.bf16.msra.mxu0 %v7448_v34  ;;  %5236 = vmatpush1.bf16.msra.mxu1 %v7450_v42  ;;  %v7499_v34 = vcombine.high %v2572_v35, %v2576_v7  ;;  %v2579_v42 = vld [vmem:[%s9276_s20 + $0x550] sm:$0xff]  ;;  %v2624_v35 = vld [vmem:[%s9276_s20 + $0x6b8] sm:$0xff] }
 0x347   : > { %4915 = vmatprep.subr.bf16.mxu0 %v7457_v13  ;;  %5237 = vmatprep.subr.bf16.mxu1 %v7459_v40  ;;  %v2583_v13 = vld [vmem:[%s9276_s20 + $0x570] sm:$0xff]  ;;  %v2580_v40 = vld [vmem:[%s9276_s20 + $0x558] sm:$0xff] }
 0x348   : > { %v7505_v43 = vcombine.high %v2579_v42, %v2583_v13  ;;  %v2619_v44 = vld [vmem:[%s9276_s20 + $0x690] sm:$0xff] }
 0x349   : > { %v2623_v38 = vld [vmem:[%s9276_s20 + $0x6b0] sm:$0xff] }
 0x34a   : > { %4916 = vmatpush1.bf16.msra.mxu0 %v7456_v12  ;;  %5238 = vmatpush1.bf16.msra.mxu1 %v7458_v15  ;;  %v8608_v12 = vld [vmem:[#allocation2 + $0x40] ss:$16 sps:$4 sm:$0xff]   ;;  %v7507_v15 = vcombine.high %v2580_v40, %v2584_v60 }
 0x34b   : > { %5046 = vmatprep.subr.bf16.mxu0 %v7465_v57  ;;  %5368 = vmatprep.subr.bf16.mxu1 %v7467_v62  ;;  %v2587_v57 = vld [vmem:[%s9276_s20 + $0x590] sm:$0xff] }
 0x34c   : > { %4515 = vmatmul.mubr.bf16.gmra.mrb[32].mxu0 %v8191_v36  ;;  %4837 = vmatmul.mubr.bf16.gmra.mrb[32].mxu1 %v8191_v36  ;;  %v2591_v36 = vld [vmem:[%s9276_s20 + $0x5b0] sm:$0xff] }
 0x34d   : > { %4524 = vmatprep.mubr.bf16.mxu0 %v8192_v53  ;;  %4846 = vmatprep.mubr.bf16.mxu1 %v8192_v53  ;;  %v8609_v62 = vld [vmem:[#allocation2 + $0x64] ss:$16 sps:$4 sm:$0xff]   ;;  %v2588_v53 = vld [vmem:[%s9276_s20 + $0x598] sm:$0xff] }
 0x354   : > { %4525 = vmatmul.mubr.bf16.gmra.mrb[36].mxu0 %v8194_v49  ;;  %4847 = vmatmul.mubr.bf16.gmra.mrb[36].mxu1 %v8194_v49  ;;  %v2592_v49 = vld [vmem:[%s9276_s20 + $0x5b8] sm:$0xff] }
 0x355   : > { %4534 = vmatprep.mubr.bf16.mxu0 %v8195_v4  ;;  %4856 = vmatprep.mubr.bf16.mxu1 %v8195_v4  ;;  %v7504_v4 = vcombine.low %v2579_v42, %v2583_v13  ;;  %v7515_v19 = vcombine.high %v2588_v53, %v2592_v49  ;;  %v7514_v33 = vcombine.low %v2588_v53, %v2592_v49  ;;  %v2628_v42 = vld [vmem:[%s9276_s20 + $0x6d8] sm:$0xff] }
 0x356   : > { %v2632_v13 = vld [vmem:[%s9276_s20 + $0x6f8] sm:$0xff] }
 0x357   : > { %v7554_v49 = vcombine.low %v2628_v42, %v2632_v13 }
 0x35c   : > { %4535 = vmatmul.mubr.bf16.gmra.mrb[40].mxu0 %v8197_v5  ;;  %4857 = vmatmul.mubr.bf16.gmra.mrb[40].mxu1 %v8197_v5  ;;  %v7506_v5 = vcombine.low %v2580_v40, %v2584_v60  ;;  %v7544_v40 = vcombine.low %v2619_v44, %v2623_v38 }
 0x35d   : > { %4544 = vmatprep.mubr.bf16.mxu0 %v8198_v37  ;;  %4866 = vmatprep.mubr.bf16.mxu1 %v8198_v37  ;;  %v7513_v37 = vcombine.high %v2587_v57, %v2591_v36 }
 0x364   : > { %4545 = vmatmul.mubr.bf16.gmra.mrb[44].mxu0 %v8200_v41  ;;  %4867 = vmatmul.mubr.bf16.gmra.mrb[44].mxu1 %v8200_v41  ;;  %v2595_v41 = vld [vmem:[%s9276_s20 + $0x5d0] sm:$0xff] }
 0x365   : > { %4554 = vmatprep.mubr.bf16.mxu0 %v11319_v31  ;;  %4876 = vmatprep.mubr.bf16.mxu1 %v11319_v31 }
 0x36c   : > { %4555 = vmatmul.mubr.bf16.gmra.mrb[48].mxu0 %v11323_v59  ;;  %4877 = vmatmul.mubr.bf16.gmra.mrb[48].mxu1 %v11323_v59 }
 0x36d   : > { %4917 = vmatprep.mubr.bf16.mxu0 %v8603_v10  ;;  %5239 = vmatprep.mubr.bf16.mxu1 %v8603_v10  ;;  %v2599_v10 = vld [vmem:[%s9276_s20 + $0x5f0] sm:$0xff] }
 0x36e   : > { %v7521_v52 = vcombine.high %v2595_v41, %v2599_v10  ;;  %v7520_v24 = vcombine.low %v2595_v41, %v2599_v10  ;;  %v2644_v41 = vld [vmem:[%s9276_s20 + $0x758] sm:$0xff] }
 0x36f   : > { %v2648_v10 = vld [vmem:[%s9276_s20 + $0x778] sm:$0xff] }
 0x374   : > { %4918 = vmatmul.mubr.bf16.vlgmr.msra.gmra.mrb[52].mxu0 %v8604_v46  ;;  %5240 = vmatmul.mubr.bf16.vlgmr.msra.gmra.mrb[52].mxu1 %v8604_v46  ;;  %v8611_v46 = vld [vmem:[#allocation2 + $0x84] ss:$16 sps:$4 sm:$0xff]  }
 0x375   : > { %5047 = vmatpush1.bf16.msra.mxu0 %v7464_v16  ;;  %5369 = vmatpush1.bf16.msra.mxu1 %v7466_v39  ;;  %v7512_v16 = vcombine.low %v2587_v57, %v2591_v36  ;;  %v8610_v39 = vld [vmem:[#allocation2 + $0x60] ss:$16 sps:$4 sm:$0xff]   ;;  %v8615_v57 = vld [vmem:[#allocation2 + $0xc4] ss:$16 sps:$4 sm:$0xff]   ;;  %v2636_v36 = vld [vmem:[%s9276_s20 + $0x718] sm:$0xff] }
 0x376   : > { %4927 = vmatprep.mubr.bf16.mxu0 %v8605_v14  ;;  %5048 = vmatprep.subr.bf16.mxu0 %v7473_v45  ;;  %v7523_v45 = vcombine.high %v2596_v58, %v2600_v54 }
 0x377   : > { %5249 = vmatprep.mubr.bf16.mxu1 %v8605_v14  ;;  %5370 = vmatprep.subr.bf16.mxu1 %v7475_v11  ;;  %v2604_v11 = vld [vmem:[%s9276_s20 + $0x618] sm:$0xff]  ;;  %v7529_v14 = vcombine.high %v2603_v48, %v2607_v51 }
 0x378   : > { %v7530_v29 = vcombine.low %v2604_v11, %v2608_v63 }
 0x379   : > { %5049 = vmatpush1.bf16.msra.mxu0 %v7472_v30  ;;  %5371 = vmatpush1.bf16.msra.mxu1 %v7474_v22  ;;  %v7522_v30 = vcombine.low %v2596_v58, %v2600_v54  ;;  %v7531_v22 = vcombine.high %v2604_v11, %v2608_v63  ;;  %v7570_v63 = vcombine.low %v2644_v41, %v2648_v10 }
 0x37a   : > { %5050 = vmatprep.subr.bf16.mxu0 %v7481_v23  ;;  %5372 = vmatprep.subr.bf16.mxu1 %v7483_v18  ;;  %v2611_v23 = vld [vmem:[%s9276_s20 + $0x650] sm:$0xff] }
 0x37b   : > { %v2615_v18 = vld [vmem:[%s9276_s20 + $0x670] sm:$0xff] }
 0x37c   : > { %4928 = vmatmul.mubr.bf16.gmra.mrb[56].mxu0 %v8606_v32  ;;  %5250 = vmatmul.mubr.bf16.gmra.mrb[56].mxu1 %v8606_v32  ;;  %v7537_v0 = vcombine.high %v2611_v23, %v2615_v18  ;;  %v8613_v32 = vld [vmem:[#allocation2 + $0xa4] ss:$16 sps:$4 sm:$0xff]   ;;  %v7536_v7 = vcombine.low %v2611_v23, %v2615_v18  ;;  %v2660_v23 = vld [vmem:[%s9276_s20 + $0x7d8] sm:$0xff] }
 0x37d   : > { %5051 = vmatpush1.bf16.msra.mxu0 %v7480_v9  ;;  %5373 = vmatpush1.bf16.msra.mxu1 %v7482_v17  ;;  %v7528_v9 = vcombine.low %v2603_v48, %v2607_v51  ;;  %v8612_v17 = vld [vmem:[#allocation2 + $0x80] ss:$16 sps:$4 sm:$0xff]   ;;  %v8617_v48 = vld [vmem:[#allocation2 + $0xe4] ss:$16 sps:$4 sm:$0xff]   ;;  %v2652_v51 = vld [vmem:[%s9276_s20 + $0x798] sm:$0xff] }
 0x37e   : > { %4937 = vmatprep.mubr.bf16.mxu0 %v8607_v27  ;;  %5259 = vmatprep.mubr.bf16.mxu1 %v8607_v27  ;;  %v7545_v27 = vcombine.high %v2619_v44, %v2623_v38  ;;  %v2664_v18 = vld [vmem:[%s9276_s20 + $0x7f8] sm:$0xff]  ;;  %v8620_v38 = vld [vmem:[#allocation2 + $0x100] ss:$16 sps:$4 sm:$0xff]  }
 0x37f   : > { %5052 = vmatprep.subr.bf16.mxu0 %v7489_v2  ;;  %5374 = vmatprep.subr.bf16.mxu1 %v7491_v1  ;;  %v7539_v2 = vcombine.high %v2612_v26, %v2616_v6  ;;  %v2620_v1 = vld [vmem:[%s9276_s20 + $0x698] sm:$0xff]  ;;  %v7586_v44 = vcombine.low %v2660_v23, %v2664_v18 }
 0x380   : > { %v7546_v60 = vcombine.low %v2620_v1, %v2624_v35 }
 0x381   : > { %5053 = vmatpush1.bf16.msra.mxu0 %v7488_v28  ;;  %5375 = vmatpush1.bf16.msra.mxu1 %v7490_v21  ;;  %v7538_v28 = vcombine.low %v2612_v26, %v2616_v6  ;;  %v7547_v21 = vcombine.high %v2620_v1, %v2624_v35  ;;  %v8622_v1 = vld [vmem:[#allocation2 + $0x120] ss:$16 sps:$4 sm:$0xff]   ;;  %v8623_v35 = vld [vmem:[#allocation2 + $0x144] ss:$16 sps:$4 sm:$0xff]  }
 0x382   : > { %5054 = vmatprep.subr.bf16.mxu0 %v7497_v3  ;;  %5376 = vmatprep.subr.bf16.mxu1 %v7499_v34  ;;  %v2627_v3 = vld [vmem:[%s9276_s20 + $0x6d0] sm:$0xff] }
 0x383   : > { %v2631_v34 = vld [vmem:[%s9276_s20 + $0x6f0] sm:$0xff] }
 0x384   : > { %4938 = vmatmul.mubr.bf16.gmra.mrb[60].mxu0 %v8608_v12  ;;  %5260 = vmatmul.mubr.bf16.gmra.mrb[60].mxu1 %v8608_v12  ;;  %v2635_v12 = vld [vmem:[%s9276_s20 + $0x710] sm:$0xff]  ;;  %v7552_v53 = vcombine.low %v2627_v3, %v2631_v34 }
 0x385   : > { %4947 = vmatprep.mubr.bf16.mxu0 %v8609_v62  ;;  %5269 = vmatprep.mubr.bf16.mxu1 %v8609_v62  ;;  %v2640_v62 = vld [vmem:[%s9276_s20 + $0x738] sm:$0xff] }
 0x386   : > { %5055 = vmatpush1.bf16.msra.mxu0 %v7496_v20  ;;  %5377 = vmatpush1.bf16.msra.mxu1 %v7498_v47  ;;  %v7553_v20 = vcombine.high %v2627_v3, %v2631_v34  ;;  %v8614_v47 = vld [vmem:[#allocation2 + $0xa0] ss:$16 sps:$4 sm:$0xff]   ;;  %v7562_v54 = vcombine.low %v2636_v36, %v2640_v62  ;;  %v8626_v3 = vld [vmem:[#allocation2 + $0xc] ss:$16 sps:$4 sm:$0xff]  }
 0x387   : > { %5056 = vmatprep.subr.bf16.mxu0 %v7505_v43  ;;  %5378 = vmatprep.subr.bf16.mxu1 %v7507_v15  ;;  %v7555_v43 = vcombine.high %v2628_v42, %v2632_v13  ;;  %v2639_v15 = vld [vmem:[%s9276_s20 + $0x730] sm:$0xff] }
 0x388   : > { %v7560_v58 = vcombine.low %v2635_v12, %v2639_v15  ;;  %v2665_v42 = vld [vmem:[%s9274_s19] sm:$0xff] }
 0x38a   : > { %5057 = vmatpush1.bf16.msra.mxu0 %v7504_v4  ;;  %5379 = vmatpush1.bf16.msra.mxu1 %v7506_v5  ;;  %v7561_v4 = vcombine.high %v2635_v12, %v2639_v15  ;;  %v7563_v5 = vcombine.high %v2636_v36, %v2640_v62 }
 0x38b   : > { %5058 = vmatprep.subr.bf16.mxu0 %v7513_v37  ;;  %5380 = vmatprep.subr.bf16.mxu1 %v7515_v19  ;;  %v2643_v37 = vld [vmem:[%s9276_s20 + $0x750] sm:$0xff] }
 0x38c   : > { %4948 = vmatmul.mubr.bf16.gmra.mrb[64].mxu0 %v8610_v39  ;;  %5270 = vmatmul.mubr.bf16.gmra.mrb[64].mxu1 %v8610_v39  ;;  %v2647_v19 = vld [vmem:[%s9276_s20 + $0x770] sm:$0xff] }
 0x38d   : > { %4957 = vmatprep.mubr.bf16.mxu0 %v8611_v46  ;;  %5279 = vmatprep.mubr.bf16.mxu1 %v8611_v46  ;;  %v2651_v39 = vld [vmem:[%s9276_s20 + $0x790] sm:$0xff]  ;;  %v2656_v46 = vld [vmem:[%s9276_s20 + $0x7b8] sm:$0xff]  ;;  %v7568_v11 = vcombine.low %v2643_v37, %v2647_v19 }
 0x38e   : > { %5059 = vmatpush1.bf16.msra.mxu0 %v7512_v16  ;;  %5381 = vmatpush1.bf16.msra.mxu1 %v7514_v33  ;;  %v7569_v16 = vcombine.high %v2643_v37, %v2647_v19  ;;  %v8616_v33 = vld [vmem:[#allocation2 + $0xc0] ss:$16 sps:$4 sm:$0xff]   ;;  %v7578_v6 = vcombine.low %v2652_v51, %v2656_v46 }
 0x38f   : > { %5060 = vmatprep.subr.bf16.mxu0 %v7521_v52  ;;  %5382 = vmatprep.subr.bf16.mxu1 %v7523_v45  ;;  %v7571_v52 = vcombine.high %v2644_v41, %v2648_v10  ;;  %v2655_v45 = vld [vmem:[%s9276_s20 + $0x7b0] sm:$0xff] }
 0x390   : > { %v7576_v26 = vcombine.low %v2651_v39, %v2655_v45 }
 0x392   : > { %5061 = vmatpush1.bf16.msra.mxu0 %v7520_v24  ;;  %5383 = vmatpush1.bf16.msra.mxu1 %v7522_v30  ;;  %v7577_v24 = vcombine.high %v2651_v39, %v2655_v45  ;;  %v7579_v30 = vcombine.high %v2652_v51, %v2656_v46 }
 0x393   : > { %5062 = vmatprep.subr.bf16.mxu0 %v7529_v14  ;;  %5384 = vmatprep.subr.bf16.mxu1 %v7531_v22  ;;  %v2659_v14 = vld [vmem:[%s9276_s20 + $0x7d0] sm:$0xff] }
 0x394   : > { %4958 = vmatmul.mubr.bf16.gmra.mrb[68].mxu0 %v8612_v17  ;;  %5280 = vmatmul.mubr.bf16.gmra.mrb[68].mxu1 %v8612_v17  ;;  %v2663_v22 = vld [vmem:[%s9276_s20 + $0x7f0] sm:$0xff] }
 0x395   : > { %4967 = vmatprep.mubr.bf16.mxu0 %v8613_v32  ;;  %5289 = vmatprep.mubr.bf16.mxu1 %v8613_v32  ;;  %v8619_v17 = vld [vmem:[#allocation2 + $0x104] ss:$16 sps:$4 sm:$0xff]  }
 0x396   : > { %5063 = vmatpush1.bf16.msra.mxu0 %v7528_v9  ;;  %5385 = vmatpush1.bf16.msra.mxu1 %v7530_v29  ;;  %v7585_v9 = vcombine.high %v2659_v14, %v2663_v22  ;;  %v8618_v29 = vld [vmem:[#allocation2 + $0xe0] ss:$16 sps:$4 sm:$0xff]   ;;  %v8621_v32 = vld [vmem:[#allocation2 + $0x124] ss:$16 sps:$4 sm:$0xff]  }
 0x397   : > { %5064 = vmatprep.subr.bf16.mxu0 %v7537_v0  ;;  %5386 = vmatprep.subr.bf16.mxu1 %v7539_v2  ;;  %v7587_v0 = vcombine.high %v2660_v23, %v2664_v18  ;;  %v7584_v2 = vcombine.low %v2659_v14, %v2663_v22 }
 0x39a   : > { %5065 = vmatpush1.bf16.msra.mxu0 %v7536_v7  ;;  %5387 = vmatpush1.bf16.msra.mxu1 %v7538_v28  ;;  %v8624_v7 = vld [vmem:[#allocation2 + $0x140] ss:$16 sps:$4 sm:$0xff]   ;;  %v8625_v28 = vld [vmem:[#allocation2 + $0x164] ss:$16 sps:$4 sm:$0xff]  }
 0x39b   : > { %5066 = vmatprep.subr.bf16.mxu0 %v7545_v27  ;;  %5388 = vmatprep.subr.bf16.mxu1 %v7547_v21  ;;  %v2667_v27 = vlaneseq }
 0x39c   : > { %4968 = vmatmul.mubr.bf16.gmra.mrb[72].mxu0 %v8614_v47  ;;  %5290 = vmatmul.mubr.bf16.gmra.mrb[72].mxu1 %v8614_v47  ;;  %v8628_v47 = vld [vmem:[#allocation2 + $0x2c] ss:$16 sps:$4 sm:$0xff]  }
 0x39d   : > { %4977 = vmatprep.mubr.bf16.mxu0 %v8615_v57  ;;  %5299 = vmatprep.mubr.bf16.mxu1 %v8615_v57  ;;  %v11395_v21 = vshrl.u32 %v2667_v27, 7 }
 0x39e   : > { %5067 = vmatpush1.bf16.msra.mxu0 %v7544_v40  ;;  %5389 = vmatpush1.bf16.msra.mxu1 %v7546_v60  ;;  %v8627_v40 = vld [vmem:[#allocation2 + $0x8] ss:$16 sps:$4 sm:$0xff]  }
 0x39f   : > { %5068 = vmatprep.subr.bf16.mxu0 %v7553_v20  ;;  %5390 = vmatprep.subr.bf16.mxu1 %v7555_v43  ;;  %13782 = vst [vmem:[#allocation75_spill] sm:$0xff] %v11395_v21  ;;  %v2669_v34 = vsub.s32 0, %v11395_v21  ;;  %v2673_v13 = vsub.s32 1, %v11395_v21 }
 0x3a1   : > { %v11404_v60 = vrot.slane %v2665_v42, %v2669_v34 }
 0x3a2   : > { %5069 = vmatpush1.bf16.msra.mxu0 %v7552_v53  ;;  %5391 = vmatpush1.bf16.msra.mxu1 %v7554_v49 }
 0x3a3   : > { %5070 = vmatprep.subr.bf16.mxu0 %v7561_v4  ;;  %5392 = vmatprep.subr.bf16.mxu1 %v7563_v5 }
 0x3a4   : > { %4978 = vmatmul.mubr.bf16.gmra.mrb[76].mxu0 %v8616_v33  ;;  %5300 = vmatmul.mubr.bf16.gmra.mrb[76].mxu1 %v8616_v33 }
 0x3a5   : > { %4987 = vmatprep.mubr.bf16.mxu0 %v8617_v48  ;;  %5309 = vmatprep.mubr.bf16.mxu1 %v8617_v48  ;;  %v8630_v48 = vld [vmem:[#allocation2 + $0x4c] ss:$16 sps:$4 sm:$0xff]  }
 0x3a6   : > { %5071 = vmatpush1.bf16.msra.mxu0 %v7560_v58  ;;  %5393 = vmatpush1.bf16.msra.mxu1 %v7562_v54 }
 0x3a7   : > { %5072 = vmatprep.subr.bf16.mxu0 %v7569_v16  ;;  %5394 = vmatprep.subr.bf16.mxu1 %v7571_v52  ;;  %v8629_v16 = vld [vmem:[#allocation2 + $0x28] ss:$16 sps:$4 sm:$0xff]  }
 0x3aa   : > { %5073 = vmatpush1.bf16.msra.mxu0 %v7568_v11  ;;  %5395 = vmatpush1.bf16.msra.mxu1 %v7570_v63 }
 0x3ab   : > { %5074 = vmatprep.subr.bf16.mxu0 %v7577_v24  ;;  %5396 = vmatprep.subr.bf16.mxu1 %v7579_v30 }
 0x3ac   : > { %4988 = vmatmul.mubr.bf16.gmra.mrb[80].mxu0 %v8618_v29  ;;  %5310 = vmatmul.mubr.bf16.gmra.mrb[80].mxu1 %v8618_v29 }
 0x3ad   : > { %4997 = vmatprep.mubr.bf16.mxu0 %v8619_v17  ;;  %5319 = vmatprep.mubr.bf16.mxu1 %v8619_v17 }
 0x3ae   : > { %5075 = vmatpush1.bf16.msra.mxu0 %v7576_v26  ;;  %5397 = vmatpush1.bf16.msra.mxu1 %v7578_v6 }
 0x3af   : > { %5076 = vmatprep.subr.bf16.mxu0 %v7585_v9  ;;  %5398 = vmatprep.subr.bf16.mxu1 %v7587_v0 }
 0x3b2   : > { %5077 = vmatpush1.bf16.msra.mxu0 %v7584_v2  ;;  %5399 = vmatpush1.bf16.msra.mxu1 %v7586_v44 }
 0x3b4   : > { %4998 = vmatmul.mubr.bf16.gmra.mrb[84].mxu0 %v8620_v38  ;;  %5320 = vmatmul.mubr.bf16.gmra.mrb[84].mxu1 %v8620_v38 }
 0x3b5   : > { %5007 = vmatprep.mubr.bf16.mxu0 %v8621_v32  ;;  %5329 = vmatprep.mubr.bf16.mxu1 %v8621_v32 }
 0x3bc   : > { %5008 = vmatmul.mubr.bf16.gmra.mrb[88].mxu0 %v8622_v1  ;;  %5330 = vmatmul.mubr.bf16.gmra.mrb[88].mxu1 %v8622_v1 }
 0x3bd   : > { %5017 = vmatprep.mubr.bf16.mxu0 %v8623_v35  ;;  %5339 = vmatprep.mubr.bf16.mxu1 %v8623_v35  ;;  %v8631_v35 = vld [vmem:[#allocation2 + $0x48] ss:$16 sps:$4 sm:$0xff]  }
 0x3c4   : > { %5018 = vmatmul.mubr.bf16.gmra.mrb[92].mxu0 %v8624_v7  ;;  %5340 = vmatmul.mubr.bf16.gmra.mrb[92].mxu1 %v8624_v7 }
 0x3c5   : > { %5027 = vmatprep.mubr.bf16.mxu0 %v8625_v28  ;;  %5349 = vmatprep.mubr.bf16.mxu1 %v8625_v28 }
 0x3cc   : > { %5028 = vmatmul.mubr.bf16.gmra.mrb[96].mxu0 %v11218_v61  ;;  %5350 = vmatmul.mubr.bf16.gmra.mrb[96].mxu1 %v11218_v61  ;;  %v2677_v61 = vsub.s32 2, %v11395_v21 }
 0x3cd   : > { %5037 = vmatprep.mubr.bf16.mxu0 %v11220_v25  ;;  %5359 = vmatprep.mubr.bf16.mxu1 %v11220_v25  ;;  %v2681_v25 = vsub.s32 3, %v11395_v21 }
 0x3ce   : > { %v11406_v20 = vrot.slane %v2665_v42, %v2677_v61 }
 0x3d4   : > { %5038 = vmatmul.mubr.bf16.gmra.mrb[100].mxu0 %v11226_v8  ;;  %5360 = vmatmul.mubr.bf16.gmra.mrb[100].mxu1 %v11226_v8  ;;  %v11408_v8 = vrot.slane %v2665_v42, %v2673_v13 }
 0x3d5   : > { %5078 = vmatprep.mubr.bf16.mxu0 %v11228_v50  ;;  %5400 = vmatprep.mubr.bf16.mxu1 %v8626_v3  ;;  %v11411_v50 = vrot.slane %v2665_v42, %v2681_v25  ;;  %v8632_v3 = vld [vmem:[#allocation2 + $0x6c] ss:$16 sps:$4 sm:$0xff]  }
 0x3dc   : > { %5079 = vmatmul.mubr.bf16.vlgmr.msra.gmra.mrb[52].mxu0 %v8627_v40  ;;  %5401 = vmatmul.mubr.bf16.vlgmr.msra.gmra.mrb[52].mxu1 %v8627_v40 }
 0x3dd   : > { %5088 = vmatprep.mubr.bf16.mxu0 %v11242_v55  ;;  %5410 = vmatprep.mubr.bf16.mxu1 %v8628_v47 }
 0x3df   : > { %v4436_v43 = vpop.f32.mrb[0].mxu0  ;;  %v4758_v15 = vpop.f32.mrb[0].mxu1 }
 0x3e0   : > { %v7644_v12 = vadd.f32 %v4436_v43, %v11404_v60  ;;  %v4438_v57 = vpop.f32.mrb[1].mxu0  ;;  %v7694_v36 = vadd.f32 %v4758_v15, %v11406_v20  ;;  %v4760_v53 = vpop.f32.mrb[1].mxu1 }
 0x3e1   : > { %v7645_v62 = vadd.f32 %v4438_v57, %v11408_v8  ;;  %v4440_v49 = vpop.f32.mrb[2].mxu0  ;;  %v7695_v5 = vadd.f32 %v4760_v53, %v11411_v50  ;;  %v4762_v37 = vpop.f32.mrb[2].mxu1 }
 0x3e2   : > { %v5729_v4 = vmul.f32 0.70710677, %v7644_v12  ;;  %v7646_v55 = vadd.f32 %v4440_v49, %v11404_v60  ;;  %v4442_v19 = vpop.f32.mrb[3].mxu0  ;;  %v5731_v41 = vmul.f32 0.70710677, %v7694_v36  ;;  %v4764_v54 = vpop.f32.mrb[3].mxu1  ;;  %v7696_v52 = vadd.f32 %v4762_v37, %v11406_v20 }
 0x3e3   : > { %v5730_v10 = vmul.f32 0.70710677, %v7645_v62  ;;  %v5732_v58 = vmul.f32 0.70710677, %v7695_v5  ;;  %v7647_v39 = vadd.f32 %v4442_v19, %v11408_v8  ;;  %v7697_v45 = vadd.f32 %v4764_v54, %v11411_v50 }
 0x3e4   : > { %8203 = verf.f32 %v5729_v4  ;;  %5089 = vmatmul.mubr.bf16.gmra.mrb[56].mxu0 %v8629_v16  ;;  %v5737_v33 = vmul.f32 0.70710677, %v7646_v55  ;;  %5411 = vmatmul.mubr.bf16.gmra.mrb[56].mxu1 %v8629_v16  ;;  %v5739_v51 = vmul.f32 0.70710677, %v7696_v52  ;;  %v5529_v9 = vmul.f32 0.5, %v7644_v12 }
 0x3e5   : > { %8205 = verf.f32 %v5731_v41  ;;  %5098 = vmatprep.mubr.bf16.mxu0 %v11254_v56  ;;  %5420 = vmatprep.mubr.bf16.mxu1 %v8630_v48  ;;  %v5738_v11 = vmul.f32 0.70710677, %v7647_v39  ;;  %v5740_v63 = vmul.f32 0.70710677, %v7697_v45  ;;  %v5531_v29 = vmul.f32 0.5, %v7694_v36 }
 0x3e6   : > { %8207 = verf.f32 %v5730_v10  ;;  %v5530_v44 = vmul.f32 0.5, %v7645_v62  ;;  %v5532_v38 = vmul.f32 0.5, %v7695_v5  ;;  %v5537_v42 = vmul.f32 0.5, %v7646_v55 }
 0x3e7   : > { %8209 = verf.f32 %v5732_v58  ;;  %v4446_v46 = vpop.f32.mrb[4].mxu0  ;;  %v4768_v24 = vpop.f32.mrb[4].mxu1  ;;  %v5539_v61 = vmul.f32 0.5, %v7696_v52  ;;  %v5538_v36 = vmul.f32 0.5, %v7647_v39  ;;  %v5540_v37 = vmul.f32 0.5, %v7697_v45 }
 0x3e8   : > { %8211 = verf.f32 %v5737_v33  ;;  %v11423_v30 = vadd.f32 %v4446_v46, %v11404_v60  ;;  %v11426_v14 = vadd.f32 %v4768_v24, %v11406_v20  ;;  %v4448_v56 = vpop.f32.mrb[5].mxu0  ;;  %v4770_v22 = vpop.f32.mrb[5].mxu1 }
 0x3e9   : > { %8213 = verf.f32 %v5739_v51  ;;  %v11429_v23 = vadd.f32 %v4448_v56, %v11408_v8  ;;  %v11432_v18 = vadd.f32 %v4770_v22, %v11411_v50  ;;  %v4450_v26 = vpop.f32.mrb[6].mxu0  ;;  %v4772_v6 = vpop.f32.mrb[6].mxu1 }
 0x3ea   : > { %8215 = verf.f32 %v5738_v11  ;;  %v5745_v0 = vmul.f32 0.70710677, %v11423_v30  ;;  %v4452_v17 = vpop.f32.mrb[7].mxu0  ;;  %v4774_v2 = vpop.f32.mrb[7].mxu1  ;;  %v5747_v32 = vmul.f32 0.70710677, %v11426_v14  ;;  %v11439_v28 = vadd.f32 %v4450_v26, %v11404_v60 }
 0x3eb   : > { %8217 = verf.f32 %v5740_v63  ;;  %v5746_v1 = vmul.f32 0.70710677, %v11429_v23  ;;  %v5748_v7 = vmul.f32 0.70710677, %v11432_v18  ;;  %v11442_v27 = vadd.f32 %v4772_v6, %v11406_v20  ;;  %v8633_v26 = vld [vmem:[#allocation2 + $0x68] ss:$16 sps:$4 sm:$0xff]  }
 0x3ec   : > { %5099 = vmatmul.mubr.bf16.gmra.mrb[60].mxu0 %v8631_v35  ;;  %8219 = verf.f32 %v5745_v0  ;;  %5421 = vmatmul.mubr.bf16.gmra.mrb[60].mxu1 %v8631_v35  ;;  %v11445_v13 = vadd.f32 %v4452_v17, %v11408_v8  ;;  %v5753_v47 = vmul.f32 0.70710677, %v11439_v28  ;;  %v11449_v43 = vadd.f32 %v4774_v2, %v11411_v50  ;;  %v8634_v0 = vld [vmem:[#allocation2 + $0x8c] ss:$16 sps:$4 sm:$0xff]  }
 0x3ed   : > { %5108 = vmatprep.mubr.bf16.mxu0 %v8632_v3  ;;  %8221 = verf.f32 %v5747_v32  ;;  %5430 = vmatprep.mubr.bf16.mxu1 %v8632_v3  ;;  %v5755_v62 = vmul.f32 0.70710677, %v11442_v27  ;;  %v5545_v51 = vmul.f32 0.5, %v11423_v30  ;;  %v5546_v35 = vmul.f32 0.5, %v11429_v23 }
 0x3ee   : > { %v8204_v34 = vpop.eup %8203  ;;  %8223 = verf.f32 %v5746_v1  ;;  %v5754_v16 = vmul.f32 0.70710677, %v11445_v13  ;;  %v5756_v46 = vmul.f32 0.70710677, %v11449_v43 }
 0x3ef   : > { %v8206_v25 = vpop.eup %8205  ;;  %v6129_v40 = vadd.f32 1.0, %v8204_v34  ;;  %v4456_v12 = vpop.f32.mrb[8].mxu0  ;;  %8225 = verf.f32 %v5748_v7 }
 0x3f0   : > { %v8208_v15 = vpop.eup %8207  ;;  %v6131_v57 = vadd.f32 1.0, %v8206_v25  ;;  %v4778_v53 = vpop.f32.mrb[8].mxu1  ;;  %8227 = verf.f32 %v5753_v47  ;;  %v11466_v22 = vadd.f32 %v4456_v12, %v11404_v60 }
 0x3f1   : > { %v4458_v49 = vpop.f32.mrb[9].mxu0  ;;  %v8210_v4 = vpop.eup %8209  ;;  %v6329_v5 = vmul.f32 %v6129_v40, %v5529_v9  ;;  %v6130_v55 = vadd.f32 1.0, %v8208_v15  ;;  %8229 = verf.f32 %v5755_v62  ;;  %v5548_v15 = vmul.f32 0.5, %v11432_v18 }
 0x3f2   : > { %v4780_v19 = vpop.f32.mrb[9].mxu1  ;;  %v11452_v41 = vpop.f32.mrb[10].mxu0  ;;  %v6331_v58 = vmul.f32 %v6131_v57, %v5531_v29  ;;  %v6132_v54 = vadd.f32 1.0, %v8210_v4  ;;  %8231 = verf.f32 %v5754_v16  ;;  %v11470_v29 = vadd.f32 %v4778_v53, %v11406_v20 }
 0x3f3   : > { %v8212_v10 = vpop.eup %8211  ;;  %v11455_v33 = vpop.f32.mrb[10].mxu1  ;;  %6529 = vst [vmem:[%s9278_s26] sm:$0xff] %v6329_v5  ;;  %v6330_v48 = vmul.f32 %v6130_v55, %v5530_v44  ;;  %8233 = verf.f32 %v5756_v46  ;;  %v5547_v44 = vmul.f32 0.5, %v11426_v14  ;;  %v11479_v3 = vadd.f32 %v4458_v49, %v11408_v8 }
 0x3f4   : > { %v11457_v52 = vpop.f32.mrb[11].mxu0  ;;  %v8214_v39 = vpop.eup %8213  ;;  %v6137_v45 = vadd.f32 1.0, %v8212_v10  ;;  %6531 = vst [vmem:[%s9278_s26 + $0x10] sm:$0xff] %v6331_v58  ;;  %v6332_v24 = vmul.f32 %v6132_v54, %v5532_v38  ;;  %5109 = vmatmul.mubr.bf16.gmra.mrb[64].mxu0 %v8633_v26  ;;  %5431 = vmatmul.mubr.bf16.gmra.mrb[64].mxu1 %v8633_v26  ;;  %v5761_v38 = vmul.f32 0.70710677, %v11466_v22  ;;  %v11485_v25 = vadd.f32 %v4780_v19, %v11411_v50 }
 0x3f5   : > { %v11462_v11 = vpop.f32.mrb[11].mxu1  ;;  %v8216_v63 = vpop.eup %8215  ;;  %v6139_v56 = vadd.f32 1.0, %v8214_v39  ;;  %6530 = vst [vmem:[%s9278_s26 + $0x8] sm:$0xff] %v6330_v48  ;;  %5118 = vmatprep.mubr.bf16.mxu0 %v8634_v0  ;;  %5440 = vmatprep.mubr.bf16.mxu1 %v8634_v0  ;;  %v5763_v7 = vmul.f32 0.70710677, %v11470_v29  ;;  %v5553_v5 = vmul.f32 0.5, %v11439_v28  ;;  %v11507_v54 = vadd.f32 %v11452_v41, %v11404_v60 }
 0x3f6   : > { %v8218_v6 = vpop.eup %8217  ;;  %v6337_v9 = vmul.f32 %v6137_v45, %v5537_v42  ;;  %v6138_v30 = vadd.f32 1.0, %v8216_v63  ;;  %6532 = vst [vmem:[%s9278_s26 + $0x18] sm:$0xff] %v6332_v24  ;;  %8235 = verf.f32 %v5761_v38  ;;  %v5762_v57 = vmul.f32 0.70710677, %v11479_v3 }
 0x3f7   : > { %v6339_v17 = vmul.f32 %v6139_v56, %v5539_v61  ;;  %v6140_v2 = vadd.f32 1.0, %v8218_v6  ;;  %v8220_v32 = vpop.eup %8219  ;;  %v11481_v34 = vpop.f32.mrb[12].mxu0  ;;  %8237 = verf.f32 %v5763_v7  ;;  %v5764_v55 = vmul.f32 0.70710677, %v11485_v25  ;;  %v8636_v56 = vld [vmem:[#allocation2 + $0xac] ss:$16 sps:$4 sm:$0xff]  }
 0x3f8   : > { %6537 = vst [vmem:[%s9278_s26 + $0x40] sm:$0xff] %v6337_v9  ;;  %v6338_v1 = vmul.f32 %v6138_v30, %v5538_v36  ;;  %v8222_v42 = vpop.eup %8221  ;;  %v6145_v61 = vadd.f32 1.0, %v8220_v32  ;;  %v11487_v40 = vpop.f32.mrb[12].mxu1  ;;  %8239 = verf.f32 %v5762_v57  ;;  %v11514_v45 = vadd.f32 %v11455_v33, %v11406_v20 }
 0x3f9   : > { %6539 = vst [vmem:[%s9278_s26 + $0x50] sm:$0xff] %v6339_v17  ;;  %v6340_v14 = vmul.f32 %v6140_v2, %v5540_v37  ;;  %v11489_v47 = vpop.f32.mrb[13].mxu0  ;;  %v8224_v23 = vpop.eup %8223  ;;  %v6147_v12 = vadd.f32 1.0, %v8222_v42  ;;  %8241 = verf.f32 %v5764_v55  ;;  %v5555_v41 = vmul.f32 0.5, %v11442_v27 }
 0x3fa   : > { %6538 = vst [vmem:[%s9278_s26 + $0x48] sm:$0xff] %v6338_v1  ;;  %v11494_v36 = vpop.f32.mrb[13].mxu1  ;;  %v11496_v62 = vpop.f32.mrb[14].mxu0  ;;  %v6345_v49 = vmul.f32 %v6145_v61, %v5545_v51  ;;  %v6146_v4 = vadd.f32 1.0, %v8224_v23  ;;  %v8635_v51 = vld [vmem:[#allocation2 + $0x88] ss:$16 sps:$4 sm:$0xff]   ;;  %v11524_v30 = vadd.f32 %v11457_v52, %v11408_v8  ;;  %v11529_v2 = vadd.f32 %v11462_v11, %v11411_v50 }
 0x3fb   : > { %v8226_v53 = vpop.eup %8225  ;;  %6540 = vst [vmem:[%s9278_s26 + $0x58] sm:$0xff] %v6340_v14  ;;  %v11501_v37 = vpop.f32.mrb[14].mxu1  ;;  %v6347_v10 = vmul.f32 %v6147_v12, %v5547_v44  ;;  %v5769_v24 = vmul.f32 0.70710677, %v11507_v54  ;;  %v5554_v33 = vmul.f32 0.5, %v11445_v13  ;;  %v5556_v13 = vmul.f32 0.5, %v11449_v43 }
 0x3fc   : > { %v11503_v18 = vpop.f32.mrb[15].mxu0  ;;  %v8228_v19 = vpop.eup %8227  ;;  %v6148_v58 = vadd.f32 1.0, %v8226_v53  ;;  %6545 = vst [vmem:[%s9278_s26 + $0x80] sm:$0xff] %v6345_v49  ;;  %v6346_v28 = vmul.f32 %v6146_v4, %v5546_v35  ;;  %5119 = vmatmul.mubr.bf16.gmra.mrb[68].mxu0 %v8635_v51  ;;  %5441 = vmatmul.mubr.bf16.gmra.mrb[68].mxu1 %v8635_v51  ;;  %v5771_v9 = vmul.f32 0.70710677, %v11514_v45  ;;  %v5561_v7 = vmul.f32 0.5, %v11466_v22 }
 0x3fd   : > { %v11509_v16 = vpop.f32.mrb[15].mxu1  ;;  %v8230_v39 = vpop.eup %8229  ;;  %v6153_v48 = vadd.f32 1.0, %v8228_v19  ;;  %6547 = vst [vmem:[%s9278_s26 + $0x90] sm:$0xff] %v6347_v10  ;;  %5128 = vmatprep.mubr.bf16.mxu0 %v8636_v56  ;;  %5450 = vmatprep.mubr.bf16.mxu1 %v8636_v56  ;;  %8243 = verf.f32 %v5769_v24  ;;  %v5770_v52 = vmul.f32 0.70710677, %v11524_v30  ;;  %v11545_v42 = vadd.f32 %v11481_v34, %v11404_v60 }
 0x3fe   : > { %v6348_v46 = vmul.f32 %v6148_v58, %v5548_v15  ;;  %v6155_v63 = vadd.f32 1.0, %v8230_v39  ;;  %v8232_v26 = vpop.eup %8231  ;;  %6546 = vst [vmem:[%s9278_s26 + $0x88] sm:$0xff] %v6346_v28  ;;  %8245 = verf.f32 %v5771_v9  ;;  %v5772_v11 = vmul.f32 0.70710677, %v11529_v2  ;;  %v8637_v10 = vld [vmem:[#allocation2 + $0xa8] ss:$16 sps:$4 sm:$0xff]  }
 0x3ff   : > { %v6353_v6 = vmul.f32 %v6153_v48, %v5553_v5  ;;  %v8234_v27 = vpop.eup %8233  ;;  %v6154_v17 = vadd.f32 1.0, %v8232_v26  ;;  %v11531_v44 = vpop.f32.mrb[16].mxu0  ;;  %8247 = verf.f32 %v5770_v52  ;;  %v11553_v12 = vadd.f32 %v11487_v40, %v11406_v20  ;;  %v8638_v48 = vld [vmem:[#allocation2 + $0xcc] ss:$16 sps:$4 sm:$0xff]  }
 0x400   : > { %6548 = vst [vmem:[%s9278_s26 + $0x98] sm:$0xff] %v6348_v46  ;;  %v6355_v0 = vmul.f32 %v6155_v63, %v5555_v41  ;;  %v6156_v38 = vadd.f32 1.0, %v8234_v27  ;;  %v11536_v32 = vpop.f32.mrb[16].mxu1  ;;  %v11538_v1 = vpop.f32.mrb[17].mxu0  ;;  %v11557_v22 = vadd.f32 %v11489_v47, %v11408_v8  ;;  %v5563_v49 = vmul.f32 0.5, %v11470_v29 }
 0x401   : > { %6553 = vst [vmem:[%s9278_s26 + $0xc0] sm:$0xff] %v6353_v6  ;;  %v6354_v35 = vmul.f32 %v6154_v17, %v5554_v33  ;;  %v11547_v43 = vpop.f32.mrb[17].mxu1  ;;  %v11549_v14 = vpop.f32.mrb[18].mxu0  ;;  %8249 = verf.f32 %v5772_v11  ;;  %v5777_v4 = vmul.f32 0.70710677, %v11545_v42  ;;  %v5562_v55 = vmul.f32 0.5, %v11479_v3 }
 0x402   : > { %6555 = vst [vmem:[%s9278_s26 + $0xd0] sm:$0xff] %v6355_v0  ;;  %v8236_v61 = vpop.eup %8235  ;;  %v6356_v23 = vmul.f32 %v6156_v38, %v5556_v13  ;;  %v11559_v15 = vpop.f32.mrb[18].mxu1  ;;  %v5564_v47 = vmul.f32 0.5, %v11485_v25  ;;  %v5779_v19 = vmul.f32 0.70710677, %v11553_v12  ;;  %v11575_v28 = vadd.f32 %v11494_v36, %v11411_v50 }
 0x403   : > { %v11561_v34 = vpop.f32.mrb[19].mxu0  ;;  %v8238_v57 = vpop.eup %8237  ;;  %6554 = vst [vmem:[%s9278_s26 + $0xc8] sm:$0xff] %v6354_v35  ;;  %v6161_v53 = vadd.f32 1.0, %v8236_v61  ;;  %8251 = verf.f32 %v5777_v4  ;;  %v5778_v29 = vmul.f32 0.70710677, %v11557_v22  ;;  %v11579_v46 = vadd.f32 %v11496_v62, %v11404_v60 }
 0x404   : > { %v11566_v5 = vpop.f32.mrb[19].mxu1  ;;  %6556 = vst [vmem:[%s9278_s26 + $0xd8] sm:$0xff] %v6356_v23  ;;  %v6163_v40 = vadd.f32 1.0, %v8238_v57  ;;  %5129 = vmatmul.mubr.bf16.gmra.mrb[72].mxu0 %v8637_v10  ;;  %v8240_v58 = vpop.eup %8239  ;;  %5451 = vmatmul.mubr.bf16.gmra.mrb[72].mxu1 %v8637_v10  ;;  %8253 = verf.f32 %v5779_v19  ;;  %v5569_v63 = vmul.f32 0.5, %v11507_v54  ;;  %v5780_v36 = vmul.f32 0.70710677, %v11575_v28 }
 0x405   : > { %v6361_v39 = vmul.f32 %v6161_v53, %v5561_v7  ;;  %5138 = vmatprep.mubr.bf16.mxu0 %v8638_v48  ;;  %v8242_v3 = vpop.eup %8241  ;;  %v6162_v51 = vadd.f32 1.0, %v8240_v58  ;;  %5460 = vmatprep.mubr.bf16.mxu1 %v8638_v48  ;;  %8255 = verf.f32 %v5778_v29  ;;  %v5571_v26 = vmul.f32 0.5, %v11514_v45  ;;  %v8640_v19 = vld [vmem:[#allocation2 + $0xec] ss:$16 sps:$4 sm:$0xff]  }
 0x406   : > { %v6363_v25 = vmul.f32 %v6163_v40, %v5563_v49  ;;  %v6164_v41 = vadd.f32 1.0, %v8242_v3  ;;  %v5785_v6 = vmul.f32 0.70710677, %v11579_v46  ;;  %v11591_v62 = vadd.f32 %v11501_v37, %v11406_v20  ;;  %v8639_v40 = vld [vmem:[#allocation2 + $0xc8] ss:$16 sps:$4 sm:$0xff]  }
 0x407   : > { %6561 = vst [vmem:[%s9278_s26 + $0x100] sm:$0xff] %v6361_v39  ;;  %v11584_v24 = vpop.f32.mrb[20].mxu0  ;;  %v6362_v56 = vmul.f32 %v6162_v51, %v5562_v55  ;;  %v11593_v33 = vpop.f32.mrb[20].mxu1  ;;  %8257 = verf.f32 %v5780_v36  ;;  %v11599_v0 = vadd.f32 %v11503_v18, %v11408_v8  ;;  %v11603_v45 = vadd.f32 %v11509_v16, %v11411_v50 }
 0x408   : > { %6563 = vst [vmem:[%s9278_s26 + $0x110] sm:$0xff] %v6363_v25  ;;  %v11595_v9 = vpop.f32.mrb[21].mxu0  ;;  %v8244_v54 = vpop.eup %8243  ;;  %v6364_v27 = vmul.f32 %v6164_v41, %v5564_v47  ;;  %v5570_v52 = vmul.f32 0.5, %v11524_v30  ;;  %8259 = verf.f32 %v5785_v6  ;;  %v5787_v35 = vmul.f32 0.70710677, %v11591_v62 }
 0x409   : > { %v11605_v17 = vpop.f32.mrb[21].mxu1  ;;  %v11607_v37 = vpop.f32.mrb[22].mxu0  ;;  %6562 = vst [vmem:[%s9278_s26 + $0x108] sm:$0xff] %v6362_v56  ;;  %v6169_v38 = vadd.f32 1.0, %v8244_v54  ;;  %v5572_v16 = vmul.f32 0.5, %v11529_v2  ;;  %v5577_v61 = vmul.f32 0.5, %v11545_v42  ;;  %v11625_v4 = vadd.f32 %v11531_v44, %v11404_v60 }
 0x40a   : > { %v8246_v13 = vpop.eup %8245  ;;  %v11612_v7 = vpop.f32.mrb[22].mxu1  ;;  %6564 = vst [vmem:[%s9278_s26 + $0x118] sm:$0xff] %v6364_v27  ;;  %v5786_v23 = vmul.f32 0.70710677, %v11599_v0  ;;  %8261 = verf.f32 %v5787_v35  ;;  %v5788_v49 = vmul.f32 0.70710677, %v11603_v45  ;;  %v11629_v47 = vadd.f32 %v11536_v32, %v11406_v20 }
 0x40b   : > { %v11614_v18 = vpop.f32.mrb[23].mxu0  ;;  %v6171_v11 = vadd.f32 1.0, %v8246_v13  ;;  %v11620_v57 = vpop.f32.mrb[23].mxu1  ;;  %v6369_v30 = vmul.f32 %v6169_v38, %v5569_v63  ;;  %v5579_v58 = vmul.f32 0.5, %v11553_v12  ;;  %v5793_v44 = vmul.f32 0.70710677, %v11625_v4 }
 0x40c   : > { %v8248_v53 = vpop.eup %8247  ;;  %5139 = vmatmul.mubr.bf16.gmra.mrb[76].mxu0 %v8639_v40  ;;  %8263 = verf.f32 %v5786_v23  ;;  %5461 = vmatmul.mubr.bf16.gmra.mrb[76].mxu1 %v8639_v40  ;;  %v5578_v48 = vmul.f32 0.5, %v11557_v22  ;;  %v5795_v32 = vmul.f32 0.70710677, %v11629_v47  ;;  %v11639_v3 = vadd.f32 %v11538_v1, %v11408_v8 }
 0x40d   : > { %v8250_v2 = vpop.eup %8249  ;;  %v6371_v55 = vmul.f32 %v6171_v11, %v5571_v26  ;;  %v6170_v42 = vadd.f32 1.0, %v8248_v53  ;;  %5148 = vmatprep.mubr.bf16.mxu0 %v8640_v19  ;;  %6569 = vst [vmem:[%s9278_s26 + $0x140] sm:$0xff] %v6369_v30  ;;  %8265 = verf.f32 %v5788_v49  ;;  %5470 = vmatprep.mubr.bf16.mxu1 %v8640_v19  ;;  %v11645_v63 = vadd.f32 %v11547_v43, %v11411_v50  ;;  %v8642_v19 = vld [vmem:[#allocation2 + $0x10c] ss:$16 sps:$4 sm:$0xff]  }
 0x40e   : > { %v6172_v10 = vadd.f32 1.0, %v8250_v2  ;;  %v8252_v39 = vpop.eup %8251  ;;  %8267 = verf.f32 %v5793_v44  ;;  %v5580_v1 = vmul.f32 0.5, %v11575_v28  ;;  %v5794_v6 = vmul.f32 0.70710677, %v11639_v3  ;;  %v8641_v2 = vld [vmem:[#allocation2 + $0xe8] ss:$16 sps:$4 sm:$0xff]  }
 0x40f   : > { %6571 = vst [vmem:[%s9278_s26 + $0x150] sm:$0xff] %v6371_v55  ;;  %v6370_v29 = vmul.f32 %v6170_v42, %v5570_v52  ;;  %v11641_v25 = vpop.f32.mrb[24].mxu0  ;;  %v8254_v12 = vpop.eup %8253  ;;  %v6177_v41 = vadd.f32 1.0, %v8252_v39  ;;  %8269 = verf.f32 %v5795_v32  ;;  %v5585_v38 = vmul.f32 0.5, %v11579_v46 }
 0x410   : > { %v6372_v51 = vmul.f32 %v6172_v10, %v5572_v16  ;;  %v11647_v36 = vpop.f32.mrb[24].mxu1  ;;  %v11649_v22 = vpop.f32.mrb[25].mxu0  ;;  %v6179_v26 = vadd.f32 1.0, %v8254_v12  ;;  %v5796_v52 = vmul.f32 0.70710677, %v11645_v63  ;;  %8271 = verf.f32 %v5794_v6 }
 0x411   : > { %v8256_v56 = vpop.eup %8255  ;;  %6570 = vst [vmem:[%s9278_s26 + $0x148] sm:$0xff] %v6370_v29  ;;  %v11654_v54 = vpop.f32.mrb[25].mxu1  ;;  %v6377_v43 = vmul.f32 %v6177_v41, %v5577_v61  ;;  %v11667_v23 = vadd.f32 %v11549_v14, %v11404_v60  ;;  %v11671_v61 = vadd.f32 %v11559_v15, %v11406_v20  ;;  %v11678_v40 = vadd.f32 %v11561_v34, %v11408_v8 }
 0x412   : > { %v11656_v27 = vpop.f32.mrb[26].mxu0  ;;  %6572 = vst [vmem:[%s9278_s26 + $0x158] sm:$0xff] %v6372_v51  ;;  %v6178_v13 = vadd.f32 1.0, %v8256_v56  ;;  %v11661_v35 = vpop.f32.mrb[26].mxu1  ;;  %v6379_v16 = vmul.f32 %v6179_v26, %v5579_v58  ;;  %8273 = verf.f32 %v5796_v52  ;;  %v5587_v55 = vmul.f32 0.5, %v11591_v62 }
 0x413   : > { %v11663_v11 = vpop.f32.mrb[27].mxu0  ;;  %v8258_v28 = vpop.eup %8257  ;;  %6577 = vst [vmem:[%s9278_s26 + $0x180] sm:$0xff] %v6377_v43  ;;  %v5586_v15 = vmul.f32 0.5, %v11599_v0  ;;  %v5801_v42 = vmul.f32 0.70710677, %v11667_v23  ;;  %v5588_v34 = vmul.f32 0.5, %v11603_v45  ;;  %v11697_v45 = vadd.f32 %v11584_v24, %v11404_v60 }
 0x414   : > { %v11673_v53 = vpop.f32.mrb[27].mxu1  ;;  %v8260_v46 = vpop.eup %8259  ;;  %v6378_v30 = vmul.f32 %v6178_v13, %v5578_v48  ;;  %v6180_v49 = vadd.f32 1.0, %v8258_v28  ;;  %5149 = vmatmul.mubr.bf16.gmra.mrb[80].mxu0 %v8641_v2  ;;  %6579 = vst [vmem:[%s9278_s26 + $0x190] sm:$0xff] %v6379_v16  ;;  %5471 = vmatmul.mubr.bf16.gmra.mrb[80].mxu1 %v8641_v2  ;;  %v5803_v44 = vmul.f32 0.70710677, %v11671_v61  ;;  %v11690_v48 = vadd.f32 %v11566_v5, %v11411_v50 }
 0x415   : > { %v6185_v14 = vadd.f32 1.0, %v8260_v46  ;;  %5158 = vmatprep.mubr.bf16.mxu0 %v8642_v19  ;;  %v8262_v10 = vpop.eup %8261  ;;  %v5802_v39 = vmul.f32 0.70710677, %v11678_v40  ;;  %5480 = vmatprep.mubr.bf16.mxu1 %v8642_v19  ;;  %8275 = verf.f32 %v5801_v42  ;;  %v11701_v41 = vadd.f32 %v11593_v33, %v11406_v20  ;;  %v8643_v19 = vld [vmem:[#allocation2 + $0x108] ss:$16 sps:$4 sm:$0xff]  }
 0x416   : > { %6578 = vst [vmem:[%s9278_s26 + $0x188] sm:$0xff] %v6378_v30  ;;  %v6380_v58 = vmul.f32 %v6180_v49, %v5580_v1  ;;  %v8264_v62 = vpop.eup %8263  ;;  %v6187_v0 = vadd.f32 1.0, %v8262_v10  ;;  %8277 = verf.f32 %v5803_v44  ;;  %v5593_v6 = vmul.f32 0.5, %v11625_v4 }
 0x417   : > { %v6385_v29 = vmul.f32 %v6185_v14, %v5585_v38  ;;  %v11692_v32 = vpop.f32.mrb[28].mxu0  ;;  %v8266_v12 = vpop.eup %8265  ;;  %v6186_v51 = vadd.f32 1.0, %v8264_v62  ;;  %8279 = verf.f32 %v5802_v39  ;;  %v5595_v33 = vmul.f32 0.5, %v11629_v47 }
 0x418   : > { %6580 = vst [vmem:[%s9278_s26 + $0x198] sm:$0xff] %v6380_v58  ;;  %v11703_v56 = vpop.f32.mrb[28].mxu1  ;;  %v11705_v26 = vpop.f32.mrb[29].mxu0  ;;  %v6387_v5 = vmul.f32 %v6187_v0, %v5587_v55  ;;  %v6188_v1 = vadd.f32 1.0, %v8266_v12  ;;  %v5804_v52 = vmul.f32 0.70710677, %v11690_v48  ;;  %v11732_v42 = vadd.f32 %v11605_v17, %v11411_v50 }
 0x419   : > { %6585 = vst [vmem:[%s9278_s26 + $0x1c0] sm:$0xff] %v6385_v29  ;;  %v11709_v43 = vpop.f32.mrb[29].mxu1  ;;  %v11711_v24 = vpop.f32.mrb[30].mxu0  ;;  %v6386_v38 = vmul.f32 %v6186_v51, %v5586_v15  ;;  %v5809_v28 = vmul.f32 0.70710677, %v11697_v45  ;;  %v5594_v49 = vmul.f32 0.5, %v11639_v3  ;;  %v11728_v15 = vadd.f32 %v11595_v9, %v11408_v8 }
 0x41a   : > { %v8268_v13 = vpop.eup %8267  ;;  %v11716_v16 = vpop.f32.mrb[30].mxu1  ;;  %6587 = vst [vmem:[%s9278_s26 + $0x1d0] sm:$0xff] %v6387_v5  ;;  %v6388_v4 = vmul.f32 %v6188_v1, %v5588_v34  ;;  %v5811_v2 = vmul.f32 0.70710677, %v11701_v41  ;;  %8281 = verf.f32 %v5804_v52  ;;  %v11737_v58 = vadd.f32 %v11607_v37, %v11404_v60  ;;  %v8644_v34 = vld [vmem:[#allocation2 + $0x12c] ss:$16 sps:$4 sm:$0xff]  }
 0x41b   : > { %v8270_v46 = vpop.eup %8269  ;;  %v6193_v30 = vadd.f32 1.0, %v8268_v13  ;;  %v11721_v14 = vpop.f32.mrb[31].mxu0  ;;  %6586 = vst [vmem:[%s9278_s26 + $0x1c8] sm:$0xff] %v6386_v38  ;;  %8283 = verf.f32 %v5809_v28  ;;  %v11741_v9 = vadd.f32 %v11612_v7, %v11406_v20  ;;  %v5596_v62 = vmul.f32 0.5, %v11645_v63 }
 0x41c   : > { %v11723_v55 = vpop.f32.mrb[31].mxu1  ;;  %v6195_v47 = vadd.f32 1.0, %v8270_v46  ;;  %5159 = vmatmul.mubr.bf16.gmra.mrb[84].mxu0 %v8643_v19  ;;  %v8272_v3 = vpop.eup %8271  ;;  %6588 = vst [vmem:[%s9278_s26 + $0x1d8] sm:$0xff] %v6388_v4  ;;  %5481 = vmatmul.mubr.bf16.gmra.mrb[84].mxu1 %v8643_v19  ;;  %8285 = verf.f32 %v5811_v2  ;;  %v5601_v37 = vmul.f32 0.5, %v11667_v23  ;;  %v5810_v0 = vmul.f32 0.70710677, %v11728_v15 }
 0x41d   : > { %v6393_v10 = vmul.f32 %v6193_v30, %v5593_v6  ;;  %5168 = vmatprep.mubr.bf16.mxu0 %v8644_v34  ;;  %v8274_v17 = vpop.eup %8273  ;;  %v6194_v39 = vadd.f32 1.0, %v8272_v3  ;;  %5490 = vmatprep.mubr.bf16.mxu1 %v8644_v34  ;;  %v5812_v12 = vmul.f32 0.70710677, %v11732_v42  ;;  %v5603_v51 = vmul.f32 0.5, %v11671_v61 }
 0x41e   : > { %v6395_v44 = vmul.f32 %v6195_v47, %v5595_v33  ;;  %v6196_v29 = vadd.f32 1.0, %v8274_v17  ;;  %v5602_v5 = vmul.f32 0.5, %v11678_v40  ;;  %v5817_v1 = vmul.f32 0.70710677, %v11737_v58  ;;  %v8645_v17 = vld [vmem:[#allocation2 + $0x128] ss:$16 sps:$4 sm:$0xff]  }
 0x41f   : > { %6593 = vst [vmem:[%s9278_s26 + $0x200] sm:$0xff] %v6393_v10  ;;  %v6394_v7 = vmul.f32 %v6194_v39, %v5594_v49  ;;  %v11752_v63 = vpop.f32.mrb[32].mxu0  ;;  %v11754_v6 = vpop.f32.mrb[32].mxu1  ;;  %8287 = verf.f32 %v5810_v0  ;;  %v5819_v38 = vmul.f32 0.70710677, %v11741_v9  ;;  %v11759_v33 = vadd.f32 %v11614_v18, %v11408_v8 }
 0x420   : > { %6595 = vst [vmem:[%s9278_s26 + $0x210] sm:$0xff] %v6395_v44  ;;  %v8276_v13 = vpop.eup %8275  ;;  %v6396_v23 = vmul.f32 %v6196_v29, %v5596_v62  ;;  %v11761_v52 = vpop.f32.mrb[33].mxu0  ;;  %8289 = verf.f32 %v5812_v12  ;;  %v11768_v46 = vadd.f32 %v11620_v57, %v11411_v50  ;;  %v11772_v4 = vadd.f32 %v11641_v25, %v11404_v60  ;;  %v8646_v62 = vld [vmem:[#allocation2 + $0x14c] ss:$16 sps:$4 sm:$0xff]  }
 0x421   : > { %v11763_v61 = vpop.f32.mrb[33].mxu1  ;;  %v8278_v40 = vpop.eup %8277  ;;  %6594 = vst [vmem:[%s9278_s26 + $0x208] sm:$0xff] %v6394_v7  ;;  %v6201_v28 = vadd.f32 1.0, %v8276_v13  ;;  %v5604_v47 = vmul.f32 0.5, %v11690_v48  ;;  %8291 = verf.f32 %v5817_v1  ;;  %v5818_v19 = vmul.f32 0.70710677, %v11759_v33 }
 0x422   : > { %v11774_v30 = vpop.f32.mrb[34].mxu0  ;;  %v11776_v18 = vpop.f32.mrb[34].mxu1  ;;  %6596 = vst [vmem:[%s9278_s26 + $0x218] sm:$0xff] %v6396_v23  ;;  %v6203_v2 = vadd.f32 1.0, %v8278_v40  ;;  %v5609_v34 = vmul.f32 0.5, %v11697_v45  ;;  %8293 = verf.f32 %v5819_v38  ;;  %v5611_v39 = vmul.f32 0.5, %v11701_v41 }
 0x423   : > { %v8280_v49 = vpop.eup %8279  ;;  %v11781_v3 = vpop.f32.mrb[35].mxu0  ;;  %v6401_v10 = vmul.f32 %v6201_v28, %v5601_v37  ;;  %8295 = verf.f32 %v5818_v19  ;;  %v5820_v48 = vmul.f32 0.70710677, %v11768_v46  ;;  %v5825_v0 = vmul.f32 0.70710677, %v11772_v4 }
 0x424   : > { %v11783_v57 = vpop.f32.mrb[35].mxu1  ;;  %v6202_v25 = vadd.f32 1.0, %v8280_v49  ;;  %5169 = vmatmul.mubr.bf16.gmra.mrb[88].mxu0 %v8645_v17  ;;  %v6403_v44 = vmul.f32 %v6203_v2, %v5603_v51  ;;  %5491 = vmatmul.mubr.bf16.gmra.mrb[88].mxu1 %v8645_v17  ;;  %v8282_v29 = vpop.eup %8281  ;;  %v11792_v45 = vadd.f32 %v11647_v36, %v11406_v20  ;;  %v11796_v12 = vadd.f32 %v11649_v22, %v11408_v8 }
 0x425   : > { %5178 = vmatprep.mubr.bf16.mxu0 %v8646_v62  ;;  %6601 = vst [vmem:[%s9278_s26 + $0x240] sm:$0xff] %v6401_v10  ;;  %5500 = vmatprep.mubr.bf16.mxu1 %v8646_v62  ;;  %v8284_v41 = vpop.eup %8283  ;;  %v6204_v7 = vadd.f32 1.0, %v8282_v29  ;;  %8297 = verf.f32 %v5820_v48  ;;  %v11801_v51 = vadd.f32 %v11654_v54, %v11411_v50  ;;  %v5610_v22 = vmul.f32 0.5, %v11728_v15 }
 0x426   : > { %v6402_v37 = vmul.f32 %v6202_v25, %v5602_v5  ;;  %6603 = vst [vmem:[%s9278_s26 + $0x250] sm:$0xff] %v6403_v44  ;;  %v11805_v5 = vadd.f32 %v11656_v27, %v11404_v60  ;;  %v8286_v36 = vpop.eup %8285  ;;  %v6209_v13 = vadd.f32 1.0, %v8284_v41  ;;  %8299 = verf.f32 %v5825_v0 }
 0x427   : > { %v11807_v1 = vpop.f32.mrb[36].mxu0  ;;  %v5827_v23 = vmul.f32 0.70710677, %v11792_v45  ;;  %v11812_v38 = vpop.f32.mrb[36].mxu1  ;;  %v6404_v54 = vmul.f32 %v6204_v7, %v5604_v47  ;;  %v6211_v28 = vadd.f32 1.0, %v8286_v36  ;;  %v5612_v27 = vmul.f32 0.5, %v11732_v42 }
 0x428   : > { %6602 = vst [vmem:[%s9278_s26 + $0x248] sm:$0xff] %v6402_v37  ;;  %v11814_v40 = vpop.f32.mrb[37].mxu0  ;;  %v5826_v49 = vmul.f32 0.70710677, %v11796_v12  ;;  %v11818_v2 = vpop.f32.mrb[37].mxu1  ;;  %v6409_v15 = vmul.f32 %v6209_v13, %v5609_v34  ;;  %v5617_v10 = vmul.f32 0.5, %v11737_v58  ;;  %v11836_v37 = vadd.f32 %v11661_v35, %v11406_v20 }
 0x429   : > { %v11820_v19 = vpop.f32.mrb[38].mxu0  ;;  %8301 = verf.f32 %v5827_v23  ;;  %v5828_v25 = vmul.f32 0.70710677, %v11801_v51  ;;  %v11824_v17 = vpop.f32.mrb[38].mxu1  ;;  %6604 = vst [vmem:[%s9278_s26 + $0x258] sm:$0xff] %v6404_v54  ;;  %v6411_v42 = vmul.f32 %v6211_v28, %v5611_v39  ;;  %v5619_v48 = vmul.f32 0.5, %v11741_v9 }
 0x42a   : > { %v11826_v44 = vpop.f32.mrb[39].mxu0  ;;  %v8288_v47 = vpop.eup %8287  ;;  %8303 = verf.f32 %v5826_v49  ;;  %v5833_v62 = vmul.f32 0.70710677, %v11805_v5  ;;  %6609 = vst [vmem:[%s9278_s26 + $0x280] sm:$0xff] %v6409_v15  ;;  %v11840_v0 = vadd.f32 %v11663_v11, %v11408_v8  ;;  %v8647_v39 = vld [vmem:[#allocation2 + $0x148] ss:$16 sps:$4 sm:$0xff]   ;;  %v11846_v36 = vadd.f32 %v11673_v53, %v11411_v50 }
 0x42b   : > { %v11831_v29 = vpop.f32.mrb[39].mxu1  ;;  %v8290_v34 = vpop.eup %8289  ;;  %v6210_v58 = vadd.f32 1.0, %v8288_v47  ;;  %8305 = verf.f32 %v5828_v25  ;;  %6611 = vst [vmem:[%s9278_s26 + $0x290] sm:$0xff] %v6411_v42  ;;  %v5618_v7 = vmul.f32 0.5, %v11759_v33  ;;  %v8648_v35 = vld [vmem:[#allocation2 + $0x16c] ss:$16 sps:$4 sm:$0xff]   ;;  %v11851_v28 = vadd.f32 %v11692_v32, %v11404_v60 }
 0x42c   : > { %5179 = vmatmul.mubr.bf16.gmra.mrb[92].mxu0 %v8647_v39  ;;  %v8292_v9 = vpop.eup %8291  ;;  %v6212_v41 = vadd.f32 1.0, %v8290_v34  ;;  %8307 = verf.f32 %v5833_v62  ;;  %5501 = vmatmul.mubr.bf16.gmra.mrb[92].mxu1 %v8647_v39  ;;  %v5835_v54 = vmul.f32 0.70710677, %v11836_v37  ;;  %v5620_v53 = vmul.f32 0.5, %v11768_v46 }
 0x42d   : > { %5188 = vmatprep.mubr.bf16.mxu0 %v8648_v35  ;;  %v8294_v13 = vpop.eup %8293  ;;  %v6410_v23 = vmul.f32 %v6210_v58, %v5610_v22  ;;  %v6217_v11 = vadd.f32 1.0, %v8292_v9  ;;  %5510 = vmatprep.mubr.bf16.mxu1 %v8648_v35  ;;  %v5834_v25 = vmul.f32 0.70710677, %v11840_v0  ;;  %v5625_v62 = vmul.f32 0.5, %v11772_v4 }
 0x42e   : > { %v8296_v33 = vpop.eup %8295  ;;  %v6412_v49 = vmul.f32 %v6212_v41, %v5612_v27  ;;  %v6219_v15 = vadd.f32 1.0, %v8294_v13  ;;  %8309 = verf.f32 %v5835_v54  ;;  %v5627_v46 = vmul.f32 0.5, %v11792_v45 }
 0x42f   : > { %v11855_v47 = vpop.f32.mrb[40].mxu0  ;;  %6610 = vst [vmem:[%s9278_s26 + $0x288] sm:$0xff] %v6410_v23  ;;  %v6417_v22 = vmul.f32 %v6217_v11, %v5617_v10  ;;  %v6218_v42 = vadd.f32 1.0, %v8296_v33  ;;  %v11859_v32 = vpop.f32.mrb[40].mxu1  ;;  %8311 = verf.f32 %v5834_v25  ;;  %v5836_v39 = vmul.f32 0.70710677, %v11846_v36 }
 0x430   : > { %v11861_v34 = vpop.f32.mrb[41].mxu0  ;;  %v8298_v58 = vpop.eup %8297  ;;  %6612 = vst [vmem:[%s9278_s26 + $0x298] sm:$0xff] %v6412_v49  ;;  %v6419_v27 = vmul.f32 %v6219_v15, %v5619_v48  ;;  %v5841_v13 = vmul.f32 0.70710677, %v11851_v28  ;;  %v11874_v23 = vadd.f32 %v11703_v56, %v11406_v20  ;;  %v11883_v54 = vadd.f32 %v11705_v26, %v11408_v8 }
 0x431   : > { %v11866_v9 = vpop.f32.mrb[41].mxu1  ;;  %v11868_v10 = vpop.f32.mrb[42].mxu0  ;;  %6617 = vst [vmem:[%s9278_s26 + $0x2c0] sm:$0xff] %v6417_v22  ;;  %v6418_v41 = vmul.f32 %v6218_v42, %v5618_v7  ;;  %v6220_v35 = vadd.f32 1.0, %v8298_v58  ;;  %8313 = verf.f32 %v5836_v39  ;;  %v11887_v7 = vadd.f32 %v11709_v43, %v11411_v50  ;;  %v8649_v22 = vld [vmem:[#allocation2 + $0x168] ss:$16 sps:$4 sm:$0xff]  }
 0x432   : > { %v8300_v4 = vpop.eup %8299  ;;  %v11876_v48 = vpop.f32.mrb[42].mxu1  ;;  %6619 = vst [vmem:[%s9278_s26 + $0x2d0] sm:$0xff] %v6419_v27  ;;  %v5626_v15 = vmul.f32 0.5, %v11796_v12  ;;  %8315 = verf.f32 %v5841_v13  ;;  %v5843_v25 = vmul.f32 0.70710677, %v11874_v23  ;;  %v5628_v43 = vmul.f32 0.5, %v11801_v51 }
 0x433   : > { %v11878_v45 = vpop.f32.mrb[43].mxu0  ;;  %v6225_v11 = vadd.f32 1.0, %v8300_v4  ;;  %v11889_v33 = vpop.f32.mrb[43].mxu1  ;;  %6618 = vst [vmem:[%s9278_s26 + $0x2c8] sm:$0xff] %v6418_v41  ;;  %v6420_v56 = vmul.f32 %v6220_v35, %v5620_v53  ;;  %v5842_v27 = vmul.f32 0.70710677, %v11883_v54  ;;  %v11904_v35 = vadd.f32 %v11711_v24, %v11404_v60 }
 0x434   : > { %v8302_v49 = vpop.eup %8301  ;;  %5189 = vmatmul.mubr.bf16.gmra.mrb[96].mxu0 %v8649_v22  ;;  %5511 = vmatmul.mubr.bf16.gmra.mrb[96].mxu1 %v8649_v22  ;;  %v5633_v12 = vmul.f32 0.5, %v11805_v5  ;;  %8317 = verf.f32 %v5843_v25  ;;  %v5844_v4 = vmul.f32 0.70710677, %v11887_v7  ;;  %v11920_v24 = vadd.f32 %v11721_v14, %v11408_v8 }
 0x435   : > { %v8304_v26 = vpop.eup %8303  ;;  %v6425_v42 = vmul.f32 %v6225_v11, %v5625_v62  ;;  %v6227_v58 = vadd.f32 1.0, %v8302_v49  ;;  %5198 = vmatprep.mubr.bf16.mxu0 %v11319_v31  ;;  %6620 = vst [vmem:[%s9278_s26 + $0x2d8] sm:$0xff] %v6420_v56  ;;  %5520 = vmatprep.mubr.bf16.mxu1 %v11319_v31  ;;  %8319 = verf.f32 %v5842_v27  ;;  %v11910_v49 = vadd.f32 %v11716_v16, %v11406_v20 }
 0x436   : > { %v8306_v39 = vpop.eup %8305  ;;  %v6226_v53 = vadd.f32 1.0, %v8304_v26  ;;  %8321 = verf.f32 %v5844_v4  ;;  %v5849_v25 = vmul.f32 0.70710677, %v11904_v35  ;;  %v5634_v4 = vmul.f32 0.5, %v11840_v0 }
 0x437   : > { %v8308_v62 = vpop.eup %8307  ;;  %6625 = vst [vmem:[%s9278_s26 + $0x300] sm:$0xff] %v6425_v42  ;;  %v6427_v41 = vmul.f32 %v6227_v58, %v5627_v46  ;;  %v6228_v51 = vadd.f32 1.0, %v8306_v39  ;;  %v11906_v13 = vpop.f32.mrb[44].mxu0  ;;  %v5635_v42 = vmul.f32 0.5, %v11836_v37  ;;  %v5851_v58 = vmul.f32 0.70710677, %v11910_v49 }
 0x438   : > { %v6426_v11 = vmul.f32 %v6226_v53, %v5626_v15  ;;  %v6233_v5 = vadd.f32 1.0, %v8308_v62  ;;  %v11912_v31 = vpop.f32.mrb[44].mxu1  ;;  %v11914_v56 = vpop.f32.mrb[45].mxu0  ;;  %8323 = verf.f32 %v5849_v25  ;;  %v11948_v0 = vadd.f32 %v11752_v63, %v11404_v60 }
 0x439   : > { %6627 = vst [vmem:[%s9278_s26 + $0x310] sm:$0xff] %v6427_v41  ;;  %v6428_v46 = vmul.f32 %v6228_v51, %v5628_v43  ;;  %v11922_v15 = vpop.f32.mrb[45].mxu1  ;;  %v11924_v22 = vpop.f32.mrb[46].mxu0  ;;  %v11931_v43 = vadd.f32 %v11723_v55, %v11411_v50  ;;  %v5636_v55 = vmul.f32 0.5, %v11846_v36  ;;  %8325 = verf.f32 %v5851_v58 }
 0x43a   : > { %v8310_v16 = vpop.eup %8309  ;;  %6626 = vst [vmem:[%s9278_s26 + $0x308] sm:$0xff] %v6426_v11  ;;  %v6433_v26 = vmul.f32 %v6233_v5, %v5633_v12  ;;  %v11933_v27 = vpop.f32.mrb[46].mxu1  ;;  %v5850_v12 = vmul.f32 0.70710677, %v11920_v24  ;;  %v11952_v5 = vadd.f32 %v11754_v6, %v11406_v20  ;;  %v5643_v63 = vmul.f32 0.5, %v11874_v23 }
 0x43b   : > { %v11935_v14 = vpop.f32.mrb[47].mxu0  ;;  %v8312_v39 = vpop.eup %8311  ;;  %6628 = vst [vmem:[%s9278_s26 + $0x318] sm:$0xff] %v6428_v46  ;;  %v6235_v53 = vadd.f32 1.0, %v8310_v16  ;;  %v5852_v41 = vmul.f32 0.70710677, %v11931_v43  ;;  %v11957_v16 = vadd.f32 %v11761_v52, %v11408_v8 }
 0x43c   : > { %v11940_v62 = vpop.f32.mrb[47].mxu1  ;;  %6633 = vst [vmem:[%s9278_s26 + $0x340] sm:$0xff] %v6433_v26  ;;  %v6234_v37 = vadd.f32 1.0, %v8312_v39  ;;  %5199 = vmatmul.mubr.bf16.gmra.mrb[100].mxu0 %v11323_v59  ;;  %v8314_v51 = vpop.eup %8313  ;;  %8327 = verf.f32 %v5850_v12  ;;  %5521 = vmatmul.mubr.bf16.gmra.mrb[100].mxu1 %v11323_v59  ;;  %v5641_v26 = vmul.f32 0.5, %v11851_v28  ;;  %v5857_v58 = vmul.f32 0.70710677, %v11948_v0 }
 0x43d   : > { %v6435_v11 = vmul.f32 %v6235_v53, %v5635_v42  ;;  %v8316_v36 = vpop.eup %8315  ;;  %v6236_v25 = vadd.f32 1.0, %v8314_v51  ;;  %8329 = verf.f32 %v5852_v41  ;;  %v5642_v53 = vmul.f32 0.5, %v11883_v54 }
 0x43e   : > { %v6434_v46 = vmul.f32 %v6234_v37, %v5634_v4  ;;  %v6241_v42 = vadd.f32 1.0, %v8316_v36  ;;  %v8318_v59 = vpop.eup %8317  ;;  %v5859_v4 = vmul.f32 0.70710677, %v11952_v5  ;;  %v5858_v52 = vmul.f32 0.70710677, %v11957_v16 }
 0x43f   : > { %6635 = vst [vmem:[%s9278_s26 + $0x350] sm:$0xff] %v6435_v11  ;;  %v11963_v6 = vpop.f32.mrb[48].mxu0  ;;  %v6436_v39 = vmul.f32 %v6236_v25, %v5636_v55  ;;  %v11969_v12 = vpop.f32.mrb[48].mxu1  ;;  %v6243_v23 = vadd.f32 1.0, %v8318_v59  ;;  %8331 = verf.f32 %v5857_v58  ;;  %v11973_v41 = vadd.f32 %v11763_v61, %v11411_v50 }
 0x440   : > { %6634 = vst [vmem:[%s9278_s26 + $0x348] sm:$0xff] %v6434_v46  ;;  %v8320_v28 = vpop.eup %8319  ;;  %v6441_v37 = vmul.f32 %v6241_v42, %v5641_v26  ;;  %v11975_v51 = vpop.f32.mrb[49].mxu0  ;;  %8333 = verf.f32 %v5859_v4  ;;  %v11982_v36 = vadd.f32 %v11774_v30, %v11404_v60  ;;  %v11986_v46 = vadd.f32 %v11776_v18, %v11406_v20 }
 0x441   : > { %v11977_v55 = vpop.f32.mrb[49].mxu1  ;;  %v8322_v54 = vpop.eup %8321  ;;  %6636 = vst [vmem:[%s9278_s26 + $0x358] sm:$0xff] %v6436_v39  ;;  %v6242_v11 = vadd.f32 1.0, %v8320_v28  ;;  %v6443_v26 = vmul.f32 %v6243_v23, %v5643_v63  ;;  %v5644_v42 = vmul.f32 0.5, %v11887_v7  ;;  %8335 = verf.f32 %v5858_v52 }
 0x442   : > { %v4560_v25 = vpop.f32.mrb[50].mxu0  ;;  %v4882_v61 = vpop.f32.mrb[50].mxu1  ;;  %6641 = vst [vmem:[%s9278_s26 + $0x380] sm:$0xff] %v6441_v37  ;;  %v6244_v58 = vadd.f32 1.0, %v8322_v54  ;;  %v5649_v30 = vmul.f32 0.5, %v11904_v35  ;;  %v5651_v63 = vmul.f32 0.5, %v11910_v49  ;;  %v11998_v52 = vadd.f32 %v11781_v3, %v11408_v8 }
 0x443   : > { %v4561_v59 = vpop.f32.mrb[51].mxu0  ;;  %v4883_v39 = vpop.f32.mrb[51].mxu1  ;;  %v6442_v4 = vmul.f32 %v6242_v11, %v5642_v53  ;;  %v5860_v28 = vmul.f32 0.70710677, %v11973_v41  ;;  %v5865_v18 = vmul.f32 0.70710677, %v11982_v36  ;;  %v12003_v35 = vadd.f32 %v11783_v57, %v11411_v50 }
 0x444   : > { %v8324_v21 = vpop.eup %8323  ;;  %6643 = vst [vmem:[%s9278_s26 + $0x390] sm:$0xff] %v6443_v26  ;;  %v6444_v25 = vmul.f32 %v6244_v58, %v5644_v42  ;;  %v5867_v7 = vmul.f32 0.70710677, %v11986_v46  ;;  %v12007_v23 = vadd.f32 %v11807_v1, %v11404_v60  ;;  %v5650_v11 = vmul.f32 0.5, %v11920_v24 }
 0x445   : > { %v8326_v37 = vpop.eup %8325  ;;  %6642 = vst [vmem:[%s9278_s26 + $0x388] sm:$0xff] %v6442_v4  ;;  %v6249_v53 = vadd.f32 1.0, %v8324_v21  ;;  %8337 = verf.f32 %v5860_v28  ;;  %v5866_v3 = vmul.f32 0.70710677, %v11998_v52  ;;  %v5652_v57 = vmul.f32 0.5, %v11931_v43 }
 0x446   : > { %v8328_v49 = vpop.eup %8327  ;;  %6644 = vst [vmem:[%s9278_s26 + $0x398] sm:$0xff] %v6444_v25  ;;  %v6251_v54 = vadd.f32 1.0, %v8326_v37  ;;  %8339 = verf.f32 %v5865_v18  ;;  %v5868_v58 = vmul.f32 0.70710677, %v12003_v35  ;;  %v5657_v24 = vmul.f32 0.5, %v11948_v0 }
 0x447   : > { %v8330_v21 = vpop.eup %8329  ;;  %v6449_v61 = vmul.f32 %v6249_v53, %v5649_v30  ;;  %v6250_v26 = vadd.f32 1.0, %v8328_v49  ;;  %8341 = verf.f32 %v5867_v7  ;;  %v5873_v39 = vmul.f32 0.70710677, %v12007_v23 }
 0x448   : > { %v6451_v42 = vmul.f32 %v6251_v54, %v5651_v63  ;;  %v6252_v1 = vadd.f32 1.0, %v8330_v21  ;;  %8343 = verf.f32 %v5866_v3  ;;  %v12019_v4 = vadd.f32 %v11812_v38, %v11406_v20 }
 0x449   : > { %6649 = vst [vmem:[%s9278_s26 + $0x3c0] sm:$0xff] %v6449_v61  ;;  %v6450_v59 = vmul.f32 %v6250_v26, %v5650_v11  ;;  %v8332_v30 = vpop.eup %8331  ;;  %8345 = verf.f32 %v5868_v58  ;;  %v12024_v28 = vadd.f32 %v11814_v40, %v11408_v8  ;;  %v12028_v18 = vadd.f32 %v11818_v2, %v11411_v50 }
 0x44a   : > { %6651 = vst [vmem:[%s9278_s26 + $0x3d0] sm:$0xff] %v6451_v42  ;;  %v6452_v43 = vmul.f32 %v6252_v1, %v5652_v57  ;;  %v8334_v0 = vpop.eup %8333  ;;  %v6257_v25 = vadd.f32 1.0, %v8332_v30  ;;  %v5659_v63 = vmul.f32 0.5, %v11952_v5  ;;  %8347 = verf.f32 %v5873_v39 }
 0x44b   : > { %6650 = vst [vmem:[%s9278_s26 + $0x3c8] sm:$0xff] %v6450_v59  ;;  %v5875_v38 = vmul.f32 0.70710677, %v12019_v4  ;;  %v8336_v7 = vpop.eup %8335  ;;  %v6259_v37 = vadd.f32 1.0, %v8334_v0  ;;  %v5658_v53 = vmul.f32 0.5, %v11957_v16  ;;  %v5660_v40 = vmul.f32 0.5, %v11973_v41 }
 0x44c   : > { %6652 = vst [vmem:[%s9278_s26 + $0x3d8] sm:$0xff] %v6452_v43  ;;  %v5874_v49 = vmul.f32 0.70710677, %v12024_v28  ;;  %v6457_v2 = vmul.f32 %v6257_v25, %v5657_v24  ;;  %v6258_v54 = vadd.f32 1.0, %v8336_v7  ;;  %v5876_v11 = vmul.f32 0.70710677, %v12028_v18 }
 0x44d   : > { %8349 = verf.f32 %v5875_v38  ;;  %v6459_v5 = vmul.f32 %v6259_v37, %v5659_v63  ;;  %v12040_v3 = vadd.f32 %v11820_v19, %v11404_v60  ;;  %v12044_v16 = vadd.f32 %v11824_v17, %v11406_v20 }
 0x44e   : > { %8351 = verf.f32 %v5874_v49  ;;  %6657 = vst [vmem:[%s9278_s26 + $0x400] sm:$0xff] %v6457_v2  ;;  %v6458_v21 = vmul.f32 %v6258_v54, %v5658_v53  ;;  %v12049_v61 = vadd.f32 %v11826_v44, %v11408_v8  ;;  %v12053_v26 = vadd.f32 %v11831_v29, %v11411_v50 }
 0x44f   : > { %v8338_v41 = vpop.eup %8337  ;;  %8353 = verf.f32 %v5876_v11  ;;  %6659 = vst [vmem:[%s9278_s26 + $0x410] sm:$0xff] %v6459_v5  ;;  %v5665_v42 = vmul.f32 0.5, %v11982_v36  ;;  %v5667_v17 = vmul.f32 0.5, %v11986_v46  ;;  %v5881_v1 = vmul.f32 0.70710677, %v12040_v3 }
 0x450   : > { %v8340_v57 = vpop.eup %8339  ;;  %v6260_v19 = vadd.f32 1.0, %v8338_v41  ;;  %6658 = vst [vmem:[%s9278_s26 + $0x408] sm:$0xff] %v6458_v21  ;;  %v5666_v44 = vmul.f32 0.5, %v11998_v52  ;;  %v5883_v24 = vmul.f32 0.70710677, %v12044_v16  ;;  %v5668_v36 = vmul.f32 0.5, %v12003_v35 }
 0x451   : > { %v8342_v58 = vpop.eup %8341  ;;  %v6265_v59 = vadd.f32 1.0, %v8340_v57  ;;  %v5882_v29 = vmul.f32 0.70710677, %v12049_v61  ;;  %8355 = verf.f32 %v5881_v1  ;;  %v5884_v25 = vmul.f32 0.70710677, %v12053_v26 }
 0x452   : > { %v8344_v39 = vpop.eup %8343  ;;  %v6460_v30 = vmul.f32 %v6260_v19, %v5660_v40  ;;  %v6267_v43 = vadd.f32 1.0, %v8342_v58  ;;  %8357 = verf.f32 %v5883_v24  ;;  %v12068_v38 = vadd.f32 %v11855_v47, %v11404_v60 }
 0x453   : > { %v6465_v46 = vmul.f32 %v6265_v59, %v5665_v42  ;;  %v6266_v0 = vadd.f32 1.0, %v8344_v39  ;;  %v8346_v63 = vpop.eup %8345  ;;  %8359 = verf.f32 %v5882_v29  ;;  %v12072_v7 = vadd.f32 %v11859_v32, %v11406_v20 }
 0x454   : > { %6660 = vst [vmem:[%s9278_s26 + $0x418] sm:$0xff] %v6460_v30  ;;  %v6467_v52 = vmul.f32 %v6267_v43, %v5667_v17  ;;  %v8348_v35 = vpop.eup %8347  ;;  %v6268_v53 = vadd.f32 1.0, %v8346_v63  ;;  %8361 = verf.f32 %v5884_v25  ;;  %v12077_v40 = vadd.f32 %v11861_v34, %v11408_v8 }
 0x455   : > { %6665 = vst [vmem:[%s9278_s26 + $0x440] sm:$0xff] %v6465_v46  ;;  %v6466_v37 = vmul.f32 %v6266_v0, %v5666_v44  ;;  %v5673_v49 = vmul.f32 0.5, %v12007_v23  ;;  %v6273_v2 = vadd.f32 1.0, %v8348_v35  ;;  %v5675_v47 = vmul.f32 0.5, %v12019_v4 }
 0x456   : > { %6667 = vst [vmem:[%s9278_s26 + $0x450] sm:$0xff] %v6467_v52  ;;  %v5889_v54 = vmul.f32 0.70710677, %v12068_v38  ;;  %v6468_v11 = vmul.f32 %v6268_v53, %v5668_v36  ;;  %v5674_v5 = vmul.f32 0.5, %v12024_v28  ;;  %v5891_v41 = vmul.f32 0.70710677, %v12072_v7 }
 0x457   : > { %v8350_v32 = vpop.eup %8349  ;;  %6666 = vst [vmem:[%s9278_s26 + $0x448] sm:$0xff] %v6466_v37  ;;  %v5890_v34 = vmul.f32 0.70710677, %v12077_v40  ;;  %v6473_v57 = vmul.f32 %v6273_v2, %v5673_v49  ;;  %v12089_v23 = vadd.f32 %v11866_v9, %v11411_v50  ;;  %v12094_v28 = vadd.f32 %v11868_v10, %v11404_v60 }
 0x458   : > { %v8352_v21 = vpop.eup %8351  ;;  %v6275_v19 = vadd.f32 1.0, %v8350_v32  ;;  %8363 = verf.f32 %v5889_v54  ;;  %6668 = vst [vmem:[%s9278_s26 + $0x458] sm:$0xff] %v6468_v11  ;;  %v12098_v17 = vadd.f32 %v11876_v48, %v11406_v20  ;;  %v5676_v58 = vmul.f32 0.5, %v12028_v18 }
 0x459   : > { %v8354_v4 = vpop.eup %8353  ;;  %v6274_v42 = vadd.f32 1.0, %v8352_v21  ;;  %8365 = verf.f32 %v5891_v41  ;;  %6673 = vst [vmem:[%s9278_s26 + $0x480] sm:$0xff] %v6473_v57  ;;  %v5681_v44 = vmul.f32 0.5, %v12040_v3  ;;  %v5892_v24 = vmul.f32 0.70710677, %v12089_v23 }
 0x45a   : > { %v6475_v1 = vmul.f32 %v6275_v19, %v5675_v47  ;;  %v6276_v9 = vadd.f32 1.0, %v8354_v4  ;;  %8367 = verf.f32 %v5890_v34  ;;  %v5897_v10 = vmul.f32 0.70710677, %v12094_v28 }
 0x45b   : > { %v6474_v59 = vmul.f32 %v6274_v42, %v5674_v5  ;;  %v8356_v29 = vpop.eup %8355  ;;  %v5683_v48 = vmul.f32 0.5, %v12044_v16  ;;  %v5899_v30 = vmul.f32 0.70710677, %v12098_v17  ;;  %v12110_v18 = vadd.f32 %v11878_v45, %v11408_v8 }
 0x45c   : > { %6675 = vst [vmem:[%s9278_s26 + $0x490] sm:$0xff] %v6475_v1  ;;  %v6476_v39 = vmul.f32 %v6276_v9, %v5676_v58  ;;  %v8358_v43 = vpop.eup %8357  ;;  %v6281_v36 = vadd.f32 1.0, %v8356_v29  ;;  %8369 = verf.f32 %v5892_v24  ;;  %v12115_v3 = vadd.f32 %v11889_v33, %v11411_v50 }
 0x45d   : > { %6674 = vst [vmem:[%s9278_s26 + $0x488] sm:$0xff] %v6474_v59  ;;  %v12119_v46 = vadd.f32 %v11906_v13, %v11404_v60  ;;  %v8360_v16 = vpop.eup %8359  ;;  %v6283_v0 = vadd.f32 1.0, %v8358_v43  ;;  %v5682_v25 = vmul.f32 0.5, %v12049_v61  ;;  %8371 = verf.f32 %v5897_v10 }
 0x45e   : > { %6676 = vst [vmem:[%s9278_s26 + $0x498] sm:$0xff] %v6476_v39  ;;  %v5898_v45 = vmul.f32 0.70710677, %v12110_v18  ;;  %v8362_v63 = vpop.eup %8361  ;;  %v6481_v52 = vmul.f32 %v6281_v36, %v5681_v44  ;;  %v6282_v35 = vadd.f32 1.0, %v8360_v16  ;;  %v5684_v33 = vmul.f32 0.5, %v12053_v26 }
 0x45f   : > { %8373 = verf.f32 %v5899_v30  ;;  %v6483_v37 = vmul.f32 %v6283_v0, %v5683_v48  ;;  %v6284_v13 = vadd.f32 1.0, %v8362_v63  ;;  %v5900_v53 = vmul.f32 0.70710677, %v12115_v3 }
 0x460   : > { %8375 = verf.f32 %v5898_v45  ;;  %6681 = vst [vmem:[%s9278_s26 + $0x4c0] sm:$0xff] %v6481_v52  ;;  %v6482_v49 = vmul.f32 %v6282_v35, %v5682_v25  ;;  %v5689_v61 = vmul.f32 0.5, %v12068_v38  ;;  %v5905_v2 = vmul.f32 0.70710677, %v12119_v46 }
 0x461   : > { %v12131_v47 = vadd.f32 %v11912_v31, %v11406_v20  ;;  %6683 = vst [vmem:[%s9278_s26 + $0x4d0] sm:$0xff] %v6483_v37  ;;  %v6484_v26 = vmul.f32 %v6284_v13, %v5684_v33  ;;  %8377 = verf.f32 %v5900_v53  ;;  %v12136_v32 = vadd.f32 %v11914_v56, %v11408_v8 }
 0x462   : > { %v8364_v54 = vpop.eup %8363  ;;  %v12140_v11 = vadd.f32 %v11922_v15, %v11411_v50  ;;  %6682 = vst [vmem:[%s9278_s26 + $0x4c8] sm:$0xff] %v6482_v49  ;;  %v5691_v41 = vmul.f32 0.5, %v12072_v7  ;;  %8379 = verf.f32 %v5905_v2  ;;  %v5690_v57 = vmul.f32 0.5, %v12077_v40 }
 0x463   : > { %v8366_v38 = vpop.eup %8365  ;;  %v6289_v5 = vadd.f32 1.0, %v8364_v54  ;;  %v5907_v31 = vmul.f32 0.70710677, %v12131_v47  ;;  %6684 = vst [vmem:[%s9278_s26 + $0x4d8] sm:$0xff] %v6484_v26  ;;  %v5692_v56 = vmul.f32 0.5, %v12089_v23  ;;  %v12152_v1 = vadd.f32 %v11924_v22, %v11404_v60 }
 0x464   : > { %v8368_v34 = vpop.eup %8367  ;;  %v6291_v21 = vadd.f32 1.0, %v8366_v38  ;;  %v5906_v19 = vmul.f32 0.70710677, %v12136_v32  ;;  %v5908_v42 = vmul.f32 0.70710677, %v12140_v11  ;;  %v12156_v40 = vadd.f32 %v11933_v27, %v11406_v20 }
 0x465   : > { %v6489_v15 = vmul.f32 %v6289_v5, %v5689_v61  ;;  %v6290_v4 = vadd.f32 1.0, %v8368_v34  ;;  %8381 = verf.f32 %v5907_v31  ;;  %v12161_v9 = vadd.f32 %v11935_v14, %v11408_v8 }
 0x466   : > { %v6491_v7 = vmul.f32 %v6291_v21, %v5691_v41  ;;  %8383 = verf.f32 %v5906_v19  ;;  %v8370_v23 = vpop.eup %8369  ;;  %v12165_v59 = vadd.f32 %v11940_v62, %v11411_v50  ;;  %v5697_v24 = vmul.f32 0.5, %v12094_v28 }
 0x467   : > { %6689 = vst [vmem:[%s9278_s26 + $0x500] sm:$0xff] %v6489_v15  ;;  %v6490_v58 = vmul.f32 %v6290_v4, %v5690_v57  ;;  %8385 = verf.f32 %v5908_v42  ;;  %v8372_v44 = vpop.eup %8371  ;;  %v6292_v22 = vadd.f32 1.0, %v8370_v23  ;;  %v5699_v27 = vmul.f32 0.5, %v12098_v17 }
 0x468   : > { %6691 = vst [vmem:[%s9278_s26 + $0x510] sm:$0xff] %v6491_v7  ;;  %v5913_v10 = vmul.f32 0.70710677, %v12152_v1  ;;  %v6297_v39 = vadd.f32 1.0, %v8372_v44  ;;  %v5698_v14 = vmul.f32 0.5, %v12110_v18  ;;  %v5700_v28 = vmul.f32 0.5, %v12115_v3 }
 0x469   : > { %v8374_v29 = vpop.eup %8373  ;;  %6690 = vst [vmem:[%s9278_s26 + $0x508] sm:$0xff] %v6490_v58  ;;  %v5915_v48 = vmul.f32 0.70710677, %v12156_v40  ;;  %v5914_v62 = vmul.f32 0.70710677, %v12161_v9  ;;  %v6492_v43 = vmul.f32 %v6292_v22, %v5692_v56  ;;  %v7692_v45 = vadd.f32 %v11963_v6, %v11404_v60 }
 0x46a   : > { %v8376_v30 = vpop.eup %8375  ;;  %v6299_v36 = vadd.f32 1.0, %v8374_v29  ;;  %8387 = verf.f32 %v5913_v10  ;;  %v6497_v17 = vmul.f32 %v6297_v39, %v5697_v24  ;;  %v5916_v0 = vmul.f32 0.70710677, %v12165_v59 }
 0x46b   : > { %v6298_v16 = vadd.f32 1.0, %v8376_v30  ;;  %8389 = verf.f32 %v5915_v48  ;;  %v8378_v25 = vpop.eup %8377  ;;  %6692 = vst [vmem:[%s9278_s26 + $0x518] sm:$0xff] %v6492_v43  ;;  %v12182_v63 = vadd.f32 %v11969_v12, %v11406_v20  ;;  %v7693_v33 = vadd.f32 %v11975_v51, %v11408_v8 }
 0x46c   : > { %v6499_v18 = vmul.f32 %v6299_v36, %v5699_v27  ;;  %8391 = verf.f32 %v5914_v62  ;;  %v8380_v3 = vpop.eup %8379  ;;  %6697 = vst [vmem:[%s9278_s26 + $0x540] sm:$0xff] %v6497_v17  ;;  %v6300_v35 = vadd.f32 1.0, %v8378_v25  ;;  %v5705_v37 = vmul.f32 0.5, %v12119_v46  ;;  %v13783_v17 = vld [vmem:[#allocation75_spill] sm:$0xff] }
 0x46d   : > { %v6498_v52 = vmul.f32 %v6298_v16, %v5698_v14  ;;  %8393 = verf.f32 %v5916_v0  ;;  %v6305_v13 = vadd.f32 1.0, %v8380_v3  ;;  %v5921_v53 = vmul.f32 0.70710677, %v7692_v45 }
 0x46e   : > { %6699 = vst [vmem:[%s9278_s26 + $0x550] sm:$0xff] %v6499_v18  ;;  %v6500_v60 = vmul.f32 %v6300_v35, %v5700_v28  ;;  %v5707_v20 = vmul.f32 0.5, %v12131_v47  ;;  %v5923_v6 = vmul.f32 0.70710677, %v12182_v63  ;;  %v5922_v12 = vmul.f32 0.70710677, %v7693_v33 }
 0x46f   : > { %v8382_v49 = vpop.eup %8381  ;;  %6698 = vst [vmem:[%s9278_s26 + $0x548] sm:$0xff] %v6498_v52  ;;  %v6505_v2 = vmul.f32 %v6305_v13, %v5705_v37  ;;  %8395 = verf.f32 %v5921_v53  ;;  %v7743_v8 = vadd.f32 %v11977_v55, %v11411_v50  ;;  %v5706_v46 = vmul.f32 0.5, %v12136_v32 }
 0x470   : > { %v8384_v61 = vpop.eup %8383  ;;  %v6307_v54 = vadd.f32 1.0, %v8382_v49  ;;  %6700 = vst [vmem:[%s9278_s26 + $0x558] sm:$0xff] %v6500_v60  ;;  %8397 = verf.f32 %v5923_v6  ;;  %v5708_v38 = vmul.f32 0.5, %v12140_v11  ;;  %v5713_v55 = vmul.f32 0.5, %v12152_v1 }
 0x471   : > { %v8386_v51 = vpop.eup %8385  ;;  %v6306_v26 = vadd.f32 1.0, %v8384_v61  ;;  %6705 = vst [vmem:[%s9278_s26 + $0x580] sm:$0xff] %v6505_v2  ;;  %8399 = verf.f32 %v5922_v12  ;;  %v5924_v31 = vmul.f32 0.70710677, %v7743_v8  ;;  %v5715_v11 = vmul.f32 0.5, %v12156_v40 }
 0x472   : > { %v6507_v47 = vmul.f32 %v6307_v54, %v5707_v20  ;;  %v6308_v5 = vadd.f32 1.0, %v8386_v51  ;;  %v5714_v4 = vmul.f32 0.5, %v12161_v9  ;;  %v5716_v23 = vmul.f32 0.5, %v12165_v59 }
 0x473   : > { %v6506_v41 = vmul.f32 %v6306_v26, %v5706_v46  ;;  %8401 = verf.f32 %v5924_v31  ;;  %v5721_v40 = vmul.f32 0.5, %v7692_v45  ;;  %v5723_v9 = vmul.f32 0.5, %v12182_v63  ;;  %v8650_v45 = vld [vmem:[%s9274_s19] sm:$0xff]  ;;  %s7643_s19 = sshll.u32 (%p8741_p5), %s8726_s24, 6 }
 0x474   : > { %v8388_v34 = vpop.eup %8387  ;;  %6707 = vst [vmem:[%s9278_s26 + $0x590] sm:$0xff] %v6507_v47  ;;  %v6508_v21 = vmul.f32 %v6308_v5, %v5708_v38  ;;  %v5722_v39 = vmul.f32 0.5, %v7693_v33  ;;  %v5724_v43 = vmul.f32 0.5, %v7743_v8  ;;  %v2685_v16 = vsub.s32 4, %v13783_v17  ;;  %s13024_s8 = scalar_lea.vmem (%p8741_p5), %s13439_s6, %s7643_s19 }
 0x475   : > { %v8390_v50 = vpop.eup %8389  ;;  %6706 = vst [vmem:[%s9278_s26 + $0x588] sm:$0xff] %v6506_v41  ;;  %v6313_v32 = vadd.f32 1.0, %v8388_v34  ;;  %v2693_v0 = vsub.s32 6, %v13783_v17  ;;  %v2689_v25 = vsub.s32 5, %v13783_v17  ;;  %v2697_v18 = vsub.s32 7, %v13783_v17 }
 0x476   : > { %v8392_v57 = vpop.eup %8391  ;;  %6708 = vst [vmem:[%s9278_s26 + $0x598] sm:$0xff] %v6508_v21  ;;  %v6315_v56 = vadd.f32 1.0, %v8390_v50  ;;  %v12219_v63 = vrot.slane %v8650_v45, %v2685_v16 }
 0x477   : > { %v8394_v19 = vpop.eup %8393  ;;  %v6513_v15 = vmul.f32 %v6313_v32, %v5713_v55  ;;  %v6314_v42 = vadd.f32 1.0, %v8392_v57  ;;  %v12221_v3 = vrot.slane %v8650_v45, %v2693_v0  ;;  %v12223_v52 = vrot.slane %v8650_v45, %v2689_v25 }
 0x478   : > { %v6515_v7 = vmul.f32 %v6315_v56, %v5715_v11  ;;  %v6316_v58 = vadd.f32 1.0, %v8394_v19  ;;  %v12225_v35 = vrot.slane %v8650_v45, %v2697_v18 }
 0x479   : > { %6713 = vst [vmem:[%s9278_s26 + $0x5c0] sm:$0xff] %v6513_v15  ;;  %v6514_v1 = vmul.f32 %v6314_v42, %v5714_v4  ;;  %v8396_v44 = vpop.eup %8395 }
 0x47a   : > { %6715 = vst [vmem:[%s9278_s26 + $0x5d0] sm:$0xff] %v6515_v7  ;;  %v6516_v22 = vmul.f32 %v6316_v58, %v5716_v23  ;;  %v8398_v24 = vpop.eup %8397  ;;  %v6321_v27 = vadd.f32 1.0, %v8396_v44 }
 0x47b   : > { %6714 = vst [vmem:[%s9278_s26 + $0x5c8] sm:$0xff] %v6514_v1  ;;  %v8400_v10 = vpop.eup %8399  ;;  %v6323_v29 = vadd.f32 1.0, %v8398_v24 }
 0x47c   : > { %6716 = vst [vmem:[%s9278_s26 + $0x5d8] sm:$0xff] %v6516_v22  ;;  %v6521_v59 = vmul.f32 %v6321_v27, %v5721_v40  ;;  %v6322_v14 = vadd.f32 1.0, %v8400_v10 }
 0x47d   : > { %v6523_v48 = vmul.f32 %v6323_v29, %v5723_v9  ;;  %v8402_v62 = vpop.eup %8401 }
 0x47e   : > { %6721 = vst [vmem:[%s9278_s26 + $0x600] sm:$0xf] %v6521_v59  ;;  %v6522_v30 = vmul.f32 %v6322_v14, %v5722_v39  ;;  %v6324_v36 = vadd.f32 1.0, %v8402_v62 }
 0x47f   : > { %6723 = vst [vmem:[%s9278_s26 + $0x610] sm:$0xf] %v6523_v48 }
 0x480   : > { %6722 = vst [vmem:[%s9278_s26 + $0x608] sm:$0xf] %v6522_v30  ;;  %v6524_v28 = vmul.f32 %v6324_v36, %v5724_v43 }
 0x482   : > { %6724 = vst [vmem:[%s9278_s26 + $0x618] sm:$0xf] %v6524_v28 }
 0x4af   : > { %v5080_v33 = vpop.f32.mrb[52].mxu0  ;;  %v5402_v13 = vpop.f32.mrb[52].mxu1 }
 0x4b0   : > { %v7744_v37 = vadd.f32 %v5080_v33, %v12219_v63  ;;  %v5082_v53 = vpop.f32.mrb[53].mxu0  ;;  %v7794_v49 = vadd.f32 %v5402_v13, %v12221_v3  ;;  %v5404_v20 = vpop.f32.mrb[53].mxu1 }
 0x4b1   : > { %v7745_v60 = vadd.f32 %v5082_v53, %v12223_v52  ;;  %v5084_v6 = vpop.f32.mrb[54].mxu0  ;;  %v7795_v61 = vadd.f32 %v5404_v20, %v12225_v35  ;;  %v5406_v54 = vpop.f32.mrb[54].mxu1 }
 0x4b2   : > { %v5733_v12 = vmul.f32 0.70710677, %v7744_v37  ;;  %v7746_v2 = vadd.f32 %v5084_v6, %v12219_v63  ;;  %v5086_v8 = vpop.f32.mrb[55].mxu0  ;;  %v5735_v51 = vmul.f32 0.70710677, %v7794_v49  ;;  %v5408_v47 = vpop.f32.mrb[55].mxu1  ;;  %v7796_v5 = vadd.f32 %v5406_v54, %v12221_v3 }
 0x4b3   : > { %v5734_v46 = vmul.f32 0.70710677, %v7745_v60  ;;  %v5736_v26 = vmul.f32 0.70710677, %v7795_v61  ;;  %v7747_v41 = vadd.f32 %v5086_v8, %v12223_v52  ;;  %v7797_v31 = vadd.f32 %v5408_v47, %v12225_v35 }
 0x4b4   : > { %8403 = verf.f32 %v5733_v12  ;;  %v5741_v38 = vmul.f32 0.70710677, %v7746_v2  ;;  %v5743_v34 = vmul.f32 0.70710677, %v7796_v5  ;;  %v5533_v23 = vmul.f32 0.5, %v7744_v37 }
 0x4b5   : > { %8405 = verf.f32 %v5735_v51  ;;  %v5742_v50 = vmul.f32 0.70710677, %v7747_v41  ;;  %v5744_v55 = vmul.f32 0.70710677, %v7797_v31  ;;  %v5535_v58 = vmul.f32 0.5, %v7794_v49 }
 0x4b6   : > { %8407 = verf.f32 %v5734_v46  ;;  %v5534_v24 = vmul.f32 0.5, %v7745_v60  ;;  %v5536_v40 = vmul.f32 0.5, %v7795_v61  ;;  %v5541_v14 = vmul.f32 0.5, %v7746_v2 }
 0x4b7   : > { %8409 = verf.f32 %v5736_v26  ;;  %v5090_v21 = vpop.f32.mrb[56].mxu0  ;;  %v5412_v32 = vpop.f32.mrb[56].mxu1  ;;  %v5543_v48 = vmul.f32 0.5, %v7796_v5  ;;  %v5542_v25 = vmul.f32 0.5, %v7747_v41  ;;  %v5544_v49 = vmul.f32 0.5, %v7797_v31 }
 0x4b8   : > { %8411 = verf.f32 %v5741_v38  ;;  %v7748_v57 = vadd.f32 %v5090_v21, %v12219_v63  ;;  %v12237_v11 = vadd.f32 %v5412_v32, %v12221_v3  ;;  %v5092_v56 = vpop.f32.mrb[57].mxu0  ;;  %v5414_v19 = vpop.f32.mrb[57].mxu1 }
 0x4b9   : > { %8413 = verf.f32 %v5743_v34  ;;  %v12240_v15 = vadd.f32 %v5092_v56, %v12223_v52  ;;  %v12243_v4 = vadd.f32 %v5414_v19, %v12225_v35  ;;  %v5094_v42 = vpop.f32.mrb[58].mxu0  ;;  %v5416_v7 = vpop.f32.mrb[58].mxu1 }
 0x4ba   : > { %8415 = verf.f32 %v5742_v50  ;;  %v5749_v1 = vmul.f32 0.70710677, %v7748_v57  ;;  %v5096_v44 = vpop.f32.mrb[59].mxu0  ;;  %v5418_v22 = vpop.f32.mrb[59].mxu1  ;;  %v5751_v27 = vmul.f32 0.70710677, %v12237_v11  ;;  %v12249_v29 = vadd.f32 %v5094_v42, %v12219_v63 }
 0x4bb   : > { %8417 = verf.f32 %v5744_v55  ;;  %v5750_v10 = vmul.f32 0.70710677, %v12240_v15  ;;  %v5752_v9 = vmul.f32 0.70710677, %v12243_v4  ;;  %v12252_v59 = vadd.f32 %v5416_v7, %v12221_v3 }
 0x4bc   : > { %8419 = verf.f32 %v5749_v1  ;;  %v12255_v62 = vadd.f32 %v5096_v44, %v12223_v52  ;;  %v5757_v36 = vmul.f32 0.70710677, %v12249_v29  ;;  %v12259_v28 = vadd.f32 %v5418_v22, %v12225_v35 }
 0x4bd   : > { %8421 = verf.f32 %v5751_v27  ;;  %v5759_v18 = vmul.f32 0.70710677, %v12252_v59  ;;  %v5549_v47 = vmul.f32 0.5, %v7748_v57  ;;  %v5551_v42 = vmul.f32 0.5, %v12237_v11 }
 0x4be   : > { %v8404_v39 = vpop.eup %8403  ;;  %8423 = verf.f32 %v5750_v10  ;;  %v5758_v2 = vmul.f32 0.70710677, %v12255_v62  ;;  %v5760_v38 = vmul.f32 0.70710677, %v12259_v28  ;;  %v5550_v1 = vmul.f32 0.5, %v12240_v15 }
 0x4bf   : > { %v8406_v30 = vpop.eup %8405  ;;  %v6133_v43 = vadd.f32 1.0, %v8404_v39  ;;  %v5100_v17 = vpop.f32.mrb[60].mxu0  ;;  %8425 = verf.f32 %v5752_v9 }
 0x4c0   : > { %v8408_v16 = vpop.eup %8407  ;;  %v6135_v0 = vadd.f32 1.0, %v8406_v30  ;;  %v5422_v45 = vpop.f32.mrb[60].mxu1  ;;  %8427 = verf.f32 %v5757_v36  ;;  %v12275_v21 = vadd.f32 %v5100_v17, %v12219_v63 }
 0x4c1   : > { %v5102_v33 = vpop.f32.mrb[61].mxu0  ;;  %v8410_v37 = vpop.eup %8409  ;;  %v6333_v13 = vmul.f32 %v6133_v43, %v5533_v23  ;;  %v6134_v53 = vadd.f32 1.0, %v8408_v16  ;;  %8429 = verf.f32 %v5759_v18  ;;  %v12279_v57 = vadd.f32 %v5422_v45, %v12221_v3 }
 0x4c2   : > { %v5424_v60 = vpop.f32.mrb[61].mxu1  ;;  %v12262_v20 = vpop.f32.mrb[62].mxu0  ;;  %v6335_v12 = vmul.f32 %v6135_v0, %v5535_v58  ;;  %v6136_v61 = vadd.f32 1.0, %v8410_v37  ;;  %8431 = verf.f32 %v5758_v2  ;;  %v5765_v7 = vmul.f32 0.70710677, %v12275_v21 }
 0x4c3   : > { %v8412_v6 = vpop.eup %8411  ;;  %v12265_v54 = vpop.f32.mrb[62].mxu1  ;;  %6533 = vst [vmem:[%s9278_s26 + $0x20] sm:$0xff] %v6333_v13  ;;  %v6334_v46 = vmul.f32 %v6134_v53, %v5534_v24  ;;  %8433 = verf.f32 %v5760_v38  ;;  %v5767_v44 = vmul.f32 0.70710677, %v12279_v57  ;;  %v12288_v22 = vadd.f32 %v5102_v33, %v12223_v52 }
 0x4c4   : > { %v12267_v8 = vpop.f32.mrb[63].mxu0  ;;  %v8414_v51 = vpop.eup %8413  ;;  %v6141_v26 = vadd.f32 1.0, %v8412_v6  ;;  %6535 = vst [vmem:[%s9278_s26 + $0x30] sm:$0xff] %v6335_v12  ;;  %v6336_v31 = vmul.f32 %v6136_v61, %v5536_v40  ;;  %8435 = verf.f32 %v5765_v7  ;;  %v12294_v10 = vadd.f32 %v5424_v60, %v12225_v35 }
 0x4c5   : > { %v12271_v5 = vpop.f32.mrb[63].mxu1  ;;  %v8416_v41 = vpop.eup %8415  ;;  %v6143_v34 = vadd.f32 1.0, %v8414_v51  ;;  %6534 = vst [vmem:[%s9278_s26 + $0x28] sm:$0xff] %v6334_v46  ;;  %8437 = verf.f32 %v5767_v44  ;;  %v5766_v30 = vmul.f32 0.70710677, %v12288_v22  ;;  %v12316_v53 = vadd.f32 %v12262_v20, %v12219_v63 }
 0x4c6   : > { %v8418_v50 = vpop.eup %8417  ;;  %v6341_v55 = vmul.f32 %v6141_v26, %v5541_v14  ;;  %v6142_v32 = vadd.f32 1.0, %v8416_v41  ;;  %6536 = vst [vmem:[%s9278_s26 + $0x38] sm:$0xff] %v6336_v31  ;;  %v5768_v18 = vmul.f32 0.70710677, %v12294_v10  ;;  %v12323_v12 = vadd.f32 %v12265_v54, %v12221_v3 }
 0x4c7   : > { %v6343_v56 = vmul.f32 %v6143_v34, %v5543_v48  ;;  %v6144_v19 = vadd.f32 1.0, %v8418_v50  ;;  %v8420_v23 = vpop.eup %8419  ;;  %v12290_v24 = vpop.f32.mrb[64].mxu0  ;;  %v5552_v48 = vmul.f32 0.5, %v12243_v4  ;;  %8439 = verf.f32 %v5766_v30 }
 0x4c8   : > { %6541 = vst [vmem:[%s9278_s26 + $0x60] sm:$0xff] %v6341_v55  ;;  %v6342_v58 = vmul.f32 %v6142_v32, %v5542_v25  ;;  %v8422_v40 = vpop.eup %8421  ;;  %v6149_v11 = vadd.f32 1.0, %v8420_v23  ;;  %v12296_v9 = vpop.f32.mrb[64].mxu1  ;;  %v5557_v25 = vmul.f32 0.5, %v12249_v29  ;;  %8441 = verf.f32 %v5768_v18 }
 0x4c9   : > { %6543 = vst [vmem:[%s9278_s26 + $0x70] sm:$0xff] %v6343_v56  ;;  %v6344_v27 = vmul.f32 %v6144_v19, %v5544_v49  ;;  %v12298_v39 = vpop.f32.mrb[65].mxu0  ;;  %v8424_v15 = vpop.eup %8423  ;;  %v6151_v14 = vadd.f32 1.0, %v8422_v40  ;;  %v5559_v2 = vmul.f32 0.5, %v12252_v59  ;;  %v5773_v20 = vmul.f32 0.70710677, %v12316_v53 }
 0x4ca   : > { %6542 = vst [vmem:[%s9278_s26 + $0x68] sm:$0xff] %v6342_v58  ;;  %v12303_v43 = vpop.f32.mrb[65].mxu1  ;;  %v12305_v36 = vpop.f32.mrb[66].mxu0  ;;  %v6349_v16 = vmul.f32 %v6149_v11, %v5549_v47  ;;  %v6150_v0 = vadd.f32 1.0, %v8424_v15  ;;  %v5558_v47 = vmul.f32 0.5, %v12255_v62  ;;  %v12333_v54 = vadd.f32 %v12267_v8, %v12223_v52 }
 0x4cb   : > { %v8426_v17 = vpop.eup %8425  ;;  %6544 = vst [vmem:[%s9278_s26 + $0x78] sm:$0xff] %v6344_v27  ;;  %v12310_v45 = vpop.f32.mrb[66].mxu1  ;;  %v6351_v37 = vmul.f32 %v6151_v14, %v5551_v42  ;;  %v5775_v38 = vmul.f32 0.70710677, %v12323_v12  ;;  %8443 = verf.f32 %v5773_v20  ;;  %v12338_v34 = vadd.f32 %v12271_v5, %v12225_v35 }
 0x4cc   : > { %v12312_v4 = vpop.f32.mrb[67].mxu0  ;;  %v8428_v33 = vpop.eup %8427  ;;  %v6152_v13 = vadd.f32 1.0, %v8426_v17  ;;  %6549 = vst [vmem:[%s9278_s26 + $0xa0] sm:$0xff] %v6349_v16  ;;  %v6350_v29 = vmul.f32 %v6150_v0, %v5550_v1  ;;  %v5560_v62 = vmul.f32 0.5, %v12259_v28  ;;  %v5774_v32 = vmul.f32 0.70710677, %v12333_v54 }
 0x4cd   : > { %v12318_v49 = vpop.f32.mrb[67].mxu1  ;;  %v8430_v60 = vpop.eup %8429  ;;  %v6157_v6 = vadd.f32 1.0, %v8428_v33  ;;  %6551 = vst [vmem:[%s9278_s26 + $0xb0] sm:$0xff] %v6351_v37  ;;  %8445 = verf.f32 %v5775_v38  ;;  %v5565_v42 = vmul.f32 0.5, %v12275_v21  ;;  %v5776_v5 = vmul.f32 0.70710677, %v12338_v34 }
 0x4ce   : > { %v6352_v61 = vmul.f32 %v6152_v13, %v5552_v48  ;;  %v6159_v51 = vadd.f32 1.0, %v8430_v60  ;;  %v8432_v46 = vpop.eup %8431  ;;  %6550 = vst [vmem:[%s9278_s26 + $0xa8] sm:$0xff] %v6350_v29  ;;  %v7756_v7 = vadd.f32 %v12290_v24, %v12219_v63  ;;  %8447 = verf.f32 %v5774_v32 }
 0x4cf   : > { %v6357_v26 = vmul.f32 %v6157_v6, %v5557_v25  ;;  %v8434_v41 = vpop.eup %8433  ;;  %v6158_v59 = vadd.f32 1.0, %v8432_v46  ;;  %v12340_v50 = vpop.f32.mrb[68].mxu0  ;;  %v12360_v44 = vadd.f32 %v12296_v9, %v12221_v3  ;;  %v12364_v21 = vadd.f32 %v12298_v39, %v12223_v52 }
 0x4d0   : > { %6552 = vst [vmem:[%s9278_s26 + $0xb8] sm:$0xff] %v6352_v61  ;;  %v6359_v31 = vmul.f32 %v6159_v51, %v5559_v2  ;;  %v6160_v55 = vadd.f32 1.0, %v8434_v41  ;;  %v12345_v8 = vpop.f32.mrb[68].mxu1  ;;  %v12347_v56 = vpop.f32.mrb[69].mxu0  ;;  %v5567_v15 = vmul.f32 0.5, %v12279_v57  ;;  %8449 = verf.f32 %v5776_v5 }
 0x4d1   : > { %6557 = vst [vmem:[%s9278_s26 + $0xe0] sm:$0xff] %v6357_v26  ;;  %v6358_v19 = vmul.f32 %v6158_v59, %v5558_v47  ;;  %v12354_v23 = vpop.f32.mrb[69].mxu1  ;;  %v12356_v28 = vpop.f32.mrb[70].mxu0  ;;  %v5781_v14 = vmul.f32 0.70710677, %v7756_v7  ;;  %v5566_v30 = vmul.f32 0.5, %v12288_v22  ;;  %v12381_v57 = vadd.f32 %v12303_v43, %v12225_v35 }
 0x4d2   : > { %6559 = vst [vmem:[%s9278_s26 + $0xf0] sm:$0xff] %v6359_v31  ;;  %v8436_v58 = vpop.eup %8435  ;;  %v6360_v1 = vmul.f32 %v6160_v55, %v5560_v62  ;;  %v12366_v40 = vpop.f32.mrb[70].mxu1  ;;  %v5568_v39 = vmul.f32 0.5, %v12294_v10  ;;  %v5783_v17 = vmul.f32 0.70710677, %v12360_v44  ;;  %v12385_v22 = vadd.f32 %v12305_v36, %v12219_v63 }
 0x4d3   : > { %v12368_v27 = vpop.f32.mrb[71].mxu0  ;;  %v8438_v24 = vpop.eup %8437  ;;  %6558 = vst [vmem:[%s9278_s26 + $0xe8] sm:$0xff] %v6358_v19  ;;  %v6165_v11 = vadd.f32 1.0, %v8436_v58  ;;  %8451 = verf.f32 %v5781_v14  ;;  %v5782_v25 = vmul.f32 0.70710677, %v12364_v21  ;;  %v5573_v13 = vmul.f32 0.5, %v12316_v53 }
 0x4d4   : > { %v12372_v48 = vpop.f32.mrb[71].mxu1  ;;  %6560 = vst [vmem:[%s9278_s26 + $0xf8] sm:$0xff] %v6360_v1  ;;  %v6167_v9 = vadd.f32 1.0, %v8438_v24  ;;  %v8440_v16 = vpop.eup %8439  ;;  %8453 = verf.f32 %v5783_v17  ;;  %v5784_v60 = vmul.f32 0.70710677, %v12381_v57  ;;  %v5575_v6 = vmul.f32 0.5, %v12323_v12 }
 0x4d5   : > { %v6365_v0 = vmul.f32 %v6165_v11, %v5565_v42  ;;  %v8442_v18 = vpop.eup %8441  ;;  %v6166_v37 = vadd.f32 1.0, %v8440_v16  ;;  %8455 = verf.f32 %v5782_v25  ;;  %v5789_v61 = vmul.f32 0.70710677, %v12385_v22 }
 0x4d6   : > { %v6367_v33 = vmul.f32 %v6167_v9, %v5567_v15  ;;  %v6168_v10 = vadd.f32 1.0, %v8442_v18  ;;  %v12397_v36 = vadd.f32 %v12310_v45, %v12221_v3  ;;  %v8444_v53 = vpop.eup %8443  ;;  %8457 = verf.f32 %v5784_v60 }
 0x4d7   : > { %6565 = vst [vmem:[%s9278_s26 + $0x120] sm:$0xff] %v6365_v0  ;;  %v12390_v29 = vpop.f32.mrb[72].mxu0  ;;  %v6366_v43 = vmul.f32 %v6166_v37, %v5566_v30  ;;  %v12399_v2 = vpop.f32.mrb[72].mxu1  ;;  %v12405_v46 = vadd.f32 %v12312_v4, %v12223_v52  ;;  %v12409_v12 = vadd.f32 %v12318_v49, %v12225_v35  ;;  %v6173_v38 = vadd.f32 1.0, %v8444_v53 }
 0x4d8   : > { %6567 = vst [vmem:[%s9278_s26 + $0x130] sm:$0xff] %v6367_v33  ;;  %v12401_v51 = vpop.f32.mrb[73].mxu0  ;;  %v6368_v20 = vmul.f32 %v6168_v10, %v5568_v39  ;;  %v12411_v26 = vpop.f32.mrb[73].mxu1  ;;  %v5574_v41 = vmul.f32 0.5, %v12333_v54  ;;  %8459 = verf.f32 %v5789_v61  ;;  %v5791_v31 = vmul.f32 0.70710677, %v12397_v36 }
 0x4d9   : > { %v12413_v45 = vpop.f32.mrb[74].mxu0  ;;  %v8446_v47 = vpop.eup %8445  ;;  %6566 = vst [vmem:[%s9278_s26 + $0x128] sm:$0xff] %v6366_v43  ;;  %v5576_v62 = vmul.f32 0.5, %v12338_v34  ;;  %v5581_v55 = vmul.f32 0.5, %v7756_v7  ;;  %v5790_v32 = vmul.f32 0.70710677, %v12405_v46  ;;  %v6373_v54 = vmul.f32 %v6173_v38, %v5573_v13 }
 0x4da   : > { %v12418_v59 = vpop.f32.mrb[74].mxu1  ;;  %v12420_v4 = vpop.f32.mrb[75].mxu0  ;;  %6568 = vst [vmem:[%s9278_s26 + $0x138] sm:$0xff] %v6368_v20  ;;  %v6175_v49 = vadd.f32 1.0, %v8446_v47  ;;  %8461 = verf.f32 %v5791_v31  ;;  %v5792_v5 = vmul.f32 0.70710677, %v12409_v12  ;;  %v12430_v58 = vadd.f32 %v12340_v50, %v12219_v63 }
 0x4db   : > { %v12425_v19 = vpop.f32.mrb[75].mxu1  ;;  %v8448_v42 = vpop.eup %8447  ;;  %8463 = verf.f32 %v5790_v32  ;;  %v12434_v34 = vadd.f32 %v12345_v8, %v12221_v3  ;;  %6573 = vst [vmem:[%s9278_s26 + $0x160] sm:$0xff] %v6373_v54  ;;  %v5583_v15 = vmul.f32 0.5, %v12360_v44  ;;  %v5582_v30 = vmul.f32 0.5, %v12364_v21 }
 0x4dc   : > { %v8450_v1 = vpop.eup %8449  ;;  %v6375_v24 = vmul.f32 %v6175_v49, %v5575_v6  ;;  %v6174_v11 = vadd.f32 1.0, %v8448_v42  ;;  %8465 = verf.f32 %v5792_v5  ;;  %v5797_v14 = vmul.f32 0.70710677, %v12430_v58 }
 0x4dd   : > { %v6176_v7 = vadd.f32 1.0, %v8450_v1  ;;  %v8452_v9 = vpop.eup %8451  ;;  %v5799_v39 = vmul.f32 0.70710677, %v12434_v34  ;;  %v12444_v17 = vadd.f32 %v12347_v56, %v12223_v52  ;;  %v12450_v25 = vadd.f32 %v12354_v23, %v12225_v35 }
 0x4de   : > { %6575 = vst [vmem:[%s9278_s26 + $0x170] sm:$0xff] %v6375_v24  ;;  %v6374_v50 = vmul.f32 %v6174_v11, %v5574_v41  ;;  %v8454_v16 = vpop.eup %8453  ;;  %v6181_v0 = vadd.f32 1.0, %v8452_v9  ;;  %8467 = verf.f32 %v5797_v14  ;;  %v5584_v56 = vmul.f32 0.5, %v12381_v57 }
 0x4df   : > { %v12446_v8 = vpop.f32.mrb[76].mxu0  ;;  %v6376_v44 = vmul.f32 %v6176_v7, %v5576_v62  ;;  %v12452_v18 = vpop.f32.mrb[76].mxu1  ;;  %v6183_v37 = vadd.f32 1.0, %v8454_v16  ;;  %8469 = verf.f32 %v5799_v39  ;;  %v5798_v10 = vmul.f32 0.70710677, %v12444_v17 }
 0x4e0   : > { %v12454_v21 = vpop.f32.mrb[77].mxu0  ;;  %v8456_v33 = vpop.eup %8455  ;;  %6574 = vst [vmem:[%s9278_s26 + $0x168] sm:$0xff] %v6374_v50  ;;  %v6381_v23 = vmul.f32 %v6181_v0, %v5581_v55  ;;  %v5589_v6 = vmul.f32 0.5, %v12385_v22  ;;  %v5800_v61 = vmul.f32 0.70710677, %v12450_v25  ;;  %v12472_v38 = vadd.f32 %v12356_v28, %v12219_v63 }
 0x4e1   : > { %v12459_v13 = vpop.f32.mrb[77].mxu1  ;;  %v12461_v60 = vpop.f32.mrb[78].mxu0  ;;  %6576 = vst [vmem:[%s9278_s26 + $0x178] sm:$0xff] %v6376_v44  ;;  %v6182_v43 = vadd.f32 1.0, %v8456_v33  ;;  %v6383_v47 = vmul.f32 %v6183_v37, %v5583_v15  ;;  %8471 = verf.f32 %v5798_v10  ;;  %v12476_v41 = vadd.f32 %v12366_v40, %v12221_v3 }
 0x4e2   : > { %v12466_v53 = vpop.f32.mrb[78].mxu1  ;;  %v12468_v20 = vpop.f32.mrb[79].mxu0  ;;  %6581 = vst [vmem:[%s9278_s26 + $0x1a0] sm:$0xff] %v6381_v23  ;;  %8473 = verf.f32 %v5800_v61  ;;  %v12483_v55 = vadd.f32 %v12368_v27, %v12223_v52  ;;  %v5591_v28 = vmul.f32 0.5, %v12397_v36  ;;  %v5590_v42 = vmul.f32 0.5, %v12405_v46 }
 0x4e3   : > { %v8458_v57 = vpop.eup %8457  ;;  %v12478_v22 = vpop.f32.mrb[79].mxu1  ;;  %v6382_v49 = vmul.f32 %v6182_v43, %v5582_v30  ;;  %6583 = vst [vmem:[%s9278_s26 + $0x1b0] sm:$0xff] %v6383_v47  ;;  %v5805_v40 = vmul.f32 0.70710677, %v12472_v38  ;;  %v5592_v1 = vmul.f32 0.5, %v12409_v12  ;;  %v12495_v36 = vadd.f32 %v12372_v48, %v12225_v35 }
 0x4e4   : > { %v8460_v31 = vpop.eup %8459  ;;  %v6184_v62 = vadd.f32 1.0, %v8458_v57  ;;  %v5807_v24 = vmul.f32 0.70710677, %v12476_v41  ;;  %v5806_v27 = vmul.f32 0.70710677, %v12483_v55  ;;  %v12502_v12 = vadd.f32 %v12390_v29, %v12219_v63 }
 0x4e5   : > { %v6189_v32 = vadd.f32 1.0, %v8460_v31  ;;  %v8462_v54 = vpop.eup %8461  ;;  %6582 = vst [vmem:[%s9278_s26 + $0x1a8] sm:$0xff] %v6382_v49  ;;  %8475 = verf.f32 %v5805_v40  ;;  %v12506_v50 = vadd.f32 %v12399_v2, %v12221_v3  ;;  %v5597_v44 = vmul.f32 0.5, %v12430_v58 }
 0x4e6   : > { %v6384_v5 = vmul.f32 %v6184_v62, %v5584_v56  ;;  %v8464_v11 = vpop.eup %8463  ;;  %v6191_v15 = vadd.f32 1.0, %v8462_v54  ;;  %8477 = verf.f32 %v5807_v24  ;;  %v5599_v2 = vmul.f32 0.5, %v12434_v34 }
 0x4e7   : > { %v6389_v7 = vmul.f32 %v6189_v32, %v5589_v6  ;;  %v12497_v46 = vpop.f32.mrb[80].mxu0  ;;  %v8466_v14 = vpop.eup %8465  ;;  %v6190_v9 = vadd.f32 1.0, %v8464_v11  ;;  %8479 = verf.f32 %v5806_v27  ;;  %v5808_v56 = vmul.f32 0.70710677, %v12495_v36 }
 0x4e8   : > { %6584 = vst [vmem:[%s9278_s26 + $0x1b8] sm:$0xff] %v6384_v5  ;;  %v12508_v30 = vpop.f32.mrb[80].mxu1  ;;  %v12510_v39 = vpop.f32.mrb[81].mxu0  ;;  %v6391_v48 = vmul.f32 %v6191_v15, %v5591_v28  ;;  %v6192_v16 = vadd.f32 1.0, %v8466_v14  ;;  %v5813_v10 = vmul.f32 0.70710677, %v12502_v12  ;;  %v12533_v49 = vadd.f32 %v12401_v51, %v12223_v52 }
 0x4e9   : > { %6589 = vst [vmem:[%s9278_s26 + $0x1e0] sm:$0xff] %v6389_v7  ;;  %v12514_v0 = vpop.f32.mrb[81].mxu1  ;;  %v12516_v29 = vpop.f32.mrb[82].mxu0  ;;  %v6390_v37 = vmul.f32 %v6190_v9, %v5590_v42  ;;  %v5598_v61 = vmul.f32 0.5, %v12444_v17  ;;  %v5815_v57 = vmul.f32 0.70710677, %v12506_v50  ;;  %8481 = verf.f32 %v5808_v56 }
 0x4ea   : > { %v8468_v33 = vpop.eup %8467  ;;  %v12521_v23 = vpop.f32.mrb[82].mxu1  ;;  %6591 = vst [vmem:[%s9278_s26 + $0x1f0] sm:$0xff] %v6391_v48  ;;  %v6392_v58 = vmul.f32 %v6192_v16, %v5592_v1  ;;  %v12537_v62 = vadd.f32 %v12411_v26, %v12225_v35  ;;  %8483 = verf.f32 %v5813_v10  ;;  %v12542_v28 = vadd.f32 %v12413_v45, %v12219_v63 }
 0x4eb   : > { %v8470_v43 = vpop.eup %8469  ;;  %v6197_v6 = vadd.f32 1.0, %v8468_v33  ;;  %v12526_v47 = vpop.f32.mrb[83].mxu0  ;;  %6590 = vst [vmem:[%s9278_s26 + $0x1e8] sm:$0xff] %v6390_v37  ;;  %v12546_v42 = vadd.f32 %v12418_v59, %v12221_v3  ;;  %v5600_v5 = vmul.f32 0.5, %v12450_v25  ;;  %8485 = verf.f32 %v5815_v57 }
 0x4ec   : > { %v12528_v31 = vpop.f32.mrb[83].mxu1  ;;  %v6199_v34 = vadd.f32 1.0, %v8470_v43  ;;  %v8472_v32 = vpop.eup %8471  ;;  %6592 = vst [vmem:[%s9278_s26 + $0x1f8] sm:$0xff] %v6392_v58  ;;  %v5605_v1 = vmul.f32 0.5, %v12472_v38  ;;  %v5814_v24 = vmul.f32 0.70710677, %v12533_v49  ;;  %v12564_v48 = vadd.f32 %v12420_v4, %v12223_v52 }
 0x4ed   : > { %v6397_v17 = vmul.f32 %v6197_v6, %v5597_v44  ;;  %v8474_v40 = vpop.eup %8473  ;;  %v6198_v54 = vadd.f32 1.0, %v8472_v32  ;;  %v5816_v27 = vmul.f32 0.70710677, %v12537_v62  ;;  %v5607_v59 = vmul.f32 0.5, %v12476_v41 }
 0x4ee   : > { %v6399_v51 = vmul.f32 %v6199_v34, %v5599_v2  ;;  %v6200_v26 = vadd.f32 1.0, %v8474_v40  ;;  %v5606_v11 = vmul.f32 0.5, %v12483_v55  ;;  %v5821_v7 = vmul.f32 0.70710677, %v12542_v28 }
 0x4ef   : > { %6597 = vst [vmem:[%s9278_s26 + $0x220] sm:$0xff] %v6397_v17  ;;  %v6398_v45 = vmul.f32 %v6198_v54, %v5598_v61  ;;  %v12557_v15 = vpop.f32.mrb[84].mxu0  ;;  %v12559_v25 = vpop.f32.mrb[84].mxu1  ;;  %8487 = verf.f32 %v5814_v24  ;;  %v5823_v9 = vmul.f32 0.70710677, %v12546_v42  ;;  %v12573_v33 = vadd.f32 %v12425_v19, %v12225_v35 }
 0x4f0   : > { %6599 = vst [vmem:[%s9278_s26 + $0x230] sm:$0xff] %v6399_v51  ;;  %v8476_v14 = vpop.eup %8475  ;;  %v6400_v38 = vmul.f32 %v6200_v26, %v5600_v5  ;;  %v12566_v16 = vpop.f32.mrb[85].mxu0  ;;  %8489 = verf.f32 %v5816_v27  ;;  %v12577_v37 = vadd.f32 %v12446_v8, %v12219_v63  ;;  %v5608_v43 = vmul.f32 0.5, %v12495_v36 }
 0x4f1   : > { %v12568_v41 = vpop.f32.mrb[85].mxu1  ;;  %v8478_v55 = vpop.eup %8477  ;;  %6598 = vst [vmem:[%s9278_s26 + $0x228] sm:$0xff] %v6398_v45  ;;  %v6205_v44 = vadd.f32 1.0, %v8476_v14  ;;  %8491 = verf.f32 %v5821_v7  ;;  %v5822_v58 = vmul.f32 0.70710677, %v12564_v48  ;;  %v5613_v57 = vmul.f32 0.5, %v12502_v12 }
 0x4f2   : > { %v12579_v2 = vpop.f32.mrb[86].mxu0  ;;  %v12581_v4 = vpop.f32.mrb[86].mxu1  ;;  %6600 = vst [vmem:[%s9278_s26 + $0x238] sm:$0xff] %v6400_v38  ;;  %v6207_v10 = vadd.f32 1.0, %v8478_v55  ;;  %8493 = verf.f32 %v5823_v9  ;;  %v5615_v32 = vmul.f32 0.5, %v12506_v50  ;;  %v12597_v54 = vadd.f32 %v12452_v18, %v12221_v3 }
 0x4f3   : > { %v8480_v56 = vpop.eup %8479  ;;  %v12586_v6 = vpop.f32.mrb[87].mxu0  ;;  %v6405_v8 = vmul.f32 %v6205_v44, %v5605_v1  ;;  %8495 = verf.f32 %v5822_v58  ;;  %v5824_v36 = vmul.f32 0.70710677, %v12573_v33  ;;  %v5829_v51 = vmul.f32 0.70710677, %v12577_v37 }
 0x4f4   : > { %v12588_v19 = vpop.f32.mrb[87].mxu1  ;;  %v6206_v61 = vadd.f32 1.0, %v8480_v56  ;;  %v6407_v34 = vmul.f32 %v6207_v10, %v5607_v59  ;;  %v8482_v17 = vpop.eup %8481  ;;  %v12601_v12 = vadd.f32 %v12454_v21, %v12223_v52  ;;  %v12606_v26 = vadd.f32 %v12459_v13, %v12225_v35 }
 0x4f5   : > { %6605 = vst [vmem:[%s9278_s26 + $0x260] sm:$0xff] %v6405_v8  ;;  %v8484_v5 = vpop.eup %8483  ;;  %v6208_v50 = vadd.f32 1.0, %v8482_v17  ;;  %8497 = verf.f32 %v5824_v36  ;;  %v12610_v1 = vadd.f32 %v12461_v60, %v12219_v63  ;;  %v5614_v21 = vmul.f32 0.5, %v12533_v49 }
 0x4f6   : > { %v6406_v40 = vmul.f32 %v6206_v61, %v5606_v11  ;;  %6607 = vst [vmem:[%s9278_s26 + $0x270] sm:$0xff] %v6407_v34  ;;  %v8486_v18 = vpop.eup %8485  ;;  %v6213_v27 = vadd.f32 1.0, %v8484_v5  ;;  %8499 = verf.f32 %v5829_v51  ;;  %v5831_v45 = vmul.f32 0.70710677, %v12597_v54 }
 0x4f7   : > { %v12612_v24 = vpop.f32.mrb[88].mxu0  ;;  %v12617_v59 = vpop.f32.mrb[88].mxu1  ;;  %v6408_v13 = vmul.f32 %v6208_v50, %v5608_v43  ;;  %v6215_v7 = vadd.f32 1.0, %v8486_v18  ;;  %v5616_v60 = vmul.f32 0.5, %v12537_v62  ;;  %v5830_v14 = vmul.f32 0.70710677, %v12601_v12 }
 0x4f8   : > { %6606 = vst [vmem:[%s9278_s26 + $0x268] sm:$0xff] %v6406_v40  ;;  %v12619_v11 = vpop.f32.mrb[89].mxu0  ;;  %v12623_v38 = vpop.f32.mrb[89].mxu1  ;;  %v6413_v49 = vmul.f32 %v6213_v27, %v5613_v57  ;;  %v5621_v55 = vmul.f32 0.5, %v12542_v28  ;;  %8501 = verf.f32 %v5831_v45  ;;  %v5832_v44 = vmul.f32 0.70710677, %v12606_v26 }
 0x4f9   : > { %v12625_v9 = vpop.f32.mrb[90].mxu0  ;;  %v12629_v56 = vpop.f32.mrb[90].mxu1  ;;  %6608 = vst [vmem:[%s9278_s26 + $0x278] sm:$0xff] %v6408_v13  ;;  %v6415_v62 = vmul.f32 %v6215_v7, %v5615_v32  ;;  %v5623_v58 = vmul.f32 0.5, %v12546_v42  ;;  %8503 = verf.f32 %v5830_v14  ;;  %v5837_v8 = vmul.f32 0.70710677, %v12610_v1 }
 0x4fa   : > { %v12631_v10 = vpop.f32.mrb[91].mxu0  ;;  %v8488_v43 = vpop.eup %8487  ;;  %6613 = vst [vmem:[%s9278_s26 + $0x2a0] sm:$0xff] %v6413_v49  ;;  %8505 = verf.f32 %v5832_v44  ;;  %v12641_v34 = vadd.f32 %v12466_v53, %v12221_v3  ;;  %v12645_v36 = vadd.f32 %v12468_v20, %v12223_v52  ;;  %v5622_v17 = vmul.f32 0.5, %v12564_v48 }
 0x4fb   : > { %v12636_v61 = vpop.f32.mrb[91].mxu1  ;;  %v8490_v57 = vpop.eup %8489  ;;  %v6214_v28 = vadd.f32 1.0, %v8488_v43  ;;  %6615 = vst [vmem:[%s9278_s26 + $0x2b0] sm:$0xff] %v6415_v62  ;;  %8507 = verf.f32 %v5837_v8  ;;  %v12651_v40 = vadd.f32 %v12478_v22, %v12225_v35  ;;  %v12656_v20 = vadd.f32 %v12497_v46, %v12219_v63 }
 0x4fc   : > { %v8492_v32 = vpop.eup %8491  ;;  %v6216_v42 = vadd.f32 1.0, %v8490_v57  ;;  %v5839_v53 = vmul.f32 0.70710677, %v12641_v34  ;;  %v5624_v48 = vmul.f32 0.5, %v12573_v33  ;;  %v5838_v13 = vmul.f32 0.70710677, %v12645_v36 }
 0x4fd   : > { %v8494_v51 = vpop.eup %8493  ;;  %v6414_v5 = vmul.f32 %v6214_v28, %v5614_v21  ;;  %v6221_v50 = vadd.f32 1.0, %v8492_v32  ;;  %v5629_v14 = vmul.f32 0.5, %v12577_v37  ;;  %v5631_v33 = vmul.f32 0.5, %v12597_v54 }
 0x4fe   : > { %v8496_v18 = vpop.eup %8495  ;;  %v6416_v27 = vmul.f32 %v6216_v42, %v5616_v60  ;;  %v6223_v45 = vadd.f32 1.0, %v8494_v51  ;;  %8509 = verf.f32 %v5839_v53  ;;  %v5840_v43 = vmul.f32 0.70710677, %v12651_v40 }
 0x4ff   : > { %v12660_v7 = vpop.f32.mrb[92].mxu0  ;;  %6614 = vst [vmem:[%s9278_s26 + $0x2a8] sm:$0xff] %v6414_v5  ;;  %v6421_v22 = vmul.f32 %v6221_v50, %v5621_v55  ;;  %v6222_v21 = vadd.f32 1.0, %v8496_v18  ;;  %v12664_v49 = vpop.f32.mrb[92].mxu1  ;;  %8511 = verf.f32 %v5838_v13  ;;  %v5845_v28 = vmul.f32 0.70710677, %v12656_v20 }
 0x500   : > { %v12666_v46 = vpop.f32.mrb[93].mxu0  ;;  %v8498_v44 = vpop.eup %8497  ;;  %6616 = vst [vmem:[%s9278_s26 + $0x2b8] sm:$0xff] %v6416_v27  ;;  %v6423_v60 = vmul.f32 %v6223_v45, %v5623_v58  ;;  %v12679_v32 = vadd.f32 %v12508_v30, %v12221_v3  ;;  %8513 = verf.f32 %v5840_v43  ;;  %v12688_v51 = vadd.f32 %v12510_v39, %v12223_v52 }
 0x501   : > { %v12671_v62 = vpop.f32.mrb[93].mxu1  ;;  %v12673_v55 = vpop.f32.mrb[94].mxu0  ;;  %6621 = vst [vmem:[%s9278_s26 + $0x2e0] sm:$0xff] %v6421_v22  ;;  %v6422_v8 = vmul.f32 %v6222_v21, %v5622_v17  ;;  %v6224_v57 = vadd.f32 1.0, %v8498_v44  ;;  %v12692_v17 = vadd.f32 %v12514_v0, %v12225_v35  ;;  %v5630_v53 = vmul.f32 0.5, %v12601_v12 }
 0x502   : > { %v8500_v37 = vpop.eup %8499  ;;  %v12681_v58 = vpop.f32.mrb[94].mxu1  ;;  %6623 = vst [vmem:[%s9278_s26 + $0x2f0] sm:$0xff] %v6423_v60  ;;  %8515 = verf.f32 %v5845_v28  ;;  %v5847_v18 = vmul.f32 0.70710677, %v12679_v32  ;;  %v5632_v39 = vmul.f32 0.5, %v12606_v26  ;;  %v5637_v44 = vmul.f32 0.5, %v12610_v1 }
 0x503   : > { %v12683_v54 = vpop.f32.mrb[95].mxu0  ;;  %v6229_v42 = vadd.f32 1.0, %v8500_v37  ;;  %v12694_v5 = vpop.f32.mrb[95].mxu1  ;;  %6622 = vst [vmem:[%s9278_s26 + $0x2e8] sm:$0xff] %v6422_v8  ;;  %v6424_v50 = vmul.f32 %v6224_v57, %v5624_v48  ;;  %v5846_v22 = vmul.f32 0.70710677, %v12688_v51  ;;  %v12707_v26 = vadd.f32 %v12516_v29, %v12219_v63 }
 0x504   : > { %v8502_v30 = vpop.eup %8501  ;;  %8517 = verf.f32 %v5847_v18  ;;  %v5848_v48 = vmul.f32 0.70710677, %v12692_v17  ;;  %v12713_v1 = vadd.f32 %v12521_v23, %v12221_v3  ;;  %v12723_v29 = vadd.f32 %v12526_v47, %v12223_v52 }
 0x505   : > { %v8504_v27 = vpop.eup %8503  ;;  %v6429_v45 = vmul.f32 %v6229_v42, %v5629_v14  ;;  %v6231_v13 = vadd.f32 1.0, %v8502_v30  ;;  %6624 = vst [vmem:[%s9278_s26 + $0x2f8] sm:$0xff] %v6424_v50  ;;  %8519 = verf.f32 %v5846_v22  ;;  %v5853_v42 = vmul.f32 0.70710677, %v12707_v26 }
 0x506   : > { %v8506_v0 = vpop.eup %8505  ;;  %v6230_v21 = vadd.f32 1.0, %v8504_v27  ;;  %8521 = verf.f32 %v5848_v48  ;;  %v5639_v18 = vmul.f32 0.5, %v12641_v34  ;;  %v5855_v27 = vmul.f32 0.70710677, %v12713_v1 }
 0x507   : > { %v8508_v12 = vpop.eup %8507  ;;  %6629 = vst [vmem:[%s9278_s26 + $0x320] sm:$0xff] %v6429_v45  ;;  %v6431_v60 = vmul.f32 %v6231_v13, %v5631_v33  ;;  %v6232_v43 = vadd.f32 1.0, %v8506_v0  ;;  %v12709_v14 = vpop.f32.mrb[96].mxu0  ;;  %v12734_v45 = vadd.f32 %v12528_v31, %v12225_v35  ;;  %v5638_v0 = vmul.f32 0.5, %v12645_v36 }
 0x508   : > { %v6430_v37 = vmul.f32 %v6230_v21, %v5630_v53  ;;  %v6237_v8 = vadd.f32 1.0, %v8508_v12  ;;  %v12715_v57 = vpop.f32.mrb[96].mxu1  ;;  %v12717_v28 = vpop.f32.mrb[97].mxu0  ;;  %8523 = verf.f32 %v5853_v42  ;;  %v5854_v21 = vmul.f32 0.70710677, %v12723_v29 }
 0x509   : > { %6631 = vst [vmem:[%s9278_s26 + $0x330] sm:$0xff] %v6431_v60  ;;  %v6432_v33 = vmul.f32 %v6232_v43, %v5632_v39  ;;  %v12725_v30 = vpop.f32.mrb[97].mxu1  ;;  %v12727_v50 = vpop.f32.mrb[98].mxu0  ;;  %v5640_v31 = vmul.f32 0.5, %v12651_v40  ;;  %8525 = verf.f32 %v5855_v27  ;;  %v5856_v48 = vmul.f32 0.70710677, %v12734_v45 }
 0x50a   : > { %v8510_v23 = vpop.eup %8509  ;;  %6630 = vst [vmem:[%s9278_s26 + $0x328] sm:$0xff] %v6430_v37  ;;  %v6437_v53 = vmul.f32 %v6237_v8, %v5637_v44  ;;  %v12736_v13 = vpop.f32.mrb[98].mxu1  ;;  %8527 = verf.f32 %v5854_v21  ;;  %v12750_v36 = vadd.f32 %v12557_v15, %v12219_v63  ;;  %v12754_v43 = vadd.f32 %v12559_v25, %v12221_v3 }
 0x50b   : > { %v12738_v47 = vpop.f32.mrb[99].mxu0  ;;  %v8512_v39 = vpop.eup %8511  ;;  %6632 = vst [vmem:[%s9278_s26 + $0x338] sm:$0xff] %v6432_v33  ;;  %v6239_v22 = vadd.f32 1.0, %v8510_v23  ;;  %8529 = verf.f32 %v5856_v48  ;;  %v12758_v40 = vadd.f32 %v12566_v16, %v12223_v52  ;;  %v5645_v42 = vmul.f32 0.5, %v12656_v20 }
 0x50c   : > { %v12743_v44 = vpop.f32.mrb[99].mxu1  ;;  %6637 = vst [vmem:[%s9278_s26 + $0x360] sm:$0xff] %v6437_v53  ;;  %v6238_v34 = vadd.f32 1.0, %v8512_v39  ;;  %v8514_v12 = vpop.eup %8513  ;;  %v5647_v53 = vmul.f32 0.5, %v12679_v32  ;;  %v5861_v15 = vmul.f32 0.70710677, %v12750_v36 }
 0x50d   : > { %v6439_v60 = vmul.f32 %v6239_v22, %v5639_v18  ;;  %v8516_v37 = vpop.eup %8515  ;;  %v6240_v33 = vadd.f32 1.0, %v8514_v12  ;;  %v5646_v39 = vmul.f32 0.5, %v12688_v51  ;;  %v5863_v22 = vmul.f32 0.70710677, %v12754_v43 }
 0x50e   : > { %v6438_v8 = vmul.f32 %v6238_v34, %v5638_v0  ;;  %v6245_v23 = vadd.f32 1.0, %v8516_v37  ;;  %v8518_v25 = vpop.eup %8517  ;;  %v5862_v16 = vmul.f32 0.70710677, %v12758_v40  ;;  %8531 = verf.f32 %v5861_v15 }
 0x50f   : > { %6639 = vst [vmem:[%s9278_s26 + $0x370] sm:$0xff] %v6439_v60  ;;  %v12764_v18 = vpop.f32.mrb[100].mxu0  ;;  %v6440_v27 = vmul.f32 %v6240_v33, %v5640_v31  ;;  %v12770_v0 = vpop.f32.mrb[100].mxu1  ;;  %v6247_v32 = vadd.f32 1.0, %v8518_v25  ;;  %v12774_v34 = vadd.f32 %v12568_v41, %v12225_v35  ;;  %8533 = verf.f32 %v5863_v22 }
 0x510   : > { %6638 = vst [vmem:[%s9278_s26 + $0x368] sm:$0xff] %v6438_v8  ;;  %v8520_v20 = vpop.eup %8519  ;;  %v6445_v21 = vmul.f32 %v6245_v23, %v5645_v42  ;;  %v12776_v48 = vpop.f32.mrb[101].mxu0  ;;  %v12783_v60 = vadd.f32 %v12579_v2, %v12219_v63  ;;  %v12787_v37 = vadd.f32 %v12581_v4, %v12221_v3  ;;  %v5648_v42 = vmul.f32 0.5, %v12692_v17 }
 0x511   : > { %v12778_v31 = vpop.f32.mrb[101].mxu1  ;;  %v8522_v51 = vpop.eup %8521  ;;  %6640 = vst [vmem:[%s9278_s26 + $0x378] sm:$0xff] %v6440_v27  ;;  %v6246_v12 = vadd.f32 1.0, %v8520_v20  ;;  %v6447_v33 = vmul.f32 %v6247_v32, %v5647_v53  ;;  %8535 = verf.f32 %v5862_v16  ;;  %v5653_v2 = vmul.f32 0.5, %v12707_v26 }
 0x512   : > { %v5204_v8 = vpop.f32.mrb[102].mxu0  ;;  %v5526_v41 = vpop.f32.mrb[102].mxu1  ;;  %6645 = vst [vmem:[%s9278_s26 + $0x3a0] sm:$0xff] %v6445_v21  ;;  %v6248_v23 = vadd.f32 1.0, %v8522_v51  ;;  %v5864_v22 = vmul.f32 0.70710677, %v12774_v34  ;;  %v12799_v16 = vadd.f32 %v12586_v6, %v12223_v52  ;;  %v12804_v26 = vadd.f32 %v12588_v19, %v12225_v35 }
 0x513   : > { %v5205_v15 = vpop.f32.mrb[103].mxu0  ;;  %v5527_v25 = vpop.f32.mrb[103].mxu1  ;;  %v6446_v27 = vmul.f32 %v6246_v12, %v5646_v39  ;;  %v5869_v4 = vmul.f32 0.70710677, %v12783_v60  ;;  %6647 = vst [vmem:[%s9278_s26 + $0x3b0] sm:$0xff] %v6447_v33  ;;  %v5655_v53 = vmul.f32 0.5, %v12713_v1  ;;  %v12808_v32 = vadd.f32 %v12612_v24, %v12219_v63 }
 0x514   : > { %v8524_v20 = vpop.eup %8523  ;;  %v6448_v8 = vmul.f32 %v6248_v23, %v5648_v42  ;;  %v5871_v17 = vmul.f32 0.70710677, %v12787_v37  ;;  %8537 = verf.f32 %v5864_v22  ;;  %v5654_v12 = vmul.f32 0.5, %v12723_v29 }
 0x515   : > { %v8526_v21 = vpop.eup %8525  ;;  %6646 = vst [vmem:[%s9278_s26 + $0x3a8] sm:$0xff] %v6446_v27  ;;  %v6253_v39 = vadd.f32 1.0, %v8524_v20  ;;  %8539 = verf.f32 %v5869_v4  ;;  %v5870_v6 = vmul.f32 0.70710677, %v12799_v16  ;;  %v5656_v19 = vmul.f32 0.5, %v12734_v45 }
 0x516   : > { %v8528_v1 = vpop.eup %8527  ;;  %6648 = vst [vmem:[%s9278_s26 + $0x3b8] sm:$0xff] %v6448_v8  ;;  %v6255_v51 = vadd.f32 1.0, %v8526_v21  ;;  %8541 = verf.f32 %v5871_v17  ;;  %v5872_v15 = vmul.f32 0.70710677, %v12804_v26  ;;  %v5661_v29 = vmul.f32 0.5, %v12750_v36 }
 0x517   : > { %v8530_v41 = vpop.eup %8529  ;;  %v6453_v33 = vmul.f32 %v6253_v39, %v5653_v2  ;;  %v6254_v42 = vadd.f32 1.0, %v8528_v1  ;;  %8543 = verf.f32 %v5870_v6  ;;  %v5877_v27 = vmul.f32 0.70710677, %v12808_v32 }
 0x518   : > { %v6455_v23 = vmul.f32 %v6255_v51, %v5655_v53  ;;  %v6256_v24 = vadd.f32 1.0, %v8530_v41  ;;  %v12820_v2 = vadd.f32 %v12617_v59, %v12221_v3  ;;  %v8532_v22 = vpop.eup %8531  ;;  %8545 = verf.f32 %v5872_v15 }
 0x519   : > { %6653 = vst [vmem:[%s9278_s26 + $0x3e0] sm:$0xff] %v6453_v33  ;;  %v6454_v25 = vmul.f32 %v6254_v42, %v5654_v12  ;;  %v12825_v4 = vadd.f32 %v12619_v11, %v12223_v52  ;;  %v12829_v20 = vadd.f32 %v12623_v38, %v12225_v35  ;;  %v8534_v36 = vpop.eup %8533  ;;  %v6261_v8 = vadd.f32 1.0, %v8532_v22 }
 0x51a   : > { %6655 = vst [vmem:[%s9278_s26 + $0x3f0] sm:$0xff] %v6455_v23  ;;  %v6456_v45 = vmul.f32 %v6256_v24, %v5656_v19  ;;  %v5663_v53 = vmul.f32 0.5, %v12754_v43  ;;  %8547 = verf.f32 %v5877_v27  ;;  %v5879_v59 = vmul.f32 0.70710677, %v12820_v2 }
 0x51b   : > { %6654 = vst [vmem:[%s9278_s26 + $0x3e8] sm:$0xff] %v6454_v25  ;;  %v8536_v17 = vpop.eup %8535  ;;  %v6263_v21 = vadd.f32 1.0, %v8534_v36  ;;  %v5662_v39 = vmul.f32 0.5, %v12758_v40  ;;  %v5664_v11 = vmul.f32 0.5, %v12774_v34  ;;  %v5878_v1 = vmul.f32 0.70710677, %v12825_v4 }
 0x51c   : > { %6656 = vst [vmem:[%s9278_s26 + $0x3f8] sm:$0xff] %v6456_v45  ;;  %v6461_v38 = vmul.f32 %v6261_v8, %v5661_v29  ;;  %v6262_v51 = vadd.f32 1.0, %v8536_v17  ;;  %8549 = verf.f32 %v5879_v59  ;;  %v5880_v12 = vmul.f32 0.70710677, %v12829_v20 }
 0x51d   : > { %v6463_v43 = vmul.f32 %v6263_v21, %v5663_v53  ;;  %8551 = verf.f32 %v5878_v1  ;;  %v12841_v6 = vadd.f32 %v12625_v9, %v12219_v63  ;;  %v12845_v40 = vadd.f32 %v12629_v56, %v12221_v3 }
 0x51e   : > { %v8538_v34 = vpop.eup %8537  ;;  %6661 = vst [vmem:[%s9278_s26 + $0x420] sm:$0xff] %v6461_v38  ;;  %v6462_v41 = vmul.f32 %v6262_v51, %v5662_v39  ;;  %8553 = verf.f32 %v5880_v12  ;;  %v12850_v33 = vadd.f32 %v12631_v10, %v12223_v52  ;;  %v12854_v42 = vadd.f32 %v12636_v61, %v12225_v35 }
 0x51f   : > { %v8540_v19 = vpop.eup %8539  ;;  %6663 = vst [vmem:[%s9278_s26 + $0x430] sm:$0xff] %v6463_v43  ;;  %v6264_v9 = vadd.f32 1.0, %v8538_v34  ;;  %v5669_v23 = vmul.f32 0.5, %v12783_v60  ;;  %v5671_v56 = vmul.f32 0.5, %v12787_v37  ;;  %v5885_v24 = vmul.f32 0.70710677, %v12841_v6 }
 0x520   : > { %v8542_v15 = vpop.eup %8541  ;;  %6662 = vst [vmem:[%s9278_s26 + $0x428] sm:$0xff] %v6462_v41  ;;  %v6269_v25 = vadd.f32 1.0, %v8540_v19  ;;  %v5670_v10 = vmul.f32 0.5, %v12799_v16  ;;  %v5887_v29 = vmul.f32 0.70710677, %v12845_v40  ;;  %v5672_v60 = vmul.f32 0.5, %v12804_v26 }
 0x521   : > { %v5886_v61 = vmul.f32 0.70710677, %v12850_v33  ;;  %v8544_v27 = vpop.eup %8543  ;;  %v6464_v22 = vmul.f32 %v6264_v9, %v5664_v11  ;;  %v6271_v45 = vadd.f32 1.0, %v8542_v15  ;;  %8555 = verf.f32 %v5885_v24 }
 0x522   : > { %v6469_v37 = vmul.f32 %v6269_v25, %v5669_v23  ;;  %v6270_v36 = vadd.f32 1.0, %v8544_v27  ;;  %8557 = verf.f32 %v5887_v29  ;;  %v5888_v8 = vmul.f32 0.70710677, %v12854_v42  ;;  %v8546_v53 = vpop.eup %8545 }
 0x523   : > { %6664 = vst [vmem:[%s9278_s26 + $0x438] sm:$0xff] %v6464_v22  ;;  %v6471_v16 = vmul.f32 %v6271_v45, %v5671_v56  ;;  %8559 = verf.f32 %v5886_v61  ;;  %v12869_v59 = vadd.f32 %v12660_v7, %v12219_v63  ;;  %v12873_v17 = vadd.f32 %v12664_v49, %v12221_v3 }
 0x524   : > { %v8548_v26 = vpop.eup %8547  ;;  %6669 = vst [vmem:[%s9278_s26 + $0x460] sm:$0xff] %v6469_v37  ;;  %v6470_v21 = vmul.f32 %v6270_v36, %v5670_v10  ;;  %v6272_v39 = vadd.f32 1.0, %v8546_v53  ;;  %8561 = verf.f32 %v5888_v8  ;;  %v12878_v11 = vadd.f32 %v12666_v46, %v12223_v52 }
 0x525   : > { %6671 = vst [vmem:[%s9278_s26 + $0x470] sm:$0xff] %v6471_v16  ;;  %v5677_v1 = vmul.f32 0.5, %v12808_v32  ;;  %v6277_v38 = vadd.f32 1.0, %v8548_v26  ;;  %v5679_v7 = vmul.f32 0.5, %v12820_v2  ;;  %v5893_v51 = vmul.f32 0.70710677, %v12869_v59 }
 0x526   : > { %v8550_v49 = vpop.eup %8549  ;;  %6670 = vst [vmem:[%s9278_s26 + $0x468] sm:$0xff] %v6470_v21  ;;  %v6472_v12 = vmul.f32 %v6272_v39, %v5672_v60  ;;  %v5678_v43 = vmul.f32 0.5, %v12825_v4  ;;  %v5895_v34 = vmul.f32 0.70710677, %v12873_v17  ;;  %v5894_v46 = vmul.f32 0.70710677, %v12878_v11 }
 0x527   : > { %v8552_v41 = vpop.eup %8551  ;;  %v6477_v19 = vmul.f32 %v6277_v38, %v5677_v1  ;;  %v6279_v9 = vadd.f32 1.0, %v8550_v49  ;;  %8563 = verf.f32 %v5893_v51  ;;  %v12890_v32 = vadd.f32 %v12671_v62, %v12225_v35 }
 0x528   : > { %v8554_v2 = vpop.eup %8553  ;;  %6672 = vst [vmem:[%s9278_s26 + $0x478] sm:$0xff] %v6472_v12  ;;  %v6278_v23 = vadd.f32 1.0, %v8552_v41  ;;  %8565 = verf.f32 %v5895_v34  ;;  %v12895_v4 = vadd.f32 %v12673_v55, %v12219_v63  ;;  %v12899_v56 = vadd.f32 %v12681_v58, %v12221_v3 }
 0x529   : > { %6677 = vst [vmem:[%s9278_s26 + $0x4a0] sm:$0xff] %v6477_v19  ;;  %v6479_v24 = vmul.f32 %v6279_v9, %v5679_v7  ;;  %v5680_v15 = vmul.f32 0.5, %v12829_v20  ;;  %v6280_v62 = vadd.f32 1.0, %v8554_v2  ;;  %8567 = verf.f32 %v5894_v46 }
 0x52a   : > { %v6478_v25 = vmul.f32 %v6278_v23, %v5678_v43  ;;  %v5685_v10 = vmul.f32 0.5, %v12841_v6  ;;  %v5896_v29 = vmul.f32 0.70710677, %v12890_v32  ;;  %v5901_v55 = vmul.f32 0.70710677, %v12895_v4 }
 0x52b   : > { %v8556_v61 = vpop.eup %8555  ;;  %6679 = vst [vmem:[%s9278_s26 + $0x4b0] sm:$0xff] %v6479_v24  ;;  %v6480_v27 = vmul.f32 %v6280_v62, %v5680_v15  ;;  %v5687_v58 = vmul.f32 0.5, %v12845_v40  ;;  %v5903_v22 = vmul.f32 0.70710677, %v12899_v56  ;;  %v12911_v20 = vadd.f32 %v12683_v54, %v12223_v52 }
 0x52c   : > { %v8558_v45 = vpop.eup %8557  ;;  %6678 = vst [vmem:[%s9278_s26 + $0x4a8] sm:$0xff] %v6478_v25  ;;  %v6285_v60 = vadd.f32 1.0, %v8556_v61  ;;  %8569 = verf.f32 %v5896_v29  ;;  %v12916_v6 = vadd.f32 %v12694_v5, %v12225_v35  ;;  %v12920_v37 = vadd.f32 %v12709_v14, %v12219_v63 }
 0x52d   : > { %v8560_v40 = vpop.eup %8559  ;;  %6680 = vst [vmem:[%s9278_s26 + $0x4b8] sm:$0xff] %v6480_v27  ;;  %v6287_v36 = vadd.f32 1.0, %v8558_v45  ;;  %v5686_v8 = vmul.f32 0.5, %v12850_v33  ;;  %8571 = verf.f32 %v5901_v55  ;;  %v5902_v54 = vmul.f32 0.70710677, %v12911_v20 }
 0x52e   : > { %v8562_v53 = vpop.eup %8561  ;;  %v6485_v16 = vmul.f32 %v6285_v60, %v5685_v10  ;;  %v6286_v26 = vadd.f32 1.0, %v8560_v40  ;;  %v5688_v5 = vmul.f32 0.5, %v12854_v42  ;;  %8573 = verf.f32 %v5903_v22 }
 0x52f   : > { %v6487_v21 = vmul.f32 %v6287_v36, %v5687_v58  ;;  %v6288_v14 = vadd.f32 1.0, %v8562_v53  ;;  %8575 = verf.f32 %v5902_v54  ;;  %v5904_v39 = vmul.f32 0.70710677, %v12916_v6 }
 0x530   : > { %6685 = vst [vmem:[%s9278_s26 + $0x4e0] sm:$0xff] %v6485_v16  ;;  %v6486_v1 = vmul.f32 %v6286_v26, %v5686_v8  ;;  %v5693_v33 = vmul.f32 0.5, %v12869_v59  ;;  %v5909_v38 = vmul.f32 0.70710677, %v12920_v37  ;;  %v12932_v7 = vadd.f32 %v12715_v57, %v12221_v3 }
 0x531   : > { %v8564_v51 = vpop.eup %8563  ;;  %6687 = vst [vmem:[%s9278_s26 + $0x4f0] sm:$0xff] %v6487_v21  ;;  %v6488_v42 = vmul.f32 %v6288_v14, %v5688_v5  ;;  %8577 = verf.f32 %v5904_v39  ;;  %v12937_v49 = vadd.f32 %v12717_v28, %v12223_v52  ;;  %v12941_v12 = vadd.f32 %v12725_v30, %v12225_v35 }
 0x532   : > { %v8566_v59 = vpop.eup %8565  ;;  %6686 = vst [vmem:[%s9278_s26 + $0x4e8] sm:$0xff] %v6486_v1  ;;  %v6293_v43 = vadd.f32 1.0, %v8564_v51  ;;  %v5695_v34 = vmul.f32 0.5, %v12873_v17  ;;  %8579 = verf.f32 %v5909_v38  ;;  %v5911_v57 = vmul.f32 0.70710677, %v12932_v7 }
 0x533   : > { %v8568_v46 = vpop.eup %8567  ;;  %6688 = vst [vmem:[%s9278_s26 + $0x4f8] sm:$0xff] %v6488_v42  ;;  %v6295_v41 = vadd.f32 1.0, %v8566_v59  ;;  %v5694_v19 = vmul.f32 0.5, %v12878_v11  ;;  %v5696_v28 = vmul.f32 0.5, %v12890_v32  ;;  %v5910_v9 = vmul.f32 0.70710677, %v12937_v49 }
 0x534   : > { %v6493_v30 = vmul.f32 %v6293_v43, %v5693_v33  ;;  %v6294_v2 = vadd.f32 1.0, %v8568_v46  ;;  %8581 = verf.f32 %v5911_v57  ;;  %v5912_v23 = vmul.f32 0.70710677, %v12941_v12 }
 0x535   : > { %v6495_v17 = vmul.f32 %v6295_v41, %v5695_v34  ;;  %8583 = verf.f32 %v5910_v9  ;;  %v12953_v24 = vadd.f32 %v12727_v50, %v12219_v63  ;;  %v12957_v11 = vadd.f32 %v12736_v13, %v12221_v3 }
 0x536   : > { %v8570_v32 = vpop.eup %8569  ;;  %6693 = vst [vmem:[%s9278_s26 + $0x520] sm:$0xff] %v6493_v30  ;;  %v6494_v15 = vmul.f32 %v6294_v2, %v5694_v19  ;;  %8585 = verf.f32 %v5912_v23  ;;  %v12962_v62 = vadd.f32 %v12738_v47, %v12223_v52  ;;  %v12966_v25 = vadd.f32 %v12743_v44, %v12225_v35 }
 0x537   : > { %v8572_v10 = vpop.eup %8571  ;;  %6695 = vst [vmem:[%s9278_s26 + $0x530] sm:$0xff] %v6495_v17  ;;  %v6296_v50 = vadd.f32 1.0, %v8570_v32  ;;  %v5701_v29 = vmul.f32 0.5, %v12895_v4  ;;  %v5703_v13 = vmul.f32 0.5, %v12899_v56  ;;  %v5917_v55 = vmul.f32 0.70710677, %v12953_v24 }
 0x538   : > { %v8574_v61 = vpop.eup %8573  ;;  %6694 = vst [vmem:[%s9278_s26 + $0x528] sm:$0xff] %v6494_v15  ;;  %v6301_v27 = vadd.f32 1.0, %v8572_v10  ;;  %v5702_v47 = vmul.f32 0.5, %v12911_v20  ;;  %v5919_v58 = vmul.f32 0.70710677, %v12957_v11  ;;  %v5704_v4 = vmul.f32 0.5, %v12916_v6 }
 0x539   : > { %v5918_v44 = vmul.f32 0.70710677, %v12962_v62  ;;  %v8576_v22 = vpop.eup %8575  ;;  %v6496_v45 = vmul.f32 %v6296_v50, %v5696_v28  ;;  %v6303_v60 = vadd.f32 1.0, %v8574_v61  ;;  %8587 = verf.f32 %v5917_v55 }
 0x53a   : > { %v6501_v56 = vmul.f32 %v6301_v27, %v5701_v29  ;;  %v6302_v40 = vadd.f32 1.0, %v8576_v22  ;;  %8589 = verf.f32 %v5919_v58  ;;  %v5920_v36 = vmul.f32 0.70710677, %v12966_v25 }
 0x53b   : > { %v8578_v8 = vpop.eup %8577  ;;  %6696 = vst [vmem:[%s9278_s26 + $0x538] sm:$0xff] %v6496_v45  ;;  %v6503_v20 = vmul.f32 %v6303_v60, %v5703_v13  ;;  %8591 = verf.f32 %v5918_v44  ;;  %v7792_v54 = vadd.f32 %v12764_v18, %v12219_v63  ;;  %v12983_v53 = vadd.f32 %v12770_v0, %v12221_v3 }
 0x53c   : > { %v8580_v6 = vpop.eup %8579  ;;  %6701 = vst [vmem:[%s9278_s26 + $0x560] sm:$0xff] %v6501_v56  ;;  %v6502_v16 = vmul.f32 %v6302_v40, %v5702_v47  ;;  %v6304_v26 = vadd.f32 1.0, %v8578_v8  ;;  %8593 = verf.f32 %v5920_v36  ;;  %v7793_v5 = vadd.f32 %v12776_v48, %v12223_v52  ;;  %v6751_v56 = vld [vmem:[%s9278_s26] sm:$0xff] (%p8741_p5)  ;;  %v6753_v40 = vld [vmem:[%s9278_s26 + $0x8] sm:$0xff] (%p8741_p5)  ;;  %v6755_v36 = vld [vmem:[%s9278_s26 + $0x10] sm:$0xff] (%p8741_p5) }
 0x53d   : > { %6703 = vst [vmem:[%s9278_s26 + $0x570] sm:$0xff] %v6503_v20  ;;  %v5709_v21 = vmul.f32 0.5, %v12920_v37  ;;  %v6309_v14 = vadd.f32 1.0, %v8580_v6  ;;  %v5925_v39 = vmul.f32 0.70710677, %v7792_v54  ;;  %v5711_v3 = vmul.f32 0.5, %v12932_v7  ;;  %6752 = vst [vmem:[%s13024_s8] sm:$0xff] (%p8741_p5), %v6751_v56 }
 0x53e   : > { %v8582_v1 = vpop.eup %8581  ;;  %6702 = vst [vmem:[%s9278_s26 + $0x568] sm:$0xff] %v6502_v16  ;;  %v6504_v63 = vmul.f32 %v6304_v26, %v5704_v4  ;;  %v5927_v18 = vmul.f32 0.70710677, %v12983_v53  ;;  %v5926_v0 = vmul.f32 0.70710677, %v7793_v5  ;;  %v7843_v52 = vadd.f32 %v12778_v31, %v12225_v35  ;;  %v6757_v8 = vld [vmem:[%s9278_s26 + $0x18] sm:$0xff] (%p8741_p5) }
 0x53f   : > { %v8584_v33 = vpop.eup %8583  ;;  %v6509_v38 = vmul.f32 %v6309_v14, %v5709_v21  ;;  %v6311_v51 = vadd.f32 1.0, %v8582_v1  ;;  %8595 = verf.f32 %v5925_v39  ;;  %v5710_v37 = vmul.f32 0.5, %v12937_v49  ;;  %v6759_v20 = vld [vmem:[%s9278_s26 + $0x20] sm:$0xff] (%p8741_p5)  ;;  %6754 = vst [vmem:[%s13024_s8 + $0x8] sm:$0xff] (%p8741_p5), %v6753_v40  ;;  %6756 = vst [vmem:[%s13024_s8 + $0x10] sm:$0xff] (%p8741_p5), %v6755_v36  ;;  %v6765_v6 = vld [vmem:[%s9278_s26 + $0x38] sm:$0xff] (%p8741_p5) }
 0x540   : > { %v8586_v48 = vpop.eup %8585  ;;  %6704 = vst [vmem:[%s9278_s26 + $0x578] sm:$0xff] %v6504_v63  ;;  %v6310_v42 = vadd.f32 1.0, %v8584_v33  ;;  %8597 = verf.f32 %v5927_v18  ;;  %v5712_v59 = vmul.f32 0.5, %v12941_v12  ;;  %v5928_v57 = vmul.f32 0.70710677, %v7843_v52  ;;  %6758 = vst [vmem:[%s13024_s8 + $0x18] sm:$0xff] (%p8741_p5), %v6757_v8 }
 0x541   : > { %6709 = vst [vmem:[%s9278_s26 + $0x5a0] sm:$0xff] %v6509_v38  ;;  %v6511_v7 = vmul.f32 %v6311_v51, %v5711_v3  ;;  %v6312_v43 = vadd.f32 1.0, %v8586_v48  ;;  %8599 = verf.f32 %v5926_v0  ;;  %v5717_v31 = vmul.f32 0.5, %v12953_v24  ;;  %6760 = vst [vmem:[%s13024_s8 + $0x20] sm:$0xff] (%p8741_p5), %v6759_v20  ;;  %v6767_v16 = vld [vmem:[%s9278_s26 + $0x40] sm:$0xff] (%p8741_p5)  ;;  %v6769_v26 = vld [vmem:[%s9278_s26 + $0x48] sm:$0xff] (%p8741_p5) }
 0x542   : > { %v6510_v34 = vmul.f32 %v6310_v42, %v5710_v37  ;;  %8601 = verf.f32 %v5928_v57  ;;  %v5719_v12 = vmul.f32 0.5, %v12957_v11  ;;  %v5718_v2 = vmul.f32 0.5, %v12962_v62  ;;  %6766 = vst [vmem:[%s13024_s8 + $0x38] sm:$0xff] (%p8741_p5), %v6765_v6  ;;  %6768 = vst [vmem:[%s13024_s8 + $0x80] sm:$0xff] (%p8741_p5), %v6767_v16  ;;  %v6773_v21 = vld [vmem:[%s9278_s26 + $0x58] sm:$0xff] (%p8741_p5)  ;;  %v6775_v14 = vld [vmem:[%s9278_s26 + $0x60] sm:$0xff] (%p8741_p5) }
 0x543   : > { %v8588_v46 = vpop.eup %8587  ;;  %6711 = vst [vmem:[%s9278_s26 + $0x5b0] sm:$0xff] %v6511_v7  ;;  %v6512_v41 = vmul.f32 %v6312_v43, %v5712_v59  ;;  %v5720_v32 = vmul.f32 0.5, %v12966_v25  ;;  %v5725_v11 = vmul.f32 0.5, %v7792_v54  ;;  %v5727_v62 = vmul.f32 0.5, %v12983_v53  ;;  %v6761_v54 = vld [vmem:[%s9278_s26 + $0x28] sm:$0xff] (%p8741_p5)  ;;  %v6763_v53 = vld [vmem:[%s9278_s26 + $0x30] sm:$0xff] (%p8741_p5) }
 0x544   : > { %v8590_v35 = vpop.eup %8589  ;;  %6710 = vst [vmem:[%s9278_s26 + $0x5a8] sm:$0xff] %v6510_v34  ;;  %v6317_v49 = vadd.f32 1.0, %v8588_v46  ;;  %v5726_v27 = vmul.f32 0.5, %v7793_v5  ;;  %v5728_v45 = vmul.f32 0.5, %v7843_v52  ;;  %6762 = vst [vmem:[%s13024_s8 + $0x28] sm:$0xff] (%p8741_p5), %v6761_v54  ;;  %v6771_v5 = vld [vmem:[%s9278_s26 + $0x50] sm:$0xff] (%p8741_p5) }
 0x545   : > { %v8592_v19 = vpop.eup %8591  ;;  %6712 = vst [vmem:[%s9278_s26 + $0x5b8] sm:$0xff] %v6512_v41  ;;  %v6319_v28 = vadd.f32 1.0, %v8590_v35  ;;  %6764 = vst [vmem:[%s13024_s8 + $0x30] sm:$0xff] (%p8741_p5), %v6763_v53  ;;  %v6777_v39 = vld [vmem:[%s9278_s26 + $0x68] sm:$0xff] (%p8741_p5)  ;;  %v6779_v1 = vld [vmem:[%s9278_s26 + $0x70] sm:$0xff] (%p8741_p5) }
 0x546   : > { %v8594_v9 = vpop.eup %8593  ;;  %v6517_v30 = vmul.f32 %v6317_v49, %v5717_v31  ;;  %v6318_v23 = vadd.f32 1.0, %v8592_v19  ;;  %6770 = vst [vmem:[%s13024_s8 + $0x88] sm:$0xff] (%p8741_p5), %v6769_v26  ;;  %6772 = vst [vmem:[%s13024_s8 + $0x90] sm:$0xff] (%p8741_p5), %v6771_v5  ;;  %v6781_v63 = vld [vmem:[%s9278_s26 + $0x78] sm:$0xff] (%p8741_p5)  ;;  %v6783_v3 = vld [vmem:[%s9278_s26 + $0x80] sm:$0xff] (%p8741_p5) }
 0x547   : > { %v6519_v17 = vmul.f32 %v6319_v28, %v5719_v12  ;;  %v6320_v15 = vadd.f32 1.0, %v8594_v9  ;;  %6774 = vst [vmem:[%s13024_s8 + $0x98] sm:$0xff] (%p8741_p5), %v6773_v21  ;;  %6776 = vst [vmem:[%s13024_s8 + $0xa0] sm:$0xff] (%p8741_p5), %v6775_v14  ;;  %v6785_v18 = vld [vmem:[%s9278_s26 + $0x88] sm:$0xff] (%p8741_p5)  ;;  %v6787_v0 = vld [vmem:[%s9278_s26 + $0x90] sm:$0xff] (%p8741_p5) }
 0x548   : > { %6717 = vst [vmem:[%s9278_s26 + $0x5e0] sm:$0xff] %v6517_v30  ;;  %v6518_v24 = vmul.f32 %v6318_v23, %v5718_v2  ;;  %6778 = vst [vmem:[%s13024_s8 + $0xa8] sm:$0xff] (%p8741_p5), %v6777_v39  ;;  %v6789_v33 = vld [vmem:[%s9278_s26 + $0x98] sm:$0xff] (%p8741_p5)  ;;  %v6791_v38 = vld [vmem:[%s9278_s26 + $0xa0] sm:$0xff] (%p8741_p5) }
 0x549   : > { %v8596_v10 = vpop.eup %8595  ;;  %6719 = vst [vmem:[%s9278_s26 + $0x5f0] sm:$0xff] %v6519_v17  ;;  %v6520_v50 = vmul.f32 %v6320_v15, %v5720_v32  ;;  %6780 = vst [vmem:[%s13024_s8 + $0xb0] sm:$0xff] (%p8741_p5), %v6779_v1  ;;  %v6793_v51 = vld [vmem:[%s9278_s26 + $0xa8] sm:$0xff] (%p8741_p5)  ;;  %v6795_v52 = vld [vmem:[%s9278_s26 + $0xb0] sm:$0xff] (%p8741_p5) }
 0x54a   : > { %v8598_v29 = vpop.eup %8597  ;;  %6718 = vst [vmem:[%s9278_s26 + $0x5e8] sm:$0xff] %v6518_v24  ;;  %v6325_v13 = vadd.f32 1.0, %v8596_v10  ;;  %6782 = vst [vmem:[%s13024_s8 + $0xb8] sm:$0xff] (%p8741_p5), %v6781_v63  ;;  %v6797_v48 = vld [vmem:[%s9278_s26 + $0xb8] sm:$0xff] (%p8741_p5)  ;;  %v6799_v37 = vld [vmem:[%s9278_s26 + $0xc0] sm:$0xff] (%p8741_p5) }
 0x54b   : > { %v8600_v55 = vpop.eup %8599  ;;  %6720 = vst [vmem:[%s9278_s26 + $0x5f8] sm:$0xff] %v6520_v50  ;;  %v6327_v61 = vadd.f32 1.0, %v8598_v29  ;;  %6735 = sbr.rel (!%p8741_p5) target bundleno = 1450 (0x5aa), region = 75  ;;  %6784 = vst [vmem:[%s13024_s8 + $0x100] sm:$0xff] (%p8741_p5), %v6783_v3  ;;  %v6801_v42 = vld [vmem:[%s9278_s26 + $0xc8] sm:$0xff] (%p8741_p5)  ;;  %v6803_v7 = vld [vmem:[%s9278_s26 + $0xd0] sm:$0xff] (%p8741_p5) }
 0x54c   : > { %v6525_v25 = vmul.f32 %v6325_v13, %v5725_v11  ;;  %v6326_v47 = vadd.f32 1.0, %v8600_v55  ;;  %v8602_v44 = vpop.eup %8601  ;;  %6786 = vst [vmem:[%s13024_s8 + $0x108] sm:$0xff] (%p8741_p5), %v6785_v18  ;;  %6788 = vst [vmem:[%s13024_s8 + $0x110] sm:$0xff] (%p8741_p5), %v6787_v0  ;;  %v6805_v59 = vld [vmem:[%s9278_s26 + $0xd8] sm:$0xff] (%p8741_p5)  ;;  %v6807_v43 = vld [vmem:[%s9278_s26 + $0xe0] sm:$0xff] (%p8741_p5) }
 0x54d   : > { %v6527_v58 = vmul.f32 %v6327_v61, %v5727_v62  ;;  %v6328_v60 = vadd.f32 1.0, %v8602_v44  ;;  %6790 = vst [vmem:[%s13024_s8 + $0x118] sm:$0xff] (%p8741_p5), %v6789_v33  ;;  %6792 = vst [vmem:[%s13024_s8 + $0x120] sm:$0xff] (%p8741_p5), %v6791_v38  ;;  %v6809_v34 = vld [vmem:[%s9278_s26 + $0xe8] sm:$0xff] (%p8741_p5)  ;;  %v6811_v57 = vld [vmem:[%s9278_s26 + $0xf0] sm:$0xff] (%p8741_p5) }
 0x54e   : > { %6725 = vst [vmem:[%s9278_s26 + $0x620] sm:$0xf] %v6525_v25  ;;  %v6526_v22 = vmul.f32 %v6326_v47, %v5726_v27  ;;  %6794 = vst [vmem:[%s13024_s8 + $0x128] sm:$0xff] (%p8741_p5), %v6793_v51  ;;  %v6813_v46 = vld [vmem:[%s9278_s26 + $0xf8] sm:$0xff] (%p8741_p5)  ;;  %v6815_v41 = vld [vmem:[%s9278_s26 + $0x100] sm:$0xff] (%p8741_p5) }
 0x54f   : > { %6727 = vst [vmem:[%s9278_s26 + $0x630] sm:$0xf] %v6527_v58  ;;  %v6528_v4 = vmul.f32 %v6328_v60, %v5728_v45  ;;  %6796 = vst [vmem:[%s13024_s8 + $0x130] sm:$0xff] (%p8741_p5), %v6795_v52  ;;  %v6817_v35 = vld [vmem:[%s9278_s26 + $0x108] sm:$0xff] (%p8741_p5)  ;;  %v6819_v31 = vld [vmem:[%s9278_s26 + $0x110] sm:$0xff] (%p8741_p5) }
 0x550   : > { %6726 = vst [vmem:[%s9278_s26 + $0x628] sm:$0xf] %v6526_v22  ;;  %6798 = vst [vmem:[%s13024_s8 + $0x138] sm:$0xff] (%p8741_p5), %v6797_v48  ;;  %v6821_v49 = vld [vmem:[%s9278_s26 + $0x118] sm:$0xff] (%p8741_p5)  ;;  %v6823_v19 = vld [vmem:[%s9278_s26 + $0x120] sm:$0xff] (%p8741_p5) }
 0x551   : > { %6728 = vst [vmem:[%s9278_s26 + $0x638] sm:$0xf] %v6528_v4  ;;  %6800 = vst [vmem:[%s13024_s8 + $0x180] sm:$0xff] (%p8741_p5), %v6799_v37  ;;  %v6825_v12 = vld [vmem:[%s9278_s26 + $0x128] sm:$0xff] (%p8741_p5)  ;;  %v6827_v28 = vld [vmem:[%s9278_s26 + $0x130] sm:$0xff] (%p8741_p5) }
 0x552   : > { %6802 = vst [vmem:[%s13024_s8 + $0x188] sm:$0xff] %v6801_v42  ;;  %6804 = vst [vmem:[%s13024_s8 + $0x190] sm:$0xff] %v6803_v7  ;;  %v6829_v9 = vld [vmem:[%s9278_s26 + $0x138] sm:$0xff]  ;;  %v6831_v30 = vld [vmem:[%s9278_s26 + $0x140] sm:$0xff] }
 0x553   : > { %6806 = vst [vmem:[%s13024_s8 + $0x198] sm:$0xff] %v6805_v59  ;;  %6808 = vst [vmem:[%s13024_s8 + $0x1a0] sm:$0xff] %v6807_v43  ;;  %v6833_v2 = vld [vmem:[%s9278_s26 + $0x148] sm:$0xff]  ;;  %v6835_v23 = vld [vmem:[%s9278_s26 + $0x150] sm:$0xff] }
 0x554   : > { %6810 = vst [vmem:[%s13024_s8 + $0x1a8] sm:$0xff] %v6809_v34  ;;  %6812 = vst [vmem:[%s13024_s8 + $0x1b0] sm:$0xff] %v6811_v57  ;;  %v6837_v17 = vld [vmem:[%s9278_s26 + $0x158] sm:$0xff]  ;;  %v6839_v32 = vld [vmem:[%s9278_s26 + $0x160] sm:$0xff] }
 0x555   : > { %6814 = vst [vmem:[%s13024_s8 + $0x1b8] sm:$0xff] %v6813_v46  ;;  %6816 = vst [vmem:[%s13024_s8 + $0x200] sm:$0xff] %v6815_v41  ;;  %v6841_v15 = vld [vmem:[%s9278_s26 + $0x168] sm:$0xff]  ;;  %v6843_v24 = vld [vmem:[%s9278_s26 + $0x170] sm:$0xff] }
 0x556   : > { %6818 = vst [vmem:[%s13024_s8 + $0x208] sm:$0xff] %v6817_v35  ;;  %6820 = vst [vmem:[%s13024_s8 + $0x210] sm:$0xff] %v6819_v31  ;;  %v6845_v10 = vld [vmem:[%s9278_s26 + $0x178] sm:$0xff]  ;;  %v6847_v50 = vld [vmem:[%s9278_s26 + $0x180] sm:$0xff] }
 0x557   : > { %6822 = vst [vmem:[%s13024_s8 + $0x218] sm:$0xff] %v6821_v49  ;;  %6824 = vst [vmem:[%s13024_s8 + $0x220] sm:$0xff] %v6823_v19  ;;  %v6849_v29 = vld [vmem:[%s9278_s26 + $0x188] sm:$0xff]  ;;  %v6851_v11 = vld [vmem:[%s9278_s26 + $0x190] sm:$0xff] }
 0x558   : > { %6826 = vst [vmem:[%s13024_s8 + $0x228] sm:$0xff] %v6825_v12  ;;  %6828 = vst [vmem:[%s13024_s8 + $0x230] sm:$0xff] %v6827_v28  ;;  %v6853_v13 = vld [vmem:[%s9278_s26 + $0x198] sm:$0xff]  ;;  %v6855_v55 = vld [vmem:[%s9278_s26 + $0x1a0] sm:$0xff] }
 0x559   : > { %6830 = vst [vmem:[%s13024_s8 + $0x238] sm:$0xff] %v6829_v9  ;;  %6832 = vst [vmem:[%s13024_s8 + $0x280] sm:$0xff] %v6831_v30  ;;  %v6857_v62 = vld [vmem:[%s9278_s26 + $0x1a8] sm:$0xff]  ;;  %v6859_v61 = vld [vmem:[%s9278_s26 + $0x1b0] sm:$0xff] }
 0x55a   : > { %6834 = vst [vmem:[%s13024_s8 + $0x288] sm:$0xff] %v6833_v2  ;;  %6836 = vst [vmem:[%s13024_s8 + $0x290] sm:$0xff] %v6835_v23  ;;  %v6861_v25 = vld [vmem:[%s9278_s26 + $0x1b8] sm:$0xff]  ;;  %v6863_v27 = vld [vmem:[%s9278_s26 + $0x1c0] sm:$0xff] }
 0x55b   : > { %6838 = vst [vmem:[%s13024_s8 + $0x298] sm:$0xff] %v6837_v17  ;;  %6840 = vst [vmem:[%s13024_s8 + $0x2a0] sm:$0xff] %v6839_v32  ;;  %v6865_v47 = vld [vmem:[%s9278_s26 + $0x1c8] sm:$0xff]  ;;  %v6867_v58 = vld [vmem:[%s9278_s26 + $0x1d0] sm:$0xff] }
 0x55c   : > { %6842 = vst [vmem:[%s13024_s8 + $0x2a8] sm:$0xff] %v6841_v15  ;;  %6844 = vst [vmem:[%s13024_s8 + $0x2b0] sm:$0xff] %v6843_v24  ;;  %v6869_v44 = vld [vmem:[%s9278_s26 + $0x1d8] sm:$0xff]  ;;  %v6871_v22 = vld [vmem:[%s9278_s26 + $0x1e0] sm:$0xff] }
 0x55d   : > { %6846 = vst [vmem:[%s13024_s8 + $0x2b8] sm:$0xff] %v6845_v10  ;;  %6848 = vst [vmem:[%s13024_s8 + $0x300] sm:$0xff] %v6847_v50  ;;  %v6873_v45 = vld [vmem:[%s9278_s26 + $0x1e8] sm:$0xff]  ;;  %v6875_v60 = vld [vmem:[%s9278_s26 + $0x1f0] sm:$0xff] }
 0x55e   : > { %6850 = vst [vmem:[%s13024_s8 + $0x308] sm:$0xff] %v6849_v29  ;;  %6852 = vst [vmem:[%s13024_s8 + $0x310] sm:$0xff] %v6851_v11  ;;  %v6877_v4 = vld [vmem:[%s9278_s26 + $0x1f8] sm:$0xff]  ;;  %v6879_v56 = vld [vmem:[%s9278_s26 + $0x200] sm:$0xff] }
 0x55f   : > { %6854 = vst [vmem:[%s13024_s8 + $0x318] sm:$0xff] %v6853_v13  ;;  %6856 = vst [vmem:[%s13024_s8 + $0x320] sm:$0xff] %v6855_v55  ;;  %v6881_v40 = vld [vmem:[%s9278_s26 + $0x208] sm:$0xff]  ;;  %v6883_v36 = vld [vmem:[%s9278_s26 + $0x210] sm:$0xff] }
 0x560   : > { %6858 = vst [vmem:[%s13024_s8 + $0x328] sm:$0xff] %v6857_v62  ;;  %6860 = vst [vmem:[%s13024_s8 + $0x330] sm:$0xff] %v6859_v61  ;;  %v6885_v8 = vld [vmem:[%s9278_s26 + $0x218] sm:$0xff]  ;;  %v6887_v20 = vld [vmem:[%s9278_s26 + $0x220] sm:$0xff] }
 0x561   : > { %6862 = vst [vmem:[%s13024_s8 + $0x338] sm:$0xff] %v6861_v25  ;;  %6864 = vst [vmem:[%s13024_s8 + $0x380] sm:$0xff] %v6863_v27  ;;  %v6889_v54 = vld [vmem:[%s9278_s26 + $0x228] sm:$0xff]  ;;  %v6891_v53 = vld [vmem:[%s9278_s26 + $0x230] sm:$0xff] }
 0x562   : > { %6866 = vst [vmem:[%s13024_s8 + $0x388] sm:$0xff] %v6865_v47  ;;  %6868 = vst [vmem:[%s13024_s8 + $0x390] sm:$0xff] %v6867_v58  ;;  %v6893_v6 = vld [vmem:[%s9278_s26 + $0x238] sm:$0xff]  ;;  %v6895_v16 = vld [vmem:[%s9278_s26 + $0x240] sm:$0xff] }
 0x563   : > { %6870 = vst [vmem:[%s13024_s8 + $0x398] sm:$0xff] %v6869_v44  ;;  %6872 = vst [vmem:[%s13024_s8 + $0x3a0] sm:$0xff] %v6871_v22  ;;  %v6897_v26 = vld [vmem:[%s9278_s26 + $0x248] sm:$0xff]  ;;  %v6899_v5 = vld [vmem:[%s9278_s26 + $0x250] sm:$0xff] }
 0x564   : > { %6874 = vst [vmem:[%s13024_s8 + $0x3a8] sm:$0xff] %v6873_v45  ;;  %6876 = vst [vmem:[%s13024_s8 + $0x3b0] sm:$0xff] %v6875_v60  ;;  %v6901_v21 = vld [vmem:[%s9278_s26 + $0x258] sm:$0xff]  ;;  %v6903_v14 = vld [vmem:[%s9278_s26 + $0x260] sm:$0xff] }
 0x565   : > { %6878 = vst [vmem:[%s13024_s8 + $0x3b8] sm:$0xff] %v6877_v4  ;;  %6880 = vst [vmem:[%s13024_s8 + $0x400] sm:$0xff] %v6879_v56  ;;  %v6905_v39 = vld [vmem:[%s9278_s26 + $0x268] sm:$0xff]  ;;  %v6907_v1 = vld [vmem:[%s9278_s26 + $0x270] sm:$0xff] }
 0x566   : > { %6882 = vst [vmem:[%s13024_s8 + $0x408] sm:$0xff] %v6881_v40  ;;  %6884 = vst [vmem:[%s13024_s8 + $0x410] sm:$0xff] %v6883_v36  ;;  %v6909_v63 = vld [vmem:[%s9278_s26 + $0x278] sm:$0xff]  ;;  %v6911_v3 = vld [vmem:[%s9278_s26 + $0x280] sm:$0xff] }
 0x567   : > { %6886 = vst [vmem:[%s13024_s8 + $0x418] sm:$0xff] %v6885_v8  ;;  %6888 = vst [vmem:[%s13024_s8 + $0x420] sm:$0xff] %v6887_v20  ;;  %v6913_v18 = vld [vmem:[%s9278_s26 + $0x288] sm:$0xff]  ;;  %v6915_v0 = vld [vmem:[%s9278_s26 + $0x290] sm:$0xff] }
 0x568   : > { %6890 = vst [vmem:[%s13024_s8 + $0x428] sm:$0xff] %v6889_v54  ;;  %6892 = vst [vmem:[%s13024_s8 + $0x430] sm:$0xff] %v6891_v53  ;;  %v6917_v33 = vld [vmem:[%s9278_s26 + $0x298] sm:$0xff]  ;;  %v6919_v38 = vld [vmem:[%s9278_s26 + $0x2a0] sm:$0xff] }
 0x569   : > { %6894 = vst [vmem:[%s13024_s8 + $0x438] sm:$0xff] %v6893_v6  ;;  %6896 = vst [vmem:[%s13024_s8 + $0x480] sm:$0xff] %v6895_v16  ;;  %v6921_v51 = vld [vmem:[%s9278_s26 + $0x2a8] sm:$0xff]  ;;  %v6923_v52 = vld [vmem:[%s9278_s26 + $0x2b0] sm:$0xff] }
 0x56a   : > { %6898 = vst [vmem:[%s13024_s8 + $0x488] sm:$0xff] %v6897_v26  ;;  %6900 = vst [vmem:[%s13024_s8 + $0x490] sm:$0xff] %v6899_v5  ;;  %v6925_v48 = vld [vmem:[%s9278_s26 + $0x2b8] sm:$0xff]  ;;  %v6927_v37 = vld [vmem:[%s9278_s26 + $0x2c0] sm:$0xff] }
 0x56b   : > { %6902 = vst [vmem:[%s13024_s8 + $0x498] sm:$0xff] %v6901_v21  ;;  %6904 = vst [vmem:[%s13024_s8 + $0x4a0] sm:$0xff] %v6903_v14  ;;  %v6929_v42 = vld [vmem:[%s9278_s26 + $0x2c8] sm:$0xff]  ;;  %v6931_v7 = vld [vmem:[%s9278_s26 + $0x2d0] sm:$0xff] }
 0x56c   : > { %6906 = vst [vmem:[%s13024_s8 + $0x4a8] sm:$0xff] %v6905_v39  ;;  %6908 = vst [vmem:[%s13024_s8 + $0x4b0] sm:$0xff] %v6907_v1  ;;  %v6933_v59 = vld [vmem:[%s9278_s26 + $0x2d8] sm:$0xff]  ;;  %v6935_v43 = vld [vmem:[%s9278_s26 + $0x2e0] sm:$0xff] }
 0x56d   : > { %6910 = vst [vmem:[%s13024_s8 + $0x4b8] sm:$0xff] %v6909_v63  ;;  %6912 = vst [vmem:[%s13024_s8 + $0x500] sm:$0xff] %v6911_v3  ;;  %v6937_v34 = vld [vmem:[%s9278_s26 + $0x2e8] sm:$0xff]  ;;  %v6939_v57 = vld [vmem:[%s9278_s26 + $0x2f0] sm:$0xff] }
 0x56e   : > { %6914 = vst [vmem:[%s13024_s8 + $0x508] sm:$0xff] %v6913_v18  ;;  %6916 = vst [vmem:[%s13024_s8 + $0x510] sm:$0xff] %v6915_v0  ;;  %v6941_v46 = vld [vmem:[%s9278_s26 + $0x2f8] sm:$0xff]  ;;  %v6943_v41 = vld [vmem:[%s9278_s26 + $0x300] sm:$0xff] }
 0x56f   : > { %6918 = vst [vmem:[%s13024_s8 + $0x518] sm:$0xff] %v6917_v33  ;;  %6920 = vst [vmem:[%s13024_s8 + $0x520] sm:$0xff] %v6919_v38  ;;  %v6945_v35 = vld [vmem:[%s9278_s26 + $0x308] sm:$0xff]  ;;  %v6947_v31 = vld [vmem:[%s9278_s26 + $0x310] sm:$0xff] }
 0x570   : > { %6922 = vst [vmem:[%s13024_s8 + $0x528] sm:$0xff] %v6921_v51  ;;  %6924 = vst [vmem:[%s13024_s8 + $0x530] sm:$0xff] %v6923_v52  ;;  %v6949_v49 = vld [vmem:[%s9278_s26 + $0x318] sm:$0xff]  ;;  %v6951_v19 = vld [vmem:[%s9278_s26 + $0x320] sm:$0xff] }
 0x571   : > { %6926 = vst [vmem:[%s13024_s8 + $0x538] sm:$0xff] %v6925_v48  ;;  %6928 = vst [vmem:[%s13024_s8 + $0x580] sm:$0xff] %v6927_v37  ;;  %v6953_v12 = vld [vmem:[%s9278_s26 + $0x328] sm:$0xff]  ;;  %v6955_v28 = vld [vmem:[%s9278_s26 + $0x330] sm:$0xff] }
 0x572   : > { %6930 = vst [vmem:[%s13024_s8 + $0x588] sm:$0xff] %v6929_v42  ;;  %6932 = vst [vmem:[%s13024_s8 + $0x590] sm:$0xff] %v6931_v7  ;;  %v6957_v9 = vld [vmem:[%s9278_s26 + $0x338] sm:$0xff]  ;;  %v6959_v30 = vld [vmem:[%s9278_s26 + $0x340] sm:$0xff] }
 0x573   : > { %6934 = vst [vmem:[%s13024_s8 + $0x598] sm:$0xff] %v6933_v59  ;;  %6936 = vst [vmem:[%s13024_s8 + $0x5a0] sm:$0xff] %v6935_v43  ;;  %v6961_v2 = vld [vmem:[%s9278_s26 + $0x348] sm:$0xff]  ;;  %v6963_v23 = vld [vmem:[%s9278_s26 + $0x350] sm:$0xff] }
 0x574   : > { %6938 = vst [vmem:[%s13024_s8 + $0x5a8] sm:$0xff] %v6937_v34  ;;  %6940 = vst [vmem:[%s13024_s8 + $0x5b0] sm:$0xff] %v6939_v57  ;;  %v6965_v17 = vld [vmem:[%s9278_s26 + $0x358] sm:$0xff]  ;;  %v6967_v32 = vld [vmem:[%s9278_s26 + $0x360] sm:$0xff] }
 0x575   : > { %6942 = vst [vmem:[%s13024_s8 + $0x5b8] sm:$0xff] %v6941_v46  ;;  %6944 = vst [vmem:[%s13024_s8 + $0x600] sm:$0xff] %v6943_v41  ;;  %v6969_v15 = vld [vmem:[%s9278_s26 + $0x368] sm:$0xff]  ;;  %v6971_v24 = vld [vmem:[%s9278_s26 + $0x370] sm:$0xff] }
 0x576   : > { %6946 = vst [vmem:[%s13024_s8 + $0x608] sm:$0xff] %v6945_v35  ;;  %6948 = vst [vmem:[%s13024_s8 + $0x610] sm:$0xff] %v6947_v31  ;;  %v6973_v10 = vld [vmem:[%s9278_s26 + $0x378] sm:$0xff]  ;;  %v6975_v50 = vld [vmem:[%s9278_s26 + $0x380] sm:$0xff] }
 0x577   : > { %6950 = vst [vmem:[%s13024_s8 + $0x618] sm:$0xff] %v6949_v49  ;;  %6952 = vst [vmem:[%s13024_s8 + $0x620] sm:$0xff] %v6951_v19  ;;  %v6977_v29 = vld [vmem:[%s9278_s26 + $0x388] sm:$0xff]  ;;  %v6979_v11 = vld [vmem:[%s9278_s26 + $0x390] sm:$0xff] }
 0x578   : > { %6954 = vst [vmem:[%s13024_s8 + $0x628] sm:$0xff] %v6953_v12  ;;  %6956 = vst [vmem:[%s13024_s8 + $0x630] sm:$0xff] %v6955_v28  ;;  %v6981_v13 = vld [vmem:[%s9278_s26 + $0x398] sm:$0xff]  ;;  %v6983_v55 = vld [vmem:[%s9278_s26 + $0x3a0] sm:$0xff] }
 0x579   : > { %6958 = vst [vmem:[%s13024_s8 + $0x638] sm:$0xff] %v6957_v9  ;;  %6960 = vst [vmem:[%s13024_s8 + $0x680] sm:$0xff] %v6959_v30  ;;  %v6985_v62 = vld [vmem:[%s9278_s26 + $0x3a8] sm:$0xff]  ;;  %v6987_v61 = vld [vmem:[%s9278_s26 + $0x3b0] sm:$0xff] }
 0x57a   : > { %6962 = vst [vmem:[%s13024_s8 + $0x688] sm:$0xff] %v6961_v2  ;;  %6964 = vst [vmem:[%s13024_s8 + $0x690] sm:$0xff] %v6963_v23  ;;  %v6989_v25 = vld [vmem:[%s9278_s26 + $0x3b8] sm:$0xff]  ;;  %v6991_v27 = vld [vmem:[%s9278_s26 + $0x3c0] sm:$0xff] }
 0x57b   : > { %6966 = vst [vmem:[%s13024_s8 + $0x698] sm:$0xff] %v6965_v17  ;;  %6968 = vst [vmem:[%s13024_s8 + $0x6a0] sm:$0xff] %v6967_v32  ;;  %v6993_v47 = vld [vmem:[%s9278_s26 + $0x3c8] sm:$0xff]  ;;  %v6995_v58 = vld [vmem:[%s9278_s26 + $0x3d0] sm:$0xff] }
 0x57c   : > { %6970 = vst [vmem:[%s13024_s8 + $0x6a8] sm:$0xff] %v6969_v15  ;;  %6972 = vst [vmem:[%s13024_s8 + $0x6b0] sm:$0xff] %v6971_v24  ;;  %v6997_v44 = vld [vmem:[%s9278_s26 + $0x3d8] sm:$0xff]  ;;  %v6999_v22 = vld [vmem:[%s9278_s26 + $0x3e0] sm:$0xff] }
 0x57d   : > { %6974 = vst [vmem:[%s13024_s8 + $0x6b8] sm:$0xff] %v6973_v10  ;;  %6976 = vst [vmem:[%s13024_s8 + $0x700] sm:$0xff] %v6975_v50  ;;  %v7001_v45 = vld [vmem:[%s9278_s26 + $0x3e8] sm:$0xff]  ;;  %v7003_v60 = vld [vmem:[%s9278_s26 + $0x3f0] sm:$0xff] }
 0x57e   : > { %6978 = vst [vmem:[%s13024_s8 + $0x708] sm:$0xff] %v6977_v29  ;;  %6980 = vst [vmem:[%s13024_s8 + $0x710] sm:$0xff] %v6979_v11  ;;  %v7005_v4 = vld [vmem:[%s9278_s26 + $0x3f8] sm:$0xff]  ;;  %v7007_v56 = vld [vmem:[%s9278_s26 + $0x400] sm:$0xff] }
 0x57f   : > { %6982 = vst [vmem:[%s13024_s8 + $0x718] sm:$0xff] %v6981_v13  ;;  %6984 = vst [vmem:[%s13024_s8 + $0x720] sm:$0xff] %v6983_v55  ;;  %v7009_v40 = vld [vmem:[%s9278_s26 + $0x408] sm:$0xff]  ;;  %v7011_v36 = vld [vmem:[%s9278_s26 + $0x410] sm:$0xff] }
 0x580   : > { %6986 = vst [vmem:[%s13024_s8 + $0x728] sm:$0xff] %v6985_v62  ;;  %6988 = vst [vmem:[%s13024_s8 + $0x730] sm:$0xff] %v6987_v61  ;;  %v7013_v8 = vld [vmem:[%s9278_s26 + $0x418] sm:$0xff]  ;;  %v7015_v20 = vld [vmem:[%s9278_s26 + $0x420] sm:$0xff] }
 0x581   : > { %6990 = vst [vmem:[%s13024_s8 + $0x738] sm:$0xff] %v6989_v25  ;;  %6992 = vst [vmem:[%s13024_s8 + $0x780] sm:$0xff] %v6991_v27  ;;  %v7017_v54 = vld [vmem:[%s9278_s26 + $0x428] sm:$0xff]  ;;  %v7019_v53 = vld [vmem:[%s9278_s26 + $0x430] sm:$0xff] }
 0x582   : > { %6994 = vst [vmem:[%s13024_s8 + $0x788] sm:$0xff] %v6993_v47  ;;  %6996 = vst [vmem:[%s13024_s8 + $0x790] sm:$0xff] %v6995_v58  ;;  %v7021_v6 = vld [vmem:[%s9278_s26 + $0x438] sm:$0xff]  ;;  %v7023_v16 = vld [vmem:[%s9278_s26 + $0x440] sm:$0xff] }
 0x583   : > { %6998 = vst [vmem:[%s13024_s8 + $0x798] sm:$0xff] %v6997_v44  ;;  %7000 = vst [vmem:[%s13024_s8 + $0x7a0] sm:$0xff] %v6999_v22  ;;  %v7025_v26 = vld [vmem:[%s9278_s26 + $0x448] sm:$0xff]  ;;  %v7027_v5 = vld [vmem:[%s9278_s26 + $0x450] sm:$0xff] }
 0x584   : > { %7002 = vst [vmem:[%s13024_s8 + $0x7a8] sm:$0xff] %v7001_v45  ;;  %7004 = vst [vmem:[%s13024_s8 + $0x7b0] sm:$0xff] %v7003_v60  ;;  %v7029_v21 = vld [vmem:[%s9278_s26 + $0x458] sm:$0xff]  ;;  %v7031_v14 = vld [vmem:[%s9278_s26 + $0x460] sm:$0xff] }
 0x585   : > { %7006 = vst [vmem:[%s13024_s8 + $0x7b8] sm:$0xff] %v7005_v4  ;;  %7008 = vst [vmem:[%s13024_s8 + $0x800] sm:$0xff] %v7007_v56  ;;  %v7033_v39 = vld [vmem:[%s9278_s26 + $0x468] sm:$0xff]  ;;  %v7035_v1 = vld [vmem:[%s9278_s26 + $0x470] sm:$0xff] }
 0x586   : > { %7010 = vst [vmem:[%s13024_s8 + $0x808] sm:$0xff] %v7009_v40  ;;  %7012 = vst [vmem:[%s13024_s8 + $0x810] sm:$0xff] %v7011_v36  ;;  %v7037_v63 = vld [vmem:[%s9278_s26 + $0x478] sm:$0xff]  ;;  %v7039_v3 = vld [vmem:[%s9278_s26 + $0x480] sm:$0xff] }
 0x587   : > { %7014 = vst [vmem:[%s13024_s8 + $0x818] sm:$0xff] %v7013_v8  ;;  %7016 = vst [vmem:[%s13024_s8 + $0x820] sm:$0xff] %v7015_v20  ;;  %v7041_v18 = vld [vmem:[%s9278_s26 + $0x488] sm:$0xff]  ;;  %v7043_v0 = vld [vmem:[%s9278_s26 + $0x490] sm:$0xff] }
 0x588   : > { %7018 = vst [vmem:[%s13024_s8 + $0x828] sm:$0xff] %v7017_v54  ;;  %7020 = vst [vmem:[%s13024_s8 + $0x830] sm:$0xff] %v7019_v53  ;;  %v7045_v33 = vld [vmem:[%s9278_s26 + $0x498] sm:$0xff]  ;;  %v7047_v38 = vld [vmem:[%s9278_s26 + $0x4a0] sm:$0xff] }
 0x589   : > { %7022 = vst [vmem:[%s13024_s8 + $0x838] sm:$0xff] %v7021_v6  ;;  %7024 = vst [vmem:[%s13024_s8 + $0x880] sm:$0xff] %v7023_v16  ;;  %v7049_v51 = vld [vmem:[%s9278_s26 + $0x4a8] sm:$0xff]  ;;  %v7051_v52 = vld [vmem:[%s9278_s26 + $0x4b0] sm:$0xff] }
 0x58a   : > { %7026 = vst [vmem:[%s13024_s8 + $0x888] sm:$0xff] %v7025_v26  ;;  %7028 = vst [vmem:[%s13024_s8 + $0x890] sm:$0xff] %v7027_v5  ;;  %v7053_v48 = vld [vmem:[%s9278_s26 + $0x4b8] sm:$0xff]  ;;  %v7055_v37 = vld [vmem:[%s9278_s26 + $0x4c0] sm:$0xff] }
 0x58b   : > { %7030 = vst [vmem:[%s13024_s8 + $0x898] sm:$0xff] %v7029_v21  ;;  %7032 = vst [vmem:[%s13024_s8 + $0x8a0] sm:$0xff] %v7031_v14  ;;  %v7057_v42 = vld [vmem:[%s9278_s26 + $0x4c8] sm:$0xff]  ;;  %v7059_v7 = vld [vmem:[%s9278_s26 + $0x4d0] sm:$0xff] }
 0x58c   : > { %7034 = vst [vmem:[%s13024_s8 + $0x8a8] sm:$0xff] %v7033_v39  ;;  %7036 = vst [vmem:[%s13024_s8 + $0x8b0] sm:$0xff] %v7035_v1  ;;  %v7061_v59 = vld [vmem:[%s9278_s26 + $0x4d8] sm:$0xff]  ;;  %v7063_v43 = vld [vmem:[%s9278_s26 + $0x4e0] sm:$0xff] }
 0x58d   : > { %7038 = vst [vmem:[%s13024_s8 + $0x8b8] sm:$0xff] %v7037_v63  ;;  %7040 = vst [vmem:[%s13024_s8 + $0x900] sm:$0xff] %v7039_v3  ;;  %v7065_v34 = vld [vmem:[%s9278_s26 + $0x4e8] sm:$0xff]  ;;  %v7067_v57 = vld [vmem:[%s9278_s26 + $0x4f0] sm:$0xff] }
 0x58e   : > { %7042 = vst [vmem:[%s13024_s8 + $0x908] sm:$0xff] %v7041_v18  ;;  %7044 = vst [vmem:[%s13024_s8 + $0x910] sm:$0xff] %v7043_v0  ;;  %v7069_v46 = vld [vmem:[%s9278_s26 + $0x4f8] sm:$0xff]  ;;  %v7071_v41 = vld [vmem:[%s9278_s26 + $0x500] sm:$0xff] }
 0x58f   : > { %7046 = vst [vmem:[%s13024_s8 + $0x918] sm:$0xff] %v7045_v33  ;;  %7048 = vst [vmem:[%s13024_s8 + $0x920] sm:$0xff] %v7047_v38  ;;  %v7073_v35 = vld [vmem:[%s9278_s26 + $0x508] sm:$0xff]  ;;  %v7075_v31 = vld [vmem:[%s9278_s26 + $0x510] sm:$0xff] }
 0x590   : > { %7050 = vst [vmem:[%s13024_s8 + $0x928] sm:$0xff] %v7049_v51  ;;  %7052 = vst [vmem:[%s13024_s8 + $0x930] sm:$0xff] %v7051_v52  ;;  %v7077_v49 = vld [vmem:[%s9278_s26 + $0x518] sm:$0xff]  ;;  %v7079_v19 = vld [vmem:[%s9278_s26 + $0x520] sm:$0xff] }
 0x591   : > { %7054 = vst [vmem:[%s13024_s8 + $0x938] sm:$0xff] %v7053_v48  ;;  %7056 = vst [vmem:[%s13024_s8 + $0x980] sm:$0xff] %v7055_v37  ;;  %v7081_v12 = vld [vmem:[%s9278_s26 + $0x528] sm:$0xff]  ;;  %v7083_v28 = vld [vmem:[%s9278_s26 + $0x530] sm:$0xff] }
 0x592   : > { %7058 = vst [vmem:[%s13024_s8 + $0x988] sm:$0xff] %v7057_v42  ;;  %7060 = vst [vmem:[%s13024_s8 + $0x990] sm:$0xff] %v7059_v7  ;;  %v7085_v9 = vld [vmem:[%s9278_s26 + $0x538] sm:$0xff]  ;;  %v7087_v30 = vld [vmem:[%s9278_s26 + $0x540] sm:$0xff] }
 0x593   : > { %7062 = vst [vmem:[%s13024_s8 + $0x998] sm:$0xff] %v7061_v59  ;;  %7064 = vst [vmem:[%s13024_s8 + $0x9a0] sm:$0xff] %v7063_v43  ;;  %v7089_v2 = vld [vmem:[%s9278_s26 + $0x548] sm:$0xff]  ;;  %v7091_v23 = vld [vmem:[%s9278_s26 + $0x550] sm:$0xff] }
 0x594   : > { %7066 = vst [vmem:[%s13024_s8 + $0x9a8] sm:$0xff] %v7065_v34  ;;  %7068 = vst [vmem:[%s13024_s8 + $0x9b0] sm:$0xff] %v7067_v57  ;;  %v7093_v17 = vld [vmem:[%s9278_s26 + $0x558] sm:$0xff]  ;;  %v7095_v32 = vld [vmem:[%s9278_s26 + $0x560] sm:$0xff] }
 0x595   : > { %7070 = vst [vmem:[%s13024_s8 + $0x9b8] sm:$0xff] %v7069_v46  ;;  %7072 = vst [vmem:[%s13024_s8 + $0xa00] sm:$0xff] %v7071_v41  ;;  %v7097_v15 = vld [vmem:[%s9278_s26 + $0x568] sm:$0xff]  ;;  %v7099_v24 = vld [vmem:[%s9278_s26 + $0x570] sm:$0xff] }
 0x596   : > { %7074 = vst [vmem:[%s13024_s8 + $0xa08] sm:$0xff] %v7073_v35  ;;  %7076 = vst [vmem:[%s13024_s8 + $0xa10] sm:$0xff] %v7075_v31  ;;  %v7101_v10 = vld [vmem:[%s9278_s26 + $0x578] sm:$0xff]  ;;  %v7103_v50 = vld [vmem:[%s9278_s26 + $0x580] sm:$0xff] }
 0x597   : > { %7078 = vst [vmem:[%s13024_s8 + $0xa18] sm:$0xff] %v7077_v49  ;;  %7080 = vst [vmem:[%s13024_s8 + $0xa20] sm:$0xff] %v7079_v19  ;;  %v7105_v29 = vld [vmem:[%s9278_s26 + $0x588] sm:$0xff]  ;;  %v7107_v11 = vld [vmem:[%s9278_s26 + $0x590] sm:$0xff] }
 0x598   : > { %7082 = vst [vmem:[%s13024_s8 + $0xa28] sm:$0xff] %v7081_v12  ;;  %7084 = vst [vmem:[%s13024_s8 + $0xa30] sm:$0xff] %v7083_v28  ;;  %v7109_v13 = vld [vmem:[%s9278_s26 + $0x598] sm:$0xff]  ;;  %v7111_v55 = vld [vmem:[%s9278_s26 + $0x5a0] sm:$0xff] }
 0x599   : > { %7086 = vst [vmem:[%s13024_s8 + $0xa38] sm:$0xff] %v7085_v9  ;;  %7088 = vst [vmem:[%s13024_s8 + $0xa80] sm:$0xff] %v7087_v30  ;;  %v7113_v62 = vld [vmem:[%s9278_s26 + $0x5a8] sm:$0xff]  ;;  %v7115_v61 = vld [vmem:[%s9278_s26 + $0x5b0] sm:$0xff] }
 0x59a   : > { %7090 = vst [vmem:[%s13024_s8 + $0xa88] sm:$0xff] %v7089_v2  ;;  %7092 = vst [vmem:[%s13024_s8 + $0xa90] sm:$0xff] %v7091_v23  ;;  %v7117_v25 = vld [vmem:[%s9278_s26 + $0x5b8] sm:$0xff]  ;;  %v7119_v27 = vld [vmem:[%s9278_s26 + $0x5c0] sm:$0xff] }
 0x59b   : > { %7094 = vst [vmem:[%s13024_s8 + $0xa98] sm:$0xff] %v7093_v17  ;;  %7096 = vst [vmem:[%s13024_s8 + $0xaa0] sm:$0xff] %v7095_v32  ;;  %v7121_v47 = vld [vmem:[%s9278_s26 + $0x5c8] sm:$0xff]  ;;  %v7123_v58 = vld [vmem:[%s9278_s26 + $0x5d0] sm:$0xff] }
 0x59c   : > { %7098 = vst [vmem:[%s13024_s8 + $0xaa8] sm:$0xff] %v7097_v15  ;;  %7100 = vst [vmem:[%s13024_s8 + $0xab0] sm:$0xff] %v7099_v24  ;;  %v7125_v44 = vld [vmem:[%s9278_s26 + $0x5d8] sm:$0xff]  ;;  %v7127_v22 = vld [vmem:[%s9278_s26 + $0x5e0] sm:$0xff] }
 0x59d   : > { %7102 = vst [vmem:[%s13024_s8 + $0xab8] sm:$0xff] %v7101_v10  ;;  %7104 = vst [vmem:[%s13024_s8 + $0xb00] sm:$0xff] %v7103_v50  ;;  %v7129_v45 = vld [vmem:[%s9278_s26 + $0x5e8] sm:$0xff]  ;;  %v7131_v60 = vld [vmem:[%s9278_s26 + $0x5f0] sm:$0xff] }
 0x59e   : > { %7106 = vst [vmem:[%s13024_s8 + $0xb08] sm:$0xff] %v7105_v29  ;;  %7108 = vst [vmem:[%s13024_s8 + $0xb10] sm:$0xff] %v7107_v11  ;;  %v7133_v4 = vld [vmem:[%s9278_s26 + $0x5f8] sm:$0xff]  ;;  %v7135_v56 = vld [vmem:[%s9278_s26 + $0x600] sm:$0xff] }
 0x59f   : > { %7110 = vst [vmem:[%s13024_s8 + $0xb18] sm:$0xff] %v7109_v13  ;;  %7112 = vst [vmem:[%s13024_s8 + $0xb20] sm:$0xff] %v7111_v55  ;;  %v7137_v40 = vld [vmem:[%s9278_s26 + $0x608] sm:$0xff]  ;;  %v7139_v36 = vld [vmem:[%s9278_s26 + $0x610] sm:$0xff] }
 0x5a0   : > { %7114 = vst [vmem:[%s13024_s8 + $0xb28] sm:$0xff] %v7113_v62  ;;  %7116 = vst [vmem:[%s13024_s8 + $0xb30] sm:$0xff] %v7115_v61  ;;  %v7141_v8 = vld [vmem:[%s9278_s26 + $0x618] sm:$0xff]  ;;  %v7143_v20 = vld [vmem:[%s9278_s26 + $0x620] sm:$0xff] }
 0x5a1   : > { %7118 = vst [vmem:[%s13024_s8 + $0xb38] sm:$0xff] %v7117_v25  ;;  %7120 = vst [vmem:[%s13024_s8 + $0xb80] sm:$0xff] %v7119_v27  ;;  %v7145_v54 = vld [vmem:[%s9278_s26 + $0x628] sm:$0xff]  ;;  %v7147_v53 = vld [vmem:[%s9278_s26 + $0x630] sm:$0xff] }
 0x5a2   : > { %7122 = vst [vmem:[%s13024_s8 + $0xb88] sm:$0xff] %v7121_v47  ;;  %7124 = vst [vmem:[%s13024_s8 + $0xb90] sm:$0xff] %v7123_v58  ;;  %v7149_v6 = vld [vmem:[%s9278_s26 + $0x638] sm:$0xff] }
 0x5a3   : > { %7126 = vst [vmem:[%s13024_s8 + $0xb98] sm:$0xff] %v7125_v44  ;;  %7128 = vst [vmem:[%s13024_s8 + $0xba0] sm:$0xff] %v7127_v22 }
 0x5a4   : > { %7130 = vst [vmem:[%s13024_s8 + $0xba8] sm:$0xff] %v7129_v45  ;;  %7132 = vst [vmem:[%s13024_s8 + $0xbb0] sm:$0xff] %v7131_v60 }
 0x5a5   : > { %7134 = vst [vmem:[%s13024_s8 + $0xbb8] sm:$0xff] %v7133_v4  ;;  %7136 = vst [vmem:[%s13024_s8 + $0xc00] sm:$0xff] %v7135_v56 }
 0x5a6   : > { %7138 = vst [vmem:[%s13024_s8 + $0xc08] sm:$0xff] %v7137_v40  ;;  %7140 = vst [vmem:[%s13024_s8 + $0xc10] sm:$0xff] %v7139_v36 }
 0x5a7   : > { %7142 = vst [vmem:[%s13024_s8 + $0xc18] sm:$0xff] %v7141_v8  ;;  %7144 = vst [vmem:[%s13024_s8 + $0xc20] sm:$0xff] %v7143_v20 }
 0x5a8   : > { %7146 = vst [vmem:[%s13024_s8 + $0xc28] sm:$0xff] %v7145_v54  ;;  %7148 = vst [vmem:[%s13024_s8 + $0xc30] sm:$0xff] %v7147_v53 }
 0x5a9   : > { %7150 = vst [vmem:[%s13024_s8 + $0xc38] sm:$0xff] %v7149_v6 }
 0x5aa PF: > { %p13_p12 = scmp.ge.s32.totalorder %s8729_s25, 4   ;;  %s13784_s21 = smov %s8669_s22 }
 0x5ab   : > { %s13785_s22 = smov %s8739_s28  ;;  %s13786_s23 = smov %s8729_s25 }
 0x5ac   :  { %15 = sbr.rel (!%p13_p12) target bundleno = 2 (0x2), region = 132 }

</bundles_post_ra>
